<compile_context>
chip_gen: v7x
topology: tpu7x:2x2x1
jax: 0.10.0
libtpu: 0.0.40
codegen_flags: <defaults>
</compile_context>

<pallas_src>
import functools

import jax
import jax.numpy as jnp
from jax.experimental import pallas as pl
from jax.experimental.pallas import tpu as pltpu


# ----------------------------------------------------------------------------
# Fused CCN kernel: conv3x3(+ReLU) -> conv3x3, hidden kept in VMEM
# ----------------------------------------------------------------------------
def _ccn_fused_kernel(w1_ref, b1_ref, w2_ref, b2_ref, x_ref, o_ref,
                      xpad_ref, hpad_ref, *, H, W, CIN, CHID, COUT):
    """One batch element, plane layout.

    w1_ref: (CHID, CIN*9)  SMEM    b1_ref: (1, CHID)  SMEM
    w2_ref: (COUT, CHID*9) SMEM    b2_ref: (1, COUT)  SMEM
    x_ref:  (1, CIN, H, W)   VMEM block
    o_ref:  (1, COUT, H, W)  VMEM block
    xpad_ref: (CIN,  H+2, W+2) VMEM scratch (zero-padded input)
    hpad_ref: (CHID, H+2, W+2) VMEM scratch (zero-padded hidden activation)
    """
    # In-VMEM "same" zero padding: zero the halo, copy the interior.
    xpad_ref[...] = jnp.zeros_like(xpad_ref)
    xpad_ref[:, 1:H + 1, 1:W + 1] = x_ref[0]
    hpad_ref[...] = jnp.zeros_like(hpad_ref)

    # conv1: 3x3, CIN -> CHID, + ReLU.  VPU scalar * shifted-plane multiply-adds.
    for co in range(CHID):
        acc = jnp.zeros((H, W), jnp.float32) + b1_ref[0, co]
        for ci in range(CIN):
            for dy in range(3):
                for dx in range(3):
                    acc = acc + (w1_ref[co, ci * 9 + dy * 3 + dx]
                                 * xpad_ref[ci, dy:dy + H, dx:dx + W])
        hpad_ref[co, 1:H + 1, 1:W + 1] = jnp.maximum(acc, 0.0)

    # conv2: 3x3, CHID -> COUT (counting head).
    for co in range(COUT):
        acc = jnp.zeros((H, W), jnp.float32) + b2_ref[0, co]
        for ci in range(CHID):
            for dy in range(3):
                for dx in range(3):
                    acc = acc + (w2_ref[co, ci * 9 + dy * 3 + dx]
                                 * hpad_ref[ci, dy:dy + H, dx:dx + W])
        o_ref[0, co] = acc


def ccn_forward(x_nchw, w1, b1, w2, b2):
    """x: (N, CIN, H, W) f32; w1: (CHID, CIN, 3, 3); w2: (COUT, CHID, 3, 3)."""
    N, CIN, H, W = x_nchw.shape
    CHID = w1.shape[0]
    COUT = w2.shape[0]
    w1f = w1.reshape(CHID, CIN * 9).astype(jnp.float32)
    b1f = b1.reshape(1, CHID).astype(jnp.float32)
    w2f = w2.reshape(COUT, CHID * 9).astype(jnp.float32)
    b2f = b2.reshape(1, COUT).astype(jnp.float32)
    kern = functools.partial(_ccn_fused_kernel, H=H, W=W,
                             CIN=CIN, CHID=CHID, COUT=COUT)
    return pl.pallas_call(
        kern,
        out_shape=jax.ShapeDtypeStruct((N, COUT, H, W), jnp.float32),
        grid=(N,),
        in_specs=[
            pl.BlockSpec(memory_space=pltpu.MemorySpace.SMEM),  # w1 taps
            pl.BlockSpec(memory_space=pltpu.MemorySpace.SMEM),  # b1
            pl.BlockSpec(memory_space=pltpu.MemorySpace.SMEM),  # w2 taps
            pl.BlockSpec(memory_space=pltpu.MemorySpace.SMEM),  # b2
            pl.BlockSpec((1, CIN, H, W), lambda n: (n, 0, 0, 0)),
        ],
        out_specs=pl.BlockSpec((1, COUT, H, W), lambda n: (n, 0, 0, 0)),
        scratch_shapes=[
            pltpu.VMEM((CIN, H + 2, W + 2), jnp.float32),
            pltpu.VMEM((CHID, H + 2, W + 2), jnp.float32),
        ],
        compiler_params=pltpu.CompilerParams(
            dimension_semantics=("parallel",),
            vmem_limit_bytes=32 * 1024 * 1024,
        ),
    )(w1f, b1f, w2f, b2f, x_nchw.astype(jnp.float32))


# ----------------------------------------------------------------------------
# Fused Gaussianlayer (separable 5+5 blur) + MSE squared-error accumulation
# ----------------------------------------------------------------------------
def _gauss_sse_kernel(g_ref, gt_ref, pred_ref, gauss_ref, sse_ref,
                      vpad_ref, hpad_ref, acc_ref, *, H, W, K):
    """One (batch*class) plane per grid step.

    g_ref:    (1, K)   SMEM normalized 1-D Gaussian taps
    gt_ref:   (1, H, W) VMEM block (gt plane)
    pred_ref: (1, H, W) VMEM block (matching pred plane)
    gauss_ref:(1, H, W) VMEM output block (blurred plane)
    sse_ref:  (1, 1)   SMEM output (total sum of squared errors)
    vpad_ref: (H+K-1, W)   VMEM scratch   hpad_ref: (H, W+K-1) VMEM scratch
    acc_ref:  (1, 1)   SMEM scratch accumulator (persists across grid steps)
    """
    R = K // 2
    m = pl.program_id(0)

    # vertical pass (in-VMEM zero padding)
    vpad_ref[...] = jnp.zeros_like(vpad_ref)
    vpad_ref[R:R + H, :] = gt_ref[0]
    tmp = jnp.zeros((H, W), jnp.float32)
    for k in range(K):
        tmp = tmp + g_ref[0, k] * vpad_ref[k:k + H, :]

    # horizontal pass
    hpad_ref[...] = jnp.zeros_like(hpad_ref)
    hpad_ref[:, R:R + W] = tmp
    out = jnp.zeros((H, W), jnp.float32)
    for k in range(K):
        out = out + g_ref[0, k] * hpad_ref[:, k:k + W]

    gauss_ref[0] = out

    # fused squared-error accumulation (Mse_loss branch)
    d = pred_ref[0] - out
    sse = jnp.sum(d * d)

    @pl.when(m == 0)
    def _():
        acc_ref[0, 0] = jnp.float32(0.0)

    acc_ref[0, 0] = acc_ref[0, 0] + sse

    @pl.when(m == pl.num_programs(0) - 1)
    def _():
        sse_ref[0, 0] = acc_ref[0, 0]


def gauss_and_sse(gt_planes, pred_planes, g1d):
    """gt_planes, pred_planes: (M, H, W) f32; g1d: (K,) normalized 1-D taps.

    Returns (gauss_planes (M,H,W), sse (1,1) total squared error)."""
    M, H, W = gt_planes.shape
    K = int(g1d.shape[0])
    gk = g1d.reshape(1, K).astype(jnp.float32)
    kern = functools.partial(_gauss_sse_kernel, H=H, W=W, K=K)
    gauss, sse = pl.pallas_call(
        kern,
        out_shape=(jax.ShapeDtypeStruct((M, H, W), jnp.float32),
                   jax.ShapeDtypeStruct((1, 1), jnp.float32)),
        grid=(M,),
        in_specs=[
            pl.BlockSpec(memory_space=pltpu.MemorySpace.SMEM),   # taps
            pl.BlockSpec((1, H, W), lambda m: (m, 0, 0)),        # gt plane
            pl.BlockSpec((1, H, W), lambda m: (m, 0, 0)),        # pred plane
        ],
        out_specs=(
            pl.BlockSpec((1, H, W), lambda m: (m, 0, 0)),        # gauss plane
            pl.BlockSpec(memory_space=pltpu.MemorySpace.SMEM),   # total SSE
        ),
        scratch_shapes=[
            pltpu.VMEM((H + K - 1, W), jnp.float32),
            pltpu.VMEM((H, W + K - 1), jnp.float32),
            pltpu.SMEM((1, 1), jnp.float32),
        ],
        compiler_params=pltpu.CompilerParams(
            dimension_semantics=("arbitrary",),   # SSE accumulator across grid
            vmem_limit_bytes=32 * 1024 * 1024,
        ),
    )(gk, gt_planes.astype(jnp.float32), pred_planes.astype(jnp.float32))
    return gauss, sse


# ----------------------------------------------------------------------------
# CrowdCounter wrapper (mirrors models/CC.py forward, Mse_loss branch)
# ----------------------------------------------------------------------------
class CrowdCounterPallas:
    def __init__(self, net_name="SimpleCounter", num_class=1, hidden=8, seed=0):
        self.net_name = net_name
        self.num_class = num_class
        k1, k2 = jax.random.split(jax.random.PRNGKey(seed), 2)
        # CCN params, PyTorch conv-weight layout (Cout, Cin, kh, kw)
        self.w1 = 0.1 * jax.random.normal(k1, (hidden, 3, 3, 3), jnp.float32)
        self.b1 = jnp.zeros((hidden,), jnp.float32)
        self.w2 = 0.1 * jax.random.normal(k2, (num_class, hidden, 3, 3), jnp.float32)
        self.b2 = jnp.zeros((num_class,), jnp.float32)
        # Gaussianlayer fixed weights: separable normalized 1-D Gaussian;
        # outer(g1d, g1d) equals the normalized 5x5 2-D Gaussian.
        K, sigma = 5, 1.0
        ax = jnp.arange(K, dtype=jnp.float32) - (K - 1) / 2.0
        g1 = jnp.exp(-(ax ** 2) / (2.0 * sigma ** 2))
        self.g1d = g1 / jnp.sum(g1)
        self.loss_fn = None

    @property
    def loss(self):
        return self.loss_fn

    def multi_class_gauss_map_generate(self, gt_map, pred_map):
        # Per-class depthwise Gaussian smoothing (the unsqueeze/gs/squeeze/stack
        # loop of the reference), fused with the squared-error accumulation.
        N, C, H, W = gt_map.shape
        gauss_planes, sse = gauss_and_sse(
            gt_map.reshape(N * C, H, W),
            pred_map.reshape(N * C, H, W),
            self.g1d)
        return gauss_planes.reshape(N, C, H, W), sse

    def forward(self, data, num_class, iter=0, mode="train"):
        rgb, nir = data["rgb"], data["nir"]          # NCHW, PyTorch convention
        nir = nir[:, 0:1, :, :]                      # nir[:,0,:,:].unsqueeze(1)
        # net_name != 'MCC' branch -> CCN(rgb); nir is sliced but unused.
        pred_map = ccn_forward(rgb, self.w1, self.b1, self.w2, self.b2)
        outputs = {"pred_map": pred_map}
        if mode == "train":
            gt_map = data["gt_map"][:, :num_class, :, :]
            N, C, H, W = gt_map.shape
            gauss_map, sse = self.multi_class_gauss_map_generate(gt_map, pred_map)
            # cfg.LOSS_FUNCTION == 'Mse_loss' branch: nn.MSELoss(reduction='mean')
            self.loss_fn = sse[0, 0] / float(N * C * H * W)
            outputs["gauss_map"] = gauss_map
            outputs["loss"] = self.loss_fn
            return outputs
        return outputs


# ----------------------------------------------------------------------------
if __name__ == "__main__":
    key = jax.random.PRNGKey(0)
    k_rgb, k_nir, k_gt = jax.random.split(key, 3)
    B, H, W = 2, 16, 16
    num_class = 1
    data = {
        "rgb": jax.random.normal(k_rgb, (B, 3, H, W), jnp.float32),
        "nir": jax.random.normal(k_nir, (B, 3, H, W), jnp.float32),
        # sparse non-negative "dot" ground-truth maps
        "gt_map": (jax.random.uniform(k_gt, (B, 2, H, W), jnp.float32) > 0.95
                   ).astype(jnp.float32),
    }

    model = CrowdCounterPallas(net_name="SimpleCounter", num_class=num_class)
    outputs = model.forward(data, num_class=num_class, iter=0, mode="train")

    jax.block_until_ready(outputs["pred_map"])
    jax.block_until_ready(outputs["gauss_map"])
    jax.block_until_ready(outputs["loss"])

    assert outputs["pred_map"].shape == (B, num_class, H, W)
    assert outputs["gauss_map"].shape == (B, num_class, H, W)
    print("KERNEL_OK")
</pallas_src>

<mosaic_0001>
module attributes {stable_mosaic.version = 11 : i64} {
  func.func @_ccn_fused_kernel(%arg0: i32, %arg1: memref<8x27xf32, #tpu.memory_space<smem>>, %arg2: memref<1x8xf32, #tpu.memory_space<smem>>, %arg3: memref<1x72xf32, #tpu.memory_space<smem>>, %arg4: memref<1x1xf32, #tpu.memory_space<smem>>, %arg5: memref<1x3x16x16xf32, #tpu.memory_space<vmem>>, %arg6: memref<1x1x16x16xf32, #tpu.memory_space<vmem>>, %arg7: memref<3x18x18xf32, #tpu.memory_space<vmem>>, %arg8: memref<8x18x18xf32, #tpu.memory_space<vmem>>) attributes {dimension_semantics = [#tpu.dimension_semantics<parallel>], iteration_bounds = array<i64: 2>, scalar_prefetch = 0 : i64, scratch_operands = 2 : i64, tpu.core_type = #tpu.core_type<tc>, window_params = [{transform_indices = @transform_0, window_bounds = array<i64: 8, 27>}, {transform_indices = @transform_1, window_bounds = array<i64: 1, 8>}, {transform_indices = @transform_2, window_bounds = array<i64: 1, 72>}, {transform_indices = @transform_3, window_bounds = array<i64: 1, 1>}, {transform_indices = @transform_4, window_bounds = array<i64: 1, 3, 16, 16>}, {transform_indices = @transform_5, window_bounds = array<i64: 1, 1, 16, 16>}]} {
    %cst = arith.constant 0.000000e+00 : f32
    %0 = vector.broadcast %cst : f32 to vector<3x18x18xf32>
    %c0 = arith.constant 0 : index
    %c0_0 = arith.constant 0 : index
    %c0_1 = arith.constant 0 : index
    %1 = vector.load %arg7[%c0, %c0_0, %c0_1] : memref<3x18x18xf32, #tpu.memory_space<vmem>>, vector<3x18x18xf32>
    tpu.vector_store %arg7[%c0, %c0_0, %c0_1], %0 {strides = array<i32>} : memref<3x18x18xf32, #tpu.memory_space<vmem>>, vector<3x18x18xf32>,
    %c0_2 = arith.constant 0 : index
    %c0_3 = arith.constant 0 : index
    %c0_4 = arith.constant 0 : index
    %c0_5 = arith.constant 0 : index
    %2 = vector.load %arg5[%c0_2, %c0_3, %c0_4, %c0_5] : memref<1x3x16x16xf32, #tpu.memory_space<vmem>>, vector<1x3x16x16xf32>
    %3 = vector.shape_cast %2 : vector<1x3x16x16xf32> to vector<3x16x16xf32>
    %c0_6 = arith.constant 0 : index
    %c1 = arith.constant 1 : index
    %c1_7 = arith.constant 1 : index
    %4 = vector.load %arg7[%c0_6, %c1, %c1_7] : memref<3x18x18xf32, #tpu.memory_space<vmem>>, vector<3x16x16xf32>
    tpu.vector_store %arg7[%c0_6, %c1, %c1_7], %3 {strides = array<i32>} : memref<3x18x18xf32, #tpu.memory_space<vmem>>, vector<3x16x16xf32>,
    %cst_8 = arith.constant 0.000000e+00 : f32
    %5 = vector.broadcast %cst_8 : f32 to vector<8x18x18xf32>
    %c0_9 = arith.constant 0 : index
    %c0_10 = arith.constant 0 : index
    %c0_11 = arith.constant 0 : index
    %6 = vector.load %arg8[%c0_9, %c0_10, %c0_11] : memref<8x18x18xf32, #tpu.memory_space<vmem>>, vector<8x18x18xf32>
    tpu.vector_store %arg8[%c0_9, %c0_10, %c0_11], %5 {strides = array<i32>} : memref<8x18x18xf32, #tpu.memory_space<vmem>>, vector<8x18x18xf32>,
    %cst_12 = arith.constant 0.000000e+00 : f32
    %7 = vector.broadcast %cst_12 : f32 to vector<16x16xf32>
    %c0_13 = arith.constant 0 : index
    %c0_14 = arith.constant 0 : index
    %8 = memref.load %arg2[%c0_13, %c0_14] : memref<1x8xf32, #tpu.memory_space<smem>>
    %9 = vector.broadcast %8 : f32 to vector<16x16xf32>
    %10 = arith.addf %7, %9 : vector<16x16xf32>
    %c0_15 = arith.constant 0 : index
    %c0_16 = arith.constant 0 : index
    %11 = memref.load %arg1[%c0_15, %c0_16] : memref<8x27xf32, #tpu.memory_space<smem>>
    %c0_17 = arith.constant 0 : index
    %c0_18 = arith.constant 0 : index
    %c0_19 = arith.constant 0 : index
    %12 = vector.load %arg7[%c0_17, %c0_18, %c0_19] : memref<3x18x18xf32, #tpu.memory_space<vmem>>, vector<1x16x16xf32>
    %13 = vector.shape_cast %12 : vector<1x16x16xf32> to vector<16x16xf32>
    %14 = vector.broadcast %11 : f32 to vector<16x16xf32>
    %15 = arith.mulf %14, %13 : vector<16x16xf32>
    %16 = arith.addf %10, %15 : vector<16x16xf32>
    %c0_20 = arith.constant 0 : index
    %c1_21 = arith.constant 1 : index
    %17 = memref.load %arg1[%c0_20, %c1_21] : memref<8x27xf32, #tpu.memory_space<smem>>
    %c0_22 = arith.constant 0 : index
    %c0_23 = arith.constant 0 : index
    %c1_24 = arith.constant 1 : index
    %18 = vector.load %arg7[%c0_22, %c0_23, %c1_24] : memref<3x18x18xf32, #tpu.memory_space<vmem>>, vector<1x16x16xf32>
    %19 = vector.shape_cast %18 : vector<1x16x16xf32> to vector<16x16xf32>
    %20 = vector.broadcast %17 : f32 to vector<16x16xf32>
    %21 = arith.mulf %20, %19 : vector<16x16xf32>
    %22 = arith.addf %16, %21 : vector<16x16xf32>
    %c0_25 = arith.constant 0 : index
    %c2 = arith.constant 2 : index
    %23 = memref.load %arg1[%c0_25, %c2] : memref<8x27xf32, #tpu.memory_space<smem>>
    %c0_26 = arith.constant 0 : index
    %c0_27 = arith.constant 0 : index
    %c2_28 = arith.constant 2 : index
    %24 = vector.load %arg7[%c0_26, %c0_27, %c2_28] : memref<3x18x18xf32, #tpu.memory_space<vmem>>, vector<1x16x16xf32>
    %25 = vector.shape_cast %24 : vector<1x16x16xf32> to vector<16x16xf32>
    %26 = vector.broadcast %23 : f32 to vector<16x16xf32>
    %27 = arith.mulf %26, %25 : vector<16x16xf32>
    %28 = arith.addf %22, %27 : vector<16x16xf32>
    %c0_29 = arith.constant 0 : index
    %c3 = arith.constant 3 : index
    %29 = memref.load %arg1[%c0_29, %c3] : memref<8x27xf32, #tpu.memory_space<smem>>
    %c0_30 = arith.constant 0 : index
    %c1_31 = arith.constant 1 : index
    %c0_32 = arith.constant 0 : index
    %30 = vector.load %arg7[%c0_30, %c1_31, %c0_32] : memref<3x18x18xf32, #tpu.memory_space<vmem>>, vector<1x16x16xf32>
    %31 = vector.shape_cast %30 : vector<1x16x16xf32> to vector<16x16xf32>
    %32 = vector.broadcast %29 : f32 to vector<16x16xf32>
    %33 = arith.mulf %32, %31 : vector<16x16xf32>
    %34 = arith.addf %28, %33 : vector<16x16xf32>
    %c0_33 = arith.constant 0 : index
    %c4 = arith.constant 4 : index
    %35 = memref.load %arg1[%c0_33, %c4] : memref<8x27xf32, #tpu.memory_space<smem>>
    %c0_34 = arith.constant 0 : index
    %c1_35 = arith.constant 1 : index
    %c1_36 = arith.constant 1 : index
    %36 = vector.load %arg7[%c0_34, %c1_35, %c1_36] : memref<3x18x18xf32, #tpu.memory_space<vmem>>, vector<1x16x16xf32>
    %37 = vector.shape_cast %36 : vector<1x16x16xf32> to vector<16x16xf32>
    %38 = vector.broadcast %35 : f32 to vector<16x16xf32>
    %39 = arith.mulf %38, %37 : vector<16x16xf32>
    %40 = arith.addf %34, %39 : vector<16x16xf32>
    %c0_37 = arith.constant 0 : index
    %c5 = arith.constant 5 : index
    %41 = memref.load %arg1[%c0_37, %c5] : memref<8x27xf32, #tpu.memory_space<smem>>
    %c0_38 = arith.constant 0 : index
    %c1_39 = arith.constant 1 : index
    %c2_40 = arith.constant 2 : index
    %42 = vector.load %arg7[%c0_38, %c1_39, %c2_40] : memref<3x18x18xf32, #tpu.memory_space<vmem>>, vector<1x16x16xf32>
    %43 = vector.shape_cast %42 : vector<1x16x16xf32> to vector<16x16xf32>
    %44 = vector.broadcast %41 : f32 to vector<16x16xf32>
    %45 = arith.mulf %44, %43 : vector<16x16xf32>
    %46 = arith.addf %40, %45 : vector<16x16xf32>
    %c0_41 = arith.constant 0 : index
    %c6 = arith.constant 6 : index
    %47 = memref.load %arg1[%c0_41, %c6] : memref<8x27xf32, #tpu.memory_space<smem>>
    %c0_42 = arith.constant 0 : index
    %c2_43 = arith.constant 2 : index
    %c0_44 = arith.constant 0 : index
    %48 = vector.load %arg7[%c0_42, %c2_43, %c0_44] : memref<3x18x18xf32, #tpu.memory_space<vmem>>, vector<1x16x16xf32>
    %49 = vector.shape_cast %48 : vector<1x16x16xf32> to vector<16x16xf32>
    %50 = vector.broadcast %47 : f32 to vector<16x16xf32>
    %51 = arith.mulf %50, %49 : vector<16x16xf32>
    %52 = arith.addf %46, %51 : vector<16x16xf32>
    %c0_45 = arith.constant 0 : index
    %c7 = arith.constant 7 : index
    %53 = memref.load %arg1[%c0_45, %c7] : memref<8x27xf32, #tpu.memory_space<smem>>
    %c0_46 = arith.constant 0 : index
    %c2_47 = arith.constant 2 : index
    %c1_48 = arith.constant 1 : index
    %54 = vector.load %arg7[%c0_46, %c2_47, %c1_48] : memref<3x18x18xf32, #tpu.memory_space<vmem>>, vector<1x16x16xf32>
    %55 = vector.shape_cast %54 : vector<1x16x16xf32> to vector<16x16xf32>
    %56 = vector.broadcast %53 : f32 to vector<16x16xf32>
    %57 = arith.mulf %56, %55 : vector<16x16xf32>
    %58 = arith.addf %52, %57 : vector<16x16xf32>
    %c0_49 = arith.constant 0 : index
    %c8 = arith.constant 8 : index
    %59 = memref.load %arg1[%c0_49, %c8] : memref<8x27xf32, #tpu.memory_space<smem>>
    %c0_50 = arith.constant 0 : index
    %c2_51 = arith.constant 2 : index
    %c2_52 = arith.constant 2 : index
    %60 = vector.load %arg7[%c0_50, %c2_51, %c2_52] : memref<3x18x18xf32, #tpu.memory_space<vmem>>, vector<1x16x16xf32>
    %61 = vector.shape_cast %60 : vector<1x16x16xf32> to vector<16x16xf32>
    %62 = vector.broadcast %59 : f32 to vector<16x16xf32>
    %63 = arith.mulf %62, %61 : vector<16x16xf32>
    %64 = arith.addf %58, %63 : vector<16x16xf32>
    %c0_53 = arith.constant 0 : index
    %c9 = arith.constant 9 : index
    %65 = memref.load %arg1[%c0_53, %c9] : memref<8x27xf32, #tpu.memory_space<smem>>
    %c1_54 = arith.constant 1 : index
    %c0_55 = arith.constant 0 : index
    %c0_56 = arith.constant 0 : index
    %66 = vector.load %arg7[%c1_54, %c0_55, %c0_56] : memref<3x18x18xf32, #tpu.memory_space<vmem>>, vector<1x16x16xf32>
    %67 = vector.shape_cast %66 : vector<1x16x16xf32> to vector<16x16xf32>
    %68 = vector.broadcast %65 : f32 to vector<16x16xf32>
    %69 = arith.mulf %68, %67 : vector<16x16xf32>
    %70 = arith.addf %64, %69 : vector<16x16xf32>
    %c0_57 = arith.constant 0 : index
    %c10 = arith.constant 10 : index
    %71 = memref.load %arg1[%c0_57, %c10] : memref<8x27xf32, #tpu.memory_space<smem>>
    %c1_58 = arith.constant 1 : index
    %c0_59 = arith.constant 0 : index
    %c1_60 = arith.constant 1 : index
    %72 = vector.load %arg7[%c1_58, %c0_59, %c1_60] : memref<3x18x18xf32, #tpu.memory_space<vmem>>, vector<1x16x16xf32>
    %73 = vector.shape_cast %72 : vector<1x16x16xf32> to vector<16x16xf32>
    %74 = vector.broadcast %71 : f32 to vector<16x16xf32>
    %75 = arith.mulf %74, %73 : vector<16x16xf32>
    %76 = arith.addf %70, %75 : vector<16x16xf32>
    %c0_61 = arith.constant 0 : index
    %c11 = arith.constant 11 : index
    %77 = memref.load %arg1[%c0_61, %c11] : memref<8x27xf32, #tpu.memory_space<smem>>
    %c1_62 = arith.constant 1 : index
    %c0_63 = arith.constant 0 : index
    %c2_64 = arith.constant 2 : index
    %78 = vector.load %arg7[%c1_62, %c0_63, %c2_64] : memref<3x18x18xf32, #tpu.memory_space<vmem>>, vector<1x16x16xf32>
    %79 = vector.shape_cast %78 : vector<1x16x16xf32> to vector<16x16xf32>
    %80 = vector.broadcast %77 : f32 to vector<16x16xf32>
    %81 = arith.mulf %80, %79 : vector<16x16xf32>
    %82 = arith.addf %76, %81 : vector<16x16xf32>
    %c0_65 = arith.constant 0 : index
    %c12 = arith.constant 12 : index
    %83 = memref.load %arg1[%c0_65, %c12] : memref<8x27xf32, #tpu.memory_space<smem>>
    %c1_66 = arith.constant 1 : index
    %c1_67 = arith.constant 1 : index
    %c0_68 = arith.constant 0 : index
    %84 = vector.load %arg7[%c1_66, %c1_67, %c0_68] : memref<3x18x18xf32, #tpu.memory_space<vmem>>, vector<1x16x16xf32>
    %85 = vector.shape_cast %84 : vector<1x16x16xf32> to vector<16x16xf32>
    %86 = vector.broadcast %83 : f32 to vector<16x16xf32>
    %87 = arith.mulf %86, %85 : vector<16x16xf32>
    %88 = arith.addf %82, %87 : vector<16x16xf32>
    %c0_69 = arith.constant 0 : index
    %c13 = arith.constant 13 : index
    %89 = memref.load %arg1[%c0_69, %c13] : memref<8x27xf32, #tpu.memory_space<smem>>
    %c1_70 = arith.constant 1 : index
    %c1_71 = arith.constant 1 : index
    %c1_72 = arith.constant 1 : index
    %90 = vector.load %arg7[%c1_70, %c1_71, %c1_72] : memref<3x18x18xf32, #tpu.memory_space<vmem>>, vector<1x16x16xf32>
    %91 = vector.shape_cast %90 : vector<1x16x16xf32> to vector<16x16xf32>
    %92 = vector.broadcast %89 : f32 to vector<16x16xf32>
    %93 = arith.mulf %92, %91 : vector<16x16xf32>
    %94 = arith.addf %88, %93 : vector<16x16xf32>
    %c0_73 = arith.constant 0 : index
    %c14 = arith.constant 14 : index
    %95 = memref.load %arg1[%c0_73, %c14] : memref<8x27xf32, #tpu.memory_space<smem>>
    %c1_74 = arith.constant 1 : index
    %c1_75 = arith.constant 1 : index
    %c2_76 = arith.constant 2 : index
    %96 = vector.load %arg7[%c1_74, %c1_75, %c2_76] : memref<3x18x18xf32, #tpu.memory_space<vmem>>, vector<1x16x16xf32>
    %97 = vector.shape_cast %96 : vector<1x16x16xf32> to vector<16x16xf32>
    %98 = vector.broadcast %95 : f32 to vector<16x16xf32>
    %99 = arith.mulf %98, %97 : vector<16x16xf32>
    %100 = arith.addf %94, %99 : vector<16x16xf32>
    %c0_77 = arith.constant 0 : index
    %c15 = arith.constant 15 : index
    %101 = memref.load %arg1[%c0_77, %c15] : memref<8x27xf32, #tpu.memory_space<smem>>
    %c1_78 = arith.constant 1 : index
    %c2_79 = arith.constant 2 : index
    %c0_80 = arith.constant 0 : index
    %102 = vector.load %arg7[%c1_78, %c2_79, %c0_80] : memref<3x18x18xf32, #tpu.memory_space<vmem>>, vector<1x16x16xf32>
    %103 = vector.shape_cast %102 : vector<1x16x16xf32> to vector<16x16xf32>
    %104 = vector.broadcast %101 : f32 to vector<16x16xf32>
    %105 = arith.mulf %104, %103 : vector<16x16xf32>
    %106 = arith.addf %100, %105 : vector<16x16xf32>
    %c0_81 = arith.constant 0 : index
    %c16 = arith.constant 16 : index
    %107 = memref.load %arg1[%c0_81, %c16] : memref<8x27xf32, #tpu.memory_space<smem>>
    %c1_82 = arith.constant 1 : index
    %c2_83 = arith.constant 2 : index
    %c1_84 = arith.constant 1 : index
    %108 = vector.load %arg7[%c1_82, %c2_83, %c1_84] : memref<3x18x18xf32, #tpu.memory_space<vmem>>, vector<1x16x16xf32>
    %109 = vector.shape_cast %108 : vector<1x16x16xf32> to vector<16x16xf32>
    %110 = vector.broadcast %107 : f32 to vector<16x16xf32>
    %111 = arith.mulf %110, %109 : vector<16x16xf32>
    %112 = arith.addf %106, %111 : vector<16x16xf32>
    %c0_85 = arith.constant 0 : index
    %c17 = arith.constant 17 : index
    %113 = memref.load %arg1[%c0_85, %c17] : memref<8x27xf32, #tpu.memory_space<smem>>
    %c1_86 = arith.constant 1 : index
    %c2_87 = arith.constant 2 : index
    %c2_88 = arith.constant 2 : index
    %114 = vector.load %arg7[%c1_86, %c2_87, %c2_88] : memref<3x18x18xf32, #tpu.memory_space<vmem>>, vector<1x16x16xf32>
    %115 = vector.shape_cast %114 : vector<1x16x16xf32> to vector<16x16xf32>
    %116 = vector.broadcast %113 : f32 to vector<16x16xf32>
    %117 = arith.mulf %116, %115 : vector<16x16xf32>
    %118 = arith.addf %112, %117 : vector<16x16xf32>
    %c0_89 = arith.constant 0 : index
    %c18 = arith.constant 18 : index
    %119 = memref.load %arg1[%c0_89, %c18] : memref<8x27xf32, #tpu.memory_space<smem>>
    %c2_90 = arith.constant 2 : index
    %c0_91 = arith.constant 0 : index
    %c0_92 = arith.constant 0 : index
    %120 = vector.load %arg7[%c2_90, %c0_91, %c0_92] : memref<3x18x18xf32, #tpu.memory_space<vmem>>, vector<1x16x16xf32>
    %121 = vector.shape_cast %120 : vector<1x16x16xf32> to vector<16x16xf32>
    %122 = vector.broadcast %119 : f32 to vector<16x16xf32>
    %123 = arith.mulf %122, %121 : vector<16x16xf32>
    %124 = arith.addf %118, %123 : vector<16x16xf32>
    %c0_93 = arith.constant 0 : index
    %c19 = arith.constant 19 : index
    %125 = memref.load %arg1[%c0_93, %c19] : memref<8x27xf32, #tpu.memory_space<smem>>
    %c2_94 = arith.constant 2 : index
    %c0_95 = arith.constant 0 : index
    %c1_96 = arith.constant 1 : index
    %126 = vector.load %arg7[%c2_94, %c0_95, %c1_96] : memref<3x18x18xf32, #tpu.memory_space<vmem>>, vector<1x16x16xf32>
    %127 = vector.shape_cast %126 : vector<1x16x16xf32> to vector<16x16xf32>
    %128 = vector.broadcast %125 : f32 to vector<16x16xf32>
    %129 = arith.mulf %128, %127 : vector<16x16xf32>
    %130 = arith.addf %124, %129 : vector<16x16xf32>
    %c0_97 = arith.constant 0 : index
    %c20 = arith.constant 20 : index
    %131 = memref.load %arg1[%c0_97, %c20] : memref<8x27xf32, #tpu.memory_space<smem>>
    %c2_98 = arith.constant 2 : index
    %c0_99 = arith.constant 0 : index
    %c2_100 = arith.constant 2 : index
    %132 = vector.load %arg7[%c2_98, %c0_99, %c2_100] : memref<3x18x18xf32, #tpu.memory_space<vmem>>, vector<1x16x16xf32>
    %133 = vector.shape_cast %132 : vector<1x16x16xf32> to vector<16x16xf32>
    %134 = vector.broadcast %131 : f32 to vector<16x16xf32>
    %135 = arith.mulf %134, %133 : vector<16x16xf32>
    %136 = arith.addf %130, %135 : vector<16x16xf32>
    %c0_101 = arith.constant 0 : index
    %c21 = arith.constant 21 : index
    %137 = memref.load %arg1[%c0_101, %c21] : memref<8x27xf32, #tpu.memory_space<smem>>
    %c2_102 = arith.constant 2 : index
    %c1_103 = arith.constant 1 : index
    %c0_104 = arith.constant 0 : index
    %138 = vector.load %arg7[%c2_102, %c1_103, %c0_104] : memref<3x18x18xf32, #tpu.memory_space<vmem>>, vector<1x16x16xf32>
    %139 = vector.shape_cast %138 : vector<1x16x16xf32> to vector<16x16xf32>
    %140 = vector.broadcast %137 : f32 to vector<16x16xf32>
    %141 = arith.mulf %140, %139 : vector<16x16xf32>
    %142 = arith.addf %136, %141 : vector<16x16xf32>
    %c0_105 = arith.constant 0 : index
    %c22 = arith.constant 22 : index
    %143 = memref.load %arg1[%c0_105, %c22] : memref<8x27xf32, #tpu.memory_space<smem>>
    %c2_106 = arith.constant 2 : index
    %c1_107 = arith.constant 1 : index
    %c1_108 = arith.constant 1 : index
    %144 = vector.load %arg7[%c2_106, %c1_107, %c1_108] : memref<3x18x18xf32, #tpu.memory_space<vmem>>, vector<1x16x16xf32>
    %145 = vector.shape_cast %144 : vector<1x16x16xf32> to vector<16x16xf32>
    %146 = vector.broadcast %143 : f32 to vector<16x16xf32>
    %147 = arith.mulf %146, %145 : vector<16x16xf32>
    %148 = arith.addf %142, %147 : vector<16x16xf32>
    %c0_109 = arith.constant 0 : index
    %c23 = arith.constant 23 : index
    %149 = memref.load %arg1[%c0_109, %c23] : memref<8x27xf32, #tpu.memory_space<smem>>
    %c2_110 = arith.constant 2 : index
    %c1_111 = arith.constant 1 : index
    %c2_112 = arith.constant 2 : index
    %150 = vector.load %arg7[%c2_110, %c1_111, %c2_112] : memref<3x18x18xf32, #tpu.memory_space<vmem>>, vector<1x16x16xf32>
    %151 = vector.shape_cast %150 : vector<1x16x16xf32> to vector<16x16xf32>
    %152 = vector.broadcast %149 : f32 to vector<16x16xf32>
    %153 = arith.mulf %152, %151 : vector<16x16xf32>
    %154 = arith.addf %148, %153 : vector<16x16xf32>
    %c0_113 = arith.constant 0 : index
    %c24 = arith.constant 24 : index
    %155 = memref.load %arg1[%c0_113, %c24] : memref<8x27xf32, #tpu.memory_space<smem>>
    %c2_114 = arith.constant 2 : index
    %c2_115 = arith.constant 2 : index
    %c0_116 = arith.constant 0 : index
    %156 = vector.load %arg7[%c2_114, %c2_115, %c0_116] : memref<3x18x18xf32, #tpu.memory_space<vmem>>, vector<1x16x16xf32>
    %157 = vector.shape_cast %156 : vector<1x16x16xf32> to vector<16x16xf32>
    %158 = vector.broadcast %155 : f32 to vector<16x16xf32>
    %159 = arith.mulf %158, %157 : vector<16x16xf32>
    %160 = arith.addf %154, %159 : vector<16x16xf32>
    %c0_117 = arith.constant 0 : index
    %c25 = arith.constant 25 : index
    %161 = memref.load %arg1[%c0_117, %c25] : memref<8x27xf32, #tpu.memory_space<smem>>
    %c2_118 = arith.constant 2 : index
    %c2_119 = arith.constant 2 : index
    %c1_120 = arith.constant 1 : index
    %162 = vector.load %arg7[%c2_118, %c2_119, %c1_120] : memref<3x18x18xf32, #tpu.memory_space<vmem>>, vector<1x16x16xf32>
    %163 = vector.shape_cast %162 : vector<1x16x16xf32> to vector<16x16xf32>
    %164 = vector.broadcast %161 : f32 to vector<16x16xf32>
    %165 = arith.mulf %164, %163 : vector<16x16xf32>
    %166 = arith.addf %160, %165 : vector<16x16xf32>
    %c0_121 = arith.constant 0 : index
    %c26 = arith.constant 26 : index
    %167 = memref.load %arg1[%c0_121, %c26] : memref<8x27xf32, #tpu.memory_space<smem>>
    %c2_122 = arith.constant 2 : index
    %c2_123 = arith.constant 2 : index
    %c2_124 = arith.constant 2 : index
    %168 = vector.load %arg7[%c2_122, %c2_123, %c2_124] : memref<3x18x18xf32, #tpu.memory_space<vmem>>, vector<1x16x16xf32>
    %169 = vector.shape_cast %168 : vector<1x16x16xf32> to vector<16x16xf32>
    %170 = vector.broadcast %167 : f32 to vector<16x16xf32>
    %171 = arith.mulf %170, %169 : vector<16x16xf32>
    %172 = arith.addf %166, %171 : vector<16x16xf32>
    %cst_125 = arith.constant 0.000000e+00 : f32
    %173 = vector.broadcast %cst_125 : f32 to vector<16x16xf32>
    %174 = arith.maximumf %172, %173 : vector<16x16xf32>
    %c0_126 = arith.constant 0 : index
    %c1_127 = arith.constant 1 : index
    %c1_128 = arith.constant 1 : index
    %175 = vector.load %arg8[%c0_126, %c1_127, %c1_128] : memref<8x18x18xf32, #tpu.memory_space<vmem>>, vector<1x16x16xf32>
    %176 = vector.shape_cast %175 : vector<1x16x16xf32> to vector<16x16xf32>
    %177 = vector.shape_cast %174 : vector<16x16xf32> to vector<1x16x16xf32>
    tpu.vector_store %arg8[%c0_126, %c1_127, %c1_128], %177 {strides = array<i32>} : memref<8x18x18xf32, #tpu.memory_space<vmem>>, vector<1x16x16xf32>,
    %cst_129 = arith.constant 0.000000e+00 : f32
    %178 = vector.broadcast %cst_129 : f32 to vector<16x16xf32>
    %c0_130 = arith.constant 0 : index
    %c1_131 = arith.constant 1 : index
    %179 = memref.load %arg2[%c0_130, %c1_131] : memref<1x8xf32, #tpu.memory_space<smem>>
    %180 = vector.broadcast %179 : f32 to vector<16x16xf32>
    %181 = arith.addf %178, %180 : vector<16x16xf32>
    %c1_132 = arith.constant 1 : index
    %c0_133 = arith.constant 0 : index
    %182 = memref.load %arg1[%c1_132, %c0_133] : memref<8x27xf32, #tpu.memory_space<smem>>
    %c0_134 = arith.constant 0 : index
    %c0_135 = arith.constant 0 : index
    %c0_136 = arith.constant 0 : index
    %183 = vector.load %arg7[%c0_134, %c0_135, %c0_136] : memref<3x18x18xf32, #tpu.memory_space<vmem>>, vector<1x16x16xf32>
    %184 = vector.shape_cast %183 : vector<1x16x16xf32> to vector<16x16xf32>
    %185 = vector.broadcast %182 : f32 to vector<16x16xf32>
    %186 = arith.mulf %185, %184 : vector<16x16xf32>
    %187 = arith.addf %181, %186 : vector<16x16xf32>
    %c1_137 = arith.constant 1 : index
    %c1_138 = arith.constant 1 : index
    %188 = memref.load %arg1[%c1_137, %c1_138] : memref<8x27xf32, #tpu.memory_space<smem>>
    %c0_139 = arith.constant 0 : index
    %c0_140 = arith.constant 0 : index
    %c1_141 = arith.constant 1 : index
    %189 = vector.load %arg7[%c0_139, %c0_140, %c1_141] : memref<3x18x18xf32, #tpu.memory_space<vmem>>, vector<1x16x16xf32>
    %190 = vector.shape_cast %189 : vector<1x16x16xf32> to vector<16x16xf32>
    %191 = vector.broadcast %188 : f32 to vector<16x16xf32>
    %192 = arith.mulf %191, %190 : vector<16x16xf32>
    %193 = arith.addf %187, %192 : vector<16x16xf32>
    %c1_142 = arith.constant 1 : index
    %c2_143 = arith.constant 2 : index
    %194 = memref.load %arg1[%c1_142, %c2_143] : memref<8x27xf32, #tpu.memory_space<smem>>
    %c0_144 = arith.constant 0 : index
    %c0_145 = arith.constant 0 : index
    %c2_146 = arith.constant 2 : index
    %195 = vector.load %arg7[%c0_144, %c0_145, %c2_146] : memref<3x18x18xf32, #tpu.memory_space<vmem>>, vector<1x16x16xf32>
    %196 = vector.shape_cast %195 : vector<1x16x16xf32> to vector<16x16xf32>
    %197 = vector.broadcast %194 : f32 to vector<16x16xf32>
    %198 = arith.mulf %197, %196 : vector<16x16xf32>
    %199 = arith.addf %193, %198 : vector<16x16xf32>
    %c1_147 = arith.constant 1 : index
    %c3_148 = arith.constant 3 : index
    %200 = memref.load %arg1[%c1_147, %c3_148] : memref<8x27xf32, #tpu.memory_space<smem>>
    %c0_149 = arith.constant 0 : index
    %c1_150 = arith.constant 1 : index
    %c0_151 = arith.constant 0 : index
    %201 = vector.load %arg7[%c0_149, %c1_150, %c0_151] : memref<3x18x18xf32, #tpu.memory_space<vmem>>, vector<1x16x16xf32>
    %202 = vector.shape_cast %201 : vector<1x16x16xf32> to vector<16x16xf32>
    %203 = vector.broadcast %200 : f32 to vector<16x16xf32>
    %204 = arith.mulf %203, %202 : vector<16x16xf32>
    %205 = arith.addf %199, %204 : vector<16x16xf32>
    %c1_152 = arith.constant 1 : index
    %c4_153 = arith.constant 4 : index
    %206 = memref.load %arg1[%c1_152, %c4_153] : memref<8x27xf32, #tpu.memory_space<smem>>
    %c0_154 = arith.constant 0 : index
    %c1_155 = arith.constant 1 : index
    %c1_156 = arith.constant 1 : index
    %207 = vector.load %arg7[%c0_154, %c1_155, %c1_156] : memref<3x18x18xf32, #tpu.memory_space<vmem>>, vector<1x16x16xf32>
    %208 = vector.shape_cast %207 : vector<1x16x16xf32> to vector<16x16xf32>
    %209 = vector.broadcast %206 : f32 to vector<16x16xf32>
    %210 = arith.mulf %209, %208 : vector<16x16xf32>
    %211 = arith.addf %205, %210 : vector<16x16xf32>
    %c1_157 = arith.constant 1 : index
    %c5_158 = arith.constant 5 : index
    %212 = memref.load %arg1[%c1_157, %c5_158] : memref<8x27xf32, #tpu.memory_space<smem>>
    %c0_159 = arith.constant 0 : index
    %c1_160 = arith.constant 1 : index
    %c2_161 = arith.constant 2 : index
    %213 = vector.load %arg7[%c0_159, %c1_160, %c2_161] : memref<3x18x18xf32, #tpu.memory_space<vmem>>, vector<1x16x16xf32>
    %214 = vector.shape_cast %213 : vector<1x16x16xf32> to vector<16x16xf32>
    %215 = vector.broadcast %212 : f32 to vector<16x16xf32>
    %216 = arith.mulf %215, %214 : vector<16x16xf32>
    %217 = arith.addf %211, %216 : vector<16x16xf32>
    %c1_162 = arith.constant 1 : index
    %c6_163 = arith.constant 6 : index
    %218 = memref.load %arg1[%c1_162, %c6_163] : memref<8x27xf32, #tpu.memory_space<smem>>
    %c0_164 = arith.constant 0 : index
    %c2_165 = arith.constant 2 : index
    %c0_166 = arith.constant 0 : index
    %219 = vector.load %arg7[%c0_164, %c2_165, %c0_166] : memref<3x18x18xf32, #tpu.memory_space<vmem>>, vector<1x16x16xf32>
    %220 = vector.shape_cast %219 : vector<1x16x16xf32> to vector<16x16xf32>
    %221 = vector.broadcast %218 : f32 to vector<16x16xf32>
    %222 = arith.mulf %221, %220 : vector<16x16xf32>
    %223 = arith.addf %217, %222 : vector<16x16xf32>
    %c1_167 = arith.constant 1 : index
    %c7_168 = arith.constant 7 : index
    %224 = memref.load %arg1[%c1_167, %c7_168] : memref<8x27xf32, #tpu.memory_space<smem>>
    %c0_169 = arith.constant 0 : index
    %c2_170 = arith.constant 2 : index
    %c1_171 = arith.constant 1 : index
    %225 = vector.load %arg7[%c0_169, %c2_170, %c1_171] : memref<3x18x18xf32, #tpu.memory_space<vmem>>, vector<1x16x16xf32>
    %226 = vector.shape_cast %225 : vector<1x16x16xf32> to vector<16x16xf32>
    %227 = vector.broadcast %224 : f32 to vector<16x16xf32>
    %228 = arith.mulf %227, %226 : vector<16x16xf32>
    %229 = arith.addf %223, %228 : vector<16x16xf32>
    %c1_172 = arith.constant 1 : index
    %c8_173 = arith.constant 8 : index
    %230 = memref.load %arg1[%c1_172, %c8_173] : memref<8x27xf32, #tpu.memory_space<smem>>
    %c0_174 = arith.constant 0 : index
    %c2_175 = arith.constant 2 : index
    %c2_176 = arith.constant 2 : index
    %231 = vector.load %arg7[%c0_174, %c2_175, %c2_176] : memref<3x18x18xf32, #tpu.memory_space<vmem>>, vector<1x16x16xf32>
    %232 = vector.shape_cast %231 : vector<1x16x16xf32> to vector<16x16xf32>
    %233 = vector.broadcast %230 : f32 to vector<16x16xf32>
    %234 = arith.mulf %233, %232 : vector<16x16xf32>
    %235 = arith.addf %229, %234 : vector<16x16xf32>
    %c1_177 = arith.constant 1 : index
    %c9_178 = arith.constant 9 : index
    %236 = memref.load %arg1[%c1_177, %c9_178] : memref<8x27xf32, #tpu.memory_space<smem>>
    %c1_179 = arith.constant 1 : index
    %c0_180 = arith.constant 0 : index
    %c0_181 = arith.constant 0 : index
    %237 = vector.load %arg7[%c1_179, %c0_180, %c0_181] : memref<3x18x18xf32, #tpu.memory_space<vmem>>, vector<1x16x16xf32>
    %238 = vector.shape_cast %237 : vector<1x16x16xf32> to vector<16x16xf32>
    %239 = vector.broadcast %236 : f32 to vector<16x16xf32>
    %240 = arith.mulf %239, %238 : vector<16x16xf32>
    %241 = arith.addf %235, %240 : vector<16x16xf32>
    %c1_182 = arith.constant 1 : index
    %c10_183 = arith.constant 10 : index
    %242 = memref.load %arg1[%c1_182, %c10_183] : memref<8x27xf32, #tpu.memory_space<smem>>
    %c1_184 = arith.constant 1 : index
    %c0_185 = arith.constant 0 : index
    %c1_186 = arith.constant 1 : index
    %243 = vector.load %arg7[%c1_184, %c0_185, %c1_186] : memref<3x18x18xf32, #tpu.memory_space<vmem>>, vector<1x16x16xf32>
    %244 = vector.shape_cast %243 : vector<1x16x16xf32> to vector<16x16xf32>
    %245 = vector.broadcast %242 : f32 to vector<16x16xf32>
    %246 = arith.mulf %245, %244 : vector<16x16xf32>
    %247 = arith.addf %241, %246 : vector<16x16xf32>
    %c1_187 = arith.constant 1 : index
    %c11_188 = arith.constant 11 : index
    %248 = memref.load %arg1[%c1_187, %c11_188] : memref<8x27xf32, #tpu.memory_space<smem>>
    %c1_189 = arith.constant 1 : index
    %c0_190 = arith.constant 0 : index
    %c2_191 = arith.constant 2 : index
    %249 = vector.load %arg7[%c1_189, %c0_190, %c2_191] : memref<3x18x18xf32, #tpu.memory_space<vmem>>, vector<1x16x16xf32>
    %250 = vector.shape_cast %249 : vector<1x16x16xf32> to vector<16x16xf32>
    %251 = vector.broadcast %248 : f32 to vector<16x16xf32>
    %252 = arith.mulf %251, %250 : vector<16x16xf32>
    %253 = arith.addf %247, %252 : vector<16x16xf32>
    %c1_192 = arith.constant 1 : index
    %c12_193 = arith.constant 12 : index
    %254 = memref.load %arg1[%c1_192, %c12_193] : memref<8x27xf32, #tpu.memory_space<smem>>
    %c1_194 = arith.constant 1 : index
    %c1_195 = arith.constant 1 : index
    %c0_196 = arith.constant 0 : index
    %255 = vector.load %arg7[%c1_194, %c1_195, %c0_196] : memref<3x18x18xf32, #tpu.memory_space<vmem>>, vector<1x16x16xf32>
    %256 = vector.shape_cast %255 : vector<1x16x16xf32> to vector<16x16xf32>
    %257 = vector.broadcast %254 : f32 to vector<16x16xf32>
    %258 = arith.mulf %257, %256 : vector<16x16xf32>
    %259 = arith.addf %253, %258 : vector<16x16xf32>
    %c1_197 = arith.constant 1 : index
    %c13_198 = arith.constant 13 : index
    %260 = memref.load %arg1[%c1_197, %c13_198] : memref<8x27xf32, #tpu.memory_space<smem>>
    %c1_199 = arith.constant 1 : index
    %c1_200 = arith.constant 1 : index
    %c1_201 = arith.constant 1 : index
    %261 = vector.load %arg7[%c1_199, %c1_200, %c1_201] : memref<3x18x18xf32, #tpu.memory_space<vmem>>, vector<1x16x16xf32>
    %262 = vector.shape_cast %261 : vector<1x16x16xf32> to vector<16x16xf32>
    %263 = vector.broadcast %260 : f32 to vector<16x16xf32>
    %264 = arith.mulf %263, %262 : vector<16x16xf32>
    %265 = arith.addf %259, %264 : vector<16x16xf32>
    %c1_202 = arith.constant 1 : index
    %c14_203 = arith.constant 14 : index
    %266 = memref.load %arg1[%c1_202, %c14_203] : memref<8x27xf32, #tpu.memory_space<smem>>
    %c1_204 = arith.constant 1 : index
    %c1_205 = arith.constant 1 : index
    %c2_206 = arith.constant 2 : index
    %267 = vector.load %arg7[%c1_204, %c1_205, %c2_206] : memref<3x18x18xf32, #tpu.memory_space<vmem>>, vector<1x16x16xf32>
    %268 = vector.shape_cast %267 : vector<1x16x16xf32> to vector<16x16xf32>
    %269 = vector.broadcast %266 : f32 to vector<16x16xf32>
    %270 = arith.mulf %269, %268 : vector<16x16xf32>
    %271 = arith.addf %265, %270 : vector<16x16xf32>
    %c1_207 = arith.constant 1 : index
    %c15_208 = arith.constant 15 : index
    %272 = memref.load %arg1[%c1_207, %c15_208] : memref<8x27xf32, #tpu.memory_space<smem>>
    %c1_209 = arith.constant 1 : index
    %c2_210 = arith.constant 2 : index
    %c0_211 = arith.constant 0 : index
    %273 = vector.load %arg7[%c1_209, %c2_210, %c0_211] : memref<3x18x18xf32, #tpu.memory_space<vmem>>, vector<1x16x16xf32>
    %274 = vector.shape_cast %273 : vector<1x16x16xf32> to vector<16x16xf32>
    %275 = vector.broadcast %272 : f32 to vector<16x16xf32>
    %276 = arith.mulf %275, %274 : vector<16x16xf32>
    %277 = arith.addf %271, %276 : vector<16x16xf32>
    %c1_212 = arith.constant 1 : index
    %c16_213 = arith.constant 16 : index
    %278 = memref.load %arg1[%c1_212, %c16_213] : memref<8x27xf32, #tpu.memory_space<smem>>
    %c1_214 = arith.constant 1 : index
    %c2_215 = arith.constant 2 : index
    %c1_216 = arith.constant 1 : index
    %279 = vector.load %arg7[%c1_214, %c2_215, %c1_216] : memref<3x18x18xf32, #tpu.memory_space<vmem>>, vector<1x16x16xf32>
    %280 = vector.shape_cast %279 : vector<1x16x16xf32> to vector<16x16xf32>
    %281 = vector.broadcast %278 : f32 to vector<16x16xf32>
    %282 = arith.mulf %281, %280 : vector<16x16xf32>
    %283 = arith.addf %277, %282 : vector<16x16xf32>
    %c1_217 = arith.constant 1 : index
    %c17_218 = arith.constant 17 : index
    %284 = memref.load %arg1[%c1_217, %c17_218] : memref<8x27xf32, #tpu.memory_space<smem>>
    %c1_219 = arith.constant 1 : index
    %c2_220 = arith.constant 2 : index
    %c2_221 = arith.constant 2 : index
    %285 = vector.load %arg7[%c1_219, %c2_220, %c2_221] : memref<3x18x18xf32, #tpu.memory_space<vmem>>, vector<1x16x16xf32>
    %286 = vector.shape_cast %285 : vector<1x16x16xf32> to vector<16x16xf32>
    %287 = vector.broadcast %284 : f32 to vector<16x16xf32>
    %288 = arith.mulf %287, %286 : vector<16x16xf32>
    %289 = arith.addf %283, %288 : vector<16x16xf32>
    %c1_222 = arith.constant 1 : index
    %c18_223 = arith.constant 18 : index
    %290 = memref.load %arg1[%c1_222, %c18_223] : memref<8x27xf32, #tpu.memory_space<smem>>
    %c2_224 = arith.constant 2 : index
    %c0_225 = arith.constant 0 : index
    %c0_226 = arith.constant 0 : index
    %291 = vector.load %arg7[%c2_224, %c0_225, %c0_226] : memref<3x18x18xf32, #tpu.memory_space<vmem>>, vector<1x16x16xf32>
    %292 = vector.shape_cast %291 : vector<1x16x16xf32> to vector<16x16xf32>
    %293 = vector.broadcast %290 : f32 to vector<16x16xf32>
    %294 = arith.mulf %293, %292 : vector<16x16xf32>
    %295 = arith.addf %289, %294 : vector<16x16xf32>
    %c1_227 = arith.constant 1 : index
    %c19_228 = arith.constant 19 : index
    %296 = memref.load %arg1[%c1_227, %c19_228] : memref<8x27xf32, #tpu.memory_space<smem>>
    %c2_229 = arith.constant 2 : index
    %c0_230 = arith.constant 0 : index
    %c1_231 = arith.constant 1 : index
    %297 = vector.load %arg7[%c2_229, %c0_230, %c1_231] : memref<3x18x18xf32, #tpu.memory_space<vmem>>, vector<1x16x16xf32>
    %298 = vector.shape_cast %297 : vector<1x16x16xf32> to vector<16x16xf32>
    %299 = vector.broadcast %296 : f32 to vector<16x16xf32>
    %300 = arith.mulf %299, %298 : vector<16x16xf32>
    %301 = arith.addf %295, %300 : vector<16x16xf32>
    %c1_232 = arith.constant 1 : index
    %c20_233 = arith.constant 20 : index
    %302 = memref.load %arg1[%c1_232, %c20_233] : memref<8x27xf32, #tpu.memory_space<smem>>
    %c2_234 = arith.constant 2 : index
    %c0_235 = arith.constant 0 : index
    %c2_236 = arith.constant 2 : index
    %303 = vector.load %arg7[%c2_234, %c0_235, %c2_236] : memref<3x18x18xf32, #tpu.memory_space<vmem>>, vector<1x16x16xf32>
    %304 = vector.shape_cast %303 : vector<1x16x16xf32> to vector<16x16xf32>
    %305 = vector.broadcast %302 : f32 to vector<16x16xf32>
    %306 = arith.mulf %305, %304 : vector<16x16xf32>
    %307 = arith.addf %301, %306 : vector<16x16xf32>
    %c1_237 = arith.constant 1 : index
    %c21_238 = arith.constant 21 : index
    %308 = memref.load %arg1[%c1_237, %c21_238] : memref<8x27xf32, #tpu.memory_space<smem>>
    %c2_239 = arith.constant 2 : index
    %c1_240 = arith.constant 1 : index
    %c0_241 = arith.constant 0 : index
    %309 = vector.load %arg7[%c2_239, %c1_240, %c0_241] : memref<3x18x18xf32, #tpu.memory_space<vmem>>, vector<1x16x16xf32>
    %310 = vector.shape_cast %309 : vector<1x16x16xf32> to vector<16x16xf32>
    %311 = vector.broadcast %308 : f32 to vector<16x16xf32>
    %312 = arith.mulf %311, %310 : vector<16x16xf32>
    %313 = arith.addf %307, %312 : vector<16x16xf32>
    %c1_242 = arith.constant 1 : index
    %c22_243 = arith.constant 22 : index
    %314 = memref.load %arg1[%c1_242, %c22_243] : memref<8x27xf32, #tpu.memory_space<smem>>
    %c2_244 = arith.constant 2 : index
    %c1_245 = arith.constant 1 : index
    %c1_246 = arith.constant 1 : index
    %315 = vector.load %arg7[%c2_244, %c1_245, %c1_246] : memref<3x18x18xf32, #tpu.memory_space<vmem>>, vector<1x16x16xf32>
    %316 = vector.shape_cast %315 : vector<1x16x16xf32> to vector<16x16xf32>
    %317 = vector.broadcast %314 : f32 to vector<16x16xf32>
    %318 = arith.mulf %317, %316 : vector<16x16xf32>
    %319 = arith.addf %313, %318 : vector<16x16xf32>
    %c1_247 = arith.constant 1 : index
    %c23_248 = arith.constant 23 : index
    %320 = memref.load %arg1[%c1_247, %c23_248] : memref<8x27xf32, #tpu.memory_space<smem>>
    %c2_249 = arith.constant 2 : index
    %c1_250 = arith.constant 1 : index
    %c2_251 = arith.constant 2 : index
    %321 = vector.load %arg7[%c2_249, %c1_250, %c2_251] : memref<3x18x18xf32, #tpu.memory_space<vmem>>, vector<1x16x16xf32>
    %322 = vector.shape_cast %321 : vector<1x16x16xf32> to vector<16x16xf32>
    %323 = vector.broadcast %320 : f32 to vector<16x16xf32>
    %324 = arith.mulf %323, %322 : vector<16x16xf32>
    %325 = arith.addf %319, %324 : vector<16x16xf32>
    %c1_252 = arith.constant 1 : index
    %c24_253 = arith.constant 24 : index
    %326 = memref.load %arg1[%c1_252, %c24_253] : memref<8x27xf32, #tpu.memory_space<smem>>
    %c2_254 = arith.constant 2 : index
    %c2_255 = arith.constant 2 : index
    %c0_256 = arith.constant 0 : index
    %327 = vector.load %arg7[%c2_254, %c2_255, %c0_256] : memref<3x18x18xf32, #tpu.memory_space<vmem>>, vector<1x16x16xf32>
    %328 = vector.shape_cast %327 : vector<1x16x16xf32> to vector<16x16xf32>
    %329 = vector.broadcast %326 : f32 to vector<16x16xf32>
    %330 = arith.mulf %329, %328 : vector<16x16xf32>
    %331 = arith.addf %325, %330 : vector<16x16xf32>
    %c1_257 = arith.constant 1 : index
    %c25_258 = arith.constant 25 : index
    %332 = memref.load %arg1[%c1_257, %c25_258] : memref<8x27xf32, #tpu.memory_space<smem>>
    %c2_259 = arith.constant 2 : index
    %c2_260 = arith.constant 2 : index
    %c1_261 = arith.constant 1 : index
    %333 = vector.load %arg7[%c2_259, %c2_260, %c1_261] : memref<3x18x18xf32, #tpu.memory_space<vmem>>, vector<1x16x16xf32>
    %334 = vector.shape_cast %333 : vector<1x16x16xf32> to vector<16x16xf32>
    %335 = vector.broadcast %332 : f32 to vector<16x16xf32>
    %336 = arith.mulf %335, %334 : vector<16x16xf32>
    %337 = arith.addf %331, %336 : vector<16x16xf32>
    %c1_262 = arith.constant 1 : index
    %c26_263 = arith.constant 26 : index
    %338 = memref.load %arg1[%c1_262, %c26_263] : memref<8x27xf32, #tpu.memory_space<smem>>
    %c2_264 = arith.constant 2 : index
    %c2_265 = arith.constant 2 : index
    %c2_266 = arith.constant 2 : index
    %339 = vector.load %arg7[%c2_264, %c2_265, %c2_266] : memref<3x18x18xf32, #tpu.memory_space<vmem>>, vector<1x16x16xf32>
    %340 = vector.shape_cast %339 : vector<1x16x16xf32> to vector<16x16xf32>
    %341 = vector.broadcast %338 : f32 to vector<16x16xf32>
    %342 = arith.mulf %341, %340 : vector<16x16xf32>
    %343 = arith.addf %337, %342 : vector<16x16xf32>
    %cst_267 = arith.constant 0.000000e+00 : f32
    %344 = vector.broadcast %cst_267 : f32 to vector<16x16xf32>
    %345 = arith.maximumf %343, %344 : vector<16x16xf32>
    %c1_268 = arith.constant 1 : index
    %c1_269 = arith.constant 1 : index
    %c1_270 = arith.constant 1 : index
    %346 = vector.load %arg8[%c1_268, %c1_269, %c1_270] : memref<8x18x18xf32, #tpu.memory_space<vmem>>, vector<1x16x16xf32>
    %347 = vector.shape_cast %346 : vector<1x16x16xf32> to vector<16x16xf32>
    %348 = vector.shape_cast %345 : vector<16x16xf32> to vector<1x16x16xf32>
    tpu.vector_store %arg8[%c1_268, %c1_269, %c1_270], %348 {strides = array<i32>} : memref<8x18x18xf32, #tpu.memory_space<vmem>>, vector<1x16x16xf32>,
    %cst_271 = arith.constant 0.000000e+00 : f32
    %349 = vector.broadcast %cst_271 : f32 to vector<16x16xf32>
    %c0_272 = arith.constant 0 : index
    %c2_273 = arith.constant 2 : index
    %350 = memref.load %arg2[%c0_272, %c2_273] : memref<1x8xf32, #tpu.memory_space<smem>>
    %351 = vector.broadcast %350 : f32 to vector<16x16xf32>
    %352 = arith.addf %349, %351 : vector<16x16xf32>
    %c2_274 = arith.constant 2 : index
    %c0_275 = arith.constant 0 : index
    %353 = memref.load %arg1[%c2_274, %c0_275] : memref<8x27xf32, #tpu.memory_space<smem>>
    %c0_276 = arith.constant 0 : index
    %c0_277 = arith.constant 0 : index
    %c0_278 = arith.constant 0 : index
    %354 = vector.load %arg7[%c0_276, %c0_277, %c0_278] : memref<3x18x18xf32, #tpu.memory_space<vmem>>, vector<1x16x16xf32>
    %355 = vector.shape_cast %354 : vector<1x16x16xf32> to vector<16x16xf32>
    %356 = vector.broadcast %353 : f32 to vector<16x16xf32>
    %357 = arith.mulf %356, %355 : vector<16x16xf32>
    %358 = arith.addf %352, %357 : vector<16x16xf32>
    %c2_279 = arith.constant 2 : index
    %c1_280 = arith.constant 1 : index
    %359 = memref.load %arg1[%c2_279, %c1_280] : memref<8x27xf32, #tpu.memory_space<smem>>
    %c0_281 = arith.constant 0 : index
    %c0_282 = arith.constant 0 : index
    %c1_283 = arith.constant 1 : index
    %360 = vector.load %arg7[%c0_281, %c0_282, %c1_283] : memref<3x18x18xf32, #tpu.memory_space<vmem>>, vector<1x16x16xf32>
    %361 = vector.shape_cast %360 : vector<1x16x16xf32> to vector<16x16xf32>
    %362 = vector.broadcast %359 : f32 to vector<16x16xf32>
    %363 = arith.mulf %362, %361 : vector<16x16xf32>
    %364 = arith.addf %358, %363 : vector<16x16xf32>
    %c2_284 = arith.constant 2 : index
    %c2_285 = arith.constant 2 : index
    %365 = memref.load %arg1[%c2_284, %c2_285] : memref<8x27xf32, #tpu.memory_space<smem>>
    %c0_286 = arith.constant 0 : index
    %c0_287 = arith.constant 0 : index
    %c2_288 = arith.constant 2 : index
    %366 = vector.load %arg7[%c0_286, %c0_287, %c2_288] : memref<3x18x18xf32, #tpu.memory_space<vmem>>, vector<1x16x16xf32>
    %367 = vector.shape_cast %366 : vector<1x16x16xf32> to vector<16x16xf32>
    %368 = vector.broadcast %365 : f32 to vector<16x16xf32>
    %369 = arith.mulf %368, %367 : vector<16x16xf32>
    %370 = arith.addf %364, %369 : vector<16x16xf32>
    %c2_289 = arith.constant 2 : index
    %c3_290 = arith.constant 3 : index
    %371 = memref.load %arg1[%c2_289, %c3_290] : memref<8x27xf32, #tpu.memory_space<smem>>
    %c0_291 = arith.constant 0 : index
    %c1_292 = arith.constant 1 : index
    %c0_293 = arith.constant 0 : index
    %372 = vector.load %arg7[%c0_291, %c1_292, %c0_293] : memref<3x18x18xf32, #tpu.memory_space<vmem>>, vector<1x16x16xf32>
    %373 = vector.shape_cast %372 : vector<1x16x16xf32> to vector<16x16xf32>
    %374 = vector.broadcast %371 : f32 to vector<16x16xf32>
    %375 = arith.mulf %374, %373 : vector<16x16xf32>
    %376 = arith.addf %370, %375 : vector<16x16xf32>
    %c2_294 = arith.constant 2 : index
    %c4_295 = arith.constant 4 : index
    %377 = memref.load %arg1[%c2_294, %c4_295] : memref<8x27xf32, #tpu.memory_space<smem>>
    %c0_296 = arith.constant 0 : index
    %c1_297 = arith.constant 1 : index
    %c1_298 = arith.constant 1 : index
    %378 = vector.load %arg7[%c0_296, %c1_297, %c1_298] : memref<3x18x18xf32, #tpu.memory_space<vmem>>, vector<1x16x16xf32>
    %379 = vector.shape_cast %378 : vector<1x16x16xf32> to vector<16x16xf32>
    %380 = vector.broadcast %377 : f32 to vector<16x16xf32>
    %381 = arith.mulf %380, %379 : vector<16x16xf32>
    %382 = arith.addf %376, %381 : vector<16x16xf32>
    %c2_299 = arith.constant 2 : index
    %c5_300 = arith.constant 5 : index
    %383 = memref.load %arg1[%c2_299, %c5_300] : memref<8x27xf32, #tpu.memory_space<smem>>
    %c0_301 = arith.constant 0 : index
    %c1_302 = arith.constant 1 : index
    %c2_303 = arith.constant 2 : index
    %384 = vector.load %arg7[%c0_301, %c1_302, %c2_303] : memref<3x18x18xf32, #tpu.memory_space<vmem>>, vector<1x16x16xf32>
    %385 = vector.shape_cast %384 : vector<1x16x16xf32> to vector<16x16xf32>
    %386 = vector.broadcast %383 : f32 to vector<16x16xf32>
    %387 = arith.mulf %386, %385 : vector<16x16xf32>
    %388 = arith.addf %382, %387 : vector<16x16xf32>
    %c2_304 = arith.constant 2 : index
    %c6_305 = arith.constant 6 : index
    %389 = memref.load %arg1[%c2_304, %c6_305] : memref<8x27xf32, #tpu.memory_space<smem>>
    %c0_306 = arith.constant 0 : index
    %c2_307 = arith.constant 2 : index
    %c0_308 = arith.constant 0 : index
    %390 = vector.load %arg7[%c0_306, %c2_307, %c0_308] : memref<3x18x18xf32, #tpu.memory_space<vmem>>, vector<1x16x16xf32>
    %391 = vector.shape_cast %390 : vector<1x16x16xf32> to vector<16x16xf32>
    %392 = vector.broadcast %389 : f32 to vector<16x16xf32>
    %393 = arith.mulf %392, %391 : vector<16x16xf32>
    %394 = arith.addf %388, %393 : vector<16x16xf32>
    %c2_309 = arith.constant 2 : index
    %c7_310 = arith.constant 7 : index
    %395 = memref.load %arg1[%c2_309, %c7_310] : memref<8x27xf32, #tpu.memory_space<smem>>
    %c0_311 = arith.constant 0 : index
    %c2_312 = arith.constant 2 : index
    %c1_313 = arith.constant 1 : index
    %396 = vector.load %arg7[%c0_311, %c2_312, %c1_313] : memref<3x18x18xf32, #tpu.memory_space<vmem>>, vector<1x16x16xf32>
    %397 = vector.shape_cast %396 : vector<1x16x16xf32> to vector<16x16xf32>
    %398 = vector.broadcast %395 : f32 to vector<16x16xf32>
    %399 = arith.mulf %398, %397 : vector<16x16xf32>
    %400 = arith.addf %394, %399 : vector<16x16xf32>
    %c2_314 = arith.constant 2 : index
    %c8_315 = arith.constant 8 : index
    %401 = memref.load %arg1[%c2_314, %c8_315] : memref<8x27xf32, #tpu.memory_space<smem>>
    %c0_316 = arith.constant 0 : index
    %c2_317 = arith.constant 2 : index
    %c2_318 = arith.constant 2 : index
    %402 = vector.load %arg7[%c0_316, %c2_317, %c2_318] : memref<3x18x18xf32, #tpu.memory_space<vmem>>, vector<1x16x16xf32>
    %403 = vector.shape_cast %402 : vector<1x16x16xf32> to vector<16x16xf32>
    %404 = vector.broadcast %401 : f32 to vector<16x16xf32>
    %405 = arith.mulf %404, %403 : vector<16x16xf32>
    %406 = arith.addf %400, %405 : vector<16x16xf32>
    %c2_319 = arith.constant 2 : index
    %c9_320 = arith.constant 9 : index
    %407 = memref.load %arg1[%c2_319, %c9_320] : memref<8x27xf32, #tpu.memory_space<smem>>
    %c1_321 = arith.constant 1 : index
    %c0_322 = arith.constant 0 : index
    %c0_323 = arith.constant 0 : index
    %408 = vector.load %arg7[%c1_321, %c0_322, %c0_323] : memref<3x18x18xf32, #tpu.memory_space<vmem>>, vector<1x16x16xf32>
    %409 = vector.shape_cast %408 : vector<1x16x16xf32> to vector<16x16xf32>
    %410 = vector.broadcast %407 : f32 to vector<16x16xf32>
    %411 = arith.mulf %410, %409 : vector<16x16xf32>
    %412 = arith.addf %406, %411 : vector<16x16xf32>
    %c2_324 = arith.constant 2 : index
    %c10_325 = arith.constant 10 : index
    %413 = memref.load %arg1[%c2_324, %c10_325] : memref<8x27xf32, #tpu.memory_space<smem>>
    %c1_326 = arith.constant 1 : index
    %c0_327 = arith.constant 0 : index
    %c1_328 = arith.constant 1 : index
    %414 = vector.load %arg7[%c1_326, %c0_327, %c1_328] : memref<3x18x18xf32, #tpu.memory_space<vmem>>, vector<1x16x16xf32>
    %415 = vector.shape_cast %414 : vector<1x16x16xf32> to vector<16x16xf32>
    %416 = vector.broadcast %413 : f32 to vector<16x16xf32>
    %417 = arith.mulf %416, %415 : vector<16x16xf32>
    %418 = arith.addf %412, %417 : vector<16x16xf32>
    %c2_329 = arith.constant 2 : index
    %c11_330 = arith.constant 11 : index
    %419 = memref.load %arg1[%c2_329, %c11_330] : memref<8x27xf32, #tpu.memory_space<smem>>
    %c1_331 = arith.constant 1 : index
    %c0_332 = arith.constant 0 : index
    %c2_333 = arith.constant 2 : index
    %420 = vector.load %arg7[%c1_331, %c0_332, %c2_333] : memref<3x18x18xf32, #tpu.memory_space<vmem>>, vector<1x16x16xf32>
    %421 = vector.shape_cast %420 : vector<1x16x16xf32> to vector<16x16xf32>
    %422 = vector.broadcast %419 : f32 to vector<16x16xf32>
    %423 = arith.mulf %422, %421 : vector<16x16xf32>
    %424 = arith.addf %418, %423 : vector<16x16xf32>
    %c2_334 = arith.constant 2 : index
    %c12_335 = arith.constant 12 : index
    %425 = memref.load %arg1[%c2_334, %c12_335] : memref<8x27xf32, #tpu.memory_space<smem>>
    %c1_336 = arith.constant 1 : index
    %c1_337 = arith.constant 1 : index
    %c0_338 = arith.constant 0 : index
    %426 = vector.load %arg7[%c1_336, %c1_337, %c0_338] : memref<3x18x18xf32, #tpu.memory_space<vmem>>, vector<1x16x16xf32>
    %427 = vector.shape_cast %426 : vector<1x16x16xf32> to vector<16x16xf32>
    %428 = vector.broadcast %425 : f32 to vector<16x16xf32>
    %429 = arith.mulf %428, %427 : vector<16x16xf32>
    %430 = arith.addf %424, %429 : vector<16x16xf32>
    %c2_339 = arith.constant 2 : index
    %c13_340 = arith.constant 13 : index
    %431 = memref.load %arg1[%c2_339, %c13_340] : memref<8x27xf32, #tpu.memory_space<smem>>
    %c1_341 = arith.constant 1 : index
    %c1_342 = arith.constant 1 : index
    %c1_343 = arith.constant 1 : index
    %432 = vector.load %arg7[%c1_341, %c1_342, %c1_343] : memref<3x18x18xf32, #tpu.memory_space<vmem>>, vector<1x16x16xf32>
    %433 = vector.shape_cast %432 : vector<1x16x16xf32> to vector<16x16xf32>
    %434 = vector.broadcast %431 : f32 to vector<16x16xf32>
    %435 = arith.mulf %434, %433 : vector<16x16xf32>
    %436 = arith.addf %430, %435 : vector<16x16xf32>
    %c2_344 = arith.constant 2 : index
    %c14_345 = arith.constant 14 : index
    %437 = memref.load %arg1[%c2_344, %c14_345] : memref<8x27xf32, #tpu.memory_space<smem>>
    %c1_346 = arith.constant 1 : index
    %c1_347 = arith.constant 1 : index
    %c2_348 = arith.constant 2 : index
    %438 = vector.load %arg7[%c1_346, %c1_347, %c2_348] : memref<3x18x18xf32, #tpu.memory_space<vmem>>, vector<1x16x16xf32>
    %439 = vector.shape_cast %438 : vector<1x16x16xf32> to vector<16x16xf32>
    %440 = vector.broadcast %437 : f32 to vector<16x16xf32>
    %441 = arith.mulf %440, %439 : vector<16x16xf32>
    %442 = arith.addf %436, %441 : vector<16x16xf32>
    %c2_349 = arith.constant 2 : index
    %c15_350 = arith.constant 15 : index
    %443 = memref.load %arg1[%c2_349, %c15_350] : memref<8x27xf32, #tpu.memory_space<smem>>
    %c1_351 = arith.constant 1 : index
    %c2_352 = arith.constant 2 : index
    %c0_353 = arith.constant 0 : index
    %444 = vector.load %arg7[%c1_351, %c2_352, %c0_353] : memref<3x18x18xf32, #tpu.memory_space<vmem>>, vector<1x16x16xf32>
    %445 = vector.shape_cast %444 : vector<1x16x16xf32> to vector<16x16xf32>
    %446 = vector.broadcast %443 : f32 to vector<16x16xf32>
    %447 = arith.mulf %446, %445 : vector<16x16xf32>
    %448 = arith.addf %442, %447 : vector<16x16xf32>
    %c2_354 = arith.constant 2 : index
    %c16_355 = arith.constant 16 : index
    %449 = memref.load %arg1[%c2_354, %c16_355] : memref<8x27xf32, #tpu.memory_space<smem>>
    %c1_356 = arith.constant 1 : index
    %c2_357 = arith.constant 2 : index
    %c1_358 = arith.constant 1 : index
    %450 = vector.load %arg7[%c1_356, %c2_357, %c1_358] : memref<3x18x18xf32, #tpu.memory_space<vmem>>, vector<1x16x16xf32>
    %451 = vector.shape_cast %450 : vector<1x16x16xf32> to vector<16x16xf32>
    %452 = vector.broadcast %449 : f32 to vector<16x16xf32>
    %453 = arith.mulf %452, %451 : vector<16x16xf32>
    %454 = arith.addf %448, %453 : vector<16x16xf32>
    %c2_359 = arith.constant 2 : index
    %c17_360 = arith.constant 17 : index
    %455 = memref.load %arg1[%c2_359, %c17_360] : memref<8x27xf32, #tpu.memory_space<smem>>
    %c1_361 = arith.constant 1 : index
    %c2_362 = arith.constant 2 : index
    %c2_363 = arith.constant 2 : index
    %456 = vector.load %arg7[%c1_361, %c2_362, %c2_363] : memref<3x18x18xf32, #tpu.memory_space<vmem>>, vector<1x16x16xf32>
    %457 = vector.shape_cast %456 : vector<1x16x16xf32> to vector<16x16xf32>
    %458 = vector.broadcast %455 : f32 to vector<16x16xf32>
    %459 = arith.mulf %458, %457 : vector<16x16xf32>
    %460 = arith.addf %454, %459 : vector<16x16xf32>
    %c2_364 = arith.constant 2 : index
    %c18_365 = arith.constant 18 : index
    %461 = memref.load %arg1[%c2_364, %c18_365] : memref<8x27xf32, #tpu.memory_space<smem>>
    %c2_366 = arith.constant 2 : index
    %c0_367 = arith.constant 0 : index
    %c0_368 = arith.constant 0 : index
    %462 = vector.load %arg7[%c2_366, %c0_367, %c0_368] : memref<3x18x18xf32, #tpu.memory_space<vmem>>, vector<1x16x16xf32>
    %463 = vector.shape_cast %462 : vector<1x16x16xf32> to vector<16x16xf32>
    %464 = vector.broadcast %461 : f32 to vector<16x16xf32>
    %465 = arith.mulf %464, %463 : vector<16x16xf32>
    %466 = arith.addf %460, %465 : vector<16x16xf32>
    %c2_369 = arith.constant 2 : index
    %c19_370 = arith.constant 19 : index
    %467 = memref.load %arg1[%c2_369, %c19_370] : memref<8x27xf32, #tpu.memory_space<smem>>
    %c2_371 = arith.constant 2 : index
    %c0_372 = arith.constant 0 : index
    %c1_373 = arith.constant 1 : index
    %468 = vector.load %arg7[%c2_371, %c0_372, %c1_373] : memref<3x18x18xf32, #tpu.memory_space<vmem>>, vector<1x16x16xf32>
    %469 = vector.shape_cast %468 : vector<1x16x16xf32> to vector<16x16xf32>
    %470 = vector.broadcast %467 : f32 to vector<16x16xf32>
    %471 = arith.mulf %470, %469 : vector<16x16xf32>
    %472 = arith.addf %466, %471 : vector<16x16xf32>
    %c2_374 = arith.constant 2 : index
    %c20_375 = arith.constant 20 : index
    %473 = memref.load %arg1[%c2_374, %c20_375] : memref<8x27xf32, #tpu.memory_space<smem>>
    %c2_376 = arith.constant 2 : index
    %c0_377 = arith.constant 0 : index
    %c2_378 = arith.constant 2 : index
    %474 = vector.load %arg7[%c2_376, %c0_377, %c2_378] : memref<3x18x18xf32, #tpu.memory_space<vmem>>, vector<1x16x16xf32>
    %475 = vector.shape_cast %474 : vector<1x16x16xf32> to vector<16x16xf32>
    %476 = vector.broadcast %473 : f32 to vector<16x16xf32>
    %477 = arith.mulf %476, %475 : vector<16x16xf32>
    %478 = arith.addf %472, %477 : vector<16x16xf32>
    %c2_379 = arith.constant 2 : index
    %c21_380 = arith.constant 21 : index
    %479 = memref.load %arg1[%c2_379, %c21_380] : memref<8x27xf32, #tpu.memory_space<smem>>
    %c2_381 = arith.constant 2 : index
    %c1_382 = arith.constant 1 : index
    %c0_383 = arith.constant 0 : index
    %480 = vector.load %arg7[%c2_381, %c1_382, %c0_383] : memref<3x18x18xf32, #tpu.memory_space<vmem>>, vector<1x16x16xf32>
    %481 = vector.shape_cast %480 : vector<1x16x16xf32> to vector<16x16xf32>
    %482 = vector.broadcast %479 : f32 to vector<16x16xf32>
    %483 = arith.mulf %482, %481 : vector<16x16xf32>
    %484 = arith.addf %478, %483 : vector<16x16xf32>
    %c2_384 = arith.constant 2 : index
    %c22_385 = arith.constant 22 : index
    %485 = memref.load %arg1[%c2_384, %c22_385] : memref<8x27xf32, #tpu.memory_space<smem>>
    %c2_386 = arith.constant 2 : index
    %c1_387 = arith.constant 1 : index
    %c1_388 = arith.constant 1 : index
    %486 = vector.load %arg7[%c2_386, %c1_387, %c1_388] : memref<3x18x18xf32, #tpu.memory_space<vmem>>, vector<1x16x16xf32>
    %487 = vector.shape_cast %486 : vector<1x16x16xf32> to vector<16x16xf32>
    %488 = vector.broadcast %485 : f32 to vector<16x16xf32>
    %489 = arith.mulf %488, %487 : vector<16x16xf32>
    %490 = arith.addf %484, %489 : vector<16x16xf32>
    %c2_389 = arith.constant 2 : index
    %c23_390 = arith.constant 23 : index
    %491 = memref.load %arg1[%c2_389, %c23_390] : memref<8x27xf32, #tpu.memory_space<smem>>
    %c2_391 = arith.constant 2 : index
    %c1_392 = arith.constant 1 : index
    %c2_393 = arith.constant 2 : index
    %492 = vector.load %arg7[%c2_391, %c1_392, %c2_393] : memref<3x18x18xf32, #tpu.memory_space<vmem>>, vector<1x16x16xf32>
    %493 = vector.shape_cast %492 : vector<1x16x16xf32> to vector<16x16xf32>
    %494 = vector.broadcast %491 : f32 to vector<16x16xf32>
    %495 = arith.mulf %494, %493 : vector<16x16xf32>
    %496 = arith.addf %490, %495 : vector<16x16xf32>
    %c2_394 = arith.constant 2 : index
    %c24_395 = arith.constant 24 : index
    %497 = memref.load %arg1[%c2_394, %c24_395] : memref<8x27xf32, #tpu.memory_space<smem>>
    %c2_396 = arith.constant 2 : index
    %c2_397 = arith.constant 2 : index
    %c0_398 = arith.constant 0 : index
    %498 = vector.load %arg7[%c2_396, %c2_397, %c0_398] : memref<3x18x18xf32, #tpu.memory_space<vmem>>, vector<1x16x16xf32>
    %499 = vector.shape_cast %498 : vector<1x16x16xf32> to vector<16x16xf32>
    %500 = vector.broadcast %497 : f32 to vector<16x16xf32>
    %501 = arith.mulf %500, %499 : vector<16x16xf32>
    %502 = arith.addf %496, %501 : vector<16x16xf32>
    %c2_399 = arith.constant 2 : index
    %c25_400 = arith.constant 25 : index
    %503 = memref.load %arg1[%c2_399, %c25_400] : memref<8x27xf32, #tpu.memory_space<smem>>
    %c2_401 = arith.constant 2 : index
    %c2_402 = arith.constant 2 : index
    %c1_403 = arith.constant 1 : index
    %504 = vector.load %arg7[%c2_401, %c2_402, %c1_403] : memref<3x18x18xf32, #tpu.memory_space<vmem>>, vector<1x16x16xf32>
    %505 = vector.shape_cast %504 : vector<1x16x16xf32> to vector<16x16xf32>
    %506 = vector.broadcast %503 : f32 to vector<16x16xf32>
    %507 = arith.mulf %506, %505 : vector<16x16xf32>
    %508 = arith.addf %502, %507 : vector<16x16xf32>
    %c2_404 = arith.constant 2 : index
    %c26_405 = arith.constant 26 : index
    %509 = memref.load %arg1[%c2_404, %c26_405] : memref<8x27xf32, #tpu.memory_space<smem>>
    %c2_406 = arith.constant 2 : index
    %c2_407 = arith.constant 2 : index
    %c2_408 = arith.constant 2 : index
    %510 = vector.load %arg7[%c2_406, %c2_407, %c2_408] : memref<3x18x18xf32, #tpu.memory_space<vmem>>, vector<1x16x16xf32>
    %511 = vector.shape_cast %510 : vector<1x16x16xf32> to vector<16x16xf32>
    %512 = vector.broadcast %509 : f32 to vector<16x16xf32>
    %513 = arith.mulf %512, %511 : vector<16x16xf32>
    %514 = arith.addf %508, %513 : vector<16x16xf32>
    %cst_409 = arith.constant 0.000000e+00 : f32
    %515 = vector.broadcast %cst_409 : f32 to vector<16x16xf32>
    %516 = arith.maximumf %514, %515 : vector<16x16xf32>
    %c2_410 = arith.constant 2 : index
    %c1_411 = arith.constant 1 : index
    %c1_412 = arith.constant 1 : index
    %517 = vector.load %arg8[%c2_410, %c1_411, %c1_412] : memref<8x18x18xf32, #tpu.memory_space<vmem>>, vector<1x16x16xf32>
    %518 = vector.shape_cast %517 : vector<1x16x16xf32> to vector<16x16xf32>
    %519 = vector.shape_cast %516 : vector<16x16xf32> to vector<1x16x16xf32>
    tpu.vector_store %arg8[%c2_410, %c1_411, %c1_412], %519 {strides = array<i32>} : memref<8x18x18xf32, #tpu.memory_space<vmem>>, vector<1x16x16xf32>,
    %cst_413 = arith.constant 0.000000e+00 : f32
    %520 = vector.broadcast %cst_413 : f32 to vector<16x16xf32>
    %c0_414 = arith.constant 0 : index
    %c3_415 = arith.constant 3 : index
    %521 = memref.load %arg2[%c0_414, %c3_415] : memref<1x8xf32, #tpu.memory_space<smem>>
    %522 = vector.broadcast %521 : f32 to vector<16x16xf32>
    %523 = arith.addf %520, %522 : vector<16x16xf32>
    %c3_416 = arith.constant 3 : index
    %c0_417 = arith.constant 0 : index
    %524 = memref.load %arg1[%c3_416, %c0_417] : memref<8x27xf32, #tpu.memory_space<smem>>
    %c0_418 = arith.constant 0 : index
    %c0_419 = arith.constant 0 : index
    %c0_420 = arith.constant 0 : index
    %525 = vector.load %arg7[%c0_418, %c0_419, %c0_420] : memref<3x18x18xf32, #tpu.memory_space<vmem>>, vector<1x16x16xf32>
    %526 = vector.shape_cast %525 : vector<1x16x16xf32> to vector<16x16xf32>
    %527 = vector.broadcast %524 : f32 to vector<16x16xf32>
    %528 = arith.mulf %527, %526 : vector<16x16xf32>
    %529 = arith.addf %523, %528 : vector<16x16xf32>
    %c3_421 = arith.constant 3 : index
    %c1_422 = arith.constant 1 : index
    %530 = memref.load %arg1[%c3_421, %c1_422] : memref<8x27xf32, #tpu.memory_space<smem>>
    %c0_423 = arith.constant 0 : index
    %c0_424 = arith.constant 0 : index
    %c1_425 = arith.constant 1 : index
    %531 = vector.load %arg7[%c0_423, %c0_424, %c1_425] : memref<3x18x18xf32, #tpu.memory_space<vmem>>, vector<1x16x16xf32>
    %532 = vector.shape_cast %531 : vector<1x16x16xf32> to vector<16x16xf32>
    %533 = vector.broadcast %530 : f32 to vector<16x16xf32>
    %534 = arith.mulf %533, %532 : vector<16x16xf32>
    %535 = arith.addf %529, %534 : vector<16x16xf32>
    %c3_426 = arith.constant 3 : index
    %c2_427 = arith.constant 2 : index
    %536 = memref.load %arg1[%c3_426, %c2_427] : memref<8x27xf32, #tpu.memory_space<smem>>
    %c0_428 = arith.constant 0 : index
    %c0_429 = arith.constant 0 : index
    %c2_430 = arith.constant 2 : index
    %537 = vector.load %arg7[%c0_428, %c0_429, %c2_430] : memref<3x18x18xf32, #tpu.memory_space<vmem>>, vector<1x16x16xf32>
    %538 = vector.shape_cast %537 : vector<1x16x16xf32> to vector<16x16xf32>
    %539 = vector.broadcast %536 : f32 to vector<16x16xf32>
    %540 = arith.mulf %539, %538 : vector<16x16xf32>
    %541 = arith.addf %535, %540 : vector<16x16xf32>
    %c3_431 = arith.constant 3 : index
    %c3_432 = arith.constant 3 : index
    %542 = memref.load %arg1[%c3_431, %c3_432] : memref<8x27xf32, #tpu.memory_space<smem>>
    %c0_433 = arith.constant 0 : index
    %c1_434 = arith.constant 1 : index
    %c0_435 = arith.constant 0 : index
    %543 = vector.load %arg7[%c0_433, %c1_434, %c0_435] : memref<3x18x18xf32, #tpu.memory_space<vmem>>, vector<1x16x16xf32>
    %544 = vector.shape_cast %543 : vector<1x16x16xf32> to vector<16x16xf32>
    %545 = vector.broadcast %542 : f32 to vector<16x16xf32>
    %546 = arith.mulf %545, %544 : vector<16x16xf32>
    %547 = arith.addf %541, %546 : vector<16x16xf32>
    %c3_436 = arith.constant 3 : index
    %c4_437 = arith.constant 4 : index
    %548 = memref.load %arg1[%c3_436, %c4_437] : memref<8x27xf32, #tpu.memory_space<smem>>
    %c0_438 = arith.constant 0 : index
    %c1_439 = arith.constant 1 : index
    %c1_440 = arith.constant 1 : index
    %549 = vector.load %arg7[%c0_438, %c1_439, %c1_440] : memref<3x18x18xf32, #tpu.memory_space<vmem>>, vector<1x16x16xf32>
    %550 = vector.shape_cast %549 : vector<1x16x16xf32> to vector<16x16xf32>
    %551 = vector.broadcast %548 : f32 to vector<16x16xf32>
    %552 = arith.mulf %551, %550 : vector<16x16xf32>
    %553 = arith.addf %547, %552 : vector<16x16xf32>
    %c3_441 = arith.constant 3 : index
    %c5_442 = arith.constant 5 : index
    %554 = memref.load %arg1[%c3_441, %c5_442] : memref<8x27xf32, #tpu.memory_space<smem>>
    %c0_443 = arith.constant 0 : index
    %c1_444 = arith.constant 1 : index
    %c2_445 = arith.constant 2 : index
    %555 = vector.load %arg7[%c0_443, %c1_444, %c2_445] : memref<3x18x18xf32, #tpu.memory_space<vmem>>, vector<1x16x16xf32>
    %556 = vector.shape_cast %555 : vector<1x16x16xf32> to vector<16x16xf32>
    %557 = vector.broadcast %554 : f32 to vector<16x16xf32>
    %558 = arith.mulf %557, %556 : vector<16x16xf32>
    %559 = arith.addf %553, %558 : vector<16x16xf32>
    %c3_446 = arith.constant 3 : index
    %c6_447 = arith.constant 6 : index
    %560 = memref.load %arg1[%c3_446, %c6_447] : memref<8x27xf32, #tpu.memory_space<smem>>
    %c0_448 = arith.constant 0 : index
    %c2_449 = arith.constant 2 : index
    %c0_450 = arith.constant 0 : index
    %561 = vector.load %arg7[%c0_448, %c2_449, %c0_450] : memref<3x18x18xf32, #tpu.memory_space<vmem>>, vector<1x16x16xf32>
    %562 = vector.shape_cast %561 : vector<1x16x16xf32> to vector<16x16xf32>
    %563 = vector.broadcast %560 : f32 to vector<16x16xf32>
    %564 = arith.mulf %563, %562 : vector<16x16xf32>
    %565 = arith.addf %559, %564 : vector<16x16xf32>
    %c3_451 = arith.constant 3 : index
    %c7_452 = arith.constant 7 : index
    %566 = memref.load %arg1[%c3_451, %c7_452] : memref<8x27xf32, #tpu.memory_space<smem>>
    %c0_453 = arith.constant 0 : index
    %c2_454 = arith.constant 2 : index
    %c1_455 = arith.constant 1 : index
    %567 = vector.load %arg7[%c0_453, %c2_454, %c1_455] : memref<3x18x18xf32, #tpu.memory_space<vmem>>, vector<1x16x16xf32>
    %568 = vector.shape_cast %567 : vector<1x16x16xf32> to vector<16x16xf32>
    %569 = vector.broadcast %566 : f32 to vector<16x16xf32>
    %570 = arith.mulf %569, %568 : vector<16x16xf32>
    %571 = arith.addf %565, %570 : vector<16x16xf32>
    %c3_456 = arith.constant 3 : index
    %c8_457 = arith.constant 8 : index
    %572 = memref.load %arg1[%c3_456, %c8_457] : memref<8x27xf32, #tpu.memory_space<smem>>
    %c0_458 = arith.constant 0 : index
    %c2_459 = arith.constant 2 : index
    %c2_460 = arith.constant 2 : index
    %573 = vector.load %arg7[%c0_458, %c2_459, %c2_460] : memref<3x18x18xf32, #tpu.memory_space<vmem>>, vector<1x16x16xf32>
    %574 = vector.shape_cast %573 : vector<1x16x16xf32> to vector<16x16xf32>
    %575 = vector.broadcast %572 : f32 to vector<16x16xf32>
    %576 = arith.mulf %575, %574 : vector<16x16xf32>
    %577 = arith.addf %571, %576 : vector<16x16xf32>
    %c3_461 = arith.constant 3 : index
    %c9_462 = arith.constant 9 : index
    %578 = memref.load %arg1[%c3_461, %c9_462] : memref<8x27xf32, #tpu.memory_space<smem>>
    %c1_463 = arith.constant 1 : index
    %c0_464 = arith.constant 0 : index
    %c0_465 = arith.constant 0 : index
    %579 = vector.load %arg7[%c1_463, %c0_464, %c0_465] : memref<3x18x18xf32, #tpu.memory_space<vmem>>, vector<1x16x16xf32>
    %580 = vector.shape_cast %579 : vector<1x16x16xf32> to vector<16x16xf32>
    %581 = vector.broadcast %578 : f32 to vector<16x16xf32>
    %582 = arith.mulf %581, %580 : vector<16x16xf32>
    %583 = arith.addf %577, %582 : vector<16x16xf32>
    %c3_466 = arith.constant 3 : index
    %c10_467 = arith.constant 10 : index
    %584 = memref.load %arg1[%c3_466, %c10_467] : memref<8x27xf32, #tpu.memory_space<smem>>
    %c1_468 = arith.constant 1 : index
    %c0_469 = arith.constant 0 : index
    %c1_470 = arith.constant 1 : index
    %585 = vector.load %arg7[%c1_468, %c0_469, %c1_470] : memref<3x18x18xf32, #tpu.memory_space<vmem>>, vector<1x16x16xf32>
    %586 = vector.shape_cast %585 : vector<1x16x16xf32> to vector<16x16xf32>
    %587 = vector.broadcast %584 : f32 to vector<16x16xf32>
    %588 = arith.mulf %587, %586 : vector<16x16xf32>
    %589 = arith.addf %583, %588 : vector<16x16xf32>
    %c3_471 = arith.constant 3 : index
    %c11_472 = arith.constant 11 : index
    %590 = memref.load %arg1[%c3_471, %c11_472] : memref<8x27xf32, #tpu.memory_space<smem>>
    %c1_473 = arith.constant 1 : index
    %c0_474 = arith.constant 0 : index
    %c2_475 = arith.constant 2 : index
    %591 = vector.load %arg7[%c1_473, %c0_474, %c2_475] : memref<3x18x18xf32, #tpu.memory_space<vmem>>, vector<1x16x16xf32>
    %592 = vector.shape_cast %591 : vector<1x16x16xf32> to vector<16x16xf32>
    %593 = vector.broadcast %590 : f32 to vector<16x16xf32>
    %594 = arith.mulf %593, %592 : vector<16x16xf32>
    %595 = arith.addf %589, %594 : vector<16x16xf32>
    %c3_476 = arith.constant 3 : index
    %c12_477 = arith.constant 12 : index
    %596 = memref.load %arg1[%c3_476, %c12_477] : memref<8x27xf32, #tpu.memory_space<smem>>
    %c1_478 = arith.constant 1 : index
    %c1_479 = arith.constant 1 : index
    %c0_480 = arith.constant 0 : index
    %597 = vector.load %arg7[%c1_478, %c1_479, %c0_480] : memref<3x18x18xf32, #tpu.memory_space<vmem>>, vector<1x16x16xf32>
    %598 = vector.shape_cast %597 : vector<1x16x16xf32> to vector<16x16xf32>
    %599 = vector.broadcast %596 : f32 to vector<16x16xf32>
    %600 = arith.mulf %599, %598 : vector<16x16xf32>
    %601 = arith.addf %595, %600 : vector<16x16xf32>
    %c3_481 = arith.constant 3 : index
    %c13_482 = arith.constant 13 : index
    %602 = memref.load %arg1[%c3_481, %c13_482] : memref<8x27xf32, #tpu.memory_space<smem>>
    %c1_483 = arith.constant 1 : index
    %c1_484 = arith.constant 1 : index
    %c1_485 = arith.constant 1 : index
    %603 = vector.load %arg7[%c1_483, %c1_484, %c1_485] : memref<3x18x18xf32, #tpu.memory_space<vmem>>, vector<1x16x16xf32>
    %604 = vector.shape_cast %603 : vector<1x16x16xf32> to vector<16x16xf32>
    %605 = vector.broadcast %602 : f32 to vector<16x16xf32>
    %606 = arith.mulf %605, %604 : vector<16x16xf32>
    %607 = arith.addf %601, %606 : vector<16x16xf32>
    %c3_486 = arith.constant 3 : index
    %c14_487 = arith.constant 14 : index
    %608 = memref.load %arg1[%c3_486, %c14_487] : memref<8x27xf32, #tpu.memory_space<smem>>
    %c1_488 = arith.constant 1 : index
    %c1_489 = arith.constant 1 : index
    %c2_490 = arith.constant 2 : index
    %609 = vector.load %arg7[%c1_488, %c1_489, %c2_490] : memref<3x18x18xf32, #tpu.memory_space<vmem>>, vector<1x16x16xf32>
    %610 = vector.shape_cast %609 : vector<1x16x16xf32> to vector<16x16xf32>
    %611 = vector.broadcast %608 : f32 to vector<16x16xf32>
    %612 = arith.mulf %611, %610 : vector<16x16xf32>
    %613 = arith.addf %607, %612 : vector<16x16xf32>
    %c3_491 = arith.constant 3 : index
    %c15_492 = arith.constant 15 : index
    %614 = memref.load %arg1[%c3_491, %c15_492] : memref<8x27xf32, #tpu.memory_space<smem>>
    %c1_493 = arith.constant 1 : index
    %c2_494 = arith.constant 2 : index
    %c0_495 = arith.constant 0 : index
    %615 = vector.load %arg7[%c1_493, %c2_494, %c0_495] : memref<3x18x18xf32, #tpu.memory_space<vmem>>, vector<1x16x16xf32>
    %616 = vector.shape_cast %615 : vector<1x16x16xf32> to vector<16x16xf32>
    %617 = vector.broadcast %614 : f32 to vector<16x16xf32>
    %618 = arith.mulf %617, %616 : vector<16x16xf32>
    %619 = arith.addf %613, %618 : vector<16x16xf32>
    %c3_496 = arith.constant 3 : index
    %c16_497 = arith.constant 16 : index
    %620 = memref.load %arg1[%c3_496, %c16_497] : memref<8x27xf32, #tpu.memory_space<smem>>
    %c1_498 = arith.constant 1 : index
    %c2_499 = arith.constant 2 : index
    %c1_500 = arith.constant 1 : index
    %621 = vector.load %arg7[%c1_498, %c2_499, %c1_500] : memref<3x18x18xf32, #tpu.memory_space<vmem>>, vector<1x16x16xf32>
    %622 = vector.shape_cast %621 : vector<1x16x16xf32> to vector<16x16xf32>
    %623 = vector.broadcast %620 : f32 to vector<16x16xf32>
    %624 = arith.mulf %623, %622 : vector<16x16xf32>
    %625 = arith.addf %619, %624 : vector<16x16xf32>
    %c3_501 = arith.constant 3 : index
    %c17_502 = arith.constant 17 : index
    %626 = memref.load %arg1[%c3_501, %c17_502] : memref<8x27xf32, #tpu.memory_space<smem>>
    %c1_503 = arith.constant 1 : index
    %c2_504 = arith.constant 2 : index
    %c2_505 = arith.constant 2 : index
    %627 = vector.load %arg7[%c1_503, %c2_504, %c2_505] : memref<3x18x18xf32, #tpu.memory_space<vmem>>, vector<1x16x16xf32>
    %628 = vector.shape_cast %627 : vector<1x16x16xf32> to vector<16x16xf32>
    %629 = vector.broadcast %626 : f32 to vector<16x16xf32>
    %630 = arith.mulf %629, %628 : vector<16x16xf32>
    %631 = arith.addf %625, %630 : vector<16x16xf32>
    %c3_506 = arith.constant 3 : index
    %c18_507 = arith.constant 18 : index
    %632 = memref.load %arg1[%c3_506, %c18_507] : memref<8x27xf32, #tpu.memory_space<smem>>
    %c2_508 = arith.constant 2 : index
    %c0_509 = arith.constant 0 : index
    %c0_510 = arith.constant 0 : index
    %633 = vector.load %arg7[%c2_508, %c0_509, %c0_510] : memref<3x18x18xf32, #tpu.memory_space<vmem>>, vector<1x16x16xf32>
    %634 = vector.shape_cast %633 : vector<1x16x16xf32> to vector<16x16xf32>
    %635 = vector.broadcast %632 : f32 to vector<16x16xf32>
    %636 = arith.mulf %635, %634 : vector<16x16xf32>
    %637 = arith.addf %631, %636 : vector<16x16xf32>
    %c3_511 = arith.constant 3 : index
    %c19_512 = arith.constant 19 : index
    %638 = memref.load %arg1[%c3_511, %c19_512] : memref<8x27xf32, #tpu.memory_space<smem>>
    %c2_513 = arith.constant 2 : index
    %c0_514 = arith.constant 0 : index
    %c1_515 = arith.constant 1 : index
    %639 = vector.load %arg7[%c2_513, %c0_514, %c1_515] : memref<3x18x18xf32, #tpu.memory_space<vmem>>, vector<1x16x16xf32>
    %640 = vector.shape_cast %639 : vector<1x16x16xf32> to vector<16x16xf32>
    %641 = vector.broadcast %638 : f32 to vector<16x16xf32>
    %642 = arith.mulf %641, %640 : vector<16x16xf32>
    %643 = arith.addf %637, %642 : vector<16x16xf32>
    %c3_516 = arith.constant 3 : index
    %c20_517 = arith.constant 20 : index
    %644 = memref.load %arg1[%c3_516, %c20_517] : memref<8x27xf32, #tpu.memory_space<smem>>
    %c2_518 = arith.constant 2 : index
    %c0_519 = arith.constant 0 : index
    %c2_520 = arith.constant 2 : index
    %645 = vector.load %arg7[%c2_518, %c0_519, %c2_520] : memref<3x18x18xf32, #tpu.memory_space<vmem>>, vector<1x16x16xf32>
    %646 = vector.shape_cast %645 : vector<1x16x16xf32> to vector<16x16xf32>
    %647 = vector.broadcast %644 : f32 to vector<16x16xf32>
    %648 = arith.mulf %647, %646 : vector<16x16xf32>
    %649 = arith.addf %643, %648 : vector<16x16xf32>
    %c3_521 = arith.constant 3 : index
    %c21_522 = arith.constant 21 : index
    %650 = memref.load %arg1[%c3_521, %c21_522] : memref<8x27xf32, #tpu.memory_space<smem>>
    %c2_523 = arith.constant 2 : index
    %c1_524 = arith.constant 1 : index
    %c0_525 = arith.constant 0 : index
    %651 = vector.load %arg7[%c2_523, %c1_524, %c0_525] : memref<3x18x18xf32, #tpu.memory_space<vmem>>, vector<1x16x16xf32>
    %652 = vector.shape_cast %651 : vector<1x16x16xf32> to vector<16x16xf32>
    %653 = vector.broadcast %650 : f32 to vector<16x16xf32>
    %654 = arith.mulf %653, %652 : vector<16x16xf32>
    %655 = arith.addf %649, %654 : vector<16x16xf32>
    %c3_526 = arith.constant 3 : index
    %c22_527 = arith.constant 22 : index
    %656 = memref.load %arg1[%c3_526, %c22_527] : memref<8x27xf32, #tpu.memory_space<smem>>
    %c2_528 = arith.constant 2 : index
    %c1_529 = arith.constant 1 : index
    %c1_530 = arith.constant 1 : index
    %657 = vector.load %arg7[%c2_528, %c1_529, %c1_530] : memref<3x18x18xf32, #tpu.memory_space<vmem>>, vector<1x16x16xf32>
    %658 = vector.shape_cast %657 : vector<1x16x16xf32> to vector<16x16xf32>
    %659 = vector.broadcast %656 : f32 to vector<16x16xf32>
    %660 = arith.mulf %659, %658 : vector<16x16xf32>
    %661 = arith.addf %655, %660 : vector<16x16xf32>
    %c3_531 = arith.constant 3 : index
    %c23_532 = arith.constant 23 : index
    %662 = memref.load %arg1[%c3_531, %c23_532] : memref<8x27xf32, #tpu.memory_space<smem>>
    %c2_533 = arith.constant 2 : index
    %c1_534 = arith.constant 1 : index
    %c2_535 = arith.constant 2 : index
    %663 = vector.load %arg7[%c2_533, %c1_534, %c2_535] : memref<3x18x18xf32, #tpu.memory_space<vmem>>, vector<1x16x16xf32>
    %664 = vector.shape_cast %663 : vector<1x16x16xf32> to vector<16x16xf32>
    %665 = vector.broadcast %662 : f32 to vector<16x16xf32>
    %666 = arith.mulf %665, %664 : vector<16x16xf32>
    %667 = arith.addf %661, %666 : vector<16x16xf32>
    %c3_536 = arith.constant 3 : index
    %c24_537 = arith.constant 24 : index
    %668 = memref.load %arg1[%c3_536, %c24_537] : memref<8x27xf32, #tpu.memory_space<smem>>
    %c2_538 = arith.constant 2 : index
    %c2_539 = arith.constant 2 : index
    %c0_540 = arith.constant 0 : index
    %669 = vector.load %arg7[%c2_538, %c2_539, %c0_540] : memref<3x18x18xf32, #tpu.memory_space<vmem>>, vector<1x16x16xf32>
    %670 = vector.shape_cast %669 : vector<1x16x16xf32> to vector<16x16xf32>
    %671 = vector.broadcast %668 : f32 to vector<16x16xf32>
    %672 = arith.mulf %671, %670 : vector<16x16xf32>
    %673 = arith.addf %667, %672 : vector<16x16xf32>
    %c3_541 = arith.constant 3 : index
    %c25_542 = arith.constant 25 : index
    %674 = memref.load %arg1[%c3_541, %c25_542] : memref<8x27xf32, #tpu.memory_space<smem>>
    %c2_543 = arith.constant 2 : index
    %c2_544 = arith.constant 2 : index
    %c1_545 = arith.constant 1 : index
    %675 = vector.load %arg7[%c2_543, %c2_544, %c1_545] : memref<3x18x18xf32, #tpu.memory_space<vmem>>, vector<1x16x16xf32>
    %676 = vector.shape_cast %675 : vector<1x16x16xf32> to vector<16x16xf32>
    %677 = vector.broadcast %674 : f32 to vector<16x16xf32>
    %678 = arith.mulf %677, %676 : vector<16x16xf32>
    %679 = arith.addf %673, %678 : vector<16x16xf32>
    %c3_546 = arith.constant 3 : index
    %c26_547 = arith.constant 26 : index
    %680 = memref.load %arg1[%c3_546, %c26_547] : memref<8x27xf32, #tpu.memory_space<smem>>
    %c2_548 = arith.constant 2 : index
    %c2_549 = arith.constant 2 : index
    %c2_550 = arith.constant 2 : index
    %681 = vector.load %arg7[%c2_548, %c2_549, %c2_550] : memref<3x18x18xf32, #tpu.memory_space<vmem>>, vector<1x16x16xf32>
    %682 = vector.shape_cast %681 : vector<1x16x16xf32> to vector<16x16xf32>
    %683 = vector.broadcast %680 : f32 to vector<16x16xf32>
    %684 = arith.mulf %683, %682 : vector<16x16xf32>
    %685 = arith.addf %679, %684 : vector<16x16xf32>
    %cst_551 = arith.constant 0.000000e+00 : f32
    %686 = vector.broadcast %cst_551 : f32 to vector<16x16xf32>
    %687 = arith.maximumf %685, %686 : vector<16x16xf32>
    %c3_552 = arith.constant 3 : index
    %c1_553 = arith.constant 1 : index
    %c1_554 = arith.constant 1 : index
    %688 = vector.load %arg8[%c3_552, %c1_553, %c1_554] : memref<8x18x18xf32, #tpu.memory_space<vmem>>, vector<1x16x16xf32>
    %689 = vector.shape_cast %688 : vector<1x16x16xf32> to vector<16x16xf32>
    %690 = vector.shape_cast %687 : vector<16x16xf32> to vector<1x16x16xf32>
    tpu.vector_store %arg8[%c3_552, %c1_553, %c1_554], %690 {strides = array<i32>} : memref<8x18x18xf32, #tpu.memory_space<vmem>>, vector<1x16x16xf32>,
    %cst_555 = arith.constant 0.000000e+00 : f32
    %691 = vector.broadcast %cst_555 : f32 to vector<16x16xf32>
    %c0_556 = arith.constant 0 : index
    %c4_557 = arith.constant 4 : index
    %692 = memref.load %arg2[%c0_556, %c4_557] : memref<1x8xf32, #tpu.memory_space<smem>>
    %693 = vector.broadcast %692 : f32 to vector<16x16xf32>
    %694 = arith.addf %691, %693 : vector<16x16xf32>
    %c4_558 = arith.constant 4 : index
    %c0_559 = arith.constant 0 : index
    %695 = memref.load %arg1[%c4_558, %c0_559] : memref<8x27xf32, #tpu.memory_space<smem>>
    %c0_560 = arith.constant 0 : index
    %c0_561 = arith.constant 0 : index
    %c0_562 = arith.constant 0 : index
    %696 = vector.load %arg7[%c0_560, %c0_561, %c0_562] : memref<3x18x18xf32, #tpu.memory_space<vmem>>, vector<1x16x16xf32>
    %697 = vector.shape_cast %696 : vector<1x16x16xf32> to vector<16x16xf32>
    %698 = vector.broadcast %695 : f32 to vector<16x16xf32>
    %699 = arith.mulf %698, %697 : vector<16x16xf32>
    %700 = arith.addf %694, %699 : vector<16x16xf32>
    %c4_563 = arith.constant 4 : index
    %c1_564 = arith.constant 1 : index
    %701 = memref.load %arg1[%c4_563, %c1_564] : memref<8x27xf32, #tpu.memory_space<smem>>
    %c0_565 = arith.constant 0 : index
    %c0_566 = arith.constant 0 : index
    %c1_567 = arith.constant 1 : index
    %702 = vector.load %arg7[%c0_565, %c0_566, %c1_567] : memref<3x18x18xf32, #tpu.memory_space<vmem>>, vector<1x16x16xf32>
    %703 = vector.shape_cast %702 : vector<1x16x16xf32> to vector<16x16xf32>
    %704 = vector.broadcast %701 : f32 to vector<16x16xf32>
    %705 = arith.mulf %704, %703 : vector<16x16xf32>
    %706 = arith.addf %700, %705 : vector<16x16xf32>
    %c4_568 = arith.constant 4 : index
    %c2_569 = arith.constant 2 : index
    %707 = memref.load %arg1[%c4_568, %c2_569] : memref<8x27xf32, #tpu.memory_space<smem>>
    %c0_570 = arith.constant 0 : index
    %c0_571 = arith.constant 0 : index
    %c2_572 = arith.constant 2 : index
    %708 = vector.load %arg7[%c0_570, %c0_571, %c2_572] : memref<3x18x18xf32, #tpu.memory_space<vmem>>, vector<1x16x16xf32>
    %709 = vector.shape_cast %708 : vector<1x16x16xf32> to vector<16x16xf32>
    %710 = vector.broadcast %707 : f32 to vector<16x16xf32>
    %711 = arith.mulf %710, %709 : vector<16x16xf32>
    %712 = arith.addf %706, %711 : vector<16x16xf32>
    %c4_573 = arith.constant 4 : index
    %c3_574 = arith.constant 3 : index
    %713 = memref.load %arg1[%c4_573, %c3_574] : memref<8x27xf32, #tpu.memory_space<smem>>
    %c0_575 = arith.constant 0 : index
    %c1_576 = arith.constant 1 : index
    %c0_577 = arith.constant 0 : index
    %714 = vector.load %arg7[%c0_575, %c1_576, %c0_577] : memref<3x18x18xf32, #tpu.memory_space<vmem>>, vector<1x16x16xf32>
    %715 = vector.shape_cast %714 : vector<1x16x16xf32> to vector<16x16xf32>
    %716 = vector.broadcast %713 : f32 to vector<16x16xf32>
    %717 = arith.mulf %716, %715 : vector<16x16xf32>
    %718 = arith.addf %712, %717 : vector<16x16xf32>
    %c4_578 = arith.constant 4 : index
    %c4_579 = arith.constant 4 : index
    %719 = memref.load %arg1[%c4_578, %c4_579] : memref<8x27xf32, #tpu.memory_space<smem>>
    %c0_580 = arith.constant 0 : index
    %c1_581 = arith.constant 1 : index
    %c1_582 = arith.constant 1 : index
    %720 = vector.load %arg7[%c0_580, %c1_581, %c1_582] : memref<3x18x18xf32, #tpu.memory_space<vmem>>, vector<1x16x16xf32>
    %721 = vector.shape_cast %720 : vector<1x16x16xf32> to vector<16x16xf32>
    %722 = vector.broadcast %719 : f32 to vector<16x16xf32>
    %723 = arith.mulf %722, %721 : vector<16x16xf32>
    %724 = arith.addf %718, %723 : vector<16x16xf32>
    %c4_583 = arith.constant 4 : index
    %c5_584 = arith.constant 5 : index
    %725 = memref.load %arg1[%c4_583, %c5_584] : memref<8x27xf32, #tpu.memory_space<smem>>
    %c0_585 = arith.constant 0 : index
    %c1_586 = arith.constant 1 : index
    %c2_587 = arith.constant 2 : index
    %726 = vector.load %arg7[%c0_585, %c1_586, %c2_587] : memref<3x18x18xf32, #tpu.memory_space<vmem>>, vector<1x16x16xf32>
    %727 = vector.shape_cast %726 : vector<1x16x16xf32> to vector<16x16xf32>
    %728 = vector.broadcast %725 : f32 to vector<16x16xf32>
    %729 = arith.mulf %728, %727 : vector<16x16xf32>
    %730 = arith.addf %724, %729 : vector<16x16xf32>
    %c4_588 = arith.constant 4 : index
    %c6_589 = arith.constant 6 : index
    %731 = memref.load %arg1[%c4_588, %c6_589] : memref<8x27xf32, #tpu.memory_space<smem>>
    %c0_590 = arith.constant 0 : index
    %c2_591 = arith.constant 2 : index
    %c0_592 = arith.constant 0 : index
    %732 = vector.load %arg7[%c0_590, %c2_591, %c0_592] : memref<3x18x18xf32, #tpu.memory_space<vmem>>, vector<1x16x16xf32>
    %733 = vector.shape_cast %732 : vector<1x16x16xf32> to vector<16x16xf32>
    %734 = vector.broadcast %731 : f32 to vector<16x16xf32>
    %735 = arith.mulf %734, %733 : vector<16x16xf32>
    %736 = arith.addf %730, %735 : vector<16x16xf32>
    %c4_593 = arith.constant 4 : index
    %c7_594 = arith.constant 7 : index
    %737 = memref.load %arg1[%c4_593, %c7_594] : memref<8x27xf32, #tpu.memory_space<smem>>
    %c0_595 = arith.constant 0 : index
    %c2_596 = arith.constant 2 : index
    %c1_597 = arith.constant 1 : index
    %738 = vector.load %arg7[%c0_595, %c2_596, %c1_597] : memref<3x18x18xf32, #tpu.memory_space<vmem>>, vector<1x16x16xf32>
    %739 = vector.shape_cast %738 : vector<1x16x16xf32> to vector<16x16xf32>
    %740 = vector.broadcast %737 : f32 to vector<16x16xf32>
    %741 = arith.mulf %740, %739 : vector<16x16xf32>
    %742 = arith.addf %736, %741 : vector<16x16xf32>
    %c4_598 = arith.constant 4 : index
    %c8_599 = arith.constant 8 : index
    %743 = memref.load %arg1[%c4_598, %c8_599] : memref<8x27xf32, #tpu.memory_space<smem>>
    %c0_600 = arith.constant 0 : index
    %c2_601 = arith.constant 2 : index
    %c2_602 = arith.constant 2 : index
    %744 = vector.load %arg7[%c0_600, %c2_601, %c2_602] : memref<3x18x18xf32, #tpu.memory_space<vmem>>, vector<1x16x16xf32>
    %745 = vector.shape_cast %744 : vector<1x16x16xf32> to vector<16x16xf32>
    %746 = vector.broadcast %743 : f32 to vector<16x16xf32>
    %747 = arith.mulf %746, %745 : vector<16x16xf32>
    %748 = arith.addf %742, %747 : vector<16x16xf32>
    %c4_603 = arith.constant 4 : index
    %c9_604 = arith.constant 9 : index
    %749 = memref.load %arg1[%c4_603, %c9_604] : memref<8x27xf32, #tpu.memory_space<smem>>
    %c1_605 = arith.constant 1 : index
    %c0_606 = arith.constant 0 : index
    %c0_607 = arith.constant 0 : index
    %750 = vector.load %arg7[%c1_605, %c0_606, %c0_607] : memref<3x18x18xf32, #tpu.memory_space<vmem>>, vector<1x16x16xf32>
    %751 = vector.shape_cast %750 : vector<1x16x16xf32> to vector<16x16xf32>
    %752 = vector.broadcast %749 : f32 to vector<16x16xf32>
    %753 = arith.mulf %752, %751 : vector<16x16xf32>
    %754 = arith.addf %748, %753 : vector<16x16xf32>
    %c4_608 = arith.constant 4 : index
    %c10_609 = arith.constant 10 : index
    %755 = memref.load %arg1[%c4_608, %c10_609] : memref<8x27xf32, #tpu.memory_space<smem>>
    %c1_610 = arith.constant 1 : index
    %c0_611 = arith.constant 0 : index
    %c1_612 = arith.constant 1 : index
    %756 = vector.load %arg7[%c1_610, %c0_611, %c1_612] : memref<3x18x18xf32, #tpu.memory_space<vmem>>, vector<1x16x16xf32>
    %757 = vector.shape_cast %756 : vector<1x16x16xf32> to vector<16x16xf32>
    %758 = vector.broadcast %755 : f32 to vector<16x16xf32>
    %759 = arith.mulf %758, %757 : vector<16x16xf32>
    %760 = arith.addf %754, %759 : vector<16x16xf32>
    %c4_613 = arith.constant 4 : index
    %c11_614 = arith.constant 11 : index
    %761 = memref.load %arg1[%c4_613, %c11_614] : memref<8x27xf32, #tpu.memory_space<smem>>
    %c1_615 = arith.constant 1 : index
    %c0_616 = arith.constant 0 : index
    %c2_617 = arith.constant 2 : index
    %762 = vector.load %arg7[%c1_615, %c0_616, %c2_617] : memref<3x18x18xf32, #tpu.memory_space<vmem>>, vector<1x16x16xf32>
    %763 = vector.shape_cast %762 : vector<1x16x16xf32> to vector<16x16xf32>
    %764 = vector.broadcast %761 : f32 to vector<16x16xf32>
    %765 = arith.mulf %764, %763 : vector<16x16xf32>
    %766 = arith.addf %760, %765 : vector<16x16xf32>
    %c4_618 = arith.constant 4 : index
    %c12_619 = arith.constant 12 : index
    %767 = memref.load %arg1[%c4_618, %c12_619] : memref<8x27xf32, #tpu.memory_space<smem>>
    %c1_620 = arith.constant 1 : index
    %c1_621 = arith.constant 1 : index
    %c0_622 = arith.constant 0 : index
    %768 = vector.load %arg7[%c1_620, %c1_621, %c0_622] : memref<3x18x18xf32, #tpu.memory_space<vmem>>, vector<1x16x16xf32>
    %769 = vector.shape_cast %768 : vector<1x16x16xf32> to vector<16x16xf32>
    %770 = vector.broadcast %767 : f32 to vector<16x16xf32>
    %771 = arith.mulf %770, %769 : vector<16x16xf32>
    %772 = arith.addf %766, %771 : vector<16x16xf32>
    %c4_623 = arith.constant 4 : index
    %c13_624 = arith.constant 13 : index
    %773 = memref.load %arg1[%c4_623, %c13_624] : memref<8x27xf32, #tpu.memory_space<smem>>
    %c1_625 = arith.constant 1 : index
    %c1_626 = arith.constant 1 : index
    %c1_627 = arith.constant 1 : index
    %774 = vector.load %arg7[%c1_625, %c1_626, %c1_627] : memref<3x18x18xf32, #tpu.memory_space<vmem>>, vector<1x16x16xf32>
    %775 = vector.shape_cast %774 : vector<1x16x16xf32> to vector<16x16xf32>
    %776 = vector.broadcast %773 : f32 to vector<16x16xf32>
    %777 = arith.mulf %776, %775 : vector<16x16xf32>
    %778 = arith.addf %772, %777 : vector<16x16xf32>
    %c4_628 = arith.constant 4 : index
    %c14_629 = arith.constant 14 : index
    %779 = memref.load %arg1[%c4_628, %c14_629] : memref<8x27xf32, #tpu.memory_space<smem>>
    %c1_630 = arith.constant 1 : index
    %c1_631 = arith.constant 1 : index
    %c2_632 = arith.constant 2 : index
    %780 = vector.load %arg7[%c1_630, %c1_631, %c2_632] : memref<3x18x18xf32, #tpu.memory_space<vmem>>, vector<1x16x16xf32>
    %781 = vector.shape_cast %780 : vector<1x16x16xf32> to vector<16x16xf32>
    %782 = vector.broadcast %779 : f32 to vector<16x16xf32>
    %783 = arith.mulf %782, %781 : vector<16x16xf32>
    %784 = arith.addf %778, %783 : vector<16x16xf32>
    %c4_633 = arith.constant 4 : index
    %c15_634 = arith.constant 15 : index
    %785 = memref.load %arg1[%c4_633, %c15_634] : memref<8x27xf32, #tpu.memory_space<smem>>
    %c1_635 = arith.constant 1 : index
    %c2_636 = arith.constant 2 : index
    %c0_637 = arith.constant 0 : index
    %786 = vector.load %arg7[%c1_635, %c2_636, %c0_637] : memref<3x18x18xf32, #tpu.memory_space<vmem>>, vector<1x16x16xf32>
    %787 = vector.shape_cast %786 : vector<1x16x16xf32> to vector<16x16xf32>
    %788 = vector.broadcast %785 : f32 to vector<16x16xf32>
    %789 = arith.mulf %788, %787 : vector<16x16xf32>
    %790 = arith.addf %784, %789 : vector<16x16xf32>
    %c4_638 = arith.constant 4 : index
    %c16_639 = arith.constant 16 : index
    %791 = memref.load %arg1[%c4_638, %c16_639] : memref<8x27xf32, #tpu.memory_space<smem>>
    %c1_640 = arith.constant 1 : index
    %c2_641 = arith.constant 2 : index
    %c1_642 = arith.constant 1 : index
    %792 = vector.load %arg7[%c1_640, %c2_641, %c1_642] : memref<3x18x18xf32, #tpu.memory_space<vmem>>, vector<1x16x16xf32>
    %793 = vector.shape_cast %792 : vector<1x16x16xf32> to vector<16x16xf32>
    %794 = vector.broadcast %791 : f32 to vector<16x16xf32>
    %795 = arith.mulf %794, %793 : vector<16x16xf32>
    %796 = arith.addf %790, %795 : vector<16x16xf32>
    %c4_643 = arith.constant 4 : index
    %c17_644 = arith.constant 17 : index
    %797 = memref.load %arg1[%c4_643, %c17_644] : memref<8x27xf32, #tpu.memory_space<smem>>
    %c1_645 = arith.constant 1 : index
    %c2_646 = arith.constant 2 : index
    %c2_647 = arith.constant 2 : index
    %798 = vector.load %arg7[%c1_645, %c2_646, %c2_647] : memref<3x18x18xf32, #tpu.memory_space<vmem>>, vector<1x16x16xf32>
    %799 = vector.shape_cast %798 : vector<1x16x16xf32> to vector<16x16xf32>
    %800 = vector.broadcast %797 : f32 to vector<16x16xf32>
    %801 = arith.mulf %800, %799 : vector<16x16xf32>
    %802 = arith.addf %796, %801 : vector<16x16xf32>
    %c4_648 = arith.constant 4 : index
    %c18_649 = arith.constant 18 : index
    %803 = memref.load %arg1[%c4_648, %c18_649] : memref<8x27xf32, #tpu.memory_space<smem>>
    %c2_650 = arith.constant 2 : index
    %c0_651 = arith.constant 0 : index
    %c0_652 = arith.constant 0 : index
    %804 = vector.load %arg7[%c2_650, %c0_651, %c0_652] : memref<3x18x18xf32, #tpu.memory_space<vmem>>, vector<1x16x16xf32>
    %805 = vector.shape_cast %804 : vector<1x16x16xf32> to vector<16x16xf32>
    %806 = vector.broadcast %803 : f32 to vector<16x16xf32>
    %807 = arith.mulf %806, %805 : vector<16x16xf32>
    %808 = arith.addf %802, %807 : vector<16x16xf32>
    %c4_653 = arith.constant 4 : index
    %c19_654 = arith.constant 19 : index
    %809 = memref.load %arg1[%c4_653, %c19_654] : memref<8x27xf32, #tpu.memory_space<smem>>
    %c2_655 = arith.constant 2 : index
    %c0_656 = arith.constant 0 : index
    %c1_657 = arith.constant 1 : index
    %810 = vector.load %arg7[%c2_655, %c0_656, %c1_657] : memref<3x18x18xf32, #tpu.memory_space<vmem>>, vector<1x16x16xf32>
    %811 = vector.shape_cast %810 : vector<1x16x16xf32> to vector<16x16xf32>
    %812 = vector.broadcast %809 : f32 to vector<16x16xf32>
    %813 = arith.mulf %812, %811 : vector<16x16xf32>
    %814 = arith.addf %808, %813 : vector<16x16xf32>
    %c4_658 = arith.constant 4 : index
    %c20_659 = arith.constant 20 : index
    %815 = memref.load %arg1[%c4_658, %c20_659] : memref<8x27xf32, #tpu.memory_space<smem>>
    %c2_660 = arith.constant 2 : index
    %c0_661 = arith.constant 0 : index
    %c2_662 = arith.constant 2 : index
    %816 = vector.load %arg7[%c2_660, %c0_661, %c2_662] : memref<3x18x18xf32, #tpu.memory_space<vmem>>, vector<1x16x16xf32>
    %817 = vector.shape_cast %816 : vector<1x16x16xf32> to vector<16x16xf32>
    %818 = vector.broadcast %815 : f32 to vector<16x16xf32>
    %819 = arith.mulf %818, %817 : vector<16x16xf32>
    %820 = arith.addf %814, %819 : vector<16x16xf32>
    %c4_663 = arith.constant 4 : index
    %c21_664 = arith.constant 21 : index
    %821 = memref.load %arg1[%c4_663, %c21_664] : memref<8x27xf32, #tpu.memory_space<smem>>
    %c2_665 = arith.constant 2 : index
    %c1_666 = arith.constant 1 : index
    %c0_667 = arith.constant 0 : index
    %822 = vector.load %arg7[%c2_665, %c1_666, %c0_667] : memref<3x18x18xf32, #tpu.memory_space<vmem>>, vector<1x16x16xf32>
    %823 = vector.shape_cast %822 : vector<1x16x16xf32> to vector<16x16xf32>
    %824 = vector.broadcast %821 : f32 to vector<16x16xf32>
    %825 = arith.mulf %824, %823 : vector<16x16xf32>
    %826 = arith.addf %820, %825 : vector<16x16xf32>
    %c4_668 = arith.constant 4 : index
    %c22_669 = arith.constant 22 : index
    %827 = memref.load %arg1[%c4_668, %c22_669] : memref<8x27xf32, #tpu.memory_space<smem>>
    %c2_670 = arith.constant 2 : index
    %c1_671 = arith.constant 1 : index
    %c1_672 = arith.constant 1 : index
    %828 = vector.load %arg7[%c2_670, %c1_671, %c1_672] : memref<3x18x18xf32, #tpu.memory_space<vmem>>, vector<1x16x16xf32>
    %829 = vector.shape_cast %828 : vector<1x16x16xf32> to vector<16x16xf32>
    %830 = vector.broadcast %827 : f32 to vector<16x16xf32>
    %831 = arith.mulf %830, %829 : vector<16x16xf32>
    %832 = arith.addf %826, %831 : vector<16x16xf32>
    %c4_673 = arith.constant 4 : index
    %c23_674 = arith.constant 23 : index
    %833 = memref.load %arg1[%c4_673, %c23_674] : memref<8x27xf32, #tpu.memory_space<smem>>
    %c2_675 = arith.constant 2 : index
    %c1_676 = arith.constant 1 : index
    %c2_677 = arith.constant 2 : index
    %834 = vector.load %arg7[%c2_675, %c1_676, %c2_677] : memref<3x18x18xf32, #tpu.memory_space<vmem>>, vector<1x16x16xf32>
    %835 = vector.shape_cast %834 : vector<1x16x16xf32> to vector<16x16xf32>
    %836 = vector.broadcast %833 : f32 to vector<16x16xf32>
    %837 = arith.mulf %836, %835 : vector<16x16xf32>
    %838 = arith.addf %832, %837 : vector<16x16xf32>
    %c4_678 = arith.constant 4 : index
    %c24_679 = arith.constant 24 : index
    %839 = memref.load %arg1[%c4_678, %c24_679] : memref<8x27xf32, #tpu.memory_space<smem>>
    %c2_680 = arith.constant 2 : index
    %c2_681 = arith.constant 2 : index
    %c0_682 = arith.constant 0 : index
    %840 = vector.load %arg7[%c2_680, %c2_681, %c0_682] : memref<3x18x18xf32, #tpu.memory_space<vmem>>, vector<1x16x16xf32>
    %841 = vector.shape_cast %840 : vector<1x16x16xf32> to vector<16x16xf32>
    %842 = vector.broadcast %839 : f32 to vector<16x16xf32>
    %843 = arith.mulf %842, %841 : vector<16x16xf32>
    %844 = arith.addf %838, %843 : vector<16x16xf32>
    %c4_683 = arith.constant 4 : index
    %c25_684 = arith.constant 25 : index
    %845 = memref.load %arg1[%c4_683, %c25_684] : memref<8x27xf32, #tpu.memory_space<smem>>
    %c2_685 = arith.constant 2 : index
    %c2_686 = arith.constant 2 : index
    %c1_687 = arith.constant 1 : index
    %846 = vector.load %arg7[%c2_685, %c2_686, %c1_687] : memref<3x18x18xf32, #tpu.memory_space<vmem>>, vector<1x16x16xf32>
    %847 = vector.shape_cast %846 : vector<1x16x16xf32> to vector<16x16xf32>
    %848 = vector.broadcast %845 : f32 to vector<16x16xf32>
    %849 = arith.mulf %848, %847 : vector<16x16xf32>
    %850 = arith.addf %844, %849 : vector<16x16xf32>
    %c4_688 = arith.constant 4 : index
    %c26_689 = arith.constant 26 : index
    %851 = memref.load %arg1[%c4_688, %c26_689] : memref<8x27xf32, #tpu.memory_space<smem>>
    %c2_690 = arith.constant 2 : index
    %c2_691 = arith.constant 2 : index
    %c2_692 = arith.constant 2 : index
    %852 = vector.load %arg7[%c2_690, %c2_691, %c2_692] : memref<3x18x18xf32, #tpu.memory_space<vmem>>, vector<1x16x16xf32>
    %853 = vector.shape_cast %852 : vector<1x16x16xf32> to vector<16x16xf32>
    %854 = vector.broadcast %851 : f32 to vector<16x16xf32>
    %855 = arith.mulf %854, %853 : vector<16x16xf32>
    %856 = arith.addf %850, %855 : vector<16x16xf32>
    %cst_693 = arith.constant 0.000000e+00 : f32
    %857 = vector.broadcast %cst_693 : f32 to vector<16x16xf32>
    %858 = arith.maximumf %856, %857 : vector<16x16xf32>
    %c4_694 = arith.constant 4 : index
    %c1_695 = arith.constant 1 : index
    %c1_696 = arith.constant 1 : index
    %859 = vector.load %arg8[%c4_694, %c1_695, %c1_696] : memref<8x18x18xf32, #tpu.memory_space<vmem>>, vector<1x16x16xf32>
    %860 = vector.shape_cast %859 : vector<1x16x16xf32> to vector<16x16xf32>
    %861 = vector.shape_cast %858 : vector<16x16xf32> to vector<1x16x16xf32>
    tpu.vector_store %arg8[%c4_694, %c1_695, %c1_696], %861 {strides = array<i32>} : memref<8x18x18xf32, #tpu.memory_space<vmem>>, vector<1x16x16xf32>,
    %cst_697 = arith.constant 0.000000e+00 : f32
    %862 = vector.broadcast %cst_697 : f32 to vector<16x16xf32>
    %c0_698 = arith.constant 0 : index
    %c5_699 = arith.constant 5 : index
    %863 = memref.load %arg2[%c0_698, %c5_699] : memref<1x8xf32, #tpu.memory_space<smem>>
    %864 = vector.broadcast %863 : f32 to vector<16x16xf32>
    %865 = arith.addf %862, %864 : vector<16x16xf32>
    %c5_700 = arith.constant 5 : index
    %c0_701 = arith.constant 0 : index
    %866 = memref.load %arg1[%c5_700, %c0_701] : memref<8x27xf32, #tpu.memory_space<smem>>
    %c0_702 = arith.constant 0 : index
    %c0_703 = arith.constant 0 : index
    %c0_704 = arith.constant 0 : index
    %867 = vector.load %arg7[%c0_702, %c0_703, %c0_704] : memref<3x18x18xf32, #tpu.memory_space<vmem>>, vector<1x16x16xf32>
    %868 = vector.shape_cast %867 : vector<1x16x16xf32> to vector<16x16xf32>
    %869 = vector.broadcast %866 : f32 to vector<16x16xf32>
    %870 = arith.mulf %869, %868 : vector<16x16xf32>
    %871 = arith.addf %865, %870 : vector<16x16xf32>
    %c5_705 = arith.constant 5 : index
    %c1_706 = arith.constant 1 : index
    %872 = memref.load %arg1[%c5_705, %c1_706] : memref<8x27xf32, #tpu.memory_space<smem>>
    %c0_707 = arith.constant 0 : index
    %c0_708 = arith.constant 0 : index
    %c1_709 = arith.constant 1 : index
    %873 = vector.load %arg7[%c0_707, %c0_708, %c1_709] : memref<3x18x18xf32, #tpu.memory_space<vmem>>, vector<1x16x16xf32>
    %874 = vector.shape_cast %873 : vector<1x16x16xf32> to vector<16x16xf32>
    %875 = vector.broadcast %872 : f32 to vector<16x16xf32>
    %876 = arith.mulf %875, %874 : vector<16x16xf32>
    %877 = arith.addf %871, %876 : vector<16x16xf32>
    %c5_710 = arith.constant 5 : index
    %c2_711 = arith.constant 2 : index
    %878 = memref.load %arg1[%c5_710, %c2_711] : memref<8x27xf32, #tpu.memory_space<smem>>
    %c0_712 = arith.constant 0 : index
    %c0_713 = arith.constant 0 : index
    %c2_714 = arith.constant 2 : index
    %879 = vector.load %arg7[%c0_712, %c0_713, %c2_714] : memref<3x18x18xf32, #tpu.memory_space<vmem>>, vector<1x16x16xf32>
    %880 = vector.shape_cast %879 : vector<1x16x16xf32> to vector<16x16xf32>
    %881 = vector.broadcast %878 : f32 to vector<16x16xf32>
    %882 = arith.mulf %881, %880 : vector<16x16xf32>
    %883 = arith.addf %877, %882 : vector<16x16xf32>
    %c5_715 = arith.constant 5 : index
    %c3_716 = arith.constant 3 : index
    %884 = memref.load %arg1[%c5_715, %c3_716] : memref<8x27xf32, #tpu.memory_space<smem>>
    %c0_717 = arith.constant 0 : index
    %c1_718 = arith.constant 1 : index
    %c0_719 = arith.constant 0 : index
    %885 = vector.load %arg7[%c0_717, %c1_718, %c0_719] : memref<3x18x18xf32, #tpu.memory_space<vmem>>, vector<1x16x16xf32>
    %886 = vector.shape_cast %885 : vector<1x16x16xf32> to vector<16x16xf32>
    %887 = vector.broadcast %884 : f32 to vector<16x16xf32>
    %888 = arith.mulf %887, %886 : vector<16x16xf32>
    %889 = arith.addf %883, %888 : vector<16x16xf32>
    %c5_720 = arith.constant 5 : index
    %c4_721 = arith.constant 4 : index
    %890 = memref.load %arg1[%c5_720, %c4_721] : memref<8x27xf32, #tpu.memory_space<smem>>
    %c0_722 = arith.constant 0 : index
    %c1_723 = arith.constant 1 : index
    %c1_724 = arith.constant 1 : index
    %891 = vector.load %arg7[%c0_722, %c1_723, %c1_724] : memref<3x18x18xf32, #tpu.memory_space<vmem>>, vector<1x16x16xf32>
    %892 = vector.shape_cast %891 : vector<1x16x16xf32> to vector<16x16xf32>
    %893 = vector.broadcast %890 : f32 to vector<16x16xf32>
    %894 = arith.mulf %893, %892 : vector<16x16xf32>
    %895 = arith.addf %889, %894 : vector<16x16xf32>
    %c5_725 = arith.constant 5 : index
    %c5_726 = arith.constant 5 : index
    %896 = memref.load %arg1[%c5_725, %c5_726] : memref<8x27xf32, #tpu.memory_space<smem>>
    %c0_727 = arith.constant 0 : index
    %c1_728 = arith.constant 1 : index
    %c2_729 = arith.constant 2 : index
    %897 = vector.load %arg7[%c0_727, %c1_728, %c2_729] : memref<3x18x18xf32, #tpu.memory_space<vmem>>, vector<1x16x16xf32>
    %898 = vector.shape_cast %897 : vector<1x16x16xf32> to vector<16x16xf32>
    %899 = vector.broadcast %896 : f32 to vector<16x16xf32>
    %900 = arith.mulf %899, %898 : vector<16x16xf32>
    %901 = arith.addf %895, %900 : vector<16x16xf32>
    %c5_730 = arith.constant 5 : index
    %c6_731 = arith.constant 6 : index
    %902 = memref.load %arg1[%c5_730, %c6_731] : memref<8x27xf32, #tpu.memory_space<smem>>
    %c0_732 = arith.constant 0 : index
    %c2_733 = arith.constant 2 : index
    %c0_734 = arith.constant 0 : index
    %903 = vector.load %arg7[%c0_732, %c2_733, %c0_734] : memref<3x18x18xf32, #tpu.memory_space<vmem>>, vector<1x16x16xf32>
    %904 = vector.shape_cast %903 : vector<1x16x16xf32> to vector<16x16xf32>
    %905 = vector.broadcast %902 : f32 to vector<16x16xf32>
    %906 = arith.mulf %905, %904 : vector<16x16xf32>
    %907 = arith.addf %901, %906 : vector<16x16xf32>
    %c5_735 = arith.constant 5 : index
    %c7_736 = arith.constant 7 : index
    %908 = memref.load %arg1[%c5_735, %c7_736] : memref<8x27xf32, #tpu.memory_space<smem>>
    %c0_737 = arith.constant 0 : index
    %c2_738 = arith.constant 2 : index
    %c1_739 = arith.constant 1 : index
    %909 = vector.load %arg7[%c0_737, %c2_738, %c1_739] : memref<3x18x18xf32, #tpu.memory_space<vmem>>, vector<1x16x16xf32>
    %910 = vector.shape_cast %909 : vector<1x16x16xf32> to vector<16x16xf32>
    %911 = vector.broadcast %908 : f32 to vector<16x16xf32>
    %912 = arith.mulf %911, %910 : vector<16x16xf32>
    %913 = arith.addf %907, %912 : vector<16x16xf32>
    %c5_740 = arith.constant 5 : index
    %c8_741 = arith.constant 8 : index
    %914 = memref.load %arg1[%c5_740, %c8_741] : memref<8x27xf32, #tpu.memory_space<smem>>
    %c0_742 = arith.constant 0 : index
    %c2_743 = arith.constant 2 : index
    %c2_744 = arith.constant 2 : index
    %915 = vector.load %arg7[%c0_742, %c2_743, %c2_744] : memref<3x18x18xf32, #tpu.memory_space<vmem>>, vector<1x16x16xf32>
    %916 = vector.shape_cast %915 : vector<1x16x16xf32> to vector<16x16xf32>
    %917 = vector.broadcast %914 : f32 to vector<16x16xf32>
    %918 = arith.mulf %917, %916 : vector<16x16xf32>
    %919 = arith.addf %913, %918 : vector<16x16xf32>
    %c5_745 = arith.constant 5 : index
    %c9_746 = arith.constant 9 : index
    %920 = memref.load %arg1[%c5_745, %c9_746] : memref<8x27xf32, #tpu.memory_space<smem>>
    %c1_747 = arith.constant 1 : index
    %c0_748 = arith.constant 0 : index
    %c0_749 = arith.constant 0 : index
    %921 = vector.load %arg7[%c1_747, %c0_748, %c0_749] : memref<3x18x18xf32, #tpu.memory_space<vmem>>, vector<1x16x16xf32>
    %922 = vector.shape_cast %921 : vector<1x16x16xf32> to vector<16x16xf32>
    %923 = vector.broadcast %920 : f32 to vector<16x16xf32>
    %924 = arith.mulf %923, %922 : vector<16x16xf32>
    %925 = arith.addf %919, %924 : vector<16x16xf32>
    %c5_750 = arith.constant 5 : index
    %c10_751 = arith.constant 10 : index
    %926 = memref.load %arg1[%c5_750, %c10_751] : memref<8x27xf32, #tpu.memory_space<smem>>
    %c1_752 = arith.constant 1 : index
    %c0_753 = arith.constant 0 : index
    %c1_754 = arith.constant 1 : index
    %927 = vector.load %arg7[%c1_752, %c0_753, %c1_754] : memref<3x18x18xf32, #tpu.memory_space<vmem>>, vector<1x16x16xf32>
    %928 = vector.shape_cast %927 : vector<1x16x16xf32> to vector<16x16xf32>
    %929 = vector.broadcast %926 : f32 to vector<16x16xf32>
    %930 = arith.mulf %929, %928 : vector<16x16xf32>
    %931 = arith.addf %925, %930 : vector<16x16xf32>
    %c5_755 = arith.constant 5 : index
    %c11_756 = arith.constant 11 : index
    %932 = memref.load %arg1[%c5_755, %c11_756] : memref<8x27xf32, #tpu.memory_space<smem>>
    %c1_757 = arith.constant 1 : index
    %c0_758 = arith.constant 0 : index
    %c2_759 = arith.constant 2 : index
    %933 = vector.load %arg7[%c1_757, %c0_758, %c2_759] : memref<3x18x18xf32, #tpu.memory_space<vmem>>, vector<1x16x16xf32>
    %934 = vector.shape_cast %933 : vector<1x16x16xf32> to vector<16x16xf32>
    %935 = vector.broadcast %932 : f32 to vector<16x16xf32>
    %936 = arith.mulf %935, %934 : vector<16x16xf32>
    %937 = arith.addf %931, %936 : vector<16x16xf32>
    %c5_760 = arith.constant 5 : index
    %c12_761 = arith.constant 12 : index
    %938 = memref.load %arg1[%c5_760, %c12_761] : memref<8x27xf32, #tpu.memory_space<smem>>
    %c1_762 = arith.constant 1 : index
    %c1_763 = arith.constant 1 : index
    %c0_764 = arith.constant 0 : index
    %939 = vector.load %arg7[%c1_762, %c1_763, %c0_764] : memref<3x18x18xf32, #tpu.memory_space<vmem>>, vector<1x16x16xf32>
    %940 = vector.shape_cast %939 : vector<1x16x16xf32> to vector<16x16xf32>
    %941 = vector.broadcast %938 : f32 to vector<16x16xf32>
    %942 = arith.mulf %941, %940 : vector<16x16xf32>
    %943 = arith.addf %937, %942 : vector<16x16xf32>
    %c5_765 = arith.constant 5 : index
    %c13_766 = arith.constant 13 : index
    %944 = memref.load %arg1[%c5_765, %c13_766] : memref<8x27xf32, #tpu.memory_space<smem>>
    %c1_767 = arith.constant 1 : index
    %c1_768 = arith.constant 1 : index
    %c1_769 = arith.constant 1 : index
    %945 = vector.load %arg7[%c1_767, %c1_768, %c1_769] : memref<3x18x18xf32, #tpu.memory_space<vmem>>, vector<1x16x16xf32>
    %946 = vector.shape_cast %945 : vector<1x16x16xf32> to vector<16x16xf32>
    %947 = vector.broadcast %944 : f32 to vector<16x16xf32>
    %948 = arith.mulf %947, %946 : vector<16x16xf32>
    %949 = arith.addf %943, %948 : vector<16x16xf32>
    %c5_770 = arith.constant 5 : index
    %c14_771 = arith.constant 14 : index
    %950 = memref.load %arg1[%c5_770, %c14_771] : memref<8x27xf32, #tpu.memory_space<smem>>
    %c1_772 = arith.constant 1 : index
    %c1_773 = arith.constant 1 : index
    %c2_774 = arith.constant 2 : index
    %951 = vector.load %arg7[%c1_772, %c1_773, %c2_774] : memref<3x18x18xf32, #tpu.memory_space<vmem>>, vector<1x16x16xf32>
    %952 = vector.shape_cast %951 : vector<1x16x16xf32> to vector<16x16xf32>
    %953 = vector.broadcast %950 : f32 to vector<16x16xf32>
    %954 = arith.mulf %953, %952 : vector<16x16xf32>
    %955 = arith.addf %949, %954 : vector<16x16xf32>
    %c5_775 = arith.constant 5 : index
    %c15_776 = arith.constant 15 : index
    %956 = memref.load %arg1[%c5_775, %c15_776] : memref<8x27xf32, #tpu.memory_space<smem>>
    %c1_777 = arith.constant 1 : index
    %c2_778 = arith.constant 2 : index
    %c0_779 = arith.constant 0 : index
    %957 = vector.load %arg7[%c1_777, %c2_778, %c0_779] : memref<3x18x18xf32, #tpu.memory_space<vmem>>, vector<1x16x16xf32>
    %958 = vector.shape_cast %957 : vector<1x16x16xf32> to vector<16x16xf32>
    %959 = vector.broadcast %956 : f32 to vector<16x16xf32>
    %960 = arith.mulf %959, %958 : vector<16x16xf32>
    %961 = arith.addf %955, %960 : vector<16x16xf32>
    %c5_780 = arith.constant 5 : index
    %c16_781 = arith.constant 16 : index
    %962 = memref.load %arg1[%c5_780, %c16_781] : memref<8x27xf32, #tpu.memory_space<smem>>
    %c1_782 = arith.constant 1 : index
    %c2_783 = arith.constant 2 : index
    %c1_784 = arith.constant 1 : index
    %963 = vector.load %arg7[%c1_782, %c2_783, %c1_784] : memref<3x18x18xf32, #tpu.memory_space<vmem>>, vector<1x16x16xf32>
    %964 = vector.shape_cast %963 : vector<1x16x16xf32> to vector<16x16xf32>
    %965 = vector.broadcast %962 : f32 to vector<16x16xf32>
    %966 = arith.mulf %965, %964 : vector<16x16xf32>
    %967 = arith.addf %961, %966 : vector<16x16xf32>
    %c5_785 = arith.constant 5 : index
    %c17_786 = arith.constant 17 : index
    %968 = memref.load %arg1[%c5_785, %c17_786] : memref<8x27xf32, #tpu.memory_space<smem>>
    %c1_787 = arith.constant 1 : index
    %c2_788 = arith.constant 2 : index
    %c2_789 = arith.constant 2 : index
    %969 = vector.load %arg7[%c1_787, %c2_788, %c2_789] : memref<3x18x18xf32, #tpu.memory_space<vmem>>, vector<1x16x16xf32>
    %970 = vector.shape_cast %969 : vector<1x16x16xf32> to vector<16x16xf32>
    %971 = vector.broadcast %968 : f32 to vector<16x16xf32>
    %972 = arith.mulf %971, %970 : vector<16x16xf32>
    %973 = arith.addf %967, %972 : vector<16x16xf32>
    %c5_790 = arith.constant 5 : index
    %c18_791 = arith.constant 18 : index
    %974 = memref.load %arg1[%c5_790, %c18_791] : memref<8x27xf32, #tpu.memory_space<smem>>
    %c2_792 = arith.constant 2 : index
    %c0_793 = arith.constant 0 : index
    %c0_794 = arith.constant 0 : index
    %975 = vector.load %arg7[%c2_792, %c0_793, %c0_794] : memref<3x18x18xf32, #tpu.memory_space<vmem>>, vector<1x16x16xf32>
    %976 = vector.shape_cast %975 : vector<1x16x16xf32> to vector<16x16xf32>
    %977 = vector.broadcast %974 : f32 to vector<16x16xf32>
    %978 = arith.mulf %977, %976 : vector<16x16xf32>
    %979 = arith.addf %973, %978 : vector<16x16xf32>
    %c5_795 = arith.constant 5 : index
    %c19_796 = arith.constant 19 : index
    %980 = memref.load %arg1[%c5_795, %c19_796] : memref<8x27xf32, #tpu.memory_space<smem>>
    %c2_797 = arith.constant 2 : index
    %c0_798 = arith.constant 0 : index
    %c1_799 = arith.constant 1 : index
    %981 = vector.load %arg7[%c2_797, %c0_798, %c1_799] : memref<3x18x18xf32, #tpu.memory_space<vmem>>, vector<1x16x16xf32>
    %982 = vector.shape_cast %981 : vector<1x16x16xf32> to vector<16x16xf32>
    %983 = vector.broadcast %980 : f32 to vector<16x16xf32>
    %984 = arith.mulf %983, %982 : vector<16x16xf32>
    %985 = arith.addf %979, %984 : vector<16x16xf32>
    %c5_800 = arith.constant 5 : index
    %c20_801 = arith.constant 20 : index
    %986 = memref.load %arg1[%c5_800, %c20_801] : memref<8x27xf32, #tpu.memory_space<smem>>
    %c2_802 = arith.constant 2 : index
    %c0_803 = arith.constant 0 : index
    %c2_804 = arith.constant 2 : index
    %987 = vector.load %arg7[%c2_802, %c0_803, %c2_804] : memref<3x18x18xf32, #tpu.memory_space<vmem>>, vector<1x16x16xf32>
    %988 = vector.shape_cast %987 : vector<1x16x16xf32> to vector<16x16xf32>
    %989 = vector.broadcast %986 : f32 to vector<16x16xf32>
    %990 = arith.mulf %989, %988 : vector<16x16xf32>
    %991 = arith.addf %985, %990 : vector<16x16xf32>
    %c5_805 = arith.constant 5 : index
    %c21_806 = arith.constant 21 : index
    %992 = memref.load %arg1[%c5_805, %c21_806] : memref<8x27xf32, #tpu.memory_space<smem>>
    %c2_807 = arith.constant 2 : index
    %c1_808 = arith.constant 1 : index
    %c0_809 = arith.constant 0 : index
    %993 = vector.load %arg7[%c2_807, %c1_808, %c0_809] : memref<3x18x18xf32, #tpu.memory_space<vmem>>, vector<1x16x16xf32>
    %994 = vector.shape_cast %993 : vector<1x16x16xf32> to vector<16x16xf32>
    %995 = vector.broadcast %992 : f32 to vector<16x16xf32>
    %996 = arith.mulf %995, %994 : vector<16x16xf32>
    %997 = arith.addf %991, %996 : vector<16x16xf32>
    %c5_810 = arith.constant 5 : index
    %c22_811 = arith.constant 22 : index
    %998 = memref.load %arg1[%c5_810, %c22_811] : memref<8x27xf32, #tpu.memory_space<smem>>
    %c2_812 = arith.constant 2 : index
    %c1_813 = arith.constant 1 : index
    %c1_814 = arith.constant 1 : index
    %999 = vector.load %arg7[%c2_812, %c1_813, %c1_814] : memref<3x18x18xf32, #tpu.memory_space<vmem>>, vector<1x16x16xf32>
    %1000 = vector.shape_cast %999 : vector<1x16x16xf32> to vector<16x16xf32>
    %1001 = vector.broadcast %998 : f32 to vector<16x16xf32>
    %1002 = arith.mulf %1001, %1000 : vector<16x16xf32>
    %1003 = arith.addf %997, %1002 : vector<16x16xf32>
    %c5_815 = arith.constant 5 : index
    %c23_816 = arith.constant 23 : index
    %1004 = memref.load %arg1[%c5_815, %c23_816] : memref<8x27xf32, #tpu.memory_space<smem>>
    %c2_817 = arith.constant 2 : index
    %c1_818 = arith.constant 1 : index
    %c2_819 = arith.constant 2 : index
    %1005 = vector.load %arg7[%c2_817, %c1_818, %c2_819] : memref<3x18x18xf32, #tpu.memory_space<vmem>>, vector<1x16x16xf32>
    %1006 = vector.shape_cast %1005 : vector<1x16x16xf32> to vector<16x16xf32>
    %1007 = vector.broadcast %1004 : f32 to vector<16x16xf32>
    %1008 = arith.mulf %1007, %1006 : vector<16x16xf32>
    %1009 = arith.addf %1003, %1008 : vector<16x16xf32>
    %c5_820 = arith.constant 5 : index
    %c24_821 = arith.constant 24 : index
    %1010 = memref.load %arg1[%c5_820, %c24_821] : memref<8x27xf32, #tpu.memory_space<smem>>
    %c2_822 = arith.constant 2 : index
    %c2_823 = arith.constant 2 : index
    %c0_824 = arith.constant 0 : index
    %1011 = vector.load %arg7[%c2_822, %c2_823, %c0_824] : memref<3x18x18xf32, #tpu.memory_space<vmem>>, vector<1x16x16xf32>
    %1012 = vector.shape_cast %1011 : vector<1x16x16xf32> to vector<16x16xf32>
    %1013 = vector.broadcast %1010 : f32 to vector<16x16xf32>
    %1014 = arith.mulf %1013, %1012 : vector<16x16xf32>
    %1015 = arith.addf %1009, %1014 : vector<16x16xf32>
    %c5_825 = arith.constant 5 : index
    %c25_826 = arith.constant 25 : index
    %1016 = memref.load %arg1[%c5_825, %c25_826] : memref<8x27xf32, #tpu.memory_space<smem>>
    %c2_827 = arith.constant 2 : index
    %c2_828 = arith.constant 2 : index
    %c1_829 = arith.constant 1 : index
    %1017 = vector.load %arg7[%c2_827, %c2_828, %c1_829] : memref<3x18x18xf32, #tpu.memory_space<vmem>>, vector<1x16x16xf32>
    %1018 = vector.shape_cast %1017 : vector<1x16x16xf32> to vector<16x16xf32>
    %1019 = vector.broadcast %1016 : f32 to vector<16x16xf32>
    %1020 = arith.mulf %1019, %1018 : vector<16x16xf32>
    %1021 = arith.addf %1015, %1020 : vector<16x16xf32>
    %c5_830 = arith.constant 5 : index
    %c26_831 = arith.constant 26 : index
    %1022 = memref.load %arg1[%c5_830, %c26_831] : memref<8x27xf32, #tpu.memory_space<smem>>
    %c2_832 = arith.constant 2 : index
    %c2_833 = arith.constant 2 : index
    %c2_834 = arith.constant 2 : index
    %1023 = vector.load %arg7[%c2_832, %c2_833, %c2_834] : memref<3x18x18xf32, #tpu.memory_space<vmem>>, vector<1x16x16xf32>
    %1024 = vector.shape_cast %1023 : vector<1x16x16xf32> to vector<16x16xf32>
    %1025 = vector.broadcast %1022 : f32 to vector<16x16xf32>
    %1026 = arith.mulf %1025, %1024 : vector<16x16xf32>
    %1027 = arith.addf %1021, %1026 : vector<16x16xf32>
    %cst_835 = arith.constant 0.000000e+00 : f32
    %1028 = vector.broadcast %cst_835 : f32 to vector<16x16xf32>
    %1029 = arith.maximumf %1027, %1028 : vector<16x16xf32>
    %c5_836 = arith.constant 5 : index
    %c1_837 = arith.constant 1 : index
    %c1_838 = arith.constant 1 : index
    %1030 = vector.load %arg8[%c5_836, %c1_837, %c1_838] : memref<8x18x18xf32, #tpu.memory_space<vmem>>, vector<1x16x16xf32>
    %1031 = vector.shape_cast %1030 : vector<1x16x16xf32> to vector<16x16xf32>
    %1032 = vector.shape_cast %1029 : vector<16x16xf32> to vector<1x16x16xf32>
    tpu.vector_store %arg8[%c5_836, %c1_837, %c1_838], %1032 {strides = array<i32>} : memref<8x18x18xf32, #tpu.memory_space<vmem>>, vector<1x16x16xf32>,
    %cst_839 = arith.constant 0.000000e+00 : f32
    %1033 = vector.broadcast %cst_839 : f32 to vector<16x16xf32>
    %c0_840 = arith.constant 0 : index
    %c6_841 = arith.constant 6 : index
    %1034 = memref.load %arg2[%c0_840, %c6_841] : memref<1x8xf32, #tpu.memory_space<smem>>
    %1035 = vector.broadcast %1034 : f32 to vector<16x16xf32>
    %1036 = arith.addf %1033, %1035 : vector<16x16xf32>
    %c6_842 = arith.constant 6 : index
    %c0_843 = arith.constant 0 : index
    %1037 = memref.load %arg1[%c6_842, %c0_843] : memref<8x27xf32, #tpu.memory_space<smem>>
    %c0_844 = arith.constant 0 : index
    %c0_845 = arith.constant 0 : index
    %c0_846 = arith.constant 0 : index
    %1038 = vector.load %arg7[%c0_844, %c0_845, %c0_846] : memref<3x18x18xf32, #tpu.memory_space<vmem>>, vector<1x16x16xf32>
    %1039 = vector.shape_cast %1038 : vector<1x16x16xf32> to vector<16x16xf32>
    %1040 = vector.broadcast %1037 : f32 to vector<16x16xf32>
    %1041 = arith.mulf %1040, %1039 : vector<16x16xf32>
    %1042 = arith.addf %1036, %1041 : vector<16x16xf32>
    %c6_847 = arith.constant 6 : index
    %c1_848 = arith.constant 1 : index
    %1043 = memref.load %arg1[%c6_847, %c1_848] : memref<8x27xf32, #tpu.memory_space<smem>>
    %c0_849 = arith.constant 0 : index
    %c0_850 = arith.constant 0 : index
    %c1_851 = arith.constant 1 : index
    %1044 = vector.load %arg7[%c0_849, %c0_850, %c1_851] : memref<3x18x18xf32, #tpu.memory_space<vmem>>, vector<1x16x16xf32>
    %1045 = vector.shape_cast %1044 : vector<1x16x16xf32> to vector<16x16xf32>
    %1046 = vector.broadcast %1043 : f32 to vector<16x16xf32>
    %1047 = arith.mulf %1046, %1045 : vector<16x16xf32>
    %1048 = arith.addf %1042, %1047 : vector<16x16xf32>
    %c6_852 = arith.constant 6 : index
    %c2_853 = arith.constant 2 : index
    %1049 = memref.load %arg1[%c6_852, %c2_853] : memref<8x27xf32, #tpu.memory_space<smem>>
    %c0_854 = arith.constant 0 : index
    %c0_855 = arith.constant 0 : index
    %c2_856 = arith.constant 2 : index
    %1050 = vector.load %arg7[%c0_854, %c0_855, %c2_856] : memref<3x18x18xf32, #tpu.memory_space<vmem>>, vector<1x16x16xf32>
    %1051 = vector.shape_cast %1050 : vector<1x16x16xf32> to vector<16x16xf32>
    %1052 = vector.broadcast %1049 : f32 to vector<16x16xf32>
    %1053 = arith.mulf %1052, %1051 : vector<16x16xf32>
    %1054 = arith.addf %1048, %1053 : vector<16x16xf32>
    %c6_857 = arith.constant 6 : index
    %c3_858 = arith.constant 3 : index
    %1055 = memref.load %arg1[%c6_857, %c3_858] : memref<8x27xf32, #tpu.memory_space<smem>>
    %c0_859 = arith.constant 0 : index
    %c1_860 = arith.constant 1 : index
    %c0_861 = arith.constant 0 : index
    %1056 = vector.load %arg7[%c0_859, %c1_860, %c0_861] : memref<3x18x18xf32, #tpu.memory_space<vmem>>, vector<1x16x16xf32>
    %1057 = vector.shape_cast %1056 : vector<1x16x16xf32> to vector<16x16xf32>
    %1058 = vector.broadcast %1055 : f32 to vector<16x16xf32>
    %1059 = arith.mulf %1058, %1057 : vector<16x16xf32>
    %1060 = arith.addf %1054, %1059 : vector<16x16xf32>
    %c6_862 = arith.constant 6 : index
    %c4_863 = arith.constant 4 : index
    %1061 = memref.load %arg1[%c6_862, %c4_863] : memref<8x27xf32, #tpu.memory_space<smem>>
    %c0_864 = arith.constant 0 : index
    %c1_865 = arith.constant 1 : index
    %c1_866 = arith.constant 1 : index
    %1062 = vector.load %arg7[%c0_864, %c1_865, %c1_866] : memref<3x18x18xf32, #tpu.memory_space<vmem>>, vector<1x16x16xf32>
    %1063 = vector.shape_cast %1062 : vector<1x16x16xf32> to vector<16x16xf32>
    %1064 = vector.broadcast %1061 : f32 to vector<16x16xf32>
    %1065 = arith.mulf %1064, %1063 : vector<16x16xf32>
    %1066 = arith.addf %1060, %1065 : vector<16x16xf32>
    %c6_867 = arith.constant 6 : index
    %c5_868 = arith.constant 5 : index
    %1067 = memref.load %arg1[%c6_867, %c5_868] : memref<8x27xf32, #tpu.memory_space<smem>>
    %c0_869 = arith.constant 0 : index
    %c1_870 = arith.constant 1 : index
    %c2_871 = arith.constant 2 : index
    %1068 = vector.load %arg7[%c0_869, %c1_870, %c2_871] : memref<3x18x18xf32, #tpu.memory_space<vmem>>, vector<1x16x16xf32>
    %1069 = vector.shape_cast %1068 : vector<1x16x16xf32> to vector<16x16xf32>
    %1070 = vector.broadcast %1067 : f32 to vector<16x16xf32>
    %1071 = arith.mulf %1070, %1069 : vector<16x16xf32>
    %1072 = arith.addf %1066, %1071 : vector<16x16xf32>
    %c6_872 = arith.constant 6 : index
    %c6_873 = arith.constant 6 : index
    %1073 = memref.load %arg1[%c6_872, %c6_873] : memref<8x27xf32, #tpu.memory_space<smem>>
    %c0_874 = arith.constant 0 : index
    %c2_875 = arith.constant 2 : index
    %c0_876 = arith.constant 0 : index
    %1074 = vector.load %arg7[%c0_874, %c2_875, %c0_876] : memref<3x18x18xf32, #tpu.memory_space<vmem>>, vector<1x16x16xf32>
    %1075 = vector.shape_cast %1074 : vector<1x16x16xf32> to vector<16x16xf32>
    %1076 = vector.broadcast %1073 : f32 to vector<16x16xf32>
    %1077 = arith.mulf %1076, %1075 : vector<16x16xf32>
    %1078 = arith.addf %1072, %1077 : vector<16x16xf32>
    %c6_877 = arith.constant 6 : index
    %c7_878 = arith.constant 7 : index
    %1079 = memref.load %arg1[%c6_877, %c7_878] : memref<8x27xf32, #tpu.memory_space<smem>>
    %c0_879 = arith.constant 0 : index
    %c2_880 = arith.constant 2 : index
    %c1_881 = arith.constant 1 : index
    %1080 = vector.load %arg7[%c0_879, %c2_880, %c1_881] : memref<3x18x18xf32, #tpu.memory_space<vmem>>, vector<1x16x16xf32>
    %1081 = vector.shape_cast %1080 : vector<1x16x16xf32> to vector<16x16xf32>
    %1082 = vector.broadcast %1079 : f32 to vector<16x16xf32>
    %1083 = arith.mulf %1082, %1081 : vector<16x16xf32>
    %1084 = arith.addf %1078, %1083 : vector<16x16xf32>
    %c6_882 = arith.constant 6 : index
    %c8_883 = arith.constant 8 : index
    %1085 = memref.load %arg1[%c6_882, %c8_883] : memref<8x27xf32, #tpu.memory_space<smem>>
    %c0_884 = arith.constant 0 : index
    %c2_885 = arith.constant 2 : index
    %c2_886 = arith.constant 2 : index
    %1086 = vector.load %arg7[%c0_884, %c2_885, %c2_886] : memref<3x18x18xf32, #tpu.memory_space<vmem>>, vector<1x16x16xf32>
    %1087 = vector.shape_cast %1086 : vector<1x16x16xf32> to vector<16x16xf32>
    %1088 = vector.broadcast %1085 : f32 to vector<16x16xf32>
    %1089 = arith.mulf %1088, %1087 : vector<16x16xf32>
    %1090 = arith.addf %1084, %1089 : vector<16x16xf32>
    %c6_887 = arith.constant 6 : index
    %c9_888 = arith.constant 9 : index
    %1091 = memref.load %arg1[%c6_887, %c9_888] : memref<8x27xf32, #tpu.memory_space<smem>>
    %c1_889 = arith.constant 1 : index
    %c0_890 = arith.constant 0 : index
    %c0_891 = arith.constant 0 : index
    %1092 = vector.load %arg7[%c1_889, %c0_890, %c0_891] : memref<3x18x18xf32, #tpu.memory_space<vmem>>, vector<1x16x16xf32>
    %1093 = vector.shape_cast %1092 : vector<1x16x16xf32> to vector<16x16xf32>
    %1094 = vector.broadcast %1091 : f32 to vector<16x16xf32>
    %1095 = arith.mulf %1094, %1093 : vector<16x16xf32>
    %1096 = arith.addf %1090, %1095 : vector<16x16xf32>
    %c6_892 = arith.constant 6 : index
    %c10_893 = arith.constant 10 : index
    %1097 = memref.load %arg1[%c6_892, %c10_893] : memref<8x27xf32, #tpu.memory_space<smem>>
    %c1_894 = arith.constant 1 : index
    %c0_895 = arith.constant 0 : index
    %c1_896 = arith.constant 1 : index
    %1098 = vector.load %arg7[%c1_894, %c0_895, %c1_896] : memref<3x18x18xf32, #tpu.memory_space<vmem>>, vector<1x16x16xf32>
    %1099 = vector.shape_cast %1098 : vector<1x16x16xf32> to vector<16x16xf32>
    %1100 = vector.broadcast %1097 : f32 to vector<16x16xf32>
    %1101 = arith.mulf %1100, %1099 : vector<16x16xf32>
    %1102 = arith.addf %1096, %1101 : vector<16x16xf32>
    %c6_897 = arith.constant 6 : index
    %c11_898 = arith.constant 11 : index
    %1103 = memref.load %arg1[%c6_897, %c11_898] : memref<8x27xf32, #tpu.memory_space<smem>>
    %c1_899 = arith.constant 1 : index
    %c0_900 = arith.constant 0 : index
    %c2_901 = arith.constant 2 : index
    %1104 = vector.load %arg7[%c1_899, %c0_900, %c2_901] : memref<3x18x18xf32, #tpu.memory_space<vmem>>, vector<1x16x16xf32>
    %1105 = vector.shape_cast %1104 : vector<1x16x16xf32> to vector<16x16xf32>
    %1106 = vector.broadcast %1103 : f32 to vector<16x16xf32>
    %1107 = arith.mulf %1106, %1105 : vector<16x16xf32>
    %1108 = arith.addf %1102, %1107 : vector<16x16xf32>
    %c6_902 = arith.constant 6 : index
    %c12_903 = arith.constant 12 : index
    %1109 = memref.load %arg1[%c6_902, %c12_903] : memref<8x27xf32, #tpu.memory_space<smem>>
    %c1_904 = arith.constant 1 : index
    %c1_905 = arith.constant 1 : index
    %c0_906 = arith.constant 0 : index
    %1110 = vector.load %arg7[%c1_904, %c1_905, %c0_906] : memref<3x18x18xf32, #tpu.memory_space<vmem>>, vector<1x16x16xf32>
    %1111 = vector.shape_cast %1110 : vector<1x16x16xf32> to vector<16x16xf32>
    %1112 = vector.broadcast %1109 : f32 to vector<16x16xf32>
    %1113 = arith.mulf %1112, %1111 : vector<16x16xf32>
    %1114 = arith.addf %1108, %1113 : vector<16x16xf32>
    %c6_907 = arith.constant 6 : index
    %c13_908 = arith.constant 13 : index
    %1115 = memref.load %arg1[%c6_907, %c13_908] : memref<8x27xf32, #tpu.memory_space<smem>>
    %c1_909 = arith.constant 1 : index
    %c1_910 = arith.constant 1 : index
    %c1_911 = arith.constant 1 : index
    %1116 = vector.load %arg7[%c1_909, %c1_910, %c1_911] : memref<3x18x18xf32, #tpu.memory_space<vmem>>, vector<1x16x16xf32>
    %1117 = vector.shape_cast %1116 : vector<1x16x16xf32> to vector<16x16xf32>
    %1118 = vector.broadcast %1115 : f32 to vector<16x16xf32>
    %1119 = arith.mulf %1118, %1117 : vector<16x16xf32>
    %1120 = arith.addf %1114, %1119 : vector<16x16xf32>
    %c6_912 = arith.constant 6 : index
    %c14_913 = arith.constant 14 : index
    %1121 = memref.load %arg1[%c6_912, %c14_913] : memref<8x27xf32, #tpu.memory_space<smem>>
    %c1_914 = arith.constant 1 : index
    %c1_915 = arith.constant 1 : index
    %c2_916 = arith.constant 2 : index
    %1122 = vector.load %arg7[%c1_914, %c1_915, %c2_916] : memref<3x18x18xf32, #tpu.memory_space<vmem>>, vector<1x16x16xf32>
    %1123 = vector.shape_cast %1122 : vector<1x16x16xf32> to vector<16x16xf32>
    %1124 = vector.broadcast %1121 : f32 to vector<16x16xf32>
    %1125 = arith.mulf %1124, %1123 : vector<16x16xf32>
    %1126 = arith.addf %1120, %1125 : vector<16x16xf32>
    %c6_917 = arith.constant 6 : index
    %c15_918 = arith.constant 15 : index
    %1127 = memref.load %arg1[%c6_917, %c15_918] : memref<8x27xf32, #tpu.memory_space<smem>>
    %c1_919 = arith.constant 1 : index
    %c2_920 = arith.constant 2 : index
    %c0_921 = arith.constant 0 : index
    %1128 = vector.load %arg7[%c1_919, %c2_920, %c0_921] : memref<3x18x18xf32, #tpu.memory_space<vmem>>, vector<1x16x16xf32>
    %1129 = vector.shape_cast %1128 : vector<1x16x16xf32> to vector<16x16xf32>
    %1130 = vector.broadcast %1127 : f32 to vector<16x16xf32>
    %1131 = arith.mulf %1130, %1129 : vector<16x16xf32>
    %1132 = arith.addf %1126, %1131 : vector<16x16xf32>
    %c6_922 = arith.constant 6 : index
    %c16_923 = arith.constant 16 : index
    %1133 = memref.load %arg1[%c6_922, %c16_923] : memref<8x27xf32, #tpu.memory_space<smem>>
    %c1_924 = arith.constant 1 : index
    %c2_925 = arith.constant 2 : index
    %c1_926 = arith.constant 1 : index
    %1134 = vector.load %arg7[%c1_924, %c2_925, %c1_926] : memref<3x18x18xf32, #tpu.memory_space<vmem>>, vector<1x16x16xf32>
    %1135 = vector.shape_cast %1134 : vector<1x16x16xf32> to vector<16x16xf32>
    %1136 = vector.broadcast %1133 : f32 to vector<16x16xf32>
    %1137 = arith.mulf %1136, %1135 : vector<16x16xf32>
    %1138 = arith.addf %1132, %1137 : vector<16x16xf32>
    %c6_927 = arith.constant 6 : index
    %c17_928 = arith.constant 17 : index
    %1139 = memref.load %arg1[%c6_927, %c17_928] : memref<8x27xf32, #tpu.memory_space<smem>>
    %c1_929 = arith.constant 1 : index
    %c2_930 = arith.constant 2 : index
    %c2_931 = arith.constant 2 : index
    %1140 = vector.load %arg7[%c1_929, %c2_930, %c2_931] : memref<3x18x18xf32, #tpu.memory_space<vmem>>, vector<1x16x16xf32>
    %1141 = vector.shape_cast %1140 : vector<1x16x16xf32> to vector<16x16xf32>
    %1142 = vector.broadcast %1139 : f32 to vector<16x16xf32>
    %1143 = arith.mulf %1142, %1141 : vector<16x16xf32>
    %1144 = arith.addf %1138, %1143 : vector<16x16xf32>
    %c6_932 = arith.constant 6 : index
    %c18_933 = arith.constant 18 : index
    %1145 = memref.load %arg1[%c6_932, %c18_933] : memref<8x27xf32, #tpu.memory_space<smem>>
    %c2_934 = arith.constant 2 : index
    %c0_935 = arith.constant 0 : index
    %c0_936 = arith.constant 0 : index
    %1146 = vector.load %arg7[%c2_934, %c0_935, %c0_936] : memref<3x18x18xf32, #tpu.memory_space<vmem>>, vector<1x16x16xf32>
    %1147 = vector.shape_cast %1146 : vector<1x16x16xf32> to vector<16x16xf32>
    %1148 = vector.broadcast %1145 : f32 to vector<16x16xf32>
    %1149 = arith.mulf %1148, %1147 : vector<16x16xf32>
    %1150 = arith.addf %1144, %1149 : vector<16x16xf32>
    %c6_937 = arith.constant 6 : index
    %c19_938 = arith.constant 19 : index
    %1151 = memref.load %arg1[%c6_937, %c19_938] : memref<8x27xf32, #tpu.memory_space<smem>>
    %c2_939 = arith.constant 2 : index
    %c0_940 = arith.constant 0 : index
    %c1_941 = arith.constant 1 : index
    %1152 = vector.load %arg7[%c2_939, %c0_940, %c1_941] : memref<3x18x18xf32, #tpu.memory_space<vmem>>, vector<1x16x16xf32>
    %1153 = vector.shape_cast %1152 : vector<1x16x16xf32> to vector<16x16xf32>
    %1154 = vector.broadcast %1151 : f32 to vector<16x16xf32>
    %1155 = arith.mulf %1154, %1153 : vector<16x16xf32>
    %1156 = arith.addf %1150, %1155 : vector<16x16xf32>
    %c6_942 = arith.constant 6 : index
    %c20_943 = arith.constant 20 : index
    %1157 = memref.load %arg1[%c6_942, %c20_943] : memref<8x27xf32, #tpu.memory_space<smem>>
    %c2_944 = arith.constant 2 : index
    %c0_945 = arith.constant 0 : index
    %c2_946 = arith.constant 2 : index
    %1158 = vector.load %arg7[%c2_944, %c0_945, %c2_946] : memref<3x18x18xf32, #tpu.memory_space<vmem>>, vector<1x16x16xf32>
    %1159 = vector.shape_cast %1158 : vector<1x16x16xf32> to vector<16x16xf32>
    %1160 = vector.broadcast %1157 : f32 to vector<16x16xf32>
    %1161 = arith.mulf %1160, %1159 : vector<16x16xf32>
    %1162 = arith.addf %1156, %1161 : vector<16x16xf32>
    %c6_947 = arith.constant 6 : index
    %c21_948 = arith.constant 21 : index
    %1163 = memref.load %arg1[%c6_947, %c21_948] : memref<8x27xf32, #tpu.memory_space<smem>>
    %c2_949 = arith.constant 2 : index
    %c1_950 = arith.constant 1 : index
    %c0_951 = arith.constant 0 : index
    %1164 = vector.load %arg7[%c2_949, %c1_950, %c0_951] : memref<3x18x18xf32, #tpu.memory_space<vmem>>, vector<1x16x16xf32>
    %1165 = vector.shape_cast %1164 : vector<1x16x16xf32> to vector<16x16xf32>
    %1166 = vector.broadcast %1163 : f32 to vector<16x16xf32>
    %1167 = arith.mulf %1166, %1165 : vector<16x16xf32>
    %1168 = arith.addf %1162, %1167 : vector<16x16xf32>
    %c6_952 = arith.constant 6 : index
    %c22_953 = arith.constant 22 : index
    %1169 = memref.load %arg1[%c6_952, %c22_953] : memref<8x27xf32, #tpu.memory_space<smem>>
    %c2_954 = arith.constant 2 : index
    %c1_955 = arith.constant 1 : index
    %c1_956 = arith.constant 1 : index
    %1170 = vector.load %arg7[%c2_954, %c1_955, %c1_956] : memref<3x18x18xf32, #tpu.memory_space<vmem>>, vector<1x16x16xf32>
    %1171 = vector.shape_cast %1170 : vector<1x16x16xf32> to vector<16x16xf32>
    %1172 = vector.broadcast %1169 : f32 to vector<16x16xf32>
    %1173 = arith.mulf %1172, %1171 : vector<16x16xf32>
    %1174 = arith.addf %1168, %1173 : vector<16x16xf32>
    %c6_957 = arith.constant 6 : index
    %c23_958 = arith.constant 23 : index
    %1175 = memref.load %arg1[%c6_957, %c23_958] : memref<8x27xf32, #tpu.memory_space<smem>>
    %c2_959 = arith.constant 2 : index
    %c1_960 = arith.constant 1 : index
    %c2_961 = arith.constant 2 : index
    %1176 = vector.load %arg7[%c2_959, %c1_960, %c2_961] : memref<3x18x18xf32, #tpu.memory_space<vmem>>, vector<1x16x16xf32>
    %1177 = vector.shape_cast %1176 : vector<1x16x16xf32> to vector<16x16xf32>
    %1178 = vector.broadcast %1175 : f32 to vector<16x16xf32>
    %1179 = arith.mulf %1178, %1177 : vector<16x16xf32>
    %1180 = arith.addf %1174, %1179 : vector<16x16xf32>
    %c6_962 = arith.constant 6 : index
    %c24_963 = arith.constant 24 : index
    %1181 = memref.load %arg1[%c6_962, %c24_963] : memref<8x27xf32, #tpu.memory_space<smem>>
    %c2_964 = arith.constant 2 : index
    %c2_965 = arith.constant 2 : index
    %c0_966 = arith.constant 0 : index
    %1182 = vector.load %arg7[%c2_964, %c2_965, %c0_966] : memref<3x18x18xf32, #tpu.memory_space<vmem>>, vector<1x16x16xf32>
    %1183 = vector.shape_cast %1182 : vector<1x16x16xf32> to vector<16x16xf32>
    %1184 = vector.broadcast %1181 : f32 to vector<16x16xf32>
    %1185 = arith.mulf %1184, %1183 : vector<16x16xf32>
    %1186 = arith.addf %1180, %1185 : vector<16x16xf32>
    %c6_967 = arith.constant 6 : index
    %c25_968 = arith.constant 25 : index
    %1187 = memref.load %arg1[%c6_967, %c25_968] : memref<8x27xf32, #tpu.memory_space<smem>>
    %c2_969 = arith.constant 2 : index
    %c2_970 = arith.constant 2 : index
    %c1_971 = arith.constant 1 : index
    %1188 = vector.load %arg7[%c2_969, %c2_970, %c1_971] : memref<3x18x18xf32, #tpu.memory_space<vmem>>, vector<1x16x16xf32>
    %1189 = vector.shape_cast %1188 : vector<1x16x16xf32> to vector<16x16xf32>
    %1190 = vector.broadcast %1187 : f32 to vector<16x16xf32>
    %1191 = arith.mulf %1190, %1189 : vector<16x16xf32>
    %1192 = arith.addf %1186, %1191 : vector<16x16xf32>
    %c6_972 = arith.constant 6 : index
    %c26_973 = arith.constant 26 : index
    %1193 = memref.load %arg1[%c6_972, %c26_973] : memref<8x27xf32, #tpu.memory_space<smem>>
    %c2_974 = arith.constant 2 : index
    %c2_975 = arith.constant 2 : index
    %c2_976 = arith.constant 2 : index
    %1194 = vector.load %arg7[%c2_974, %c2_975, %c2_976] : memref<3x18x18xf32, #tpu.memory_space<vmem>>, vector<1x16x16xf32>
    %1195 = vector.shape_cast %1194 : vector<1x16x16xf32> to vector<16x16xf32>
    %1196 = vector.broadcast %1193 : f32 to vector<16x16xf32>
    %1197 = arith.mulf %1196, %1195 : vector<16x16xf32>
    %1198 = arith.addf %1192, %1197 : vector<16x16xf32>
    %cst_977 = arith.constant 0.000000e+00 : f32
    %1199 = vector.broadcast %cst_977 : f32 to vector<16x16xf32>
    %1200 = arith.maximumf %1198, %1199 : vector<16x16xf32>
    %c6_978 = arith.constant 6 : index
    %c1_979 = arith.constant 1 : index
    %c1_980 = arith.constant 1 : index
    %1201 = vector.load %arg8[%c6_978, %c1_979, %c1_980] : memref<8x18x18xf32, #tpu.memory_space<vmem>>, vector<1x16x16xf32>
    %1202 = vector.shape_cast %1201 : vector<1x16x16xf32> to vector<16x16xf32>
    %1203 = vector.shape_cast %1200 : vector<16x16xf32> to vector<1x16x16xf32>
    tpu.vector_store %arg8[%c6_978, %c1_979, %c1_980], %1203 {strides = array<i32>} : memref<8x18x18xf32, #tpu.memory_space<vmem>>, vector<1x16x16xf32>,
    %cst_981 = arith.constant 0.000000e+00 : f32
    %1204 = vector.broadcast %cst_981 : f32 to vector<16x16xf32>
    %c0_982 = arith.constant 0 : index
    %c7_983 = arith.constant 7 : index
    %1205 = memref.load %arg2[%c0_982, %c7_983] : memref<1x8xf32, #tpu.memory_space<smem>>
    %1206 = vector.broadcast %1205 : f32 to vector<16x16xf32>
    %1207 = arith.addf %1204, %1206 : vector<16x16xf32>
    %c7_984 = arith.constant 7 : index
    %c0_985 = arith.constant 0 : index
    %1208 = memref.load %arg1[%c7_984, %c0_985] : memref<8x27xf32, #tpu.memory_space<smem>>
    %c0_986 = arith.constant 0 : index
    %c0_987 = arith.constant 0 : index
    %c0_988 = arith.constant 0 : index
    %1209 = vector.load %arg7[%c0_986, %c0_987, %c0_988] : memref<3x18x18xf32, #tpu.memory_space<vmem>>, vector<1x16x16xf32>
    %1210 = vector.shape_cast %1209 : vector<1x16x16xf32> to vector<16x16xf32>
    %1211 = vector.broadcast %1208 : f32 to vector<16x16xf32>
    %1212 = arith.mulf %1211, %1210 : vector<16x16xf32>
    %1213 = arith.addf %1207, %1212 : vector<16x16xf32>
    %c7_989 = arith.constant 7 : index
    %c1_990 = arith.constant 1 : index
    %1214 = memref.load %arg1[%c7_989, %c1_990] : memref<8x27xf32, #tpu.memory_space<smem>>
    %c0_991 = arith.constant 0 : index
    %c0_992 = arith.constant 0 : index
    %c1_993 = arith.constant 1 : index
    %1215 = vector.load %arg7[%c0_991, %c0_992, %c1_993] : memref<3x18x18xf32, #tpu.memory_space<vmem>>, vector<1x16x16xf32>
    %1216 = vector.shape_cast %1215 : vector<1x16x16xf32> to vector<16x16xf32>
    %1217 = vector.broadcast %1214 : f32 to vector<16x16xf32>
    %1218 = arith.mulf %1217, %1216 : vector<16x16xf32>
    %1219 = arith.addf %1213, %1218 : vector<16x16xf32>
    %c7_994 = arith.constant 7 : index
    %c2_995 = arith.constant 2 : index
    %1220 = memref.load %arg1[%c7_994, %c2_995] : memref<8x27xf32, #tpu.memory_space<smem>>
    %c0_996 = arith.constant 0 : index
    %c0_997 = arith.constant 0 : index
    %c2_998 = arith.constant 2 : index
    %1221 = vector.load %arg7[%c0_996, %c0_997, %c2_998] : memref<3x18x18xf32, #tpu.memory_space<vmem>>, vector<1x16x16xf32>
    %1222 = vector.shape_cast %1221 : vector<1x16x16xf32> to vector<16x16xf32>
    %1223 = vector.broadcast %1220 : f32 to vector<16x16xf32>
    %1224 = arith.mulf %1223, %1222 : vector<16x16xf32>
    %1225 = arith.addf %1219, %1224 : vector<16x16xf32>
    %c7_999 = arith.constant 7 : index
    %c3_1000 = arith.constant 3 : index
    %1226 = memref.load %arg1[%c7_999, %c3_1000] : memref<8x27xf32, #tpu.memory_space<smem>>
    %c0_1001 = arith.constant 0 : index
    %c1_1002 = arith.constant 1 : index
    %c0_1003 = arith.constant 0 : index
    %1227 = vector.load %arg7[%c0_1001, %c1_1002, %c0_1003] : memref<3x18x18xf32, #tpu.memory_space<vmem>>, vector<1x16x16xf32>
    %1228 = vector.shape_cast %1227 : vector<1x16x16xf32> to vector<16x16xf32>
    %1229 = vector.broadcast %1226 : f32 to vector<16x16xf32>
    %1230 = arith.mulf %1229, %1228 : vector<16x16xf32>
    %1231 = arith.addf %1225, %1230 : vector<16x16xf32>
    %c7_1004 = arith.constant 7 : index
    %c4_1005 = arith.constant 4 : index
    %1232 = memref.load %arg1[%c7_1004, %c4_1005] : memref<8x27xf32, #tpu.memory_space<smem>>
    %c0_1006 = arith.constant 0 : index
    %c1_1007 = arith.constant 1 : index
    %c1_1008 = arith.constant 1 : index
    %1233 = vector.load %arg7[%c0_1006, %c1_1007, %c1_1008] : memref<3x18x18xf32, #tpu.memory_space<vmem>>, vector<1x16x16xf32>
    %1234 = vector.shape_cast %1233 : vector<1x16x16xf32> to vector<16x16xf32>
    %1235 = vector.broadcast %1232 : f32 to vector<16x16xf32>
    %1236 = arith.mulf %1235, %1234 : vector<16x16xf32>
    %1237 = arith.addf %1231, %1236 : vector<16x16xf32>
    %c7_1009 = arith.constant 7 : index
    %c5_1010 = arith.constant 5 : index
    %1238 = memref.load %arg1[%c7_1009, %c5_1010] : memref<8x27xf32, #tpu.memory_space<smem>>
    %c0_1011 = arith.constant 0 : index
    %c1_1012 = arith.constant 1 : index
    %c2_1013 = arith.constant 2 : index
    %1239 = vector.load %arg7[%c0_1011, %c1_1012, %c2_1013] : memref<3x18x18xf32, #tpu.memory_space<vmem>>, vector<1x16x16xf32>
    %1240 = vector.shape_cast %1239 : vector<1x16x16xf32> to vector<16x16xf32>
    %1241 = vector.broadcast %1238 : f32 to vector<16x16xf32>
    %1242 = arith.mulf %1241, %1240 : vector<16x16xf32>
    %1243 = arith.addf %1237, %1242 : vector<16x16xf32>
    %c7_1014 = arith.constant 7 : index
    %c6_1015 = arith.constant 6 : index
    %1244 = memref.load %arg1[%c7_1014, %c6_1015] : memref<8x27xf32, #tpu.memory_space<smem>>
    %c0_1016 = arith.constant 0 : index
    %c2_1017 = arith.constant 2 : index
    %c0_1018 = arith.constant 0 : index
    %1245 = vector.load %arg7[%c0_1016, %c2_1017, %c0_1018] : memref<3x18x18xf32, #tpu.memory_space<vmem>>, vector<1x16x16xf32>
    %1246 = vector.shape_cast %1245 : vector<1x16x16xf32> to vector<16x16xf32>
    %1247 = vector.broadcast %1244 : f32 to vector<16x16xf32>
    %1248 = arith.mulf %1247, %1246 : vector<16x16xf32>
    %1249 = arith.addf %1243, %1248 : vector<16x16xf32>
    %c7_1019 = arith.constant 7 : index
    %c7_1020 = arith.constant 7 : index
    %1250 = memref.load %arg1[%c7_1019, %c7_1020] : memref<8x27xf32, #tpu.memory_space<smem>>
    %c0_1021 = arith.constant 0 : index
    %c2_1022 = arith.constant 2 : index
    %c1_1023 = arith.constant 1 : index
    %1251 = vector.load %arg7[%c0_1021, %c2_1022, %c1_1023] : memref<3x18x18xf32, #tpu.memory_space<vmem>>, vector<1x16x16xf32>
    %1252 = vector.shape_cast %1251 : vector<1x16x16xf32> to vector<16x16xf32>
    %1253 = vector.broadcast %1250 : f32 to vector<16x16xf32>
    %1254 = arith.mulf %1253, %1252 : vector<16x16xf32>
    %1255 = arith.addf %1249, %1254 : vector<16x16xf32>
    %c7_1024 = arith.constant 7 : index
    %c8_1025 = arith.constant 8 : index
    %1256 = memref.load %arg1[%c7_1024, %c8_1025] : memref<8x27xf32, #tpu.memory_space<smem>>
    %c0_1026 = arith.constant 0 : index
    %c2_1027 = arith.constant 2 : index
    %c2_1028 = arith.constant 2 : index
    %1257 = vector.load %arg7[%c0_1026, %c2_1027, %c2_1028] : memref<3x18x18xf32, #tpu.memory_space<vmem>>, vector<1x16x16xf32>
    %1258 = vector.shape_cast %1257 : vector<1x16x16xf32> to vector<16x16xf32>
    %1259 = vector.broadcast %1256 : f32 to vector<16x16xf32>
    %1260 = arith.mulf %1259, %1258 : vector<16x16xf32>
    %1261 = arith.addf %1255, %1260 : vector<16x16xf32>
    %c7_1029 = arith.constant 7 : index
    %c9_1030 = arith.constant 9 : index
    %1262 = memref.load %arg1[%c7_1029, %c9_1030] : memref<8x27xf32, #tpu.memory_space<smem>>
    %c1_1031 = arith.constant 1 : index
    %c0_1032 = arith.constant 0 : index
    %c0_1033 = arith.constant 0 : index
    %1263 = vector.load %arg7[%c1_1031, %c0_1032, %c0_1033] : memref<3x18x18xf32, #tpu.memory_space<vmem>>, vector<1x16x16xf32>
    %1264 = vector.shape_cast %1263 : vector<1x16x16xf32> to vector<16x16xf32>
    %1265 = vector.broadcast %1262 : f32 to vector<16x16xf32>
    %1266 = arith.mulf %1265, %1264 : vector<16x16xf32>
    %1267 = arith.addf %1261, %1266 : vector<16x16xf32>
    %c7_1034 = arith.constant 7 : index
    %c10_1035 = arith.constant 10 : index
    %1268 = memref.load %arg1[%c7_1034, %c10_1035] : memref<8x27xf32, #tpu.memory_space<smem>>
    %c1_1036 = arith.constant 1 : index
    %c0_1037 = arith.constant 0 : index
    %c1_1038 = arith.constant 1 : index
    %1269 = vector.load %arg7[%c1_1036, %c0_1037, %c1_1038] : memref<3x18x18xf32, #tpu.memory_space<vmem>>, vector<1x16x16xf32>
    %1270 = vector.shape_cast %1269 : vector<1x16x16xf32> to vector<16x16xf32>
    %1271 = vector.broadcast %1268 : f32 to vector<16x16xf32>
    %1272 = arith.mulf %1271, %1270 : vector<16x16xf32>
    %1273 = arith.addf %1267, %1272 : vector<16x16xf32>
    %c7_1039 = arith.constant 7 : index
    %c11_1040 = arith.constant 11 : index
    %1274 = memref.load %arg1[%c7_1039, %c11_1040] : memref<8x27xf32, #tpu.memory_space<smem>>
    %c1_1041 = arith.constant 1 : index
    %c0_1042 = arith.constant 0 : index
    %c2_1043 = arith.constant 2 : index
    %1275 = vector.load %arg7[%c1_1041, %c0_1042, %c2_1043] : memref<3x18x18xf32, #tpu.memory_space<vmem>>, vector<1x16x16xf32>
    %1276 = vector.shape_cast %1275 : vector<1x16x16xf32> to vector<16x16xf32>
    %1277 = vector.broadcast %1274 : f32 to vector<16x16xf32>
    %1278 = arith.mulf %1277, %1276 : vector<16x16xf32>
    %1279 = arith.addf %1273, %1278 : vector<16x16xf32>
    %c7_1044 = arith.constant 7 : index
    %c12_1045 = arith.constant 12 : index
    %1280 = memref.load %arg1[%c7_1044, %c12_1045] : memref<8x27xf32, #tpu.memory_space<smem>>
    %c1_1046 = arith.constant 1 : index
    %c1_1047 = arith.constant 1 : index
    %c0_1048 = arith.constant 0 : index
    %1281 = vector.load %arg7[%c1_1046, %c1_1047, %c0_1048] : memref<3x18x18xf32, #tpu.memory_space<vmem>>, vector<1x16x16xf32>
    %1282 = vector.shape_cast %1281 : vector<1x16x16xf32> to vector<16x16xf32>
    %1283 = vector.broadcast %1280 : f32 to vector<16x16xf32>
    %1284 = arith.mulf %1283, %1282 : vector<16x16xf32>
    %1285 = arith.addf %1279, %1284 : vector<16x16xf32>
    %c7_1049 = arith.constant 7 : index
    %c13_1050 = arith.constant 13 : index
    %1286 = memref.load %arg1[%c7_1049, %c13_1050] : memref<8x27xf32, #tpu.memory_space<smem>>
    %c1_1051 = arith.constant 1 : index
    %c1_1052 = arith.constant 1 : index
    %c1_1053 = arith.constant 1 : index
    %1287 = vector.load %arg7[%c1_1051, %c1_1052, %c1_1053] : memref<3x18x18xf32, #tpu.memory_space<vmem>>, vector<1x16x16xf32>
    %1288 = vector.shape_cast %1287 : vector<1x16x16xf32> to vector<16x16xf32>
    %1289 = vector.broadcast %1286 : f32 to vector<16x16xf32>
    %1290 = arith.mulf %1289, %1288 : vector<16x16xf32>
    %1291 = arith.addf %1285, %1290 : vector<16x16xf32>
    %c7_1054 = arith.constant 7 : index
    %c14_1055 = arith.constant 14 : index
    %1292 = memref.load %arg1[%c7_1054, %c14_1055] : memref<8x27xf32, #tpu.memory_space<smem>>
    %c1_1056 = arith.constant 1 : index
    %c1_1057 = arith.constant 1 : index
    %c2_1058 = arith.constant 2 : index
    %1293 = vector.load %arg7[%c1_1056, %c1_1057, %c2_1058] : memref<3x18x18xf32, #tpu.memory_space<vmem>>, vector<1x16x16xf32>
    %1294 = vector.shape_cast %1293 : vector<1x16x16xf32> to vector<16x16xf32>
    %1295 = vector.broadcast %1292 : f32 to vector<16x16xf32>
    %1296 = arith.mulf %1295, %1294 : vector<16x16xf32>
    %1297 = arith.addf %1291, %1296 : vector<16x16xf32>
    %c7_1059 = arith.constant 7 : index
    %c15_1060 = arith.constant 15 : index
    %1298 = memref.load %arg1[%c7_1059, %c15_1060] : memref<8x27xf32, #tpu.memory_space<smem>>
    %c1_1061 = arith.constant 1 : index
    %c2_1062 = arith.constant 2 : index
    %c0_1063 = arith.constant 0 : index
    %1299 = vector.load %arg7[%c1_1061, %c2_1062, %c0_1063] : memref<3x18x18xf32, #tpu.memory_space<vmem>>, vector<1x16x16xf32>
    %1300 = vector.shape_cast %1299 : vector<1x16x16xf32> to vector<16x16xf32>
    %1301 = vector.broadcast %1298 : f32 to vector<16x16xf32>
    %1302 = arith.mulf %1301, %1300 : vector<16x16xf32>
    %1303 = arith.addf %1297, %1302 : vector<16x16xf32>
    %c7_1064 = arith.constant 7 : index
    %c16_1065 = arith.constant 16 : index
    %1304 = memref.load %arg1[%c7_1064, %c16_1065] : memref<8x27xf32, #tpu.memory_space<smem>>
    %c1_1066 = arith.constant 1 : index
    %c2_1067 = arith.constant 2 : index
    %c1_1068 = arith.constant 1 : index
    %1305 = vector.load %arg7[%c1_1066, %c2_1067, %c1_1068] : memref<3x18x18xf32, #tpu.memory_space<vmem>>, vector<1x16x16xf32>
    %1306 = vector.shape_cast %1305 : vector<1x16x16xf32> to vector<16x16xf32>
    %1307 = vector.broadcast %1304 : f32 to vector<16x16xf32>
    %1308 = arith.mulf %1307, %1306 : vector<16x16xf32>
    %1309 = arith.addf %1303, %1308 : vector<16x16xf32>
    %c7_1069 = arith.constant 7 : index
    %c17_1070 = arith.constant 17 : index
    %1310 = memref.load %arg1[%c7_1069, %c17_1070] : memref<8x27xf32, #tpu.memory_space<smem>>
    %c1_1071 = arith.constant 1 : index
    %c2_1072 = arith.constant 2 : index
    %c2_1073 = arith.constant 2 : index
    %1311 = vector.load %arg7[%c1_1071, %c2_1072, %c2_1073] : memref<3x18x18xf32, #tpu.memory_space<vmem>>, vector<1x16x16xf32>
    %1312 = vector.shape_cast %1311 : vector<1x16x16xf32> to vector<16x16xf32>
    %1313 = vector.broadcast %1310 : f32 to vector<16x16xf32>
    %1314 = arith.mulf %1313, %1312 : vector<16x16xf32>
    %1315 = arith.addf %1309, %1314 : vector<16x16xf32>
    %c7_1074 = arith.constant 7 : index
    %c18_1075 = arith.constant 18 : index
    %1316 = memref.load %arg1[%c7_1074, %c18_1075] : memref<8x27xf32, #tpu.memory_space<smem>>
    %c2_1076 = arith.constant 2 : index
    %c0_1077 = arith.constant 0 : index
    %c0_1078 = arith.constant 0 : index
    %1317 = vector.load %arg7[%c2_1076, %c0_1077, %c0_1078] : memref<3x18x18xf32, #tpu.memory_space<vmem>>, vector<1x16x16xf32>
    %1318 = vector.shape_cast %1317 : vector<1x16x16xf32> to vector<16x16xf32>
    %1319 = vector.broadcast %1316 : f32 to vector<16x16xf32>
    %1320 = arith.mulf %1319, %1318 : vector<16x16xf32>
    %1321 = arith.addf %1315, %1320 : vector<16x16xf32>
    %c7_1079 = arith.constant 7 : index
    %c19_1080 = arith.constant 19 : index
    %1322 = memref.load %arg1[%c7_1079, %c19_1080] : memref<8x27xf32, #tpu.memory_space<smem>>
    %c2_1081 = arith.constant 2 : index
    %c0_1082 = arith.constant 0 : index
    %c1_1083 = arith.constant 1 : index
    %1323 = vector.load %arg7[%c2_1081, %c0_1082, %c1_1083] : memref<3x18x18xf32, #tpu.memory_space<vmem>>, vector<1x16x16xf32>
    %1324 = vector.shape_cast %1323 : vector<1x16x16xf32> to vector<16x16xf32>
    %1325 = vector.broadcast %1322 : f32 to vector<16x16xf32>
    %1326 = arith.mulf %1325, %1324 : vector<16x16xf32>
    %1327 = arith.addf %1321, %1326 : vector<16x16xf32>
    %c7_1084 = arith.constant 7 : index
    %c20_1085 = arith.constant 20 : index
    %1328 = memref.load %arg1[%c7_1084, %c20_1085] : memref<8x27xf32, #tpu.memory_space<smem>>
    %c2_1086 = arith.constant 2 : index
    %c0_1087 = arith.constant 0 : index
    %c2_1088 = arith.constant 2 : index
    %1329 = vector.load %arg7[%c2_1086, %c0_1087, %c2_1088] : memref<3x18x18xf32, #tpu.memory_space<vmem>>, vector<1x16x16xf32>
    %1330 = vector.shape_cast %1329 : vector<1x16x16xf32> to vector<16x16xf32>
    %1331 = vector.broadcast %1328 : f32 to vector<16x16xf32>
    %1332 = arith.mulf %1331, %1330 : vector<16x16xf32>
    %1333 = arith.addf %1327, %1332 : vector<16x16xf32>
    %c7_1089 = arith.constant 7 : index
    %c21_1090 = arith.constant 21 : index
    %1334 = memref.load %arg1[%c7_1089, %c21_1090] : memref<8x27xf32, #tpu.memory_space<smem>>
    %c2_1091 = arith.constant 2 : index
    %c1_1092 = arith.constant 1 : index
    %c0_1093 = arith.constant 0 : index
    %1335 = vector.load %arg7[%c2_1091, %c1_1092, %c0_1093] : memref<3x18x18xf32, #tpu.memory_space<vmem>>, vector<1x16x16xf32>
    %1336 = vector.shape_cast %1335 : vector<1x16x16xf32> to vector<16x16xf32>
    %1337 = vector.broadcast %1334 : f32 to vector<16x16xf32>
    %1338 = arith.mulf %1337, %1336 : vector<16x16xf32>
    %1339 = arith.addf %1333, %1338 : vector<16x16xf32>
    %c7_1094 = arith.constant 7 : index
    %c22_1095 = arith.constant 22 : index
    %1340 = memref.load %arg1[%c7_1094, %c22_1095] : memref<8x27xf32, #tpu.memory_space<smem>>
    %c2_1096 = arith.constant 2 : index
    %c1_1097 = arith.constant 1 : index
    %c1_1098 = arith.constant 1 : index
    %1341 = vector.load %arg7[%c2_1096, %c1_1097, %c1_1098] : memref<3x18x18xf32, #tpu.memory_space<vmem>>, vector<1x16x16xf32>
    %1342 = vector.shape_cast %1341 : vector<1x16x16xf32> to vector<16x16xf32>
    %1343 = vector.broadcast %1340 : f32 to vector<16x16xf32>
    %1344 = arith.mulf %1343, %1342 : vector<16x16xf32>
    %1345 = arith.addf %1339, %1344 : vector<16x16xf32>
    %c7_1099 = arith.constant 7 : index
    %c23_1100 = arith.constant 23 : index
    %1346 = memref.load %arg1[%c7_1099, %c23_1100] : memref<8x27xf32, #tpu.memory_space<smem>>
    %c2_1101 = arith.constant 2 : index
    %c1_1102 = arith.constant 1 : index
    %c2_1103 = arith.constant 2 : index
    %1347 = vector.load %arg7[%c2_1101, %c1_1102, %c2_1103] : memref<3x18x18xf32, #tpu.memory_space<vmem>>, vector<1x16x16xf32>
    %1348 = vector.shape_cast %1347 : vector<1x16x16xf32> to vector<16x16xf32>
    %1349 = vector.broadcast %1346 : f32 to vector<16x16xf32>
    %1350 = arith.mulf %1349, %1348 : vector<16x16xf32>
    %1351 = arith.addf %1345, %1350 : vector<16x16xf32>
    %c7_1104 = arith.constant 7 : index
    %c24_1105 = arith.constant 24 : index
    %1352 = memref.load %arg1[%c7_1104, %c24_1105] : memref<8x27xf32, #tpu.memory_space<smem>>
    %c2_1106 = arith.constant 2 : index
    %c2_1107 = arith.constant 2 : index
    %c0_1108 = arith.constant 0 : index
    %1353 = vector.load %arg7[%c2_1106, %c2_1107, %c0_1108] : memref<3x18x18xf32, #tpu.memory_space<vmem>>, vector<1x16x16xf32>
    %1354 = vector.shape_cast %1353 : vector<1x16x16xf32> to vector<16x16xf32>
    %1355 = vector.broadcast %1352 : f32 to vector<16x16xf32>
    %1356 = arith.mulf %1355, %1354 : vector<16x16xf32>
    %1357 = arith.addf %1351, %1356 : vector<16x16xf32>
    %c7_1109 = arith.constant 7 : index
    %c25_1110 = arith.constant 25 : index
    %1358 = memref.load %arg1[%c7_1109, %c25_1110] : memref<8x27xf32, #tpu.memory_space<smem>>
    %c2_1111 = arith.constant 2 : index
    %c2_1112 = arith.constant 2 : index
    %c1_1113 = arith.constant 1 : index
    %1359 = vector.load %arg7[%c2_1111, %c2_1112, %c1_1113] : memref<3x18x18xf32, #tpu.memory_space<vmem>>, vector<1x16x16xf32>
    %1360 = vector.shape_cast %1359 : vector<1x16x16xf32> to vector<16x16xf32>
    %1361 = vector.broadcast %1358 : f32 to vector<16x16xf32>
    %1362 = arith.mulf %1361, %1360 : vector<16x16xf32>
    %1363 = arith.addf %1357, %1362 : vector<16x16xf32>
    %c7_1114 = arith.constant 7 : index
    %c26_1115 = arith.constant 26 : index
    %1364 = memref.load %arg1[%c7_1114, %c26_1115] : memref<8x27xf32, #tpu.memory_space<smem>>
    %c2_1116 = arith.constant 2 : index
    %c2_1117 = arith.constant 2 : index
    %c2_1118 = arith.constant 2 : index
    %1365 = vector.load %arg7[%c2_1116, %c2_1117, %c2_1118] : memref<3x18x18xf32, #tpu.memory_space<vmem>>, vector<1x16x16xf32>
    %1366 = vector.shape_cast %1365 : vector<1x16x16xf32> to vector<16x16xf32>
    %1367 = vector.broadcast %1364 : f32 to vector<16x16xf32>
    %1368 = arith.mulf %1367, %1366 : vector<16x16xf32>
    %1369 = arith.addf %1363, %1368 : vector<16x16xf32>
    %cst_1119 = arith.constant 0.000000e+00 : f32
    %1370 = vector.broadcast %cst_1119 : f32 to vector<16x16xf32>
    %1371 = arith.maximumf %1369, %1370 : vector<16x16xf32>
    %c7_1120 = arith.constant 7 : index
    %c1_1121 = arith.constant 1 : index
    %c1_1122 = arith.constant 1 : index
    %1372 = vector.load %arg8[%c7_1120, %c1_1121, %c1_1122] : memref<8x18x18xf32, #tpu.memory_space<vmem>>, vector<1x16x16xf32>
    %1373 = vector.shape_cast %1372 : vector<1x16x16xf32> to vector<16x16xf32>
    %1374 = vector.shape_cast %1371 : vector<16x16xf32> to vector<1x16x16xf32>
    tpu.vector_store %arg8[%c7_1120, %c1_1121, %c1_1122], %1374 {strides = array<i32>} : memref<8x18x18xf32, #tpu.memory_space<vmem>>, vector<1x16x16xf32>,
    %cst_1123 = arith.constant 0.000000e+00 : f32
    %1375 = vector.broadcast %cst_1123 : f32 to vector<16x16xf32>
    %c0_1124 = arith.constant 0 : index
    %c0_1125 = arith.constant 0 : index
    %1376 = memref.load %arg4[%c0_1124, %c0_1125] : memref<1x1xf32, #tpu.memory_space<smem>>
    %1377 = vector.broadcast %1376 : f32 to vector<16x16xf32>
    %1378 = arith.addf %1375, %1377 : vector<16x16xf32>
    %c0_1126 = arith.constant 0 : index
    %c0_1127 = arith.constant 0 : index
    %1379 = memref.load %arg3[%c0_1126, %c0_1127] : memref<1x72xf32, #tpu.memory_space<smem>>
    %c0_1128 = arith.constant 0 : index
    %c0_1129 = arith.constant 0 : index
    %c0_1130 = arith.constant 0 : index
    %1380 = vector.load %arg8[%c0_1128, %c0_1129, %c0_1130] : memref<8x18x18xf32, #tpu.memory_space<vmem>>, vector<1x16x16xf32>
    %1381 = vector.shape_cast %1380 : vector<1x16x16xf32> to vector<16x16xf32>
    %1382 = vector.broadcast %1379 : f32 to vector<16x16xf32>
    %1383 = arith.mulf %1382, %1381 : vector<16x16xf32>
    %1384 = arith.addf %1378, %1383 : vector<16x16xf32>
    %c0_1131 = arith.constant 0 : index
    %c1_1132 = arith.constant 1 : index
    %1385 = memref.load %arg3[%c0_1131, %c1_1132] : memref<1x72xf32, #tpu.memory_space<smem>>
    %c0_1133 = arith.constant 0 : index
    %c0_1134 = arith.constant 0 : index
    %c1_1135 = arith.constant 1 : index
    %1386 = vector.load %arg8[%c0_1133, %c0_1134, %c1_1135] : memref<8x18x18xf32, #tpu.memory_space<vmem>>, vector<1x16x16xf32>
    %1387 = vector.shape_cast %1386 : vector<1x16x16xf32> to vector<16x16xf32>
    %1388 = vector.broadcast %1385 : f32 to vector<16x16xf32>
    %1389 = arith.mulf %1388, %1387 : vector<16x16xf32>
    %1390 = arith.addf %1384, %1389 : vector<16x16xf32>
    %c0_1136 = arith.constant 0 : index
    %c2_1137 = arith.constant 2 : index
    %1391 = memref.load %arg3[%c0_1136, %c2_1137] : memref<1x72xf32, #tpu.memory_space<smem>>
    %c0_1138 = arith.constant 0 : index
    %c0_1139 = arith.constant 0 : index
    %c2_1140 = arith.constant 2 : index
    %1392 = vector.load %arg8[%c0_1138, %c0_1139, %c2_1140] : memref<8x18x18xf32, #tpu.memory_space<vmem>>, vector<1x16x16xf32>
    %1393 = vector.shape_cast %1392 : vector<1x16x16xf32> to vector<16x16xf32>
    %1394 = vector.broadcast %1391 : f32 to vector<16x16xf32>
    %1395 = arith.mulf %1394, %1393 : vector<16x16xf32>
    %1396 = arith.addf %1390, %1395 : vector<16x16xf32>
    %c0_1141 = arith.constant 0 : index
    %c3_1142 = arith.constant 3 : index
    %1397 = memref.load %arg3[%c0_1141, %c3_1142] : memref<1x72xf32, #tpu.memory_space<smem>>
    %c0_1143 = arith.constant 0 : index
    %c1_1144 = arith.constant 1 : index
    %c0_1145 = arith.constant 0 : index
    %1398 = vector.load %arg8[%c0_1143, %c1_1144, %c0_1145] : memref<8x18x18xf32, #tpu.memory_space<vmem>>, vector<1x16x16xf32>
    %1399 = vector.shape_cast %1398 : vector<1x16x16xf32> to vector<16x16xf32>
    %1400 = vector.broadcast %1397 : f32 to vector<16x16xf32>
    %1401 = arith.mulf %1400, %1399 : vector<16x16xf32>
    %1402 = arith.addf %1396, %1401 : vector<16x16xf32>
    %c0_1146 = arith.constant 0 : index
    %c4_1147 = arith.constant 4 : index
    %1403 = memref.load %arg3[%c0_1146, %c4_1147] : memref<1x72xf32, #tpu.memory_space<smem>>
    %c0_1148 = arith.constant 0 : index
    %c1_1149 = arith.constant 1 : index
    %c1_1150 = arith.constant 1 : index
    %1404 = vector.load %arg8[%c0_1148, %c1_1149, %c1_1150] : memref<8x18x18xf32, #tpu.memory_space<vmem>>, vector<1x16x16xf32>
    %1405 = vector.shape_cast %1404 : vector<1x16x16xf32> to vector<16x16xf32>
    %1406 = vector.broadcast %1403 : f32 to vector<16x16xf32>
    %1407 = arith.mulf %1406, %1405 : vector<16x16xf32>
    %1408 = arith.addf %1402, %1407 : vector<16x16xf32>
    %c0_1151 = arith.constant 0 : index
    %c5_1152 = arith.constant 5 : index
    %1409 = memref.load %arg3[%c0_1151, %c5_1152] : memref<1x72xf32, #tpu.memory_space<smem>>
    %c0_1153 = arith.constant 0 : index
    %c1_1154 = arith.constant 1 : index
    %c2_1155 = arith.constant 2 : index
    %1410 = vector.load %arg8[%c0_1153, %c1_1154, %c2_1155] : memref<8x18x18xf32, #tpu.memory_space<vmem>>, vector<1x16x16xf32>
    %1411 = vector.shape_cast %1410 : vector<1x16x16xf32> to vector<16x16xf32>
    %1412 = vector.broadcast %1409 : f32 to vector<16x16xf32>
    %1413 = arith.mulf %1412, %1411 : vector<16x16xf32>
    %1414 = arith.addf %1408, %1413 : vector<16x16xf32>
    %c0_1156 = arith.constant 0 : index
    %c6_1157 = arith.constant 6 : index
    %1415 = memref.load %arg3[%c0_1156, %c6_1157] : memref<1x72xf32, #tpu.memory_space<smem>>
    %c0_1158 = arith.constant 0 : index
    %c2_1159 = arith.constant 2 : index
    %c0_1160 = arith.constant 0 : index
    %1416 = vector.load %arg8[%c0_1158, %c2_1159, %c0_1160] : memref<8x18x18xf32, #tpu.memory_space<vmem>>, vector<1x16x16xf32>
    %1417 = vector.shape_cast %1416 : vector<1x16x16xf32> to vector<16x16xf32>
    %1418 = vector.broadcast %1415 : f32 to vector<16x16xf32>
    %1419 = arith.mulf %1418, %1417 : vector<16x16xf32>
    %1420 = arith.addf %1414, %1419 : vector<16x16xf32>
    %c0_1161 = arith.constant 0 : index
    %c7_1162 = arith.constant 7 : index
    %1421 = memref.load %arg3[%c0_1161, %c7_1162] : memref<1x72xf32, #tpu.memory_space<smem>>
    %c0_1163 = arith.constant 0 : index
    %c2_1164 = arith.constant 2 : index
    %c1_1165 = arith.constant 1 : index
    %1422 = vector.load %arg8[%c0_1163, %c2_1164, %c1_1165] : memref<8x18x18xf32, #tpu.memory_space<vmem>>, vector<1x16x16xf32>
    %1423 = vector.shape_cast %1422 : vector<1x16x16xf32> to vector<16x16xf32>
    %1424 = vector.broadcast %1421 : f32 to vector<16x16xf32>
    %1425 = arith.mulf %1424, %1423 : vector<16x16xf32>
    %1426 = arith.addf %1420, %1425 : vector<16x16xf32>
    %c0_1166 = arith.constant 0 : index
    %c8_1167 = arith.constant 8 : index
    %1427 = memref.load %arg3[%c0_1166, %c8_1167] : memref<1x72xf32, #tpu.memory_space<smem>>
    %c0_1168 = arith.constant 0 : index
    %c2_1169 = arith.constant 2 : index
    %c2_1170 = arith.constant 2 : index
    %1428 = vector.load %arg8[%c0_1168, %c2_1169, %c2_1170] : memref<8x18x18xf32, #tpu.memory_space<vmem>>, vector<1x16x16xf32>
    %1429 = vector.shape_cast %1428 : vector<1x16x16xf32> to vector<16x16xf32>
    %1430 = vector.broadcast %1427 : f32 to vector<16x16xf32>
    %1431 = arith.mulf %1430, %1429 : vector<16x16xf32>
    %1432 = arith.addf %1426, %1431 : vector<16x16xf32>
    %c0_1171 = arith.constant 0 : index
    %c9_1172 = arith.constant 9 : index
    %1433 = memref.load %arg3[%c0_1171, %c9_1172] : memref<1x72xf32, #tpu.memory_space<smem>>
    %c1_1173 = arith.constant 1 : index
    %c0_1174 = arith.constant 0 : index
    %c0_1175 = arith.constant 0 : index
    %1434 = vector.load %arg8[%c1_1173, %c0_1174, %c0_1175] : memref<8x18x18xf32, #tpu.memory_space<vmem>>, vector<1x16x16xf32>
    %1435 = vector.shape_cast %1434 : vector<1x16x16xf32> to vector<16x16xf32>
    %1436 = vector.broadcast %1433 : f32 to vector<16x16xf32>
    %1437 = arith.mulf %1436, %1435 : vector<16x16xf32>
    %1438 = arith.addf %1432, %1437 : vector<16x16xf32>
    %c0_1176 = arith.constant 0 : index
    %c10_1177 = arith.constant 10 : index
    %1439 = memref.load %arg3[%c0_1176, %c10_1177] : memref<1x72xf32, #tpu.memory_space<smem>>
    %c1_1178 = arith.constant 1 : index
    %c0_1179 = arith.constant 0 : index
    %c1_1180 = arith.constant 1 : index
    %1440 = vector.load %arg8[%c1_1178, %c0_1179, %c1_1180] : memref<8x18x18xf32, #tpu.memory_space<vmem>>, vector<1x16x16xf32>
    %1441 = vector.shape_cast %1440 : vector<1x16x16xf32> to vector<16x16xf32>
    %1442 = vector.broadcast %1439 : f32 to vector<16x16xf32>
    %1443 = arith.mulf %1442, %1441 : vector<16x16xf32>
    %1444 = arith.addf %1438, %1443 : vector<16x16xf32>
    %c0_1181 = arith.constant 0 : index
    %c11_1182 = arith.constant 11 : index
    %1445 = memref.load %arg3[%c0_1181, %c11_1182] : memref<1x72xf32, #tpu.memory_space<smem>>
    %c1_1183 = arith.constant 1 : index
    %c0_1184 = arith.constant 0 : index
    %c2_1185 = arith.constant 2 : index
    %1446 = vector.load %arg8[%c1_1183, %c0_1184, %c2_1185] : memref<8x18x18xf32, #tpu.memory_space<vmem>>, vector<1x16x16xf32>
    %1447 = vector.shape_cast %1446 : vector<1x16x16xf32> to vector<16x16xf32>
    %1448 = vector.broadcast %1445 : f32 to vector<16x16xf32>
    %1449 = arith.mulf %1448, %1447 : vector<16x16xf32>
    %1450 = arith.addf %1444, %1449 : vector<16x16xf32>
    %c0_1186 = arith.constant 0 : index
    %c12_1187 = arith.constant 12 : index
    %1451 = memref.load %arg3[%c0_1186, %c12_1187] : memref<1x72xf32, #tpu.memory_space<smem>>
    %c1_1188 = arith.constant 1 : index
    %c1_1189 = arith.constant 1 : index
    %c0_1190 = arith.constant 0 : index
    %1452 = vector.load %arg8[%c1_1188, %c1_1189, %c0_1190] : memref<8x18x18xf32, #tpu.memory_space<vmem>>, vector<1x16x16xf32>
    %1453 = vector.shape_cast %1452 : vector<1x16x16xf32> to vector<16x16xf32>
    %1454 = vector.broadcast %1451 : f32 to vector<16x16xf32>
    %1455 = arith.mulf %1454, %1453 : vector<16x16xf32>
    %1456 = arith.addf %1450, %1455 : vector<16x16xf32>
    %c0_1191 = arith.constant 0 : index
    %c13_1192 = arith.constant 13 : index
    %1457 = memref.load %arg3[%c0_1191, %c13_1192] : memref<1x72xf32, #tpu.memory_space<smem>>
    %c1_1193 = arith.constant 1 : index
    %c1_1194 = arith.constant 1 : index
    %c1_1195 = arith.constant 1 : index
    %1458 = vector.load %arg8[%c1_1193, %c1_1194, %c1_1195] : memref<8x18x18xf32, #tpu.memory_space<vmem>>, vector<1x16x16xf32>
    %1459 = vector.shape_cast %1458 : vector<1x16x16xf32> to vector<16x16xf32>
    %1460 = vector.broadcast %1457 : f32 to vector<16x16xf32>
    %1461 = arith.mulf %1460, %1459 : vector<16x16xf32>
    %1462 = arith.addf %1456, %1461 : vector<16x16xf32>
    %c0_1196 = arith.constant 0 : index
    %c14_1197 = arith.constant 14 : index
    %1463 = memref.load %arg3[%c0_1196, %c14_1197] : memref<1x72xf32, #tpu.memory_space<smem>>
    %c1_1198 = arith.constant 1 : index
    %c1_1199 = arith.constant 1 : index
    %c2_1200 = arith.constant 2 : index
    %1464 = vector.load %arg8[%c1_1198, %c1_1199, %c2_1200] : memref<8x18x18xf32, #tpu.memory_space<vmem>>, vector<1x16x16xf32>
    %1465 = vector.shape_cast %1464 : vector<1x16x16xf32> to vector<16x16xf32>
    %1466 = vector.broadcast %1463 : f32 to vector<16x16xf32>
    %1467 = arith.mulf %1466, %1465 : vector<16x16xf32>
    %1468 = arith.addf %1462, %1467 : vector<16x16xf32>
    %c0_1201 = arith.constant 0 : index
    %c15_1202 = arith.constant 15 : index
    %1469 = memref.load %arg3[%c0_1201, %c15_1202] : memref<1x72xf32, #tpu.memory_space<smem>>
    %c1_1203 = arith.constant 1 : index
    %c2_1204 = arith.constant 2 : index
    %c0_1205 = arith.constant 0 : index
    %1470 = vector.load %arg8[%c1_1203, %c2_1204, %c0_1205] : memref<8x18x18xf32, #tpu.memory_space<vmem>>, vector<1x16x16xf32>
    %1471 = vector.shape_cast %1470 : vector<1x16x16xf32> to vector<16x16xf32>
    %1472 = vector.broadcast %1469 : f32 to vector<16x16xf32>
    %1473 = arith.mulf %1472, %1471 : vector<16x16xf32>
    %1474 = arith.addf %1468, %1473 : vector<16x16xf32>
    %c0_1206 = arith.constant 0 : index
    %c16_1207 = arith.constant 16 : index
    %1475 = memref.load %arg3[%c0_1206, %c16_1207] : memref<1x72xf32, #tpu.memory_space<smem>>
    %c1_1208 = arith.constant 1 : index
    %c2_1209 = arith.constant 2 : index
    %c1_1210 = arith.constant 1 : index
    %1476 = vector.load %arg8[%c1_1208, %c2_1209, %c1_1210] : memref<8x18x18xf32, #tpu.memory_space<vmem>>, vector<1x16x16xf32>
    %1477 = vector.shape_cast %1476 : vector<1x16x16xf32> to vector<16x16xf32>
    %1478 = vector.broadcast %1475 : f32 to vector<16x16xf32>
    %1479 = arith.mulf %1478, %1477 : vector<16x16xf32>
    %1480 = arith.addf %1474, %1479 : vector<16x16xf32>
    %c0_1211 = arith.constant 0 : index
    %c17_1212 = arith.constant 17 : index
    %1481 = memref.load %arg3[%c0_1211, %c17_1212] : memref<1x72xf32, #tpu.memory_space<smem>>
    %c1_1213 = arith.constant 1 : index
    %c2_1214 = arith.constant 2 : index
    %c2_1215 = arith.constant 2 : index
    %1482 = vector.load %arg8[%c1_1213, %c2_1214, %c2_1215] : memref<8x18x18xf32, #tpu.memory_space<vmem>>, vector<1x16x16xf32>
    %1483 = vector.shape_cast %1482 : vector<1x16x16xf32> to vector<16x16xf32>
    %1484 = vector.broadcast %1481 : f32 to vector<16x16xf32>
    %1485 = arith.mulf %1484, %1483 : vector<16x16xf32>
    %1486 = arith.addf %1480, %1485 : vector<16x16xf32>
    %c0_1216 = arith.constant 0 : index
    %c18_1217 = arith.constant 18 : index
    %1487 = memref.load %arg3[%c0_1216, %c18_1217] : memref<1x72xf32, #tpu.memory_space<smem>>
    %c2_1218 = arith.constant 2 : index
    %c0_1219 = arith.constant 0 : index
    %c0_1220 = arith.constant 0 : index
    %1488 = vector.load %arg8[%c2_1218, %c0_1219, %c0_1220] : memref<8x18x18xf32, #tpu.memory_space<vmem>>, vector<1x16x16xf32>
    %1489 = vector.shape_cast %1488 : vector<1x16x16xf32> to vector<16x16xf32>
    %1490 = vector.broadcast %1487 : f32 to vector<16x16xf32>
    %1491 = arith.mulf %1490, %1489 : vector<16x16xf32>
    %1492 = arith.addf %1486, %1491 : vector<16x16xf32>
    %c0_1221 = arith.constant 0 : index
    %c19_1222 = arith.constant 19 : index
    %1493 = memref.load %arg3[%c0_1221, %c19_1222] : memref<1x72xf32, #tpu.memory_space<smem>>
    %c2_1223 = arith.constant 2 : index
    %c0_1224 = arith.constant 0 : index
    %c1_1225 = arith.constant 1 : index
    %1494 = vector.load %arg8[%c2_1223, %c0_1224, %c1_1225] : memref<8x18x18xf32, #tpu.memory_space<vmem>>, vector<1x16x16xf32>
    %1495 = vector.shape_cast %1494 : vector<1x16x16xf32> to vector<16x16xf32>
    %1496 = vector.broadcast %1493 : f32 to vector<16x16xf32>
    %1497 = arith.mulf %1496, %1495 : vector<16x16xf32>
    %1498 = arith.addf %1492, %1497 : vector<16x16xf32>
    %c0_1226 = arith.constant 0 : index
    %c20_1227 = arith.constant 20 : index
    %1499 = memref.load %arg3[%c0_1226, %c20_1227] : memref<1x72xf32, #tpu.memory_space<smem>>
    %c2_1228 = arith.constant 2 : index
    %c0_1229 = arith.constant 0 : index
    %c2_1230 = arith.constant 2 : index
    %1500 = vector.load %arg8[%c2_1228, %c0_1229, %c2_1230] : memref<8x18x18xf32, #tpu.memory_space<vmem>>, vector<1x16x16xf32>
    %1501 = vector.shape_cast %1500 : vector<1x16x16xf32> to vector<16x16xf32>
    %1502 = vector.broadcast %1499 : f32 to vector<16x16xf32>
    %1503 = arith.mulf %1502, %1501 : vector<16x16xf32>
    %1504 = arith.addf %1498, %1503 : vector<16x16xf32>
    %c0_1231 = arith.constant 0 : index
    %c21_1232 = arith.constant 21 : index
    %1505 = memref.load %arg3[%c0_1231, %c21_1232] : memref<1x72xf32, #tpu.memory_space<smem>>
    %c2_1233 = arith.constant 2 : index
    %c1_1234 = arith.constant 1 : index
    %c0_1235 = arith.constant 0 : index
    %1506 = vector.load %arg8[%c2_1233, %c1_1234, %c0_1235] : memref<8x18x18xf32, #tpu.memory_space<vmem>>, vector<1x16x16xf32>
    %1507 = vector.shape_cast %1506 : vector<1x16x16xf32> to vector<16x16xf32>
    %1508 = vector.broadcast %1505 : f32 to vector<16x16xf32>
    %1509 = arith.mulf %1508, %1507 : vector<16x16xf32>
    %1510 = arith.addf %1504, %1509 : vector<16x16xf32>
    %c0_1236 = arith.constant 0 : index
    %c22_1237 = arith.constant 22 : index
    %1511 = memref.load %arg3[%c0_1236, %c22_1237] : memref<1x72xf32, #tpu.memory_space<smem>>
    %c2_1238 = arith.constant 2 : index
    %c1_1239 = arith.constant 1 : index
    %c1_1240 = arith.constant 1 : index
    %1512 = vector.load %arg8[%c2_1238, %c1_1239, %c1_1240] : memref<8x18x18xf32, #tpu.memory_space<vmem>>, vector<1x16x16xf32>
    %1513 = vector.shape_cast %1512 : vector<1x16x16xf32> to vector<16x16xf32>
    %1514 = vector.broadcast %1511 : f32 to vector<16x16xf32>
    %1515 = arith.mulf %1514, %1513 : vector<16x16xf32>
    %1516 = arith.addf %1510, %1515 : vector<16x16xf32>
    %c0_1241 = arith.constant 0 : index
    %c23_1242 = arith.constant 23 : index
    %1517 = memref.load %arg3[%c0_1241, %c23_1242] : memref<1x72xf32, #tpu.memory_space<smem>>
    %c2_1243 = arith.constant 2 : index
    %c1_1244 = arith.constant 1 : index
    %c2_1245 = arith.constant 2 : index
    %1518 = vector.load %arg8[%c2_1243, %c1_1244, %c2_1245] : memref<8x18x18xf32, #tpu.memory_space<vmem>>, vector<1x16x16xf32>
    %1519 = vector.shape_cast %1518 : vector<1x16x16xf32> to vector<16x16xf32>
    %1520 = vector.broadcast %1517 : f32 to vector<16x16xf32>
    %1521 = arith.mulf %1520, %1519 : vector<16x16xf32>
    %1522 = arith.addf %1516, %1521 : vector<16x16xf32>
    %c0_1246 = arith.constant 0 : index
    %c24_1247 = arith.constant 24 : index
    %1523 = memref.load %arg3[%c0_1246, %c24_1247] : memref<1x72xf32, #tpu.memory_space<smem>>
    %c2_1248 = arith.constant 2 : index
    %c2_1249 = arith.constant 2 : index
    %c0_1250 = arith.constant 0 : index
    %1524 = vector.load %arg8[%c2_1248, %c2_1249, %c0_1250] : memref<8x18x18xf32, #tpu.memory_space<vmem>>, vector<1x16x16xf32>
    %1525 = vector.shape_cast %1524 : vector<1x16x16xf32> to vector<16x16xf32>
    %1526 = vector.broadcast %1523 : f32 to vector<16x16xf32>
    %1527 = arith.mulf %1526, %1525 : vector<16x16xf32>
    %1528 = arith.addf %1522, %1527 : vector<16x16xf32>
    %c0_1251 = arith.constant 0 : index
    %c25_1252 = arith.constant 25 : index
    %1529 = memref.load %arg3[%c0_1251, %c25_1252] : memref<1x72xf32, #tpu.memory_space<smem>>
    %c2_1253 = arith.constant 2 : index
    %c2_1254 = arith.constant 2 : index
    %c1_1255 = arith.constant 1 : index
    %1530 = vector.load %arg8[%c2_1253, %c2_1254, %c1_1255] : memref<8x18x18xf32, #tpu.memory_space<vmem>>, vector<1x16x16xf32>
    %1531 = vector.shape_cast %1530 : vector<1x16x16xf32> to vector<16x16xf32>
    %1532 = vector.broadcast %1529 : f32 to vector<16x16xf32>
    %1533 = arith.mulf %1532, %1531 : vector<16x16xf32>
    %1534 = arith.addf %1528, %1533 : vector<16x16xf32>
    %c0_1256 = arith.constant 0 : index
    %c26_1257 = arith.constant 26 : index
    %1535 = memref.load %arg3[%c0_1256, %c26_1257] : memref<1x72xf32, #tpu.memory_space<smem>>
    %c2_1258 = arith.constant 2 : index
    %c2_1259 = arith.constant 2 : index
    %c2_1260 = arith.constant 2 : index
    %1536 = vector.load %arg8[%c2_1258, %c2_1259, %c2_1260] : memref<8x18x18xf32, #tpu.memory_space<vmem>>, vector<1x16x16xf32>
    %1537 = vector.shape_cast %1536 : vector<1x16x16xf32> to vector<16x16xf32>
    %1538 = vector.broadcast %1535 : f32 to vector<16x16xf32>
    %1539 = arith.mulf %1538, %1537 : vector<16x16xf32>
    %1540 = arith.addf %1534, %1539 : vector<16x16xf32>
    %c0_1261 = arith.constant 0 : index
    %c27 = arith.constant 27 : index
    %1541 = memref.load %arg3[%c0_1261, %c27] : memref<1x72xf32, #tpu.memory_space<smem>>
    %c3_1262 = arith.constant 3 : index
    %c0_1263 = arith.constant 0 : index
    %c0_1264 = arith.constant 0 : index
    %1542 = vector.load %arg8[%c3_1262, %c0_1263, %c0_1264] : memref<8x18x18xf32, #tpu.memory_space<vmem>>, vector<1x16x16xf32>
    %1543 = vector.shape_cast %1542 : vector<1x16x16xf32> to vector<16x16xf32>
    %1544 = vector.broadcast %1541 : f32 to vector<16x16xf32>
    %1545 = arith.mulf %1544, %1543 : vector<16x16xf32>
    %1546 = arith.addf %1540, %1545 : vector<16x16xf32>
    %c0_1265 = arith.constant 0 : index
    %c28 = arith.constant 28 : index
    %1547 = memref.load %arg3[%c0_1265, %c28] : memref<1x72xf32, #tpu.memory_space<smem>>
    %c3_1266 = arith.constant 3 : index
    %c0_1267 = arith.constant 0 : index
    %c1_1268 = arith.constant 1 : index
    %1548 = vector.load %arg8[%c3_1266, %c0_1267, %c1_1268] : memref<8x18x18xf32, #tpu.memory_space<vmem>>, vector<1x16x16xf32>
    %1549 = vector.shape_cast %1548 : vector<1x16x16xf32> to vector<16x16xf32>
    %1550 = vector.broadcast %1547 : f32 to vector<16x16xf32>
    %1551 = arith.mulf %1550, %1549 : vector<16x16xf32>
    %1552 = arith.addf %1546, %1551 : vector<16x16xf32>
    %c0_1269 = arith.constant 0 : index
    %c29 = arith.constant 29 : index
    %1553 = memref.load %arg3[%c0_1269, %c29] : memref<1x72xf32, #tpu.memory_space<smem>>
    %c3_1270 = arith.constant 3 : index
    %c0_1271 = arith.constant 0 : index
    %c2_1272 = arith.constant 2 : index
    %1554 = vector.load %arg8[%c3_1270, %c0_1271, %c2_1272] : memref<8x18x18xf32, #tpu.memory_space<vmem>>, vector<1x16x16xf32>
    %1555 = vector.shape_cast %1554 : vector<1x16x16xf32> to vector<16x16xf32>
    %1556 = vector.broadcast %1553 : f32 to vector<16x16xf32>
    %1557 = arith.mulf %1556, %1555 : vector<16x16xf32>
    %1558 = arith.addf %1552, %1557 : vector<16x16xf32>
    %c0_1273 = arith.constant 0 : index
    %c30 = arith.constant 30 : index
    %1559 = memref.load %arg3[%c0_1273, %c30] : memref<1x72xf32, #tpu.memory_space<smem>>
    %c3_1274 = arith.constant 3 : index
    %c1_1275 = arith.constant 1 : index
    %c0_1276 = arith.constant 0 : index
    %1560 = vector.load %arg8[%c3_1274, %c1_1275, %c0_1276] : memref<8x18x18xf32, #tpu.memory_space<vmem>>, vector<1x16x16xf32>
    %1561 = vector.shape_cast %1560 : vector<1x16x16xf32> to vector<16x16xf32>
    %1562 = vector.broadcast %1559 : f32 to vector<16x16xf32>
    %1563 = arith.mulf %1562, %1561 : vector<16x16xf32>
    %1564 = arith.addf %1558, %1563 : vector<16x16xf32>
    %c0_1277 = arith.constant 0 : index
    %c31 = arith.constant 31 : index
    %1565 = memref.load %arg3[%c0_1277, %c31] : memref<1x72xf32, #tpu.memory_space<smem>>
    %c3_1278 = arith.constant 3 : index
    %c1_1279 = arith.constant 1 : index
    %c1_1280 = arith.constant 1 : index
    %1566 = vector.load %arg8[%c3_1278, %c1_1279, %c1_1280] : memref<8x18x18xf32, #tpu.memory_space<vmem>>, vector<1x16x16xf32>
    %1567 = vector.shape_cast %1566 : vector<1x16x16xf32> to vector<16x16xf32>
    %1568 = vector.broadcast %1565 : f32 to vector<16x16xf32>
    %1569 = arith.mulf %1568, %1567 : vector<16x16xf32>
    %1570 = arith.addf %1564, %1569 : vector<16x16xf32>
    %c0_1281 = arith.constant 0 : index
    %c32 = arith.constant 32 : index
    %1571 = memref.load %arg3[%c0_1281, %c32] : memref<1x72xf32, #tpu.memory_space<smem>>
    %c3_1282 = arith.constant 3 : index
    %c1_1283 = arith.constant 1 : index
    %c2_1284 = arith.constant 2 : index
    %1572 = vector.load %arg8[%c3_1282, %c1_1283, %c2_1284] : memref<8x18x18xf32, #tpu.memory_space<vmem>>, vector<1x16x16xf32>
    %1573 = vector.shape_cast %1572 : vector<1x16x16xf32> to vector<16x16xf32>
    %1574 = vector.broadcast %1571 : f32 to vector<16x16xf32>
    %1575 = arith.mulf %1574, %1573 : vector<16x16xf32>
    %1576 = arith.addf %1570, %1575 : vector<16x16xf32>
    %c0_1285 = arith.constant 0 : index
    %c33 = arith.constant 33 : index
    %1577 = memref.load %arg3[%c0_1285, %c33] : memref<1x72xf32, #tpu.memory_space<smem>>
    %c3_1286 = arith.constant 3 : index
    %c2_1287 = arith.constant 2 : index
    %c0_1288 = arith.constant 0 : index
    %1578 = vector.load %arg8[%c3_1286, %c2_1287, %c0_1288] : memref<8x18x18xf32, #tpu.memory_space<vmem>>, vector<1x16x16xf32>
    %1579 = vector.shape_cast %1578 : vector<1x16x16xf32> to vector<16x16xf32>
    %1580 = vector.broadcast %1577 : f32 to vector<16x16xf32>
    %1581 = arith.mulf %1580, %1579 : vector<16x16xf32>
    %1582 = arith.addf %1576, %1581 : vector<16x16xf32>
    %c0_1289 = arith.constant 0 : index
    %c34 = arith.constant 34 : index
    %1583 = memref.load %arg3[%c0_1289, %c34] : memref<1x72xf32, #tpu.memory_space<smem>>
    %c3_1290 = arith.constant 3 : index
    %c2_1291 = arith.constant 2 : index
    %c1_1292 = arith.constant 1 : index
    %1584 = vector.load %arg8[%c3_1290, %c2_1291, %c1_1292] : memref<8x18x18xf32, #tpu.memory_space<vmem>>, vector<1x16x16xf32>
    %1585 = vector.shape_cast %1584 : vector<1x16x16xf32> to vector<16x16xf32>
    %1586 = vector.broadcast %1583 : f32 to vector<16x16xf32>
    %1587 = arith.mulf %1586, %1585 : vector<16x16xf32>
    %1588 = arith.addf %1582, %1587 : vector<16x16xf32>
    %c0_1293 = arith.constant 0 : index
    %c35 = arith.constant 35 : index
    %1589 = memref.load %arg3[%c0_1293, %c35] : memref<1x72xf32, #tpu.memory_space<smem>>
    %c3_1294 = arith.constant 3 : index
    %c2_1295 = arith.constant 2 : index
    %c2_1296 = arith.constant 2 : index
    %1590 = vector.load %arg8[%c3_1294, %c2_1295, %c2_1296] : memref<8x18x18xf32, #tpu.memory_space<vmem>>, vector<1x16x16xf32>
    %1591 = vector.shape_cast %1590 : vector<1x16x16xf32> to vector<16x16xf32>
    %1592 = vector.broadcast %1589 : f32 to vector<16x16xf32>
    %1593 = arith.mulf %1592, %1591 : vector<16x16xf32>
    %1594 = arith.addf %1588, %1593 : vector<16x16xf32>
    %c0_1297 = arith.constant 0 : index
    %c36 = arith.constant 36 : index
    %1595 = memref.load %arg3[%c0_1297, %c36] : memref<1x72xf32, #tpu.memory_space<smem>>
    %c4_1298 = arith.constant 4 : index
    %c0_1299 = arith.constant 0 : index
    %c0_1300 = arith.constant 0 : index
    %1596 = vector.load %arg8[%c4_1298, %c0_1299, %c0_1300] : memref<8x18x18xf32, #tpu.memory_space<vmem>>, vector<1x16x16xf32>
    %1597 = vector.shape_cast %1596 : vector<1x16x16xf32> to vector<16x16xf32>
    %1598 = vector.broadcast %1595 : f32 to vector<16x16xf32>
    %1599 = arith.mulf %1598, %1597 : vector<16x16xf32>
    %1600 = arith.addf %1594, %1599 : vector<16x16xf32>
    %c0_1301 = arith.constant 0 : index
    %c37 = arith.constant 37 : index
    %1601 = memref.load %arg3[%c0_1301, %c37] : memref<1x72xf32, #tpu.memory_space<smem>>
    %c4_1302 = arith.constant 4 : index
    %c0_1303 = arith.constant 0 : index
    %c1_1304 = arith.constant 1 : index
    %1602 = vector.load %arg8[%c4_1302, %c0_1303, %c1_1304] : memref<8x18x18xf32, #tpu.memory_space<vmem>>, vector<1x16x16xf32>
    %1603 = vector.shape_cast %1602 : vector<1x16x16xf32> to vector<16x16xf32>
    %1604 = vector.broadcast %1601 : f32 to vector<16x16xf32>
    %1605 = arith.mulf %1604, %1603 : vector<16x16xf32>
    %1606 = arith.addf %1600, %1605 : vector<16x16xf32>
    %c0_1305 = arith.constant 0 : index
    %c38 = arith.constant 38 : index
    %1607 = memref.load %arg3[%c0_1305, %c38] : memref<1x72xf32, #tpu.memory_space<smem>>
    %c4_1306 = arith.constant 4 : index
    %c0_1307 = arith.constant 0 : index
    %c2_1308 = arith.constant 2 : index
    %1608 = vector.load %arg8[%c4_1306, %c0_1307, %c2_1308] : memref<8x18x18xf32, #tpu.memory_space<vmem>>, vector<1x16x16xf32>
    %1609 = vector.shape_cast %1608 : vector<1x16x16xf32> to vector<16x16xf32>
    %1610 = vector.broadcast %1607 : f32 to vector<16x16xf32>
    %1611 = arith.mulf %1610, %1609 : vector<16x16xf32>
    %1612 = arith.addf %1606, %1611 : vector<16x16xf32>
    %c0_1309 = arith.constant 0 : index
    %c39 = arith.constant 39 : index
    %1613 = memref.load %arg3[%c0_1309, %c39] : memref<1x72xf32, #tpu.memory_space<smem>>
    %c4_1310 = arith.constant 4 : index
    %c1_1311 = arith.constant 1 : index
    %c0_1312 = arith.constant 0 : index
    %1614 = vector.load %arg8[%c4_1310, %c1_1311, %c0_1312] : memref<8x18x18xf32, #tpu.memory_space<vmem>>, vector<1x16x16xf32>
    %1615 = vector.shape_cast %1614 : vector<1x16x16xf32> to vector<16x16xf32>
    %1616 = vector.broadcast %1613 : f32 to vector<16x16xf32>
    %1617 = arith.mulf %1616, %1615 : vector<16x16xf32>
    %1618 = arith.addf %1612, %1617 : vector<16x16xf32>
    %c0_1313 = arith.constant 0 : index
    %c40 = arith.constant 40 : index
    %1619 = memref.load %arg3[%c0_1313, %c40] : memref<1x72xf32, #tpu.memory_space<smem>>
    %c4_1314 = arith.constant 4 : index
    %c1_1315 = arith.constant 1 : index
    %c1_1316 = arith.constant 1 : index
    %1620 = vector.load %arg8[%c4_1314, %c1_1315, %c1_1316] : memref<8x18x18xf32, #tpu.memory_space<vmem>>, vector<1x16x16xf32>
    %1621 = vector.shape_cast %1620 : vector<1x16x16xf32> to vector<16x16xf32>
    %1622 = vector.broadcast %1619 : f32 to vector<16x16xf32>
    %1623 = arith.mulf %1622, %1621 : vector<16x16xf32>
    %1624 = arith.addf %1618, %1623 : vector<16x16xf32>
    %c0_1317 = arith.constant 0 : index
    %c41 = arith.constant 41 : index
    %1625 = memref.load %arg3[%c0_1317, %c41] : memref<1x72xf32, #tpu.memory_space<smem>>
    %c4_1318 = arith.constant 4 : index
    %c1_1319 = arith.constant 1 : index
    %c2_1320 = arith.constant 2 : index
    %1626 = vector.load %arg8[%c4_1318, %c1_1319, %c2_1320] : memref<8x18x18xf32, #tpu.memory_space<vmem>>, vector<1x16x16xf32>
    %1627 = vector.shape_cast %1626 : vector<1x16x16xf32> to vector<16x16xf32>
    %1628 = vector.broadcast %1625 : f32 to vector<16x16xf32>
    %1629 = arith.mulf %1628, %1627 : vector<16x16xf32>
    %1630 = arith.addf %1624, %1629 : vector<16x16xf32>
    %c0_1321 = arith.constant 0 : index
    %c42 = arith.constant 42 : index
    %1631 = memref.load %arg3[%c0_1321, %c42] : memref<1x72xf32, #tpu.memory_space<smem>>
    %c4_1322 = arith.constant 4 : index
    %c2_1323 = arith.constant 2 : index
    %c0_1324 = arith.constant 0 : index
    %1632 = vector.load %arg8[%c4_1322, %c2_1323, %c0_1324] : memref<8x18x18xf32, #tpu.memory_space<vmem>>, vector<1x16x16xf32>
    %1633 = vector.shape_cast %1632 : vector<1x16x16xf32> to vector<16x16xf32>
    %1634 = vector.broadcast %1631 : f32 to vector<16x16xf32>
    %1635 = arith.mulf %1634, %1633 : vector<16x16xf32>
    %1636 = arith.addf %1630, %1635 : vector<16x16xf32>
    %c0_1325 = arith.constant 0 : index
    %c43 = arith.constant 43 : index
    %1637 = memref.load %arg3[%c0_1325, %c43] : memref<1x72xf32, #tpu.memory_space<smem>>
    %c4_1326 = arith.constant 4 : index
    %c2_1327 = arith.constant 2 : index
    %c1_1328 = arith.constant 1 : index
    %1638 = vector.load %arg8[%c4_1326, %c2_1327, %c1_1328] : memref<8x18x18xf32, #tpu.memory_space<vmem>>, vector<1x16x16xf32>
    %1639 = vector.shape_cast %1638 : vector<1x16x16xf32> to vector<16x16xf32>
    %1640 = vector.broadcast %1637 : f32 to vector<16x16xf32>
    %1641 = arith.mulf %1640, %1639 : vector<16x16xf32>
    %1642 = arith.addf %1636, %1641 : vector<16x16xf32>
    %c0_1329 = arith.constant 0 : index
    %c44 = arith.constant 44 : index
    %1643 = memref.load %arg3[%c0_1329, %c44] : memref<1x72xf32, #tpu.memory_space<smem>>
    %c4_1330 = arith.constant 4 : index
    %c2_1331 = arith.constant 2 : index
    %c2_1332 = arith.constant 2 : index
    %1644 = vector.load %arg8[%c4_1330, %c2_1331, %c2_1332] : memref<8x18x18xf32, #tpu.memory_space<vmem>>, vector<1x16x16xf32>
    %1645 = vector.shape_cast %1644 : vector<1x16x16xf32> to vector<16x16xf32>
    %1646 = vector.broadcast %1643 : f32 to vector<16x16xf32>
    %1647 = arith.mulf %1646, %1645 : vector<16x16xf32>
    %1648 = arith.addf %1642, %1647 : vector<16x16xf32>
    %c0_1333 = arith.constant 0 : index
    %c45 = arith.constant 45 : index
    %1649 = memref.load %arg3[%c0_1333, %c45] : memref<1x72xf32, #tpu.memory_space<smem>>
    %c5_1334 = arith.constant 5 : index
    %c0_1335 = arith.constant 0 : index
    %c0_1336 = arith.constant 0 : index
    %1650 = vector.load %arg8[%c5_1334, %c0_1335, %c0_1336] : memref<8x18x18xf32, #tpu.memory_space<vmem>>, vector<1x16x16xf32>
    %1651 = vector.shape_cast %1650 : vector<1x16x16xf32> to vector<16x16xf32>
    %1652 = vector.broadcast %1649 : f32 to vector<16x16xf32>
    %1653 = arith.mulf %1652, %1651 : vector<16x16xf32>
    %1654 = arith.addf %1648, %1653 : vector<16x16xf32>
    %c0_1337 = arith.constant 0 : index
    %c46 = arith.constant 46 : index
    %1655 = memref.load %arg3[%c0_1337, %c46] : memref<1x72xf32, #tpu.memory_space<smem>>
    %c5_1338 = arith.constant 5 : index
    %c0_1339 = arith.constant 0 : index
    %c1_1340 = arith.constant 1 : index
    %1656 = vector.load %arg8[%c5_1338, %c0_1339, %c1_1340] : memref<8x18x18xf32, #tpu.memory_space<vmem>>, vector<1x16x16xf32>
    %1657 = vector.shape_cast %1656 : vector<1x16x16xf32> to vector<16x16xf32>
    %1658 = vector.broadcast %1655 : f32 to vector<16x16xf32>
    %1659 = arith.mulf %1658, %1657 : vector<16x16xf32>
    %1660 = arith.addf %1654, %1659 : vector<16x16xf32>
    %c0_1341 = arith.constant 0 : index
    %c47 = arith.constant 47 : index
    %1661 = memref.load %arg3[%c0_1341, %c47] : memref<1x72xf32, #tpu.memory_space<smem>>
    %c5_1342 = arith.constant 5 : index
    %c0_1343 = arith.constant 0 : index
    %c2_1344 = arith.constant 2 : index
    %1662 = vector.load %arg8[%c5_1342, %c0_1343, %c2_1344] : memref<8x18x18xf32, #tpu.memory_space<vmem>>, vector<1x16x16xf32>
    %1663 = vector.shape_cast %1662 : vector<1x16x16xf32> to vector<16x16xf32>
    %1664 = vector.broadcast %1661 : f32 to vector<16x16xf32>
    %1665 = arith.mulf %1664, %1663 : vector<16x16xf32>
    %1666 = arith.addf %1660, %1665 : vector<16x16xf32>
    %c0_1345 = arith.constant 0 : index
    %c48 = arith.constant 48 : index
    %1667 = memref.load %arg3[%c0_1345, %c48] : memref<1x72xf32, #tpu.memory_space<smem>>
    %c5_1346 = arith.constant 5 : index
    %c1_1347 = arith.constant 1 : index
    %c0_1348 = arith.constant 0 : index
    %1668 = vector.load %arg8[%c5_1346, %c1_1347, %c0_1348] : memref<8x18x18xf32, #tpu.memory_space<vmem>>, vector<1x16x16xf32>
    %1669 = vector.shape_cast %1668 : vector<1x16x16xf32> to vector<16x16xf32>
    %1670 = vector.broadcast %1667 : f32 to vector<16x16xf32>
    %1671 = arith.mulf %1670, %1669 : vector<16x16xf32>
    %1672 = arith.addf %1666, %1671 : vector<16x16xf32>
    %c0_1349 = arith.constant 0 : index
    %c49 = arith.constant 49 : index
    %1673 = memref.load %arg3[%c0_1349, %c49] : memref<1x72xf32, #tpu.memory_space<smem>>
    %c5_1350 = arith.constant 5 : index
    %c1_1351 = arith.constant 1 : index
    %c1_1352 = arith.constant 1 : index
    %1674 = vector.load %arg8[%c5_1350, %c1_1351, %c1_1352] : memref<8x18x18xf32, #tpu.memory_space<vmem>>, vector<1x16x16xf32>
    %1675 = vector.shape_cast %1674 : vector<1x16x16xf32> to vector<16x16xf32>
    %1676 = vector.broadcast %1673 : f32 to vector<16x16xf32>
    %1677 = arith.mulf %1676, %1675 : vector<16x16xf32>
    %1678 = arith.addf %1672, %1677 : vector<16x16xf32>
    %c0_1353 = arith.constant 0 : index
    %c50 = arith.constant 50 : index
    %1679 = memref.load %arg3[%c0_1353, %c50] : memref<1x72xf32, #tpu.memory_space<smem>>
    %c5_1354 = arith.constant 5 : index
    %c1_1355 = arith.constant 1 : index
    %c2_1356 = arith.constant 2 : index
    %1680 = vector.load %arg8[%c5_1354, %c1_1355, %c2_1356] : memref<8x18x18xf32, #tpu.memory_space<vmem>>, vector<1x16x16xf32>
    %1681 = vector.shape_cast %1680 : vector<1x16x16xf32> to vector<16x16xf32>
    %1682 = vector.broadcast %1679 : f32 to vector<16x16xf32>
    %1683 = arith.mulf %1682, %1681 : vector<16x16xf32>
    %1684 = arith.addf %1678, %1683 : vector<16x16xf32>
    %c0_1357 = arith.constant 0 : index
    %c51 = arith.constant 51 : index
    %1685 = memref.load %arg3[%c0_1357, %c51] : memref<1x72xf32, #tpu.memory_space<smem>>
    %c5_1358 = arith.constant 5 : index
    %c2_1359 = arith.constant 2 : index
    %c0_1360 = arith.constant 0 : index
    %1686 = vector.load %arg8[%c5_1358, %c2_1359, %c0_1360] : memref<8x18x18xf32, #tpu.memory_space<vmem>>, vector<1x16x16xf32>
    %1687 = vector.shape_cast %1686 : vector<1x16x16xf32> to vector<16x16xf32>
    %1688 = vector.broadcast %1685 : f32 to vector<16x16xf32>
    %1689 = arith.mulf %1688, %1687 : vector<16x16xf32>
    %1690 = arith.addf %1684, %1689 : vector<16x16xf32>
    %c0_1361 = arith.constant 0 : index
    %c52 = arith.constant 52 : index
    %1691 = memref.load %arg3[%c0_1361, %c52] : memref<1x72xf32, #tpu.memory_space<smem>>
    %c5_1362 = arith.constant 5 : index
    %c2_1363 = arith.constant 2 : index
    %c1_1364 = arith.constant 1 : index
    %1692 = vector.load %arg8[%c5_1362, %c2_1363, %c1_1364] : memref<8x18x18xf32, #tpu.memory_space<vmem>>, vector<1x16x16xf32>
    %1693 = vector.shape_cast %1692 : vector<1x16x16xf32> to vector<16x16xf32>
    %1694 = vector.broadcast %1691 : f32 to vector<16x16xf32>
    %1695 = arith.mulf %1694, %1693 : vector<16x16xf32>
    %1696 = arith.addf %1690, %1695 : vector<16x16xf32>
    %c0_1365 = arith.constant 0 : index
    %c53 = arith.constant 53 : index
    %1697 = memref.load %arg3[%c0_1365, %c53] : memref<1x72xf32, #tpu.memory_space<smem>>
    %c5_1366 = arith.constant 5 : index
    %c2_1367 = arith.constant 2 : index
    %c2_1368 = arith.constant 2 : index
    %1698 = vector.load %arg8[%c5_1366, %c2_1367, %c2_1368] : memref<8x18x18xf32, #tpu.memory_space<vmem>>, vector<1x16x16xf32>
    %1699 = vector.shape_cast %1698 : vector<1x16x16xf32> to vector<16x16xf32>
    %1700 = vector.broadcast %1697 : f32 to vector<16x16xf32>
    %1701 = arith.mulf %1700, %1699 : vector<16x16xf32>
    %1702 = arith.addf %1696, %1701 : vector<16x16xf32>
    %c0_1369 = arith.constant 0 : index
    %c54 = arith.constant 54 : index
    %1703 = memref.load %arg3[%c0_1369, %c54] : memref<1x72xf32, #tpu.memory_space<smem>>
    %c6_1370 = arith.constant 6 : index
    %c0_1371 = arith.constant 0 : index
    %c0_1372 = arith.constant 0 : index
    %1704 = vector.load %arg8[%c6_1370, %c0_1371, %c0_1372] : memref<8x18x18xf32, #tpu.memory_space<vmem>>, vector<1x16x16xf32>
    %1705 = vector.shape_cast %1704 : vector<1x16x16xf32> to vector<16x16xf32>
    %1706 = vector.broadcast %1703 : f32 to vector<16x16xf32>
    %1707 = arith.mulf %1706, %1705 : vector<16x16xf32>
    %1708 = arith.addf %1702, %1707 : vector<16x16xf32>
    %c0_1373 = arith.constant 0 : index
    %c55 = arith.constant 55 : index
    %1709 = memref.load %arg3[%c0_1373, %c55] : memref<1x72xf32, #tpu.memory_space<smem>>
    %c6_1374 = arith.constant 6 : index
    %c0_1375 = arith.constant 0 : index
    %c1_1376 = arith.constant 1 : index
    %1710 = vector.load %arg8[%c6_1374, %c0_1375, %c1_1376] : memref<8x18x18xf32, #tpu.memory_space<vmem>>, vector<1x16x16xf32>
    %1711 = vector.shape_cast %1710 : vector<1x16x16xf32> to vector<16x16xf32>
    %1712 = vector.broadcast %1709 : f32 to vector<16x16xf32>
    %1713 = arith.mulf %1712, %1711 : vector<16x16xf32>
    %1714 = arith.addf %1708, %1713 : vector<16x16xf32>
    %c0_1377 = arith.constant 0 : index
    %c56 = arith.constant 56 : index
    %1715 = memref.load %arg3[%c0_1377, %c56] : memref<1x72xf32, #tpu.memory_space<smem>>
    %c6_1378 = arith.constant 6 : index
    %c0_1379 = arith.constant 0 : index
    %c2_1380 = arith.constant 2 : index
    %1716 = vector.load %arg8[%c6_1378, %c0_1379, %c2_1380] : memref<8x18x18xf32, #tpu.memory_space<vmem>>, vector<1x16x16xf32>
    %1717 = vector.shape_cast %1716 : vector<1x16x16xf32> to vector<16x16xf32>
    %1718 = vector.broadcast %1715 : f32 to vector<16x16xf32>
    %1719 = arith.mulf %1718, %1717 : vector<16x16xf32>
    %1720 = arith.addf %1714, %1719 : vector<16x16xf32>
    %c0_1381 = arith.constant 0 : index
    %c57 = arith.constant 57 : index
    %1721 = memref.load %arg3[%c0_1381, %c57] : memref<1x72xf32, #tpu.memory_space<smem>>
    %c6_1382 = arith.constant 6 : index
    %c1_1383 = arith.constant 1 : index
    %c0_1384 = arith.constant 0 : index
    %1722 = vector.load %arg8[%c6_1382, %c1_1383, %c0_1384] : memref<8x18x18xf32, #tpu.memory_space<vmem>>, vector<1x16x16xf32>
    %1723 = vector.shape_cast %1722 : vector<1x16x16xf32> to vector<16x16xf32>
    %1724 = vector.broadcast %1721 : f32 to vector<16x16xf32>
    %1725 = arith.mulf %1724, %1723 : vector<16x16xf32>
    %1726 = arith.addf %1720, %1725 : vector<16x16xf32>
    %c0_1385 = arith.constant 0 : index
    %c58 = arith.constant 58 : index
    %1727 = memref.load %arg3[%c0_1385, %c58] : memref<1x72xf32, #tpu.memory_space<smem>>
    %c6_1386 = arith.constant 6 : index
    %c1_1387 = arith.constant 1 : index
    %c1_1388 = arith.constant 1 : index
    %1728 = vector.load %arg8[%c6_1386, %c1_1387, %c1_1388] : memref<8x18x18xf32, #tpu.memory_space<vmem>>, vector<1x16x16xf32>
    %1729 = vector.shape_cast %1728 : vector<1x16x16xf32> to vector<16x16xf32>
    %1730 = vector.broadcast %1727 : f32 to vector<16x16xf32>
    %1731 = arith.mulf %1730, %1729 : vector<16x16xf32>
    %1732 = arith.addf %1726, %1731 : vector<16x16xf32>
    %c0_1389 = arith.constant 0 : index
    %c59 = arith.constant 59 : index
    %1733 = memref.load %arg3[%c0_1389, %c59] : memref<1x72xf32, #tpu.memory_space<smem>>
    %c6_1390 = arith.constant 6 : index
    %c1_1391 = arith.constant 1 : index
    %c2_1392 = arith.constant 2 : index
    %1734 = vector.load %arg8[%c6_1390, %c1_1391, %c2_1392] : memref<8x18x18xf32, #tpu.memory_space<vmem>>, vector<1x16x16xf32>
    %1735 = vector.shape_cast %1734 : vector<1x16x16xf32> to vector<16x16xf32>
    %1736 = vector.broadcast %1733 : f32 to vector<16x16xf32>
    %1737 = arith.mulf %1736, %1735 : vector<16x16xf32>
    %1738 = arith.addf %1732, %1737 : vector<16x16xf32>
    %c0_1393 = arith.constant 0 : index
    %c60 = arith.constant 60 : index
    %1739 = memref.load %arg3[%c0_1393, %c60] : memref<1x72xf32, #tpu.memory_space<smem>>
    %c6_1394 = arith.constant 6 : index
    %c2_1395 = arith.constant 2 : index
    %c0_1396 = arith.constant 0 : index
    %1740 = vector.load %arg8[%c6_1394, %c2_1395, %c0_1396] : memref<8x18x18xf32, #tpu.memory_space<vmem>>, vector<1x16x16xf32>
    %1741 = vector.shape_cast %1740 : vector<1x16x16xf32> to vector<16x16xf32>
    %1742 = vector.broadcast %1739 : f32 to vector<16x16xf32>
    %1743 = arith.mulf %1742, %1741 : vector<16x16xf32>
    %1744 = arith.addf %1738, %1743 : vector<16x16xf32>
    %c0_1397 = arith.constant 0 : index
    %c61 = arith.constant 61 : index
    %1745 = memref.load %arg3[%c0_1397, %c61] : memref<1x72xf32, #tpu.memory_space<smem>>
    %c6_1398 = arith.constant 6 : index
    %c2_1399 = arith.constant 2 : index
    %c1_1400 = arith.constant 1 : index
    %1746 = vector.load %arg8[%c6_1398, %c2_1399, %c1_1400] : memref<8x18x18xf32, #tpu.memory_space<vmem>>, vector<1x16x16xf32>
    %1747 = vector.shape_cast %1746 : vector<1x16x16xf32> to vector<16x16xf32>
    %1748 = vector.broadcast %1745 : f32 to vector<16x16xf32>
    %1749 = arith.mulf %1748, %1747 : vector<16x16xf32>
    %1750 = arith.addf %1744, %1749 : vector<16x16xf32>
    %c0_1401 = arith.constant 0 : index
    %c62 = arith.constant 62 : index
    %1751 = memref.load %arg3[%c0_1401, %c62] : memref<1x72xf32, #tpu.memory_space<smem>>
    %c6_1402 = arith.constant 6 : index
    %c2_1403 = arith.constant 2 : index
    %c2_1404 = arith.constant 2 : index
    %1752 = vector.load %arg8[%c6_1402, %c2_1403, %c2_1404] : memref<8x18x18xf32, #tpu.memory_space<vmem>>, vector<1x16x16xf32>
    %1753 = vector.shape_cast %1752 : vector<1x16x16xf32> to vector<16x16xf32>
    %1754 = vector.broadcast %1751 : f32 to vector<16x16xf32>
    %1755 = arith.mulf %1754, %1753 : vector<16x16xf32>
    %1756 = arith.addf %1750, %1755 : vector<16x16xf32>
    %c0_1405 = arith.constant 0 : index
    %c63 = arith.constant 63 : index
    %1757 = memref.load %arg3[%c0_1405, %c63] : memref<1x72xf32, #tpu.memory_space<smem>>
    %c7_1406 = arith.constant 7 : index
    %c0_1407 = arith.constant 0 : index
    %c0_1408 = arith.constant 0 : index
    %1758 = vector.load %arg8[%c7_1406, %c0_1407, %c0_1408] : memref<8x18x18xf32, #tpu.memory_space<vmem>>, vector<1x16x16xf32>
    %1759 = vector.shape_cast %1758 : vector<1x16x16xf32> to vector<16x16xf32>
    %1760 = vector.broadcast %1757 : f32 to vector<16x16xf32>
    %1761 = arith.mulf %1760, %1759 : vector<16x16xf32>
    %1762 = arith.addf %1756, %1761 : vector<16x16xf32>
    %c0_1409 = arith.constant 0 : index
    %c64 = arith.constant 64 : index
    %1763 = memref.load %arg3[%c0_1409, %c64] : memref<1x72xf32, #tpu.memory_space<smem>>
    %c7_1410 = arith.constant 7 : index
    %c0_1411 = arith.constant 0 : index
    %c1_1412 = arith.constant 1 : index
    %1764 = vector.load %arg8[%c7_1410, %c0_1411, %c1_1412] : memref<8x18x18xf32, #tpu.memory_space<vmem>>, vector<1x16x16xf32>
    %1765 = vector.shape_cast %1764 : vector<1x16x16xf32> to vector<16x16xf32>
    %1766 = vector.broadcast %1763 : f32 to vector<16x16xf32>
    %1767 = arith.mulf %1766, %1765 : vector<16x16xf32>
    %1768 = arith.addf %1762, %1767 : vector<16x16xf32>
    %c0_1413 = arith.constant 0 : index
    %c65 = arith.constant 65 : index
    %1769 = memref.load %arg3[%c0_1413, %c65] : memref<1x72xf32, #tpu.memory_space<smem>>
    %c7_1414 = arith.constant 7 : index
    %c0_1415 = arith.constant 0 : index
    %c2_1416 = arith.constant 2 : index
    %1770 = vector.load %arg8[%c7_1414, %c0_1415, %c2_1416] : memref<8x18x18xf32, #tpu.memory_space<vmem>>, vector<1x16x16xf32>
    %1771 = vector.shape_cast %1770 : vector<1x16x16xf32> to vector<16x16xf32>
    %1772 = vector.broadcast %1769 : f32 to vector<16x16xf32>
    %1773 = arith.mulf %1772, %1771 : vector<16x16xf32>
    %1774 = arith.addf %1768, %1773 : vector<16x16xf32>
    %c0_1417 = arith.constant 0 : index
    %c66 = arith.constant 66 : index
    %1775 = memref.load %arg3[%c0_1417, %c66] : memref<1x72xf32, #tpu.memory_space<smem>>
    %c7_1418 = arith.constant 7 : index
    %c1_1419 = arith.constant 1 : index
    %c0_1420 = arith.constant 0 : index
    %1776 = vector.load %arg8[%c7_1418, %c1_1419, %c0_1420] : memref<8x18x18xf32, #tpu.memory_space<vmem>>, vector<1x16x16xf32>
    %1777 = vector.shape_cast %1776 : vector<1x16x16xf32> to vector<16x16xf32>
    %1778 = vector.broadcast %1775 : f32 to vector<16x16xf32>
    %1779 = arith.mulf %1778, %1777 : vector<16x16xf32>
    %1780 = arith.addf %1774, %1779 : vector<16x16xf32>
    %c0_1421 = arith.constant 0 : index
    %c67 = arith.constant 67 : index
    %1781 = memref.load %arg3[%c0_1421, %c67] : memref<1x72xf32, #tpu.memory_space<smem>>
    %c7_1422 = arith.constant 7 : index
    %c1_1423 = arith.constant 1 : index
    %c1_1424 = arith.constant 1 : index
    %1782 = vector.load %arg8[%c7_1422, %c1_1423, %c1_1424] : memref<8x18x18xf32, #tpu.memory_space<vmem>>, vector<1x16x16xf32>
    %1783 = vector.shape_cast %1782 : vector<1x16x16xf32> to vector<16x16xf32>
    %1784 = vector.broadcast %1781 : f32 to vector<16x16xf32>
    %1785 = arith.mulf %1784, %1783 : vector<16x16xf32>
    %1786 = arith.addf %1780, %1785 : vector<16x16xf32>
    %c0_1425 = arith.constant 0 : index
    %c68 = arith.constant 68 : index
    %1787 = memref.load %arg3[%c0_1425, %c68] : memref<1x72xf32, #tpu.memory_space<smem>>
    %c7_1426 = arith.constant 7 : index
    %c1_1427 = arith.constant 1 : index
    %c2_1428 = arith.constant 2 : index
    %1788 = vector.load %arg8[%c7_1426, %c1_1427, %c2_1428] : memref<8x18x18xf32, #tpu.memory_space<vmem>>, vector<1x16x16xf32>
    %1789 = vector.shape_cast %1788 : vector<1x16x16xf32> to vector<16x16xf32>
    %1790 = vector.broadcast %1787 : f32 to vector<16x16xf32>
    %1791 = arith.mulf %1790, %1789 : vector<16x16xf32>
    %1792 = arith.addf %1786, %1791 : vector<16x16xf32>
    %c0_1429 = arith.constant 0 : index
    %c69 = arith.constant 69 : index
    %1793 = memref.load %arg3[%c0_1429, %c69] : memref<1x72xf32, #tpu.memory_space<smem>>
    %c7_1430 = arith.constant 7 : index
    %c2_1431 = arith.constant 2 : index
    %c0_1432 = arith.constant 0 : index
    %1794 = vector.load %arg8[%c7_1430, %c2_1431, %c0_1432] : memref<8x18x18xf32, #tpu.memory_space<vmem>>, vector<1x16x16xf32>
    %1795 = vector.shape_cast %1794 : vector<1x16x16xf32> to vector<16x16xf32>
    %1796 = vector.broadcast %1793 : f32 to vector<16x16xf32>
    %1797 = arith.mulf %1796, %1795 : vector<16x16xf32>
    %1798 = arith.addf %1792, %1797 : vector<16x16xf32>
    %c0_1433 = arith.constant 0 : index
    %c70 = arith.constant 70 : index
    %1799 = memref.load %arg3[%c0_1433, %c70] : memref<1x72xf32, #tpu.memory_space<smem>>
    %c7_1434 = arith.constant 7 : index
    %c2_1435 = arith.constant 2 : index
    %c1_1436 = arith.constant 1 : index
    %1800 = vector.load %arg8[%c7_1434, %c2_1435, %c1_1436] : memref<8x18x18xf32, #tpu.memory_space<vmem>>, vector<1x16x16xf32>
    %1801 = vector.shape_cast %1800 : vector<1x16x16xf32> to vector<16x16xf32>
    %1802 = vector.broadcast %1799 : f32 to vector<16x16xf32>
    %1803 = arith.mulf %1802, %1801 : vector<16x16xf32>
    %1804 = arith.addf %1798, %1803 : vector<16x16xf32>
    %c0_1437 = arith.constant 0 : index
    %c71 = arith.constant 71 : index
    %1805 = memref.load %arg3[%c0_1437, %c71] : memref<1x72xf32, #tpu.memory_space<smem>>
    %c7_1438 = arith.constant 7 : index
    %c2_1439 = arith.constant 2 : index
    %c2_1440 = arith.constant 2 : index
    %1806 = vector.load %arg8[%c7_1438, %c2_1439, %c2_1440] : memref<8x18x18xf32, #tpu.memory_space<vmem>>, vector<1x16x16xf32>
    %1807 = vector.shape_cast %1806 : vector<1x16x16xf32> to vector<16x16xf32>
    %1808 = vector.broadcast %1805 : f32 to vector<16x16xf32>
    %1809 = arith.mulf %1808, %1807 : vector<16x16xf32>
    %1810 = arith.addf %1804, %1809 : vector<16x16xf32>
    %c0_1441 = arith.constant 0 : index
    %c0_1442 = arith.constant 0 : index
    %c0_1443 = arith.constant 0 : index
    %c0_1444 = arith.constant 0 : index
    %1811 = vector.load %arg6[%c0_1441, %c0_1442, %c0_1443, %c0_1444] : memref<1x1x16x16xf32, #tpu.memory_space<vmem>>, vector<1x1x16x16xf32>
    %1812 = vector.shape_cast %1811 : vector<1x1x16x16xf32> to vector<16x16xf32>
    %1813 = vector.shape_cast %1810 : vector<16x16xf32> to vector<1x1x16x16xf32>
    tpu.vector_store %arg6[%c0_1441, %c0_1442, %c0_1443, %c0_1444], %1813 {strides = array<i32>} : memref<1x1x16x16xf32, #tpu.memory_space<vmem>>, vector<1x1x16x16xf32>,
    return
  }
  func.func @transform_0(%arg0: i32) -> (i32, i32) {
    %c0_i32 = arith.constant 0 : i32
    %c0_i32_0 = arith.constant 0 : i32
    %c0_i32_1 = arith.constant 0 : i32
    return %c0_i32, %c0_i32_0 : i32, i32
  }
  func.func @transform_1(%arg0: i32) -> (i32, i32) {
    %c0_i32 = arith.constant 0 : i32
    %c0_i32_0 = arith.constant 0 : i32
    %c0_i32_1 = arith.constant 0 : i32
    return %c0_i32, %c0_i32_0 : i32, i32
  }
  func.func @transform_2(%arg0: i32) -> (i32, i32) {
    %c0_i32 = arith.constant 0 : i32
    %c0_i32_0 = arith.constant 0 : i32
    %c0_i32_1 = arith.constant 0 : i32
    return %c0_i32, %c0_i32_0 : i32, i32
  }
  func.func @transform_3(%arg0: i32) -> (i32, i32) {
    %c0_i32 = arith.constant 0 : i32
    %c0_i32_0 = arith.constant 0 : i32
    %c0_i32_1 = arith.constant 0 : i32
    return %c0_i32, %c0_i32_0 : i32, i32
  }
  func.func @transform_4(%arg0: i32) -> (i32, i32, i32, i32) {
    %c0_i32 = arith.constant 0 : i32
    %c0_i32_0 = arith.constant 0 : i32
    %c0_i32_1 = arith.constant 0 : i32
    %c0_i32_2 = arith.constant 0 : i32
    return %arg0, %c0_i32, %c0_i32_0, %c0_i32_1 : i32, i32, i32, i32
  }
  func.func @transform_5(%arg0: i32) -> (i32, i32, i32, i32) {
    %c0_i32 = arith.constant 0 : i32
    %c0_i32_0 = arith.constant 0 : i32
    %c0_i32_1 = arith.constant 0 : i32
    %c0_i32_2 = arith.constant 0 : i32
    return %arg0, %c0_i32, %c0_i32_0, %c0_i32_1 : i32, i32, i32, i32
  }
}

</mosaic_0001>

<bundles_post_ra>
// kernel: tpu_custom_call.1
= control target key start
LH: loop header
LB: loop body
LE: loop exit
PB: predicated region body
PF: predicated region fallthrough
CT: control target
= control target key end

     0   :  { %s6613_s0 = inlined_call_operand.hbm [shape: f32[8,27], index: 0, kind: input, shape index: {}]   ;;  %s6614_s1 = inlined_call_operand.vmem [shape: f32[1,8], index: 1, kind: input, shape index: {}]   ;;  %s6615_s2 = inlined_call_operand.vmem [shape: f32[1,72], index: 2, kind: input, shape index: {}]   ;;  %s6616_s3 = inlined_call_operand.<no memory space> [shape: f32[1,1], index: 3, kind: input, shape index: {}]   ;;  %s6617_s4 = inlined_call_operand.hbm [shape: f32[2,3,16,16], index: 4, kind: input, shape index: {}]   ;;  %s6618_s5 = inlined_call_operand.hbm [shape: f32[2,1,16,16], index: 5, kind: output, shape index: {}]  }
   0x1   :  { %10 = sst [smem:[#allocation4]] %s6616_s3 }
   0x2   :  { %11 = vsyncpa [#allocation8], 0 }
   0x3   :  { %12 = vsyncpa [#allocation9], 0 }
   0x4   :  { %13 = vsyncpa [#allocation12], 0 }
   0x5   :  { %14 = vsyncpa [#allocation6], 0 }
   0x6   :  { %16 = vsyncpa [#allocation6 + $0x1], 0 }
   0x7   :  { %17 = vsyncpa [#allocation7], 0 }
   0x8   :  { %19 = vsyncpa [#allocation7 + $0x1], 0  ;;  %s4696_s20 = smov 0   ;;  %s4698_s21 = smov 0  }
   0x9   :  { %s4700_s22 = smov 0   ;;  %s4702_s23 = smov 0  }
   0xa LB: > { %s4717_s3 = sadd.s32 4294967295, %s4648_s23   ;;  %s4066_s24 = sadd.s32 4294967294, %s4648_s23   ;;  %s4648_s23 = sphi %s4702_s23, %s6642_s23   ;;  %s4644_s22 = sphi %s4700_s22, %s6641_s22   ;;  %s4640_s21 = sphi %s4698_s21, %s6640_s21   ;;  %s4636_s20 = sphi %s4696_s20, %s6639_s20  }
   0xb   : > { %p129_p0 = scmp.ne.s32.totalorder %s4640_s21, %s4636_s20  ;;  %p6619_p1 = scmp.eq.s32.totalorder %s4717_s3, 0 }
   0xc   : > { %p159_p3 = scmp.eq.s32.totalorder %s4066_s24, 1  ;;  %p4067_p5 = scmp.ge.s32.totalorder %s4648_s23, 1 }
   0xd   : > { %p4726_p4 = por %p6619_p1, %p129_p0  ;;  %p166_p7 = scmp.lt.s32.totalorder %s4648_s23, 3 }
   0xe   : > { %p4731_p6 = por %p159_p3, %p129_p0  ;;  %s188_s30 = sshll.u32 %s6614_s1, 4  ;;  %s189_s30 = int_to_ptr.vmem [resolvable:$true] %s188_s30 }
   0xf   : > { %s6622_s25 = scalar_select %p4726_p4, 1, 0 }
  0x10   : > { %s6623_s26 = scalar_select %p4731_p6, 1, 0 }
  0x11   : > { %p4736_p8 = pnand %p4067_p5, %p166_p7  ;;  %s199_s8 = sshll.u32 %s6615_s2, 4  ;;  %s4755_s8 = int_to_ptr.vmem [resolvable:$true] %s199_s8 }
  0x12   : > { %s4758_s10 = sadd.s32 1, %s4648_s23   ;;  %s4497_s13 = scalar_lea.hbm %s6613_s0, 128 }
  0x13   : > { %p4396_p10 = pneg %p4736_p8  ;;  %p4498_p12 = scmp.ne.s32.totalorder %s6613_s0, %s4497_s13 }
  0x14   : > { %p4504_p5 = scmp.lt.u32.totalorder %s4497_s13, %s6613_s0 }
  0x15   : > { %p4751_p11 = pnand %p4396_p10, %p6619_p1 }
  0x17   : > { %p4499_p13 = pneg %p4751_p11 }
  0x19   : > { %p4500_p0 = pnand %p4499_p13, %p4498_p12 }
  0x1b   : > { %p4501_p3 = pneg %p4500_p0 }
  0x1d   : > { %p4506_p7 = pnand %p4504_p5, %p4501_p3 }
  0x1f   : > { %4509 = shalt.err (!%p4506_p7)
}
  0x20   : > { %s4650_s18 = smov [#allocation5]   ;;  %s4510_s28 = scalar_lea.vmem %s189_s30, 16 }
  0x21   : > { %4399 = dma.hbm_to_smem (!%p4751_p11), %s6613_s0, 128, %s4650_s18, [#allocation8]  }
  0x22   : > { %p4511_p10 = scmp.ne.s32.totalorder %s189_s30, %s4510_s28  ;;  %p4518_p9 = scmp.lt.s32.totalorder %s189_s30, %s189_s30 }
  0x23   : > { %p4519_p1 = scmp.lt.s32.totalorder %s4510_s28, %s4510_s28 }
  0x24   : > { %p4513_p12 = pnand %p4511_p10, %p4499_p13 }
  0x25   : > { %p4520_p2 = por %p4519_p1, %p4518_p9 }
  0x26   : > { %p4514_p0 = pneg %p4513_p12 }
  0x28   : > { %p4521_p6 = pnand %p4520_p2, %p4514_p0 }
  0x2a   : > { %4524 = shalt.err (!%p4521_p6)
}
  0x2b   : > { %s4651_s29 = smov [#allocation10]   ;;  %s4525_s6 = scalar_lea.vmem %s4755_s8, 16 }
  0x2c   : > { %4402 = dma.vmem_to_smem (!%p4751_p11), %s189_s30, 16, %s4651_s29, [#allocation9]  }
  0x2d   : > { %p4526_p3 = scmp.ne.s32.totalorder %s4755_s8, %s4525_s6  ;;  %p4533_p10 = scmp.lt.s32.totalorder %s4755_s8, %s4755_s8 }
  0x2e   : > { %p4534_p12 = scmp.lt.s32.totalorder %s4525_s6, %s4525_s6 }
  0x2f   : > { %p4528_p5 = pnand %p4526_p3, %p4499_p13 }
  0x30   : > { %p4535_p1 = por %p4534_p12, %p4533_p10 }
  0x31   : > { %p4529_p7 = pneg %p4528_p5 }
  0x33   : > { %p4536_p2 = pnand %p4535_p1, %p4529_p7 }
  0x35   : > { %4539 = shalt.err (!%p4536_p2)
}
  0x36   : > { %s4652_s7 = smov [#allocation11]   ;;  %s113_s30 = ssub.s32 %s4648_s23, %s4758_s10 }
  0x37   : > { %4405 = dma.vmem_to_smem (!%p4751_p11), %s4755_s8, 16, %s4652_s7, [#allocation12]  }
  0x38   : > { %s116_s11 = sadd.s32 1, %s4644_s22  ;;  %p114_p6 = scmp.eq.s32.totalorder %s113_s30, 0 }
  0x39   : > { %p123_p9 = scmp.ne.s32.totalorder %s4644_s22, %s4640_s21  ;;  %p124_p13 = scmp.eq.s32.totalorder %s4648_s23, 0 }
  0x3a   : > { %p4417_p0 = scmp.lt.s32.totalorder %s4648_s23, 2  ;;  %p6626_p5 = scmp.eq.s32.totalorder %s4717_s3, 1 }
  0x3b   : > { %s4802_s9 = scalar_select %p114_p6, %s4644_s22, %s116_s11  }
  0x3c   : > { %p125_p3 = por %p124_p13, %p123_p9  ;;  %p4806_p7 = por %p6626_p5, %p123_p9 }
  0x3d   : > { %s213_s13 = sand.u32 1, %s4644_s22   ;;  %s4378_s14 = smul.u32 768, %s4648_s23 }
  0x3e   : > { %s6627_s12 = scalar_select %p4806_p7, 1, 0 }
  0x3f   : > { %s4377_s15 = smul.u32 48, %s213_s13  ;;  %s4815_s8 = scalar_lea.hbm %s6617_s4, %s4378_s14 }
  0x40   : > { %p4817_p11 = pnand %p4417_p0, %p125_p3  ;;  %s4823_s28 = scalar_lea.sflag [#allocation6], %s213_s13 }
  0x41   : > { %s217_s19 = scalar_lea.vmem [#allocation13], %s4377_s15  ;;  %s4540_s29 = scalar_lea.hbm %s4815_s8, 768 }
  0x42   : > { %s224_s24 = sshll.u32 %s217_s19, 4  ;;  %p4541_p10 = scmp.ne.s32.totalorder %s4815_s8, %s4540_s29  ;;  %s4821_s24 = int_to_ptr.vmem [resolvable:$true] %s224_s24 }
  0x43   : > { %p4542_p12 = pneg %p4817_p11  ;;  %s4545_s30 = scalar_lea.hbm %s6617_s4, 1536 }
  0x44   : > { %p4546_p6 = scmp.lt.u32.totalorder %s4815_s8, %s6617_s4  ;;  %p4547_p9 = scmp.lt.u32.totalorder %s4545_s30, %s4540_s29 }
  0x45   : > { %p4543_p1 = pnand %p4542_p12, %p4541_p10  ;;  %p4549_p0 = scmp.lt.u32.totalorder %s4540_s29, %s4815_s8 }
  0x46   : > { %p4548_p13 = por %p4547_p9, %p4546_p6 }
  0x47   : > { %p4544_p2 = pneg %p4543_p1 }
  0x48   : > { %p4550_p3 = por %p4549_p0, %p4548_p13 }
  0x4a   : > { %p4551_p5 = pnand %p4550_p3, %p4544_p2 }
  0x4c   : > { %4554 = shalt.err (!%p4551_p5)
}
  0x4d   : > { %s4555_s13 = scalar_lea.vmem %s4821_s24, 768  ;;  %s4653_s15 = smov [#allocation13]  }
  0x4e   : > { %p4556_p10 = scmp.ne.s32.totalorder %s4821_s24, %s4555_s13  ;;  %s4560_s16 = sshll.u32 %s4653_s15, 4  ;;  %s4561_s16 = int_to_ptr.vmem [resolvable:$false] %s4560_s16 }
  0x4f   : > { %s4562_s17 = scalar_lea.vmem %s4561_s16, 1536  ;;  %p4563_p4 = scmp.lt.s32.totalorder %s4821_s24, %s4561_s16 }
  0x50   : > { %p4558_p1 = pnand %p4556_p10, %p4542_p12  ;;  %p4564_p6 = scmp.lt.s32.totalorder %s4562_s17, %s4555_s13 }
  0x52   : > { %p4559_p7 = pneg %p4558_p1  ;;  %p4565_p9 = por %p4564_p6, %p4563_p4 }
  0x54   : > { %p4566_p13 = pnand %p4565_p9, %p4559_p7 }
  0x56   : > { %4569 = shalt.err (!%p4566_p13)
}
  0x57   : > { %s4654_s19 = smov 128   ;;  %s4655_s29 = smov 8  }
  0x58   : > { %4409 = dma.hbm_to_vmem [thread:$0]  (!%p4817_p11), %s4815_s8, 768, %s4821_s24, %s4823_s28, %s4654_s19, %s4654_s19, %s4655_s29  }
  0x59   : > { %236 = sbr.rel (%p4736_p8) target bundleno = 1748 (0x6d4), region = 40  ;;  %p6629_p12 = scmp.eq.s32.totalorder (!%p4736_p8), %s4717_s3, 0 }
  0x60   : > { %4615 = dma.done.wait (%p6629_p12), [#allocation8], 128   ;;  %p6630_p2 = pmov %p6629_p12 }
  0x62   : > { %4617 = vsyncadd (%p6630_p2), [#allocation8], 4294967168  ;;  %p6631_p4 = pmov %p6630_p2 }
  0x63   : > { %p6632_p7 = pmov %p6630_p2 }
  0x64   : > { %4619 = dma.done.wait (%p6631_p4), [#allocation9], 16  }
  0x65   : > { %4621 = vsyncadd (%p6632_p7), [#allocation9], 4294967280  ;;  %p6633_p0 = pmov %p6630_p2 }
  0x67   : > { %4623 = dma.done.wait (%p6633_p0), [#allocation12], 16   ;;  %p6634_p11 = pmov %p6633_p0 }
  0x68   : > { %s4866_s27 = sand.u32 1, %s4640_s21   ;;  %p6635_p8 = scmp.ne.s32.totalorder %s6622_s25, 0 }
  0x69   : > { %4625 = vsyncadd (%p6634_p11), [#allocation12], 4294967280  ;;  %s4379_s8 = smul.u32 48, %s4866_s27  ;;  %s251_s18 = scalar_lea.sflag [#allocation6], %s4866_s27 }
  0x6b   : > { %s4870_s24 = scalar_lea.vmem [#allocation13], %s4379_s8 }
  0x6c   : > { %4627 = dma.done.wait (%p6635_p8), %s251_s18, 768  }
  0x6d   : > { %4629 = vsyncadd (%p6635_p8), %s251_s18, 4294966528 }
  0x6e   : > { %259 = sfence }
  0x6f   : > { %v293_v0 = vld [vmem:[%s4870_s24] sm:$0xff]  ;;  %v295_v1 = vld [vmem:[%s4870_s24 + $0x10] sm:$0xff]  ;;  %vm282_vm0 = vcmask 146432   ;;  %s4656_s28 = smov 1   ;;  %vm285_vm1 = vcmask 140288   ;;  %v294_v2 = vld [vmem:[%s4870_s24 + $0x8] sm:$0xff] }
  0x70   : > { %305 = vrot.lane.b32.xlu0 %v293_v0, %s4656_s28  ;;  %309 = vrot.lane.b32.xlu1 %v295_v1, %s4656_s28  ;;  %v296_v3 = vld [vmem:[%s4870_s24 + $0x18] sm:$0xff]  ;;  %v4657_v4 = vmov 0.0   ;;  %v297_v5 = vld [vmem:[%s4870_s24 + $0x20] sm:$0xff]  ;;  %vm323_vm2 = vcmask 138248   ;;  %s4078_s25 = sld [smem:[#allocation5 + $0x1]]  ;;  %s4079_s6 = sld [smem:[#allocation5 + $0x2]] }
  0x71   : > { %283 = vst.msk [vmem:[#allocation2] sm:$0xff] %vm282_vm0, %v4657_v4  ;;  %284 = vst.msk [vmem:[#allocation2 + $0x8] sm:$0xff] %vm282_vm0, %v4657_v4  ;;  %v298_v6 = vld [vmem:[%s4870_s24 + $0x28] sm:$0xff]  ;;  %s4081_s7 = sld [smem:[#allocation5 + $0x4]]  ;;  %s4082_s30 = sld [smem:[#allocation5 + $0x5]]  ;;  %vm3942_vm3 = vcmask 130048  }
  0x72   : > { %287 = vst.msk [vmem:[#allocation2 + $0x18] sm:$0xff] %vm282_vm0, %v4657_v4  ;;  %288 = vst.msk [vmem:[#allocation2 + $0x20] sm:$0xff] %vm282_vm0, %v4657_v4  ;;  %s4658_s11 = smov 127   ;;  %s4084_s14 = sld [smem:[#allocation5 + $0x7]] }
  0x73   : > { %290 = vst.msk [vmem:[#allocation2 + $0x30] sm:$0xff] %vm282_vm0, %v4657_v4  ;;  %291 = vst.msk [vmem:[#allocation2 + $0x38] sm:$0xff] %vm282_vm0, %v4657_v4  ;;  %s4659_s13 = smov 126   ;;  %s4085_s15 = sld [smem:[#allocation5 + $0x8]] }
  0x74   : > { %330 = vst.msk [vmem:[#allocation3] sm:$0xff] %vm282_vm0, %v4657_v4  ;;  %331 = vst.msk [vmem:[#allocation3 + $0x8] sm:$0xff] %vm282_vm0, %v4657_v4  ;;  %307 = vrot.lane.b32.xlu0 %v294_v2, %s4656_s28  ;;  %311 = vrot.lane.b32.xlu1 %v296_v3, %s4656_s28  ;;  %s4087_s16 = sld [smem:[#allocation5 + $0xa]]  ;;  %s4088_s17 = sld [smem:[#allocation5 + $0xb]] }
  0x75   : > { %333 = vst.msk [vmem:[#allocation3 + $0x18] sm:$0xff] %vm282_vm0, %v4657_v4  ;;  %334 = vst.msk [vmem:[#allocation3 + $0x20] sm:$0xff] %vm282_vm0, %v4657_v4  ;;  %s4090_s19 = sld [smem:[#allocation5 + $0xd]]  ;;  %s4091_s29 = sld [smem:[#allocation5 + $0xe]] }
  0x76   : > { %336 = vst.msk [vmem:[#allocation3 + $0x30] sm:$0xff] %vm282_vm0, %v4657_v4  ;;  %337 = vst.msk [vmem:[#allocation3 + $0x38] sm:$0xff] %vm282_vm0, %v4657_v4  ;;  %v366_v11 = vstv %s4078_s25  ;;  %v380_v16 = vstv %s4079_s6  ;;  %s4093_s8 = sld [smem:[#allocation5 + $0x10]]  ;;  %s4094_s18 = sld [smem:[#allocation5 + $0x11]] }
  0x77   : > { %339 = vst.msk [vmem:[#allocation3 + $0x48] sm:$0xff] %vm282_vm0, %v4657_v4  ;;  %340 = vst.msk [vmem:[#allocation3 + $0x50] sm:$0xff] %vm282_vm0, %v4657_v4  ;;  %v402_v21 = vstv %s4081_s7  ;;  %v416_v25 = vstv %s4082_s30  ;;  %s4096_s24 = sld [smem:[#allocation5 + $0x13]]  ;;  %s4097_s25 = sld [smem:[#allocation5 + $0x14]] }
  0x78   : > { %342 = vst.msk [vmem:[#allocation3 + $0x60] sm:$0xff] %vm282_vm0, %v4657_v4  ;;  %343 = vst.msk [vmem:[#allocation3 + $0x68] sm:$0xff] %vm282_vm0, %v4657_v4  ;;  %313 = vrot.lane.b32.xlu0 %v297_v5, %s4656_s28  ;;  %315 = vrot.lane.b32.xlu1 %v298_v6, %s4656_s28  ;;  %v438_v29 = vstv %s4084_s14  ;;  %s4099_s6 = sld [smem:[#allocation5 + $0x16]]  ;;  %s4100_s7 = sld [smem:[#allocation5 + $0x17]] }
  0x79   : > { %345 = vst.msk [vmem:[#allocation3 + $0x78] sm:$0xff] %vm282_vm0, %v4657_v4  ;;  %346 = vst.msk [vmem:[#allocation3 + $0x80] sm:$0xff] %vm282_vm0, %v4657_v4  ;;  %v452_v33 = vstv %s4085_s15  ;;  %s4102_s30 = sld [smem:[#allocation5 + $0x19]]  ;;  %s4103_s14 = sld [smem:[#allocation5 + $0x1a]] }
  0x7a   : > { %348 = vst.msk [vmem:[#allocation3 + $0x90] sm:$0xff] %vm282_vm0, %v4657_v4  ;;  %349 = vst.msk [vmem:[#allocation3 + $0x98] sm:$0xff] %vm282_vm0, %v4657_v4  ;;  %v475_v35 = vstv %s4087_s16  ;;  %v489_v41 = vstv %s4088_s17  ;;  %s4106_s15 = sld [smem:[#allocation5 + $0x81]]  ;;  %s4107_s16 = sld [smem:[#allocation5 + $0x82]] }
  0x7b   : > { %351 = vst.msk [vmem:[#allocation3 + $0xa8] sm:$0xff] %vm282_vm0, %v4657_v4  ;;  %352 = vst.msk [vmem:[#allocation3 + $0xb0] sm:$0xff] %vm282_vm0, %v4657_v4  ;;  %v511_v45 = vstv %s4090_s19  ;;  %v525_v49 = vstv %s4091_s29  ;;  %s4109_s17 = sld [smem:[#allocation5 + $0x84]]  ;;  %s4110_s19 = sld [smem:[#allocation5 + $0x85]] }
  0x7c   : > { %286 = vst.msk [vmem:[#allocation2 + $0x10] sm:$0x3] %vm285_vm1, %v4657_v4  ;;  %289 = vst.msk [vmem:[#allocation2 + $0x28] sm:$0x3] %vm285_vm1, %v4657_v4  ;;  %v547_v53 = vstv %s4093_s8  ;;  %v561_v57 = vstv %s4094_s18  ;;  %s4112_s29 = sld [smem:[#allocation5 + $0x87]]  ;;  %s4113_s8 = sld [smem:[#allocation5 + $0x88]] }
  0x7d   : > { %292 = vst.msk [vmem:[#allocation2 + $0x40] sm:$0x3] %vm285_vm1, %v4657_v4  ;;  %332 = vst.msk [vmem:[#allocation3 + $0x10] sm:$0x3] %vm285_vm1, %v4657_v4  ;;  %v584_v59 = vstv %s4096_s24  ;;  %v598_v0 = vstv %s4097_s25  ;;  %s4115_s18 = sld [smem:[#allocation5 + $0x8a]]  ;;  %s4116_s24 = sld [smem:[#allocation5 + $0x8b]] }
  0x7e   : > { %335 = vst.msk [vmem:[#allocation3 + $0x28] sm:$0x3] %vm285_vm1, %v4657_v4  ;;  %338 = vst.msk [vmem:[#allocation3 + $0x40] sm:$0x3] %vm285_vm1, %v4657_v4  ;;  %v620_v5 = vstv %s4099_s6  ;;  %s4118_s25 = sld [smem:[#allocation5 + $0x8d]]  ;;  %s4119_s6 = sld [smem:[#allocation5 + $0x8e]] }
  0x7f   : > { %341 = vst.msk [vmem:[#allocation3 + $0x58] sm:$0x3] %vm285_vm1, %v4657_v4  ;;  %344 = vst.msk [vmem:[#allocation3 + $0x70] sm:$0x3] %vm285_vm1, %v4657_v4  ;;  %p6636_p5 = scmp.ne.s32.totalorder %s6627_s12, 0 }
  0x80   : > { %347 = vst.msk [vmem:[#allocation3 + $0x88] sm:$0x3] %vm285_vm1, %v4657_v4  ;;  %350 = vst.msk [vmem:[#allocation3 + $0xa0] sm:$0x3] %vm285_vm1, %v4657_v4 }
  0x81   : > { %353 = vst.msk [vmem:[#allocation3 + $0xb8] sm:$0x3] %vm285_vm1, %v4657_v4 }
  0xe2   : > { %v306_v7 = vpop.permute.xlu0 %305  ;;  %v310_v8 = vpop.permute.xlu1 %309 }
  0xe3   : > { %324 = vst.msk [vmem:[#allocation2 + $0x1] sm:$0xff] %vm323_vm2, %v306_v7  ;;  %326 = vst.msk [vmem:[#allocation2 + $0x19] sm:$0xff] %vm323_vm2, %v310_v8 }
  0xe6   : > { %v308_v9 = vpop.permute.xlu0 %307  ;;  %v312_v10 = vpop.permute.xlu1 %311 }
  0xe7   : > { %325 = vst.msk [vmem:[#allocation2 + $0x9] sm:$0xff] %vm323_vm2, %v308_v9  ;;  %327 = vst.msk [vmem:[#allocation2 + $0x21] sm:$0xff] %vm323_vm2, %v312_v10  ;;  %v634_v9 = vstv %s4100_s7  ;;  %s4121_s7 = sld [smem:[#allocation5 + $0x90]] }
  0xea   : > { %v4925_v12 = vld [vmem:[#allocation2] sm:$0xff]  ;;  %v314_v13 = vpop.permute.xlu0 %313  ;;  %v316_v14 = vpop.permute.xlu1 %315  ;;  %v4957_v34 = vld [vmem:[#allocation2 + $0x18] sm:$0xff] }
  0xeb   : > { %v367_v15 = vmul.f32 %v366_v11, %v4925_v12  ;;  %328 = vst.msk [vmem:[#allocation2 + $0x31] sm:$0xff] %vm323_vm2, %v314_v13  ;;  %329 = vst.msk [vmem:[#allocation2 + $0x39] sm:$0xff] %vm323_vm2, %v316_v14  ;;  %v381_v19 = vmul.f32 %v380_v16, %v4925_v12  ;;  %v4935_v20 = vld [vmem:[#allocation2 + $0x1] sm:$0xff]  ;;  %v476_v38 = vmul.f32 %v475_v35, %v4957_v34  ;;  %v4971_v44 = vld [vmem:[#allocation2 + $0x19] sm:$0xff]  ;;  %v656_v14 = vstv %s4102_s30  ;;  %s357_s30 = sld [smem:[#allocation5]] }
  0xec   : > { %v403_v23 = vmul.f32 %v402_v21, %v4935_v20  ;;  %v417_v27 = vmul.f32 %v416_v25, %v4935_v20  ;;  %v490_v43 = vmul.f32 %v489_v41, %v4957_v34  ;;  %v512_v47 = vmul.f32 %v511_v45, %v4971_v44 }
  0xed   : > { %371 = vrot.lane.b32.xlu0 %v367_v15, %s4658_s11  ;;  %v526_v51 = vmul.f32 %v525_v49, %v4971_v44 }
  0xee   : > { %v4931_v17 = vld [vmem:[#allocation2 + $0x8] sm:$0xff]  ;;  %v4965_v40 = vld [vmem:[#allocation2 + $0x20] sm:$0xff] }
  0xef   : > { %v368_v18 = vmul.f32 %v366_v11, %v4931_v17  ;;  %v382_v22 = vmul.f32 %v380_v16, %v4931_v17  ;;  %v4941_v24 = vld [vmem:[#allocation2 + $0x9] sm:$0xff]  ;;  %v477_v42 = vmul.f32 %v475_v35, %v4965_v40  ;;  %v491_v46 = vmul.f32 %v489_v41, %v4965_v40  ;;  %v4977_v48 = vld [vmem:[#allocation2 + $0x21] sm:$0xff] }
  0xf0   : > { %v404_v26 = vmul.f32 %v402_v21, %v4941_v24  ;;  %v4947_v28 = vld [vmem:[#allocation2 + $0x2] sm:$0xff]  ;;  %v418_v30 = vmul.f32 %v416_v25, %v4941_v24  ;;  %v4953_v32 = vld [vmem:[#allocation2 + $0xa] sm:$0xff]  ;;  %v513_v50 = vmul.f32 %v511_v45, %v4977_v48  ;;  %v4983_v52 = vld [vmem:[#allocation2 + $0x1a] sm:$0xff]  ;;  %v527_v54 = vmul.f32 %v525_v49, %v4977_v48 }
  0xf1   : > { %373 = vrot.lane.b32.xlu1 %v368_v18, %s4658_s11  ;;  %385 = vrot.lane.b32.xlu0 %v381_v19, %s4659_s13  ;;  %v439_v31 = vmul.f32 %v438_v29, %v4947_v28  ;;  %v440_v36 = vmul.f32 %v438_v29, %v4953_v32  ;;  %v453_v37 = vmul.f32 %v452_v33, %v4947_v28  ;;  %v4989_v56 = vld [vmem:[#allocation2 + $0x22] sm:$0xff]  ;;  %v670_v19 = vstv %s4103_s14  ;;  %s5067_s14 = sld [smem:[#allocation5 + $0x91]] }
  0xf2   : > { %v454_v39 = vmul.f32 %v452_v33, %v4953_v32  ;;  %v548_v55 = vmul.f32 %v547_v53, %v4983_v52  ;;  %v4993_v58 = vld [vmem:[#allocation2 + $0x30] sm:$0xff]  ;;  %v549_v60 = vmul.f32 %v547_v53, %v4989_v56  ;;  %v562_v61 = vmul.f32 %v561_v57, %v4983_v52  ;;  %v5000_v63 = vld [vmem:[#allocation2 + $0x38] sm:$0xff] }
  0xf3   : > { %v585_v62 = vmul.f32 %v584_v59, %v4993_v58  ;;  %v563_v1 = vmul.f32 %v561_v57, %v4989_v56  ;;  %v586_v2 = vmul.f32 %v584_v59, %v5000_v63  ;;  %v599_v3 = vmul.f32 %v598_v0, %v4993_v58  ;;  %v5007_v4 = vld [vmem:[#allocation2 + $0x31] sm:$0xff]  ;;  %v5013_v8 = vld [vmem:[#allocation2 + $0x39] sm:$0xff] }
  0xf4   : > { %v600_v6 = vmul.f32 %v598_v0, %v5000_v63  ;;  %v621_v7 = vmul.f32 %v620_v5, %v5007_v4  ;;  %v622_v10 = vmul.f32 %v620_v5, %v5013_v8  ;;  %v635_v11 = vmul.f32 %v634_v9, %v5007_v4  ;;  %v5019_v13 = vld [vmem:[#allocation2 + $0x32] sm:$0xff]  ;;  %v5025_v18 = vld [vmem:[#allocation2 + $0x3a] sm:$0xff] }
  0xf5   : > { %387 = vrot.lane.b32.xlu1 %v382_v22, %s4659_s13  ;;  %407 = vrot.lane.b32.xlu0 %v403_v23, %s4658_s11  ;;  %v636_v15 = vmul.f32 %v634_v9, %v5013_v8  ;;  %v657_v16 = vmul.f32 %v656_v14, %v5019_v13  ;;  %v658_v21 = vmul.f32 %v656_v14, %v5025_v18  ;;  %v707_v23 = vstv %s4106_s15  ;;  %s5071_s15 = sld [smem:[#allocation10]] }
  0xf6   : > { %v671_v22 = vmul.f32 %v670_v19, %v5019_v13  ;;  %v672_v25 = vmul.f32 %v670_v19, %v5025_v18  ;;  %v709_v29 = vmul.f32 %v707_v23, %v4931_v17  ;;  %v887_v0 = vstv %s4121_s7  ;;  %s5132_s7 = sld [smem:[#allocation5 + $0x101]] }
  0xf9   : > { %409 = vrot.lane.b32.xlu1 %v404_v26, %s4658_s11  ;;  %421 = vrot.lane.b32.xlu0 %v417_v27, %s4659_s13  ;;  %v708_v26 = vmul.f32 %v707_v23, %v4925_v12  ;;  %v721_v27 = vstv %s4107_s16  ;;  %s5075_s16 = sld [smem:[#allocation5 + $0x93]] }
  0xfa   : > { %v723_v33 = vmul.f32 %v721_v27, %v4931_v17 }
  0xfd   : > { %423 = vrot.lane.b32.xlu1 %v418_v30, %s4659_s13  ;;  %443 = vrot.lane.b32.xlu0 %v439_v31, %s4658_s11  ;;  %v722_v30 = vmul.f32 %v721_v27, %v4925_v12  ;;  %v743_v31 = vstv %s4109_s17  ;;  %s5079_s17 = sld [smem:[#allocation5 + $0x3]] }
  0xfe   : > { %v744_v35 = vmul.f32 %v743_v31, %v4935_v20 }
 0x101   : > { %445 = vrot.lane.b32.xlu1 %v440_v36, %s4658_s11  ;;  %457 = vrot.lane.b32.xlu0 %v453_v37, %s4659_s13  ;;  %v757_v36 = vstv %s4110_s19  ;;  %v745_v37 = vmul.f32 %v743_v31, %v4941_v24  ;;  %s5085_s19 = sld [smem:[#allocation5 + $0x94]] }
 0x102   : > { %v759_v41 = vmul.f32 %v757_v36, %v4941_v24 }
 0x103   : > { %v396_v19 = vstv %s5079_s17  ;;  %s5162_s17 = sld [smem:[#allocation5 + $0x105]] }
 0x105   : > { %459 = vrot.lane.b32.xlu1 %v454_v39, %s4659_s13  ;;  %480 = vrot.lane.b32.xlu0 %v476_v38, %s4658_s11  ;;  %v758_v38 = vmul.f32 %v757_v36, %v4935_v20  ;;  %v779_v39 = vstv %s4112_s29  ;;  %s5094_s29 = sld [smem:[#allocation5 + $0x96]] }
 0x106   : > { %v781_v45 = vmul.f32 %v779_v39, %v4953_v32 }
 0x107   : > { %v937_v31 = vstv %s5085_s19  ;;  %s5170_s19 = sld [smem:[#allocation5 + $0x107]] }
 0x109   : > { %482 = vrot.lane.b32.xlu1 %v477_v42, %s4658_s11  ;;  %494 = vrot.lane.b32.xlu0 %v490_v43, %s4659_s13  ;;  %v780_v42 = vmul.f32 %v779_v39, %v4947_v28  ;;  %v793_v43 = vstv %s4113_s8  ;;  %s5099_s8 = sld [smem:[#allocation5 + $0x6]]  ;;  %v938_v39 = vmul.f32 %v937_v31, %v4993_v58 }
 0x10a   : > { %v795_v49 = vmul.f32 %v793_v43, %v4953_v32 }
 0x10d   : > { %496 = vrot.lane.b32.xlu1 %v491_v46, %s4659_s13  ;;  %516 = vrot.lane.b32.xlu0 %v512_v47, %s4658_s11  ;;  %v794_v46 = vmul.f32 %v793_v43, %v4947_v28  ;;  %v815_v47 = vstv %s4115_s18  ;;  %s5105_s18 = sld [smem:[#allocation5 + $0x97]]  ;;  %v959_v43 = vstv %s5094_s29  ;;  %s5175_s29 = sld [smem:[#allocation5 + $0x12]] }
 0x10e   : > { %v817_v53 = vmul.f32 %v815_v47, %v4965_v40 }
 0x111   : > { %518 = vrot.lane.b32.xlu1 %v513_v50, %s4658_s11  ;;  %530 = vrot.lane.b32.xlu0 %v526_v51, %s4659_s13  ;;  %v816_v50 = vmul.f32 %v815_v47, %v4957_v34  ;;  %v829_v51 = vstv %s4116_s24  ;;  %s5113_s24 = sld [smem:[#allocation5 + $0x99]] }
 0x112   : > { %v831_v57 = vmul.f32 %v829_v51, %v4965_v40 }
 0x115   : > { %532 = vrot.lane.b32.xlu1 %v527_v54, %s4659_s13  ;;  %552 = vrot.lane.b32.xlu0 %v548_v55, %s4658_s11  ;;  %v830_v54 = vmul.f32 %v829_v51, %v4957_v34  ;;  %v851_v55 = vstv %s4118_s25  ;;  %s5118_s25 = sld [smem:[#allocation5 + $0x9]]  ;;  %v939_v51 = vmul.f32 %v937_v31, %v5000_v63 }
 0x116   : > { %v852_v59 = vmul.f32 %v851_v55, %v4971_v44 }
 0x119   : > { %554 = vrot.lane.b32.xlu1 %v549_v60, %s4658_s11  ;;  %566 = vrot.lane.b32.xlu0 %v562_v61, %s4659_s13  ;;  %v865_v60 = vstv %s4119_s6  ;;  %v853_v61 = vmul.f32 %v851_v55, %v4977_v48  ;;  %s5124_s6 = sld [smem:[#allocation5 + $0x9a]] }
 0x11d   : > { %568 = vrot.lane.b32.xlu1 %v563_v1, %s4659_s13  ;;  %589 = vrot.lane.b32.xlu0 %v585_v62, %s4658_s11  ;;  %v866_v62 = vmul.f32 %v865_v60, %v4971_v44  ;;  %v360_v1 = vstv %s357_s30  ;;  %s5137_s30 = sld [smem:[#allocation5 + $0xc]] }
 0x11e   : > { %v361_v5 = vmul.f32 %v360_v1, %v4925_v12 }
 0x121   : > { %591 = vrot.lane.b32.xlu1 %v586_v2, %s4658_s11  ;;  %603 = vrot.lane.b32.xlu0 %v599_v3, %s4659_s13  ;;  %v867_v2 = vmul.f32 %v865_v60, %v4977_v48  ;;  %v888_v3 = vmul.f32 %v887_v0, %v4983_v52 }
 0x125   : > { %605 = vrot.lane.b32.xlu1 %v600_v6, %s4659_s13  ;;  %625 = vrot.lane.b32.xlu0 %v621_v7, %s4658_s11  ;;  %v901_v6 = vstv %s5067_s14  ;;  %v355_v7 = vstv %s5071_s15  ;;  %s5143_s14 = sld [smem:[#allocation5 + $0x102]]  ;;  %s5151_s15 = sld [smem:[#allocation5 + $0x104]] }
 0x126   : > { %v363_v14 = vadd.f32 %v361_v5, %v355_v7  ;;  %v995_v5 = vstv %s5113_s24  ;;  %s5194_s24 = sld [smem:[#allocation5 + $0x15]] }
 0x129   : > { %627 = vrot.lane.b32.xlu1 %v622_v10, %s4658_s11  ;;  %639 = vrot.lane.b32.xlu0 %v635_v11, %s4659_s13  ;;  %v889_v10 = vmul.f32 %v887_v0, %v4989_v56  ;;  %v902_v11 = vmul.f32 %v901_v6, %v4983_v52  ;;  %v961_v0 = vmul.f32 %v959_v43, %v5013_v8 }
 0x12d   : > { %641 = vrot.lane.b32.xlu1 %v636_v15, %s4659_s13  ;;  %661 = vrot.lane.b32.xlu0 %v657_v16, %s4658_s11  ;;  %v362_v15 = vmul.f32 %v360_v1, %v4931_v17  ;;  %v923_v16 = vstv %s5075_s16  ;;  %s5156_s16 = sld [smem:[#allocation5 + $0xf]] }
 0x12f   : > { %v364_v27 = vadd.f32 %v362_v15, %v355_v7  ;;  %v996_v15 = vmul.f32 %v995_v5, %v5019_v13 }
 0x131   : > { %663 = vrot.lane.b32.xlu1 %v658_v21, %s4658_s11  ;;  %675 = vrot.lane.b32.xlu0 %v671_v22, %s4659_s13 }
 0x135   : > { %677 = vrot.lane.b32.xlu1 %v672_v25, %s4659_s13  ;;  %712 = vrot.lane.b32.xlu0 %v708_v26, %s4658_s11  ;;  %v903_v25 = vmul.f32 %v901_v6, %v4989_v56  ;;  %v924_v26 = vmul.f32 %v923_v16, %v4993_v58  ;;  %v469_v6 = vstv %s5118_s25  ;;  %s5200_s25 = sld [smem:[#allocation5 + $0x10b]] }
 0x136   : > { %v471_v31 = vmul.f32 %v469_v6, %v4965_v40 }
 0x139   : > { %714 = vrot.lane.b32.xlu1 %v709_v29, %s4658_s11  ;;  %726 = vrot.lane.b32.xlu0 %v722_v30, %s4659_s13  ;;  %v397_v30 = vmul.f32 %v396_v19, %v4935_v20 }
 0x13d   : > { %728 = vrot.lane.b32.xlu1 %v723_v33, %s4659_s13  ;;  %748 = vrot.lane.b32.xlu0 %v744_v35, %s4658_s11 }
 0x141   : > { %750 = vrot.lane.b32.xlu1 %v745_v37, %s4658_s11  ;;  %762 = vrot.lane.b32.xlu0 %v758_v38, %s4659_s13  ;;  %v925_v38 = vmul.f32 %v923_v16, %v5000_v63 }
 0x145   : > { %764 = vrot.lane.b32.xlu1 %v759_v41, %s4659_s13  ;;  %784 = vrot.lane.b32.xlu0 %v780_v42, %s4658_s11  ;;  %v398_v42 = vmul.f32 %v396_v19, %v4941_v24  ;;  %v470_v19 = vmul.f32 %v469_v6, %v4957_v34 }
 0x149   : > { %786 = vrot.lane.b32.xlu1 %v781_v45, %s4658_s11  ;;  %798 = vrot.lane.b32.xlu0 %v794_v46, %s4659_s13  ;;  %v432_v45 = vstv %s5099_s8  ;;  %s5181_s8 = sld [smem:[#allocation5 + $0x108]] }
 0x14a   : > { %v433_v55 = vmul.f32 %v432_v45, %v4947_v28 }
 0x14d   : > { %800 = vrot.lane.b32.xlu1 %v795_v49, %s4659_s13  ;;  %820 = vrot.lane.b32.xlu0 %v816_v50, %s4658_s11 }
 0x151   : > { %822 = vrot.lane.b32.xlu1 %v817_v53, %s4658_s11  ;;  %834 = vrot.lane.b32.xlu0 %v830_v54, %s4659_s13  ;;  %v960_v53 = vmul.f32 %v959_v43, %v5007_v4 }
 0x155   : > { %836 = vrot.lane.b32.xlu1 %v831_v57, %s4659_s13  ;;  %856 = vrot.lane.b32.xlu0 %v852_v59, %s4658_s11  ;;  %v973_v57 = vstv %s5105_s18  ;;  %s5189_s18 = sld [smem:[#allocation5 + $0x10a]] }
 0x156   : > { %v974_v1 = vmul.f32 %v973_v57, %v5007_v4 }
 0x159   : > { %858 = vrot.lane.b32.xlu1 %v853_v61, %s4658_s11  ;;  %870 = vrot.lane.b32.xlu0 %v866_v62, %s4659_s13 }
 0x15d   : > { %872 = vrot.lane.b32.xlu1 %v867_v2, %s4659_s13  ;;  %892 = vrot.lane.b32.xlu0 %v888_v3, %s4658_s11  ;;  %v434_v3 = vmul.f32 %v432_v45, %v4953_v32 }
 0x15f   : > { %v372_v9 = vpop.permute.xlu0 %371 }
 0x160   : > { %v377_v21 = vadd.f32 %v372_v9, %v363_v14  ;;  %v975_v14 = vmul.f32 %v973_v57, %v5013_v8 }
 0x161   : > { %894 = vrot.lane.b32.xlu1 %v889_v10, %s4658_s11  ;;  %906 = vrot.lane.b32.xlu0 %v902_v11, %s4659_s13 }
 0x163   : > { %v374_v22 = vpop.permute.xlu1 %373  ;;  %v386_v23 = vpop.permute.xlu0 %385 }
 0x164   : > { %v391_v29 = vadd.f32 %v386_v23, %v377_v21  ;;  %v378_v33 = vadd.f32 %v374_v22, %v364_v27  ;;  %v1009_v21 = vstv %s5124_s6  ;;  %v997_v27 = vmul.f32 %v995_v5, %v5025_v18  ;;  %s5208_s6 = sld [smem:[#allocation5 + $0x10d]] }
 0x165   : > { %908 = vrot.lane.b32.xlu1 %v903_v25, %s4659_s13  ;;  %928 = vrot.lane.b32.xlu0 %v924_v26, %s4658_s11 }
 0x166   : > { %v399_v35 = vadd.f32 %v397_v30, %v391_v29  ;;  %v1010_v29 = vmul.f32 %v1009_v21, %v5019_v13 }
 0x167   : > { %v388_v36 = vpop.permute.xlu1 %387  ;;  %v408_v37 = vpop.permute.xlu0 %407 }
 0x168   : > { %v392_v41 = vadd.f32 %v388_v36, %v378_v33  ;;  %v413_v46 = vadd.f32 %v408_v37, %v399_v35  ;;  %v1047_v33 = vstv %s5132_s7  ;;  %v505_v35 = vstv %s5137_s30  ;;  %s5213_s7 = sld [smem:[#allocation5 + $0x18]]  ;;  %s5219_s30 = sld [smem:[#allocation5 + $0x10e]] }
 0x169   : > { %930 = vrot.lane.b32.xlu1 %v925_v38, %s4658_s11  ;;  %942 = vrot.lane.b32.xlu0 %v938_v39, %s4659_s13  ;;  %v506_v45 = vmul.f32 %v505_v35, %v4971_v44  ;;  %v507_v57 = vmul.f32 %v505_v35, %v4977_v48 }
 0x16a   : > { %v400_v47 = vadd.f32 %v398_v42, %v392_v41  ;;  %v1011_v41 = vmul.f32 %v1009_v21, %v5025_v18  ;;  %v1048_v42 = vmul.f32 %v1047_v33, %v4925_v12 }
 0x16b   : > { %v410_v49 = vpop.permute.xlu1 %409  ;;  %v422_v50 = vpop.permute.xlu0 %421 }
 0x16c   : > { %v427_v54 = vadd.f32 %v422_v50, %v413_v46  ;;  %v414_v59 = vadd.f32 %v410_v49, %v400_v47  ;;  %v1061_v46 = vstv %s5143_s14  ;;  %s5227_s14 = sld [smem:[#allocation5 + $0x110]] }
 0x16d   : > { %944 = vrot.lane.b32.xlu1 %v939_v51, %s4659_s13  ;;  %964 = vrot.lane.b32.xlu0 %v960_v53, %s4658_s11  ;;  %v1049_v53 = vmul.f32 %v1047_v33, %v4931_v17 }
 0x16e   : > { %v435_v60 = vadd.f32 %v433_v55, %v427_v54  ;;  %v1062_v54 = vmul.f32 %v1061_v46, %v4925_v12 }
 0x16f   : > { %v424_v61 = vpop.permute.xlu1 %423  ;;  %v444_v62 = vpop.permute.xlu0 %443 }
 0x170   : > { %v428_v2 = vadd.f32 %v424_v61, %v414_v59  ;;  %v449_v7 = vadd.f32 %v444_v62, %v435_v60  ;;  %v1083_v59 = vstv %s5151_s15  ;;  %v541_v60 = vstv %s5156_s16  ;;  %s5232_s15 = sld [smem:[#allocation5 + $0x80]]  ;;  %s5238_s16 = sld [smem:[#allocation5 + $0x111]] }
 0x171   : > { %966 = vrot.lane.b32.xlu1 %v961_v0, %s4658_s11  ;;  %978 = vrot.lane.b32.xlu0 %v974_v1, %s4659_s13  ;;  %v542_v6 = vmul.f32 %v541_v60, %v4983_v52  ;;  %v543_v21 = vmul.f32 %v541_v60, %v4989_v56 }
 0x172   : > { %v436_v9 = vadd.f32 %v434_v3, %v428_v2  ;;  %v1063_v2 = vmul.f32 %v1061_v46, %v4931_v17  ;;  %v1084_v3 = vmul.f32 %v1083_v59, %v4935_v20 }
 0x173   : > { %v446_v10 = vpop.permute.xlu1 %445  ;;  %v458_v11 = vpop.permute.xlu0 %457 }
 0x174   : > { %v463_v16 = vadd.f32 %v458_v11, %v449_v7  ;;  %v450_v22 = vadd.f32 %v446_v10, %v436_v9  ;;  %v1097_v7 = vstv %s5162_s17  ;;  %s5242_s17 = sld [smem:[#allocation10 + $0x1]] }
 0x175   : > { %980 = vrot.lane.b32.xlu1 %v975_v14, %s4659_s13  ;;  %1000 = vrot.lane.b32.xlu0 %v996_v15, %s4658_s11  ;;  %v1085_v15 = vmul.f32 %v1083_v59, %v4941_v24 }
 0x176   : > { %v472_v23 = vadd.f32 %v470_v19, %v463_v16  ;;  %v1098_v16 = vmul.f32 %v1097_v7, %v4935_v20 }
 0x177   : > { %v460_v25 = vpop.permute.xlu1 %459  ;;  %v481_v26 = vpop.permute.xlu0 %480 }
 0x178   : > { %v464_v30 = vadd.f32 %v460_v25, %v450_v22  ;;  %v486_v36 = vadd.f32 %v481_v26, %v472_v23  ;;  %v1119_v22 = vstv %s5170_s19  ;;  %v578_v23 = vstv %s5175_s29  ;;  %s5252_s19 = sld [smem:[#allocation5 + $0x113]] }
 0x179   : > { %1002 = vrot.lane.b32.xlu1 %v997_v27, %s4658_s11  ;;  %1014 = vrot.lane.b32.xlu0 %v1010_v29, %s4659_s13  ;;  %v579_v35 = vmul.f32 %v578_v23, %v4993_v58  ;;  %v580_v46 = vmul.f32 %v578_v23, %v5000_v63  ;;  %s5257_s29 = sld [smem:[#allocation5 + $0x83]] }
 0x17a   : > { %v473_v37 = vadd.f32 %v471_v31, %v464_v30  ;;  %v1099_v30 = vmul.f32 %v1097_v7, %v4941_v24  ;;  %v1120_v31 = vmul.f32 %v1119_v22, %v4947_v28 }
 0x17b   : > { %v483_v38 = vpop.permute.xlu1 %482  ;;  %v495_v39 = vpop.permute.xlu0 %494 }
 0x17c   : > { %v500_v43 = vadd.f32 %v495_v39, %v486_v36  ;;  %v487_v47 = vadd.f32 %v483_v38, %v473_v37  ;;  %v1133_v36 = vstv %s5181_s8  ;;  %s5269_s8 = sld [smem:[#allocation5 + $0x114]] }
 0x17d   : > { %1016 = vrot.lane.b32.xlu1 %v1011_v41, %s4659_s13  ;;  %1052 = vrot.lane.b32.xlu0 %v1048_v42, %s4658_s11  ;;  %v1121_v42 = vmul.f32 %v1119_v22, %v4953_v32 }
 0x17e   : > { %v508_v49 = vadd.f32 %v506_v45, %v500_v43  ;;  %v1134_v43 = vmul.f32 %v1133_v36, %v4947_v28 }
 0x17f   : > { %v497_v50 = vpop.permute.xlu1 %496  ;;  %v517_v51 = vpop.permute.xlu0 %516 }
 0x180   : > { %v501_v55 = vadd.f32 %v497_v50, %v487_v47  ;;  %v522_v61 = vadd.f32 %v517_v51, %v508_v49  ;;  %v1155_v47 = vstv %s5189_s18  ;;  %v614_v49 = vstv %s5194_s24  ;;  %s5280_s18 = sld [smem:[#allocation5 + $0x116]] }
 0x181   : > { %1054 = vrot.lane.b32.xlu1 %v1049_v53, %s4658_s11  ;;  %1066 = vrot.lane.b32.xlu0 %v1062_v54, %s4659_s13  ;;  %v615_v60 = vmul.f32 %v614_v49, %v5007_v4  ;;  %v616_v7 = vmul.f32 %v614_v49, %v5013_v8  ;;  %v696_v49 = vstv %s5242_s17  ;;  %s5285_s24 = sld [smem:[#allocation5 + $0x86]]  ;;  %s5339_s17 = sld [smem:[#allocation5 + $0x184]] }
 0x182   : > { %v509_v62 = vadd.f32 %v507_v57, %v501_v55  ;;  %v1135_v55 = vmul.f32 %v1133_v36, %v4953_v32  ;;  %v1156_v57 = vmul.f32 %v1155_v47, %v4957_v34 }
 0x183   : > { %v519_v0 = vpop.permute.xlu1 %518  ;;  %v531_v1 = vpop.permute.xlu0 %530 }
 0x184   : > { %v536_v5 = vadd.f32 %v531_v1, %v522_v61  ;;  %v523_v9 = vadd.f32 %v519_v0, %v509_v62  ;;  %v1169_v61 = vstv %s5200_s25  ;;  %s5291_s25 = sld [smem:[#allocation5 + $0x117]] }
 0x185   : > { %1068 = vrot.lane.b32.xlu1 %v1063_v2, %s4659_s13  ;;  %1088 = vrot.lane.b32.xlu0 %v1084_v3, %s4658_s11  ;;  %v1157_v3 = vmul.f32 %v1155_v47, %v4965_v40  ;;  %v1241_v47 = vstv %s5238_s16  ;;  %s5329_s16 = sld [smem:[#allocation5 + $0x182]] }
 0x186   : > { %v544_v10 = vadd.f32 %v542_v6, %v536_v5  ;;  %v1170_v5 = vmul.f32 %v1169_v61, %v4957_v34 }
 0x187   : > { %v533_v11 = vpop.permute.xlu1 %532  ;;  %v553_v14 = vpop.permute.xlu0 %552 }
 0x188   : > { %v537_v19 = vadd.f32 %v533_v11, %v523_v9  ;;  %v558_v25 = vadd.f32 %v553_v14, %v544_v10  ;;  %v1191_v9 = vstv %s5208_s6  ;;  %v650_v10 = vstv %s5213_s7  ;;  %s5299_s6 = sld [smem:[#allocation5 + $0x119]] }
 0x189   : > { %1090 = vrot.lane.b32.xlu1 %v1085_v15, %s4658_s11  ;;  %1102 = vrot.lane.b32.xlu0 %v1098_v16, %s4659_s13  ;;  %v651_v23 = vmul.f32 %v650_v10, %v5019_v13  ;;  %v652_v36 = vmul.f32 %v650_v10, %v5025_v18  ;;  %s5304_s7 = sld [smem:[#allocation5 + $0x89]] }
 0x18a   : > { %v545_v26 = vadd.f32 %v543_v21, %v537_v19  ;;  %v1171_v19 = vmul.f32 %v1169_v61, %v4965_v40  ;;  %v1192_v21 = vmul.f32 %v1191_v9, %v4971_v44 }
 0x18b   : > { %v555_v27 = vpop.permute.xlu1 %554  ;;  %v567_v29 = vpop.permute.xlu0 %566 }
 0x18c   : > { %v572_v33 = vadd.f32 %v567_v29, %v558_v25  ;;  %v559_v37 = vadd.f32 %v555_v27, %v545_v26  ;;  %v1205_v25 = vstv %s5219_s30  ;;  %s5310_s30 = sld [smem:[#allocation5 + $0x11a]] }
 0x18d   : > { %1104 = vrot.lane.b32.xlu1 %v1099_v30, %s4659_s13  ;;  %1124 = vrot.lane.b32.xlu0 %v1120_v31, %s4658_s11  ;;  %v1193_v31 = vmul.f32 %v1191_v9, %v4977_v48 }
 0x18e   : > { %v581_v38 = vadd.f32 %v579_v35, %v572_v33  ;;  %v1206_v33 = vmul.f32 %v1205_v25, %v4971_v44 }
 0x18f   : > { %v569_v39 = vpop.permute.xlu1 %568  ;;  %v590_v41 = vpop.permute.xlu0 %589 }
 0x190   : > { %v573_v45 = vadd.f32 %v569_v39, %v559_v37  ;;  %v595_v50 = vadd.f32 %v590_v41, %v581_v38  ;;  %v1227_v37 = vstv %s5227_s14  ;;  %v701_v38 = vstv %s5232_s15  ;;  %s5318_s14 = sld [smem:[#allocation5 + $0x181]]  ;;  %s5323_s15 = sld [smem:[#allocation5 + $0x8c]] }
 0x191   : > { %1126 = vrot.lane.b32.xlu1 %v1121_v42, %s4658_s11  ;;  %1138 = vrot.lane.b32.xlu0 %v1134_v43, %s4659_s13  ;;  %v1207_v43 = vmul.f32 %v1205_v25, %v4977_v48 }
 0x192   : > { %v582_v51 = vadd.f32 %v580_v46, %v573_v45  ;;  %v1228_v45 = vmul.f32 %v1227_v37, %v4983_v52  ;;  %v702_v46 = vmul.f32 %v701_v38, %v4925_v12  ;;  %v703_v12 = vmul.f32 %v701_v38, %v4931_v17 }
 0x193   : > { %v592_v53 = vpop.permute.xlu1 %591  ;;  %v604_v54 = vpop.permute.xlu0 %603 }
 0x194   : > { %v609_v59 = vadd.f32 %v604_v54, %v595_v50  ;;  %v596_v62 = vadd.f32 %v592_v53, %v582_v51  ;;  %v1229_v53 = vmul.f32 %v1227_v37, %v4989_v56  ;;  %v1242_v54 = vmul.f32 %v1241_v47, %v4983_v52 }
 0x195   : > { %1140 = vrot.lane.b32.xlu1 %v1135_v55, %s4659_s13  ;;  %1160 = vrot.lane.b32.xlu0 %v1156_v57, %s4658_s11  ;;  %v704_v55 = vadd.f32 %v702_v46, %v696_v49  ;;  %v1263_v57 = vstv %s5252_s19  ;;  %s5344_s19 = sld [smem:[#allocation5 + $0x8f]] }
 0x196   : > { %v617_v0 = vadd.f32 %v615_v60, %v609_v59  ;;  %v737_v59 = vstv %s5257_s29  ;;  %s5352_s29 = sld [smem:[#allocation5 + $0x185]] }
 0x197   : > { %v606_v1 = vpop.permute.xlu1 %605  ;;  %v626_v2 = vpop.permute.xlu0 %625 }
 0x198   : > { %v610_v6 = vadd.f32 %v606_v1, %v596_v62  ;;  %v631_v11 = vadd.f32 %v626_v2, %v617_v0  ;;  %v1243_v0 = vmul.f32 %v1241_v47, %v4989_v56  ;;  %v1264_v1 = vmul.f32 %v1263_v57, %v4993_v58 }
 0x199   : > { %1162 = vrot.lane.b32.xlu1 %v1157_v3, %s4658_s11  ;;  %1174 = vrot.lane.b32.xlu0 %v1170_v5, %s4659_s13  ;;  %v705_v2 = vadd.f32 %v703_v12, %v696_v49  ;;  %v738_v3 = vmul.f32 %v737_v59, %v4935_v20  ;;  %v1277_v5 = vstv %s5269_s8  ;;  %v739_v20 = vmul.f32 %v737_v59, %v4941_v24  ;;  %s5362_s8 = sld [smem:[#allocation5 + $0x187]] }
 0x19a   : > { %v618_v14 = vadd.f32 %v616_v7, %v610_v6  ;;  %v1335_v47 = vstv %s5299_s6  ;;  %v809_v49 = vstv %s5304_s7  ;;  %v1349_v59 = vstv %s5310_s30  ;;  %s5390_s6 = sld [smem:[#allocation5 + $0x95]]  ;;  %s5398_s7 = sld [smem:[#allocation5 + $0x18b]] }
 0x19b   : > { %v628_v15 = vpop.permute.xlu1 %627  ;;  %v640_v16 = vpop.permute.xlu0 %639  ;;  %v1336_v12 = vmul.f32 %v1335_v47, %v5019_v13  ;;  %s5408_s30 = sld [smem:[#allocation5 + $0x18d]] }
 0x19c   : > { %v645_v22 = vadd.f32 %v640_v16, %v631_v11  ;;  %v632_v26 = vadd.f32 %v628_v15, %v618_v14  ;;  %v1265_v11 = vmul.f32 %v1263_v57, %v5000_v63  ;;  %v1278_v14 = vmul.f32 %v1277_v5, %v4993_v58 }
 0x19d   : > { %1176 = vrot.lane.b32.xlu1 %v1171_v19, %s4659_s13  ;;  %1196 = vrot.lane.b32.xlu0 %v1192_v21, %s4658_s11  ;;  %v1299_v16 = vstv %s5280_s18  ;;  %v773_v19 = vstv %s5285_s24  ;;  %v810_v57 = vmul.f32 %v809_v49, %v4957_v34  ;;  %v5336_v34 = vld [vmem:[#allocation2] sm:$0xff]  ;;  %s5367_s18 = sld [smem:[#allocation5 + $0x92]]  ;;  %s5375_s24 = sld [smem:[#allocation5 + $0x188]] }
 0x19e   : > { %v5244_v27 = vadd.f32 %v651_v23, %v645_v22 }
 0x19f   : > { %v642_v29 = vpop.permute.xlu1 %641  ;;  %v5246_v30 = vpop.permute.xlu0 %661 }
 0x1a0   : > { %v646_v35 = vadd.f32 %v642_v29, %v632_v26  ;;  %v1279_v26 = vmul.f32 %v1277_v5, %v5000_v63  ;;  %v1300_v29 = vmul.f32 %v1299_v16, %v5007_v4  ;;  %v845_v5 = vstv %s5323_s15  ;;  %s5423_s15 = sld [smem:[#allocation5 + $0x18e]] }
 0x1a1   : > { %1198 = vrot.lane.b32.xlu1 %v1193_v31, %s4658_s11  ;;  %1210 = vrot.lane.b32.xlu0 %v1206_v33, %s4659_s13  ;;  %v774_v31 = vmul.f32 %v773_v19, %v4947_v28  ;;  %v1313_v33 = vstv %s5291_s25  ;;  %v775_v28 = vmul.f32 %v773_v19, %v4953_v32  ;;  %s5385_s25 = sld [smem:[#allocation5 + $0x18a]] }
 0x1a2   : > { %v5259_v39 = vadd.f32 %v652_v36, %v646_v35 }
 0x1a3   : > { %v5261_v41 = vpop.permute.xlu1 %663  ;;  %v5263_v42 = vpop.permute.xlu0 %675 }
 0x1a5   : > { %1212 = vrot.lane.b32.xlu1 %v1207_v43, %s4659_s13  ;;  %1232 = vrot.lane.b32.xlu0 %v1228_v45, %s4658_s11  ;;  %v1301_v43 = vmul.f32 %v1299_v16, %v5013_v8  ;;  %v1314_v45 = vmul.f32 %v1313_v33, %v5007_v4  ;;  %v1315_v4 = vmul.f32 %v1313_v33, %v5013_v8 }
 0x1a6   : > { %v1337_v8 = vmul.f32 %v1335_v47, %v5025_v18 }
 0x1a7   : > { %v5274_v50 = vpop.permute.xlu1 %677  ;;  %v713_v51 = vpop.permute.xlu0 %712 }
 0x1a8   : > { %v718_v60 = vadd.f32 %v713_v51, %v704_v55 }
 0x1a9   : > { %1234 = vrot.lane.b32.xlu1 %v1229_v53, %s4658_s11  ;;  %1246 = vrot.lane.b32.xlu0 %v1242_v54, %s4659_s13 }
 0x1ab   : > { %v715_v61 = vpop.permute.xlu1 %714  ;;  %v727_v62 = vpop.permute.xlu0 %726 }
 0x1ac   : > { %v732_v17 = vadd.f32 %v727_v62, %v718_v60  ;;  %v719_v6 = vadd.f32 %v715_v61, %v705_v2 }
 0x1ad   : > { %1248 = vrot.lane.b32.xlu1 %v1243_v0, %s4659_s13  ;;  %1268 = vrot.lane.b32.xlu0 %v1264_v1, %s4658_s11  ;;  %v1350_v1 = vmul.f32 %v1349_v59, %v5019_v13 }
 0x1ae   : > { %v740_v7 = vadd.f32 %v738_v3, %v732_v17  ;;  %v811_v17 = vmul.f32 %v809_v49, %v4965_v40  ;;  %v1387_v3 = vstv %s5318_s14  ;;  %s5413_s14 = sld [smem:[#allocation5 + $0x98]] }
 0x1af   : > { %v729_v9 = vpop.permute.xlu1 %728  ;;  %v749_v10 = vpop.permute.xlu0 %748  ;;  %v1388_v40 = vmul.f32 %v1387_v3, %v5336_v34 }
 0x1b0   : > { %v733_v15 = vadd.f32 %v729_v9, %v719_v6  ;;  %v754_v21 = vadd.f32 %v749_v10, %v740_v7  ;;  %v1351_v10 = vmul.f32 %v1349_v59, %v5025_v18 }
 0x1b1   : > { %1270 = vrot.lane.b32.xlu1 %v1265_v11, %s4658_s11  ;;  %1282 = vrot.lane.b32.xlu0 %v1278_v14, %s4659_s13  ;;  %v846_v14 = vmul.f32 %v845_v5, %v4971_v44  ;;  %v847_v44 = vmul.f32 %v845_v5, %v4977_v48 }
 0x1b2   : > { %v741_v22 = vadd.f32 %v739_v20, %v733_v15  ;;  %v5349_v15 = vld [vmem:[#allocation2 + $0x8] sm:$0xff]  ;;  %v1401_v20 = vstv %s5329_s16  ;;  %s5435_s16 = sld [smem:[#allocation5 + $0x190]] }
 0x1b3   : > { %v751_v23 = vpop.permute.xlu1 %750  ;;  %v763_v25 = vpop.permute.xlu0 %762 }
 0x1b4   : > { %v768_v24 = vadd.f32 %v763_v25, %v754_v21  ;;  %v755_v35 = vadd.f32 %v751_v23, %v741_v22  ;;  %v1389_v22 = vmul.f32 %v1387_v3, %v5349_v15  ;;  %v1402_v23 = vmul.f32 %v1401_v20, %v5336_v34 }
 0x1b5   : > { %1284 = vrot.lane.b32.xlu1 %v1279_v26, %s4659_s13  ;;  %1304 = vrot.lane.b32.xlu0 %v1300_v29, %s4658_s11  ;;  %v5359_v26 = vld [vmem:[#allocation2 + $0x1] sm:$0xff]  ;;  %v1423_v29 = vstv %s5339_s17  ;;  %s5440_s17 = sld [smem:[#allocation5 + $0x100]] }
 0x1b6   : > { %v776_v36 = vadd.f32 %v774_v31, %v768_v24  ;;  %v881_v24 = vstv %s5344_s19  ;;  %v1424_v48 = vmul.f32 %v1423_v29, %v5359_v26  ;;  %s5450_s19 = sld [smem:[#allocation5 + $0x191]] }
 0x1b7   : > { %v765_v37 = vpop.permute.xlu1 %764  ;;  %v785_v38 = vpop.permute.xlu0 %784 }
 0x1b8   : > { %v769_v46 = vadd.f32 %v765_v37, %v755_v35  ;;  %v790_v51 = vadd.f32 %v785_v38, %v776_v36  ;;  %v1403_v37 = vmul.f32 %v1401_v20, %v5349_v15 }
 0x1b9   : > { %1306 = vrot.lane.b32.xlu1 %v1301_v43, %s4658_s11  ;;  %1318 = vrot.lane.b32.xlu0 %v1314_v45, %s4659_s13  ;;  %v882_v43 = vmul.f32 %v881_v24, %v4983_v52  ;;  %v5372_v45 = vld [vmem:[#allocation2 + $0x9] sm:$0xff]  ;;  %v883_v52 = vmul.f32 %v881_v24, %v4989_v56 }
 0x1ba   : > { %v777_v53 = vadd.f32 %v775_v28, %v769_v46  ;;  %v1437_v46 = vstv %s5352_s29  ;;  %s5454_s29 = sld [smem:[#allocation10 + $0x2]] }
 0x1bb   : > { %v787_v54 = vpop.permute.xlu1 %786  ;;  %v799_v55 = vpop.permute.xlu0 %798 }
 0x1bc   : > { %v804_v32 = vadd.f32 %v799_v55, %v790_v51  ;;  %v791_v60 = vadd.f32 %v787_v54, %v777_v53  ;;  %v1425_v53 = vmul.f32 %v1423_v29, %v5372_v45  ;;  %v1438_v54 = vmul.f32 %v1437_v46, %v5359_v26 }
 0x1bd   : > { %1320 = vrot.lane.b32.xlu1 %v1315_v4, %s4659_s13  ;;  %1340 = vrot.lane.b32.xlu0 %v1336_v12, %s4658_s11  ;;  %v5382_v4 = vld [vmem:[#allocation2 + $0x2] sm:$0xff]  ;;  %v1459_v12 = vstv %s5362_s8  ;;  %s5468_s8 = sld [smem:[#allocation5 + $0x193]] }
 0x1be   : > { %v812_v61 = vadd.f32 %v810_v57, %v804_v32  ;;  %v917_v32 = vstv %s5367_s18  ;;  %v1460_v56 = vmul.f32 %v1459_v12, %v5382_v4  ;;  %s5473_s18 = sld [smem:[#allocation5 + $0x103]] }
 0x1bf   : > { %v801_v62 = vpop.permute.xlu1 %800  ;;  %v821_v0 = vpop.permute.xlu0 %820 }
 0x1c0   : > { %v805_v2 = vadd.f32 %v801_v62, %v791_v60  ;;  %v826_v6 = vadd.f32 %v821_v0, %v812_v61  ;;  %v1439_v62 = vmul.f32 %v1437_v46, %v5372_v45  ;;  %v1531_v46 = vstv %s5408_s30  ;;  %s4148_s30 = sld [smem:[#allocation5 + $0x10f]] }
 0x1c1   : > { %1342 = vrot.lane.b32.xlu1 %v1337_v8, %s4658_s11  ;;  %1354 = vrot.lane.b32.xlu0 %v1350_v1, %s4659_s13  ;;  %v918_v8 = vmul.f32 %v917_v32, %v4993_v58  ;;  %v5395_v1 = vld [vmem:[#allocation2 + $0xa] sm:$0xff]  ;;  %v919_v58 = vmul.f32 %v917_v32, %v5000_v63 }
 0x1c2   : > { %v813_v7 = vadd.f32 %v811_v17, %v805_v2  ;;  %v1473_v2 = vstv %s5375_s24  ;;  %s5484_s24 = sld [smem:[#allocation5 + $0x194]] }
 0x1c3   : > { %v823_v9 = vpop.permute.xlu1 %822  ;;  %v835_v13 = vpop.permute.xlu0 %834 }
 0x1c4   : > { %v840_v11 = vadd.f32 %v835_v13, %v826_v6  ;;  %v827_v16 = vadd.f32 %v823_v9, %v813_v7  ;;  %v1461_v7 = vmul.f32 %v1459_v12, %v5395_v1  ;;  %v1474_v9 = vmul.f32 %v1473_v2, %v5382_v4  ;;  %v5444_v12 = vld [vmem:[#allocation2 + $0x32] sm:$0xff] }
 0x1c5   : > { %1356 = vrot.lane.b32.xlu1 %v1351_v10, %s4659_s13  ;;  %1392 = vrot.lane.b32.xlu0 %v1388_v40, %s4658_s11  ;;  %v5405_v10 = vld [vmem:[#allocation2 + $0x18] sm:$0xff]  ;;  %v1495_v40 = vstv %s5385_s25  ;;  %s5497_s25 = sld [smem:[#allocation5 + $0x106]] }
 0x1c6   : > { %v848_v19 = vadd.f32 %v846_v14, %v840_v11  ;;  %v953_v11 = vstv %s5390_s6  ;;  %v1496_v63 = vmul.f32 %v1495_v40, %v5405_v10  ;;  %s5518_s6 = sld [smem:[#allocation5 + $0x109]] }
 0x1c7   : > { %v837_v21 = vpop.permute.xlu1 %836  ;;  %v857_v18 = vpop.permute.xlu0 %856 }
 0x1c8   : > { %v841_v25 = vadd.f32 %v837_v21, %v827_v16  ;;  %v862_v31 = vadd.f32 %v857_v18, %v848_v19  ;;  %v1475_v21 = vmul.f32 %v1473_v2, %v5395_v1 }
 0x1c9   : > { %1394 = vrot.lane.b32.xlu1 %v1389_v22, %s4658_s11  ;;  %1406 = vrot.lane.b32.xlu0 %v1402_v23, %s4659_s13  ;;  %v5417_v22 = vld [vmem:[#allocation2 + $0x31] sm:$0xff] }
 0x1ca   : > { %v849_v33 = vadd.f32 %v847_v44, %v841_v25  ;;  %v954_v23 = vmul.f32 %v5417_v22, %v953_v11  ;;  %v5420_v25 = vld [vmem:[#allocation2 + $0x20] sm:$0xff]  ;;  %v1509_v44 = vstv %s5398_s7  ;;  %s5529_s7 = sld [smem:[#allocation5 + $0x10c]] }
 0x1cb   : > { %v859_v35 = vpop.permute.xlu1 %858  ;;  %v871_v36 = vpop.permute.xlu0 %870 }
 0x1cc   : > { %v876_v38 = vadd.f32 %v871_v36, %v862_v31  ;;  %v863_v28 = vadd.f32 %v859_v35, %v849_v33  ;;  %v1497_v35 = vmul.f32 %v1495_v40, %v5420_v25  ;;  %v1510_v36 = vmul.f32 %v1509_v44, %v5405_v10 }
 0x1cd   : > { %1408 = vrot.lane.b32.xlu1 %v1403_v37, %s4659_s13  ;;  %1428 = vrot.lane.b32.xlu0 %v1424_v48, %s4658_s11  ;;  %v5429_v48 = vld [vmem:[#allocation2 + $0x39] sm:$0xff] }
 0x1ce   : > { %v884_v47 = vadd.f32 %v882_v43, %v876_v38  ;;  %v955_v38 = vmul.f32 %v5429_v48, %v953_v11  ;;  %v5432_v43 = vld [vmem:[#allocation2 + $0x19] sm:$0xff] }
 0x1cf   : > { %v873_v49 = vpop.permute.xlu1 %872  ;;  %v893_v51 = vpop.permute.xlu0 %892 }
 0x1d0   : > { %v877_v55 = vadd.f32 %v873_v49, %v863_v28  ;;  %v898_v57 = vadd.f32 %v893_v51, %v884_v47  ;;  %v989_v28 = vstv %s5413_s14  ;;  %s4151_s14 = sld [smem:[#allocation5 + $0x112]] }
 0x1d1   : > { %1430 = vrot.lane.b32.xlu1 %v1425_v53, %s4658_s11  ;;  %1442 = vrot.lane.b32.xlu0 %v1438_v54, %s4659_s13  ;;  %v1511_v54 = vmul.f32 %v1509_v44, %v5420_v25  ;;  %v990_v32 = vmul.f32 %v5444_v12, %v989_v28 }
 0x1d2   : > { %v885_v59 = vadd.f32 %v883_v52, %v877_v55  ;;  %v1532_v55 = vmul.f32 %v1531_v46, %v5432_v43 }
 0x1d3   : > { %v895_v60 = vpop.permute.xlu1 %894  ;;  %v907_v61 = vpop.permute.xlu0 %906 }
 0x1d4   : > { %v912_v0 = vadd.f32 %v907_v61, %v898_v57  ;;  %v899_v17 = vadd.f32 %v895_v60, %v885_v59  ;;  %v5447_v57 = vld [vmem:[#allocation2 + $0x21] sm:$0xff]  ;;  %v1545_v59 = vstv %s5423_s15  ;;  %s4154_s15 = sld [smem:[#allocation5 + $0x115]] }
 0x1d5   : > { %1444 = vrot.lane.b32.xlu1 %v1439_v62, %s4659_s13  ;;  %1464 = vrot.lane.b32.xlu0 %v1460_v56, %s4658_s11  ;;  %v1547_v40 = vmul.f32 %v1545_v59, %v5447_v57 }
 0x1d6   : > { %v920_v3 = vadd.f32 %v918_v8, %v912_v0  ;;  %v1533_v0 = vmul.f32 %v1531_v46, %v5447_v57  ;;  %v1546_v8 = vmul.f32 %v1545_v59, %v5432_v43 }
 0x1d7   : > { %v909_v5 = vpop.permute.xlu1 %908  ;;  %v929_v6 = vpop.permute.xlu0 %928 }
 0x1d8   : > { %v913_v13 = vadd.f32 %v909_v5, %v899_v17  ;;  %v934_v14 = vadd.f32 %v929_v6, %v920_v3  ;;  %v5462_v17 = vld [vmem:[#allocation2 + $0x3a] sm:$0xff]  ;;  %v1567_v6 = vstv %s5435_s16  ;;  %s4157_s16 = sld [smem:[#allocation5 + $0x118]] }
 0x1d9   : > { %1466 = vrot.lane.b32.xlu1 %v1461_v7, %s4658_s11  ;;  %1478 = vrot.lane.b32.xlu0 %v1474_v9, %s4659_s13  ;;  %v991_v3 = vmul.f32 %v5462_v17, %v989_v28  ;;  %v5465_v5 = vld [vmem:[#allocation2 + $0x1a] sm:$0xff]  ;;  %v1041_v7 = vstv %s5440_s17  ;;  %s5535_s17 = sld [smem:[#allocation5 + $0x180]] }
 0x1da   : > { %v921_v20 = vadd.f32 %v919_v58, %v913_v13  ;;  %v1568_v11 = vmul.f32 %v1567_v6, %v5465_v5 }
 0x1db   : > { %v931_v16 = vpop.permute.xlu1 %930  ;;  %v943_v19 = vpop.permute.xlu0 %942 }
 0x1dc   : > { %v948_v18 = vadd.f32 %v943_v19, %v934_v14  ;;  %v935_v29 = vadd.f32 %v931_v16, %v921_v20  ;;  %v4469_v14 = vld [vmem:[#allocation2] sm:$0xff]  ;;  %v1581_v19 = vstv %s5450_s19  ;;  %s5538_s19 = sld [smem:[#allocation10 + $0x3]] }
 0x1dd   : > { %1480 = vrot.lane.b32.xlu1 %v1475_v21, %s4659_s13  ;;  %1500 = vrot.lane.b32.xlu0 %v1496_v63, %s4658_s11  ;;  %v1042_v20 = vmul.f32 %v4469_v14, %v1041_v7  ;;  %v5481_v16 = vld [vmem:[#allocation2 + $0x22] sm:$0xff]  ;;  %v1036_v21 = vstv %s5454_s29  ;;  %v1582_v44 = vmul.f32 %v1581_v19, %v5465_v5  ;;  %s5540_s29 = sld [smem:[#allocation5 + $0x196]] }
 0x1de   : > { %v956_v24 = vadd.f32 %v954_v23, %v948_v18  ;;  %v1569_v23 = vmul.f32 %v1567_v6, %v5481_v16  ;;  %v1583_v28 = vmul.f32 %v1581_v19, %v5481_v16 }
 0x1df   : > { %v945_v31 = vpop.permute.xlu1 %944  ;;  %v965_v33 = vpop.permute.xlu0 %964 }
 0x1e0   : > { %v949_v37 = vadd.f32 %v945_v31, %v935_v29  ;;  %v970_v47 = vadd.f32 %v965_v33, %v956_v24  ;;  %v1044_v29 = vadd.f32 %v1042_v20, %v1036_v21  ;;  %v4470_v24 = vld [vmem:[#allocation2 + $0x8] sm:$0xff]  ;;  %v5491_v33 = vld [vmem:[#allocation2 + $0x30] sm:$0xff] }
 0x1e1   : > { %1502 = vrot.lane.b32.xlu1 %v1497_v35, %s4658_s11  ;;  %1514 = vrot.lane.b32.xlu0 %v1510_v36, %s4659_s13  ;;  %v1043_v31 = vmul.f32 %v4470_v24, %v1041_v7  ;;  %v1603_v35 = vstv %s5468_s8  ;;  %v1077_v36 = vstv %s5473_s18  ;;  %v4472_v7 = vld [vmem:[#allocation2 + $0x9] sm:$0xff]  ;;  %s5544_s8 = sld [smem:[#allocation5 + $0x183]]  ;;  %s5546_s18 = sld [smem:[#allocation5 + $0x197]] }
 0x1e2   : > { %v957_v49 = vadd.f32 %v955_v38, %v949_v37 }
 0x1e3   : > { %v967_v51 = vpop.permute.xlu1 %966  ;;  %v979_v53 = vpop.permute.xlu0 %978 }
 0x1e4   : > { %v984_v52 = vadd.f32 %v979_v53, %v970_v47  ;;  %v971_v60 = vadd.f32 %v967_v51, %v957_v49  ;;  %v1604_v47 = vmul.f32 %v1603_v35, %v5491_v33  ;;  %v1045_v49 = vadd.f32 %v1043_v31, %v1036_v21  ;;  %v4471_v53 = vld [vmem:[#allocation2 + $0x1] sm:$0xff] }
 0x1e5   : > { %1516 = vrot.lane.b32.xlu1 %v1511_v54, %s4659_s13  ;;  %1536 = vrot.lane.b32.xlu0 %v1532_v55, %s4658_s11  ;;  %v1078_v54 = vmul.f32 %v4471_v53, %v1077_v36  ;;  %v5501_v55 = vld [vmem:[#allocation2 + $0x38] sm:$0xff] }
 0x1e6   : > { %v5456_v61 = vadd.f32 %v990_v32, %v984_v52  ;;  %v1617_v52 = vstv %s5484_s24  ;;  %v667_v32 = vadd.f32 %v5246_v30, %v5244_v27  ;;  %v668_v27 = vadd.f32 %v5261_v41, %v5259_v39  ;;  %s5553_s24 = sld [smem:[#allocation5 + $0x199]] }
 0x1e7   : > { %v981_v62 = vpop.permute.xlu1 %980  ;;  %v5458_v56 = vpop.permute.xlu0 %1000  ;;  %v1619_v39 = vmul.f32 %v1617_v52, %v5501_v55 }
 0x1e8   : > { %v985_v2 = vadd.f32 %v981_v62, %v971_v60  ;;  %v681_v62 = vadd.f32 %v5263_v42, %v667_v32  ;;  %v1006_v30 = vadd.f32 %v5458_v56, %v5456_v61  ;;  %v1113_v42 = vstv %s5497_s25  ;;  %s5558_s25 = sld [smem:[#allocation5 + $0x186]] }
 0x1e9   : > { %1538 = vrot.lane.b32.xlu1 %v1533_v0, %s4658_s11  ;;  %1550 = vrot.lane.b32.xlu0 %v1546_v8, %s4659_s13  ;;  %v682_v19 = vadd.f32 %v5274_v50, %v668_v27 }
 0x1ea   : > { %v5475_v9 = vadd.f32 %v991_v3, %v985_v2  ;;  %v1605_v2 = vmul.f32 %v1603_v35, %v5501_v55  ;;  %v1618_v3 = vmul.f32 %v1617_v52, %v5491_v33  ;;  %v683_v20 = vmax.f32 %v681_v62, 0.0 }
 0x1eb   : > { %v5477_v13 = vpop.permute.xlu1 %1002  ;;  %v1015_v58 = vpop.permute.xlu0 %1014  ;;  %v684_v31 = vmax.f32 %v682_v19, 0.0 }
 0x1ec   : > { %v1020_v21 = vadd.f32 %v1015_v58, %v1006_v30  ;;  %v1007_v56 = vadd.f32 %v5477_v13, %v5475_v9  ;;  %v4477_v30 = vld [vmem:[#allocation2 + $0x19] sm:$0xff] }
 0x1ed   : > { %1552 = vrot.lane.b32.xlu1 %v1547_v40, %s4659_s13  ;;  %1572 = vrot.lane.b32.xlu0 %v1568_v11, %s4658_s11  ;;  %v1079_v40 = vmul.f32 %v4472_v7, %v1077_v36 }
 0x1ee   : > { %v1022_v50 = vmax.f32 %v1020_v21, 0.0 }
 0x1ef   : > { %v1017_v63 = vpop.permute.xlu1 %1016  ;;  %v1053_v18 = vpop.permute.xlu0 %1052 }
 0x1f0   : > { %v1058_v37 = vadd.f32 %v1053_v18, %v1044_v29  ;;  %v1021_v58 = vadd.f32 %v1017_v63, %v1007_v56  ;;  %v4475_v63 = vld [vmem:[#allocation2 + $0x18] sm:$0xff] }
 0x1f1   : > { %1574 = vrot.lane.b32.xlu1 %v1569_v23, %s4658_s11  ;;  %1586 = vrot.lane.b32.xlu0 %v1582_v44, %s4659_s13  ;;  %v4473_v44 = vld [vmem:[#allocation2 + $0x2] sm:$0xff] }
 0x1f2   : > { %v1114_v61 = vmul.f32 %v4473_v44, %v1113_v42 }
 0x1f3   : > { %v1055_v38 = vpop.permute.xlu1 %1054  ;;  %v1067_v46 = vpop.permute.xlu0 %1066 }
 0x1f4   : > { %v1072_v51 = vadd.f32 %v1067_v46, %v1058_v37  ;;  %v1059_v59 = vadd.f32 %v1055_v38, %v1045_v49  ;;  %v4474_v38 = vld [vmem:[#allocation2 + $0xa] sm:$0xff] }
 0x1f5   : > { %1588 = vrot.lane.b32.xlu1 %v1583_v28, %s4659_s13  ;;  %1608 = vrot.lane.b32.xlu0 %v1604_v47, %s4658_s11  ;;  %v1115_v46 = vmul.f32 %v4474_v38, %v1113_v42  ;;  %v1149_v28 = vstv %s5518_s6  ;;  %v1023_v47 = vmax.f32 %v1021_v58, 0.0  ;;  %v4480_v38 = vld [vmem:[#allocation2 + $0x22] sm:$0xff]  ;;  %s5564_s6 = sld [smem:[#allocation5 + $0x19a]] }
 0x1f6   : > { %v1080_v60 = vadd.f32 %v1078_v54, %v1072_v51  ;;  %v1150_v54 = vmul.f32 %v4475_v63, %v1149_v28 }
 0x1f7   : > { %v1069_v0 = vpop.permute.xlu1 %1068  ;;  %v1089_v8 = vpop.permute.xlu0 %1088 }
 0x1f8   : > { %v1073_v6 = vadd.f32 %v1069_v0, %v1059_v59  ;;  %v1094_v11 = vadd.f32 %v1089_v8, %v1080_v60  ;;  %v4476_v0 = vld [vmem:[#allocation2 + $0x20] sm:$0xff] }
 0x1f9   : > { %1610 = vrot.lane.b32.xlu1 %v1605_v2, %s4658_s11  ;;  %1622 = vrot.lane.b32.xlu0 %v1618_v3, %s4659_s13  ;;  %v1151_v8 = vmul.f32 %v4476_v0, %v1149_v28  ;;  %v1185_v2 = vstv %s5529_s7  ;;  %v1257_v28 = vstv %s4151_s14  ;;  %s5578_s7 = sld [smem:[#allocation5 + $0x189]]  ;;  %s4176_s14 = sld [smem:[#allocation5 + $0x18f]] }
 0x1fa   : > { %v1081_v14 = vadd.f32 %v1079_v40, %v1073_v6  ;;  %v1186_v42 = vmul.f32 %v4477_v30, %v1185_v2 }
 0x1fb   : > { %v1091_v18 = vpop.permute.xlu1 %1090  ;;  %v1103_v23 = vpop.permute.xlu0 %1102 }
 0x1fc   : > { %v1108_v41 = vadd.f32 %v1103_v23, %v1094_v11  ;;  %v1095_v29 = vadd.f32 %v1091_v18, %v1081_v14  ;;  %v4478_v18 = vld [vmem:[#allocation2 + $0x21] sm:$0xff] }
 0x1fd   : > { %1624 = vrot.lane.b32.xlu1 %v1619_v39, %s4659_s13  ;;  %687 = vrot.lane.b32.xlu0 %v683_v20, %s4656_s28  ;;  %v1187_v23 = vmul.f32 %v4478_v18, %v1185_v2  ;;  %v1221_v39 = vstv %s4148_s30  ;;  %s4173_s30 = sld [smem:[#allocation5 + $0x18c]] }
 0x1fe   : > { %v1116_v24 = vadd.f32 %v1114_v61, %v1108_v41 }
 0x1ff   : > { %v1105_v35 = vpop.permute.xlu1 %1104  ;;  %v1125_v36 = vpop.permute.xlu0 %1124 }
 0x200   : > { %v1109_v37 = vadd.f32 %v1105_v35, %v1095_v29  ;;  %v1130_v9 = vadd.f32 %v1125_v36, %v1116_v24  ;;  %v4479_v24 = vld [vmem:[#allocation2 + $0x1a] sm:$0xff] }
 0x201   : > { %689 = vrot.lane.b32.xlu1 %v684_v31, %s4656_s28  ;;  %1026 = vrot.lane.b32.xlu0 %v1022_v50, %s4656_s28  ;;  %v1222_v31 = vmul.f32 %v4479_v24, %v1221_v39 }
 0x202   : > { %v1117_v13 = vadd.f32 %v1115_v46, %v1109_v37  ;;  %v1223_v46 = vmul.f32 %v4480_v38, %v1221_v39 }
 0x203   : > { %v1127_v49 = vpop.permute.xlu1 %1126  ;;  %v1139_v51 = vpop.permute.xlu0 %1138 }
 0x204   : > { %v1144_v53 = vadd.f32 %v1139_v51, %v1130_v9  ;;  %v1131_v52 = vadd.f32 %v1127_v49, %v1117_v13 }
 0x205   : > { %1028 = vrot.lane.b32.xlu1 %v1023_v47, %s4656_s28 }
 0x206   : > { %v1152_v32 = vadd.f32 %v1150_v54, %v1144_v53  ;;  %v4481_v53 = vld [vmem:[#allocation2 + $0x30] sm:$0xff] }
 0x207   : > { %v1141_v59 = vpop.permute.xlu1 %1140  ;;  %v1161_v60 = vpop.permute.xlu0 %1160  ;;  %v1258_v63 = vmul.f32 %v4481_v53, %v1257_v28 }
 0x208   : > { %v1145_v62 = vadd.f32 %v1141_v59, %v1131_v52  ;;  %v1166_v3 = vadd.f32 %v1161_v60, %v1152_v32 }
 0x20a   : > { %v1153_v6 = vadd.f32 %v1151_v8, %v1145_v62  ;;  %v4482_v62 = vld [vmem:[#allocation2 + $0x38] sm:$0xff]  ;;  %v1293_v8 = vstv %s4154_s15  ;;  %s4179_s15 = sld [smem:[#allocation5 + $0x192]] }
 0x20b   : > { %v1163_v7 = vpop.permute.xlu1 %1162  ;;  %v1175_v40 = vpop.permute.xlu0 %1174  ;;  %v1259_v0 = vmul.f32 %v4482_v62, %v1257_v28 }
 0x20c   : > { %v1180_v27 = vadd.f32 %v1175_v40, %v1166_v3  ;;  %v1167_v11 = vadd.f32 %v1163_v7, %v1153_v6 }
 0x20e   : > { %v1188_v14 = vadd.f32 %v1186_v42, %v1180_v27  ;;  %v1294_v27 = vmul.f32 %v5417_v22, %v1293_v8 }
 0x20f   : > { %v1177_v20 = vpop.permute.xlu1 %1176  ;;  %v1197_v19 = vpop.permute.xlu0 %1196 }
 0x210   : > { %v1181_v21 = vadd.f32 %v1177_v20, %v1167_v11  ;;  %v1202_v41 = vadd.f32 %v1197_v19, %v1188_v14  ;;  %v1295_v19 = vmul.f32 %v5429_v48, %v1293_v8  ;;  %v1653_v8 = vstv %s5546_s18  ;;  %s4194_s18 = sld [smem:[#allocation5 + $0x205]] }
 0x212   : > { %v1189_v44 = vadd.f32 %v1187_v23, %v1181_v21  ;;  %v1329_v21 = vstv %s4157_s16  ;;  %s4182_s16 = sld [smem:[#allocation5 + $0x195]] }
 0x213   : > { %v1199_v61 = vpop.permute.xlu1 %1198  ;;  %v1211_v56 = vpop.permute.xlu0 %1210 }
 0x214   : > { %v1216_v29 = vadd.f32 %v1211_v56, %v1202_v41  ;;  %v1203_v50 = vadd.f32 %v1199_v61, %v1189_v44  ;;  %v1330_v61 = vmul.f32 %v5444_v12, %v1329_v21 }
 0x216   : > { %v1224_v58 = vadd.f32 %v1222_v31, %v1216_v29  ;;  %v1331_v31 = vmul.f32 %v5462_v17, %v1329_v21  ;;  %v5550_v17 = vld [vmem:[#allocation2 + $0x31] sm:$0xff] }
 0x217   : > { %v1213_v35 = vpop.permute.xlu1 %1212  ;;  %v1233_v36 = vpop.permute.xlu0 %1232 }
 0x218   : > { %v1217_v37 = vadd.f32 %v1213_v35, %v1203_v50  ;;  %v1238_v9 = vadd.f32 %v1233_v36, %v1224_v58  ;;  %v1381_v50 = vstv %s5535_s17  ;;  %s4185_s17 = sld [smem:[#allocation5 + $0x198]] }
 0x219   : > { %v1382_v38 = vmul.f32 %v1381_v50, %v5336_v34 }
 0x21a   : > { %v1225_v13 = vadd.f32 %v1223_v46, %v1217_v37  ;;  %v1376_v46 = vstv %s5538_s19  ;;  %s4190_s19 = sld [smem:[#allocation5 + $0x201]] }
 0x21b   : > { %v1235_v47 = vpop.permute.xlu1 %1234  ;;  %v1247_v49 = vpop.permute.xlu0 %1246  ;;  %v1384_v53 = vadd.f32 %v1382_v38, %v1376_v46 }
 0x21c   : > { %v1252_v51 = vadd.f32 %v1247_v49, %v1238_v9  ;;  %v1239_v54 = vadd.f32 %v1235_v47, %v1225_v13  ;;  %v1639_v49 = vstv %s5540_s29  ;;  %s4191_s29 = sld [smem:[#allocation5 + $0x202]] }
 0x21e   : > { %v1260_v52 = vadd.f32 %v1258_v63, %v1252_v51  ;;  %v1383_v63 = vmul.f32 %v1381_v50, %v5349_v15 }
 0x21f   : > { %v1249_v32 = vpop.permute.xlu1 %1248  ;;  %v1269_v59 = vpop.permute.xlu0 %1268 }
 0x220   : > { %v1253_v60 = vadd.f32 %v1249_v32, %v1239_v54  ;;  %v1274_v2 = vadd.f32 %v1269_v59, %v1260_v52  ;;  %v1417_v54 = vstv %s5544_s8  ;;  %v1640_v59 = vmul.f32 %v1639_v49, %v5550_v17  ;;  %s4193_s8 = sld [smem:[#allocation5 + $0x204]] }
 0x221   : > { %v1419_v21 = vmul.f32 %v1417_v54, %v5372_v45 }
 0x222   : > { %v1261_v3 = vadd.f32 %v1259_v0, %v1253_v60  ;;  %v5561_v0 = vld [vmem:[#allocation2 + $0x39] sm:$0xff] }
 0x223   : > { %v1271_v6 = vpop.permute.xlu1 %1270  ;;  %v1283_v7 = vpop.permute.xlu0 %1282 }
 0x224   : > { %v1288_v40 = vadd.f32 %v1283_v7, %v1274_v2  ;;  %v1275_v30 = vadd.f32 %v1271_v6, %v1261_v3  ;;  %v1385_v2 = vadd.f32 %v1383_v63, %v1376_v46  ;;  %v1418_v6 = vmul.f32 %v1417_v54, %v5359_v26 }
 0x225   : > { %v1489_v46 = vstv %s5578_s7  ;;  %s4200_s7 = sld [smem:[#allocation5 + $0x20b]] }
 0x226   : > { %v1296_v42 = vadd.f32 %v1294_v27, %v1288_v40  ;;  %v1641_v27 = vmul.f32 %v1639_v49, %v5561_v0 }
 0x227   : > { %v1285_v11 = vpop.permute.xlu1 %1284  ;;  %v1305_v14 = vpop.permute.xlu0 %1304 }
 0x228   : > { %v1289_v20 = vadd.f32 %v1285_v11, %v1275_v30  ;;  %v1310_v18 = vadd.f32 %v1305_v14, %v1296_v42  ;;  %v1654_v30 = vmul.f32 %v1653_v8, %v5550_v17  ;;  %v5571_v14 = vld [vmem:[#allocation2 + $0x32] sm:$0xff] }
 0x22a   : > { %v1297_v23 = vadd.f32 %v1295_v19, %v1289_v20  ;;  %v1675_v20 = vstv %s5553_s24  ;;  %s4196_s24 = sld [smem:[#allocation5 + $0x207]] }
 0x22b   : > { %v1307_v39 = vpop.permute.xlu1 %1306  ;;  %v1319_v41 = vpop.permute.xlu0 %1318 }
 0x22c   : > { %v1324_v44 = vadd.f32 %v1319_v41, %v1310_v18  ;;  %v1311_v22 = vadd.f32 %v1307_v39, %v1297_v23  ;;  %v1453_v18 = vstv %s5558_s25  ;;  %v1655_v41 = vmul.f32 %v1653_v8, %v5561_v0  ;;  %s4197_s25 = sld [smem:[#allocation5 + $0x208]] }
 0x22d   : > { %v1455_v38 = vmul.f32 %v1453_v18, %v5395_v1 }
 0x22e   : > { %v1332_v56 = vadd.f32 %v1330_v61, %v1324_v44  ;;  %v1676_v44 = vmul.f32 %v1675_v20, %v5571_v14 }
 0x22f   : > { %v1321_v29 = vpop.permute.xlu1 %1320  ;;  %v1341_v24 = vpop.permute.xlu0 %1340 }
 0x230   : > { %v1325_v48 = vadd.f32 %v1321_v29, %v1311_v22  ;;  %v1346_v58 = vadd.f32 %v1341_v24, %v1332_v56  ;;  %v5582_v56 = vld [vmem:[#allocation2 + $0x3a] sm:$0xff]  ;;  %v1689_v29 = vstv %s5564_s6  ;;  %s4199_s6 = sld [smem:[#allocation5 + $0x20a]] }
 0x232   : > { %v1333_v35 = vadd.f32 %v1331_v31, %v1325_v48  ;;  %v1454_v48 = vmul.f32 %v1453_v18, %v5382_v4 }
 0x233   : > { %v1343_v36 = vpop.permute.xlu1 %1342  ;;  %v1355_v12 = vpop.permute.xlu0 %1354 }
 0x234   : > { %v1360_v37 = vadd.f32 %v1355_v12, %v1346_v58  ;;  %v1347_v28 = vadd.f32 %v1343_v36, %v1333_v35  ;;  %v1677_v58 = vmul.f32 %v1675_v20, %v5582_v56  ;;  %v1690_v35 = vmul.f32 %v1689_v29, %v5571_v14 }
 0x236   : > { %v1362_v9 = vmax.f32 %v1360_v37, 0.0 }
 0x237   : > { %v1357_v13 = vpop.permute.xlu1 %1356  ;;  %v1393_v47 = vpop.permute.xlu0 %1392 }
 0x238   : > { %v1361_v51 = vadd.f32 %v1357_v13, %v1347_v28  ;;  %1366 = vrot.lane.b32.xlu0 %v1362_v9, %s4656_s28  ;;  %v1398_v32 = vadd.f32 %v1393_v47, %v1384_v53  ;;  %v1691_v13 = vmul.f32 %v1689_v29, %v5582_v56  ;;  %v1490_v53 = vmul.f32 %v1489_v46, %v5405_v10 }
 0x23a   : > { %v1363_v52 = vmax.f32 %v1361_v51, 0.0 }
 0x23b   : > { %v1395_v60 = vpop.permute.xlu1 %1394  ;;  %v1407_v62 = vpop.permute.xlu0 %1406 }
 0x23c   : > { %v1412_v3 = vadd.f32 %v1407_v62, %v1398_v32  ;;  %1368 = vrot.lane.b32.xlu1 %v1363_v52, %s4656_s28  ;;  %1644 = vrot.lane.b32.xlu0 %v1640_v59, %s4658_s11  ;;  %v1399_v7 = vadd.f32 %v1395_v60, %v1385_v2  ;;  %v1491_v60 = vmul.f32 %v1489_v46, %v5420_v25  ;;  %v1525_v62 = vstv %s4173_s30  ;;  %s4202_s30 = sld [smem:[#allocation5 + $0x20d]] }
 0x23e   : > { %v1420_v40 = vadd.f32 %v1418_v6, %v1412_v3 }
 0x23f   : > { %v1409_v42 = vpop.permute.xlu1 %1408  ;;  %v1429_v11 = vpop.permute.xlu0 %1428 }
 0x240   : > { %v1413_v19 = vadd.f32 %v1409_v42, %v1399_v7  ;;  %1646 = vrot.lane.b32.xlu1 %v1641_v27, %s4658_s11  ;;  %1658 = vrot.lane.b32.xlu0 %v1654_v30, %s4659_s13  ;;  %v1434_v23 = vadd.f32 %v1429_v11, %v1420_v40  ;;  %v1526_v40 = vmul.f32 %v1525_v62, %v5432_v43 }
 0x242   : > { %v1421_v39 = vadd.f32 %v1419_v21, %v1413_v19  ;;  %v1527_v19 = vmul.f32 %v1525_v62, %v5447_v57  ;;  %v1561_v21 = vstv %s4176_s14  ;;  %s4203_s14 = sld [smem:[#allocation5 + $0x20e]] }
 0x243   : > { %v1431_v61 = vpop.permute.xlu1 %1430  ;;  %v1443_v22 = vpop.permute.xlu0 %1442 }
 0x244   : > { %v1448_v24 = vadd.f32 %v1443_v22, %v1434_v23  ;;  %1660 = vrot.lane.b32.xlu1 %v1655_v41, %s4659_s13  ;;  %1680 = vrot.lane.b32.xlu0 %v1676_v44, %s4658_s11  ;;  %v1435_v31 = vadd.f32 %v1431_v61, %v1421_v39  ;;  %v1562_v61 = vmul.f32 %v1561_v21, %v5465_v5 }
 0x246   : > { %v1456_v50 = vadd.f32 %v1454_v48, %v1448_v24 }
 0x247   : > { %v1445_v36 = vpop.permute.xlu1 %1444  ;;  %v1465_v12 = vpop.permute.xlu0 %1464 }
 0x248   : > { %v1449_v37 = vadd.f32 %v1445_v36, %v1435_v31  ;;  %1682 = vrot.lane.b32.xlu1 %v1677_v58, %s4658_s11  ;;  %1694 = vrot.lane.b32.xlu0 %v1690_v35, %s4659_s13  ;;  %v1470_v28 = vadd.f32 %v1465_v12, %v1456_v50  ;;  %v1563_v50 = vmul.f32 %v1561_v21, %v5481_v16  ;;  %v1597_v58 = vstv %s4179_s15  ;;  %s4205_s15 = sld [smem:[#allocation5 + $0x210]] }
 0x249   : > { %v1598_v46 = vmul.f32 %v1597_v58, %v5491_v33  ;;  %v1669_v21 = vstv %s4185_s17  ;;  %s4208_s17 = sld [smem:[#allocation5 + $0x213]] }
 0x24a   : > { %v1457_v9 = vadd.f32 %v1455_v38, %v1449_v37 }
 0x24b   : > { %v1467_v47 = vpop.permute.xlu1 %1466  ;;  %v1479_v49 = vpop.permute.xlu0 %1478 }
 0x24c   : > { %v1484_v51 = vadd.f32 %v1479_v49, %v1470_v28  ;;  %1696 = vrot.lane.b32.xlu1 %v1691_v13, %s4659_s13  ;;  %v1471_v63 = vadd.f32 %v1467_v47, %v1457_v9 }
 0x24e   : > { %v1492_v54 = vadd.f32 %v1490_v53, %v1484_v51  ;;  %v1599_v51 = vmul.f32 %v1597_v58, %v5501_v55  ;;  %v1633_v53 = vstv %s4182_s16  ;;  %s4206_s16 = sld [smem:[#allocation5 + $0x211]] }
 0x24f   : > { %v1481_v52 = vpop.permute.xlu1 %1480  ;;  %v1501_v32 = vpop.permute.xlu0 %1500 }
 0x250   : > { %v1485_v59 = vadd.f32 %v1481_v52, %v1471_v63  ;;  %v1506_v8 = vadd.f32 %v1501_v32, %v1492_v54 }
 0x252   : > { %v1493_v2 = vadd.f32 %v1491_v60, %v1485_v59  ;;  %v1634_v60 = vmul.f32 %v1633_v53, %v5550_v17 }
 0x253   : > { %v1503_v3 = vpop.permute.xlu1 %1502  ;;  %v1515_v6 = vpop.permute.xlu0 %1514 }
 0x254   : > { %v1520_v7 = vadd.f32 %v1515_v6, %v1506_v8  ;;  %v1507_v27 = vadd.f32 %v1503_v3, %v1493_v2 }
 0x256   : > { %v1528_v30 = vadd.f32 %v1526_v40, %v1520_v7  ;;  %v1635_v7 = vmul.f32 %v1633_v53, %v5561_v0 }
 0x257   : > { %v1517_v42 = vpop.permute.xlu1 %1516  ;;  %v1537_v11 = vpop.permute.xlu0 %1536 }
 0x258   : > { %v1521_v20 = vadd.f32 %v1517_v42, %v1507_v27  ;;  %v1542_v18 = vadd.f32 %v1537_v11, %v1528_v30 }
 0x25a   : > { %v1529_v23 = vadd.f32 %v1527_v19, %v1521_v20 }
 0x25b   : > { %v1539_v39 = vpop.permute.xlu1 %1538  ;;  %v1551_v41 = vpop.permute.xlu0 %1550 }
 0x25c   : > { %v1556_v44 = vadd.f32 %v1551_v41, %v1542_v18  ;;  %v1543_v22 = vadd.f32 %v1539_v39, %v1529_v23 }
 0x25e   : > { %v1564_v29 = vadd.f32 %v1562_v61, %v1556_v44  ;;  %v1670_v44 = vmul.f32 %v1669_v21, %v5571_v14 }
 0x25f   : > { %v1553_v24 = vpop.permute.xlu1 %1552  ;;  %v1573_v48 = vpop.permute.xlu0 %1572 }
 0x260   : > { %v1557_v31 = vadd.f32 %v1553_v24, %v1543_v22  ;;  %v1578_v35 = vadd.f32 %v1573_v48, %v1564_v29 }
 0x262   : > { %v1565_v36 = vadd.f32 %v1563_v50, %v1557_v31  ;;  %v1671_v31 = vmul.f32 %v1669_v21, %v5582_v56  ;;  %v1921_v21 = vstv %s4206_s16  ;;  %s4204_s16 = sld [smem:[#allocation5 + $0x20f]] }
 0x263   : > { %v1575_v12 = vpop.permute.xlu1 %1574  ;;  %v1587_v37 = vpop.permute.xlu0 %1586 }
 0x264   : > { %v1592_v38 = vadd.f32 %v1587_v37, %v1578_v35  ;;  %v1579_v28 = vadd.f32 %v1575_v12, %v1565_v36 }
 0x266   : > { %v1600_v9 = vadd.f32 %v1598_v46, %v1592_v38 }
 0x267   : > { %v1589_v13 = vpop.permute.xlu1 %1588  ;;  %v1609_v47 = vpop.permute.xlu0 %1608 }
 0x268   : > { %v1593_v49 = vadd.f32 %v1589_v13, %v1579_v28  ;;  %v1614_v63 = vadd.f32 %v1609_v47, %v1600_v9  ;;  %v1727_v28 = vstv %s4190_s19  ;;  %s4209_s19 = sld [smem:[#allocation5 + $0x214]] }
 0x269   : > { %v1728_v47 = vmul.f32 %v1727_v28, %v5336_v34 }
 0x26a   : > { %v1601_v54 = vadd.f32 %v1599_v51, %v1593_v49  ;;  %v1741_v49 = vstv %s4191_s29  ;;  %v1729_v51 = vmul.f32 %v1727_v28, %v5349_v15  ;;  %s4211_s29 = sld [smem:[#allocation5 + $0x216]] }
 0x26b   : > { %v1611_v52 = vpop.permute.xlu1 %1610  ;;  %v1623_v32 = vpop.permute.xlu0 %1622  ;;  %v1742_v53 = vmul.f32 %v1741_v49, %v5336_v34 }
 0x26c   : > { %v1628_v59 = vadd.f32 %v1623_v32, %v1614_v63  ;;  %v1615_v62 = vadd.f32 %v1611_v52, %v1601_v54  ;;  %v1763_v63 = vstv %s4193_s8  ;;  %v1743_v54 = vmul.f32 %v1741_v49, %v5349_v15  ;;  %s4212_s8 = sld [smem:[#allocation5 + $0x217]]  ;;  %v4484_v49 = vld [vmem:[#allocation2 + $0x8] sm:$0xff] }
 0x26d   : > { %v1764_v52 = vmul.f32 %v1763_v63, %v5359_v26  ;;  %v1777_v32 = vstv %s4194_s18  ;;  %s4214_s18 = sld [smem:[#allocation5 + $0x219]] }
 0x26e   : > { %v1636_v8 = vadd.f32 %v1634_v60, %v1628_v59  ;;  %v1765_v59 = vmul.f32 %v1763_v63, %v5372_v45  ;;  %v1778_v34 = vmul.f32 %v1777_v32, %v5359_v26  ;;  %v1799_v60 = vstv %s4196_s24  ;;  %s4215_s24 = sld [smem:[#allocation5 + $0x21a]] }
 0x26f   : > { %v1625_v2 = vpop.permute.xlu1 %1624  ;;  %v688_v3 = vpop.permute.xlu0 %687  ;;  %v1779_v15 = vmul.f32 %v1777_v32, %v5372_v45 }
 0x270   : > { %v1629_v6 = vadd.f32 %v1625_v2, %v1615_v62  ;;  %693 = vst.msk [vmem:[#allocation3 + $0x1] sm:$0xff] %vm323_vm2, %v688_v3  ;;  %v1800_v62 = vmul.f32 %v1799_v60, %v5382_v4  ;;  %v1801_v2 = vmul.f32 %v1799_v60, %v5395_v1  ;;  %v1835_v3 = vstv %s4199_s6  ;;  %s4188_s6 = sld [smem:[#allocation10 + $0x4]] }
 0x272   : > { %v1637_v40 = vadd.f32 %v1635_v7, %v1629_v6  ;;  %v1836_v6 = vmul.f32 %v1835_v3, %v5405_v10  ;;  %v1849_v7 = vstv %s4200_s7  ;;  %s4192_s7 = sld [smem:[#allocation5 + $0x203]] }
 0x273   : > { %v690_v27 = vpop.permute.xlu1 %689  ;;  %v1027_v30 = vpop.permute.xlu0 %1026 }
 0x274   : > { %694 = vst.msk [vmem:[#allocation3 + $0x9] sm:$0xff] %vm323_vm2, %v690_v27  ;;  %1033 = vst.msk [vmem:[#allocation3 + $0x19] sm:$0xff] %vm323_vm2, %v1027_v30  ;;  %v1871_v27 = vstv %s4202_s30  ;;  %s4195_s30 = sld [smem:[#allocation5 + $0x206]] }
 0x275   : > { %v1872_v30 = vmul.f32 %v1871_v27, %v5432_v43 }
 0x276   : > { %v1716_v28 = vstv %s4188_s6  ;;  %s4224_s6 = sld [smem:[#allocation5 + $0x287]] }
 0x277   : > { %v1029_v42 = vpop.permute.xlu1 %1028 }
 0x278   : > { %1034 = vst.msk [vmem:[#allocation3 + $0x21] sm:$0xff] %vm323_vm2, %v1029_v42  ;;  %v1885_v42 = vstv %s4203_s14  ;;  %s4198_s14 = sld [smem:[#allocation5 + $0x209]] }
 0x2aa   : > { %v1367_v11 = vpop.permute.xlu0 %1366 }
 0x2ab   : > { %1373 = vst.msk [vmem:[#allocation3 + $0x31] sm:$0xff] %vm323_vm2, %v1367_v11  ;;  %v1873_v11 = vmul.f32 %v1871_v27, %v5447_v57 }
 0x2ae   : > { %v1369_v20 = vpop.permute.xlu1 %1368  ;;  %v1645_v19 = vpop.permute.xlu0 %1644 }
 0x2af   : > { %1374 = vst.msk [vmem:[#allocation3 + $0x39] sm:$0xff] %vm323_vm2, %v1369_v20  ;;  %v1650_v18 = vadd.f32 %v1645_v19, %v1636_v8  ;;  %v1813_v8 = vstv %s4197_s25  ;;  %v1907_v20 = vstv %s4205_s15  ;;  %s4189_s25 = sld [smem:[#allocation5 + $0x200]]  ;;  %s4201_s15 = sld [smem:[#allocation5 + $0x20c]] }
 0x2b0   : > { %v1814_v26 = vmul.f32 %v1813_v8, %v5382_v4  ;;  %v1815_v45 = vmul.f32 %v1813_v8, %v5395_v1  ;;  %v1850_v4 = vmul.f32 %v1849_v7, %v5405_v10  ;;  %v1851_v1 = vmul.f32 %v1849_v7, %v5420_v25 }
 0x2b1   : > { %v1886_v10 = vmul.f32 %v1885_v42, %v5432_v43  ;;  %v1908_v19 = vmul.f32 %v1907_v20, %v5465_v5  ;;  %v1922_v43 = vmul.f32 %v1921_v21, %v5465_v5 }
 0x2b2   : > { %v1647_v23 = vpop.permute.xlu1 %1646  ;;  %v1659_v39 = vpop.permute.xlu0 %1658 }
 0x2b3   : > { %v1664_v41 = vadd.f32 %v1659_v39, %v1650_v18  ;;  %v1651_v61 = vadd.f32 %v1647_v23, %v1637_v40  ;;  %v1837_v40 = vmul.f32 %v1835_v3, %v5420_v25  ;;  %v1887_v25 = vmul.f32 %v1885_v42, %v5447_v57  ;;  %v4486_v3 = vld [vmem:[#allocation2 + $0x9] sm:$0xff] }
 0x2b4   : > { %v1909_v18 = vmul.f32 %v1907_v20, %v5481_v16  ;;  %v1943_v23 = vstv %s4208_s17  ;;  %v1923_v57 = vmul.f32 %v1921_v21, %v5481_v16  ;;  %v4488_v21 = vld [vmem:[#allocation2 + $0xa] sm:$0xff]  ;;  %s4207_s17 = sld [smem:[#allocation5 + $0x212]] }
 0x2b5   : > { %v1672_v22 = vadd.f32 %v1670_v44, %v1664_v41  ;;  %v1944_v39 = vmul.f32 %v1943_v23, %v5491_v33  ;;  %v1957_v41 = vstv %s4209_s19  ;;  %v1945_v44 = vmul.f32 %v1943_v23, %v5501_v55  ;;  %s4210_s19 = sld [smem:[#allocation5 + $0x215]] }
 0x2b6   : > { %v1661_v29 = vpop.permute.xlu1 %1660  ;;  %v1681_v24 = vpop.permute.xlu0 %1680  ;;  %v1958_v5 = vmul.f32 %v1957_v41, %v5491_v33  ;;  %v1959_v16 = vmul.f32 %v1957_v41, %v5501_v55 }
 0x2b7   : > { %v1665_v48 = vadd.f32 %v1661_v29, %v1651_v61  ;;  %v1686_v50 = vadd.f32 %v1681_v24, %v1672_v22  ;;  %v1979_v61 = vstv %s4211_s29  ;;  %v1993_v29 = vstv %s4212_s8  ;;  %s4213_s29 = sld [smem:[#allocation5 + $0x218]]  ;;  %s4218_s8 = sld [smem:[#allocation5 + $0x281]] }
 0x2b8   : > { %v1980_v22 = vmul.f32 %v1979_v61, %v5550_v17  ;;  %v1981_v24 = vmul.f32 %v1979_v61, %v5561_v0  ;;  %v1994_v33 = vmul.f32 %v1993_v29, %v5550_v17 }
 0x2b9   : > { %v1673_v58 = vadd.f32 %v1671_v31, %v1665_v48  ;;  %v2015_v48 = vstv %s4214_s18  ;;  %v1995_v31 = vmul.f32 %v1993_v29, %v5561_v0  ;;  %s4219_s18 = sld [smem:[#allocation5 + $0x282]] }
 0x2ba   : > { %v1683_v35 = vpop.permute.xlu1 %1682  ;;  %v1695_v36 = vpop.permute.xlu0 %1694  ;;  %v2016_v55 = vmul.f32 %v2015_v48, %v5571_v14 }
 0x2bb   : > { %v1700_v12 = vadd.f32 %v1695_v36, %v1686_v50  ;;  %v1687_v37 = vadd.f32 %v1683_v35, %v1673_v58  ;;  %v2029_v50 = vstv %s4215_s24  ;;  %v2017_v58 = vmul.f32 %v2015_v48, %v5582_v56  ;;  %v4490_v48 = vld [vmem:[#allocation2 + $0x20] sm:$0xff]  ;;  %s4221_s24 = sld [smem:[#allocation5 + $0x284]] }
 0x2bc   : > { %v2030_v35 = vmul.f32 %v2029_v50, %v5571_v14  ;;  %v2031_v36 = vmul.f32 %v2029_v50, %v5582_v56 }
 0x2bd   : > { %v1702_v38 = vmax.f32 %v1700_v12, 0.0  ;;  %v1721_v12 = vstv %s4189_s25  ;;  %s4222_s25 = sld [smem:[#allocation5 + $0x285]] }
 0x2be   : > { %v1697_v46 = vpop.permute.xlu1 %1696 }
 0x2bf   : > { %v1701_v9 = vadd.f32 %v1697_v46, %v1687_v37  ;;  %1706 = vrot.lane.b32.xlu0 %v1702_v38, %s4656_s28  ;;  %v4483_v38 = vld [vmem:[#allocation2] sm:$0xff] }
 0x2c0   : > { %v1722_v46 = vmul.f32 %v4483_v38, %v1721_v12 }
 0x2c1   : > { %v1703_v13 = vmax.f32 %v1701_v9, 0.0 }
 0x2c3   : > { %1708 = vrot.lane.b32.xlu1 %v1703_v13, %s4656_s28  ;;  %1732 = vrot.lane.b32.xlu0 %v1728_v47, %s4658_s11  ;;  %v1724_v47 = vadd.f32 %v1722_v46, %v1716_v28 }
 0x2c7   : > { %1734 = vrot.lane.b32.xlu1 %v1729_v51, %s4658_s11  ;;  %1746 = vrot.lane.b32.xlu0 %v1742_v53, %s4659_s13  ;;  %v1723_v51 = vmul.f32 %v4484_v49, %v1721_v12  ;;  %v1757_v53 = vstv %s4192_s7  ;;  %v4492_v49 = vld [vmem:[#allocation2 + $0x21] sm:$0xff]  ;;  %s4225_s7 = sld [smem:[#allocation5 + $0x288]] }
 0x2c9   : > { %v1725_v32 = vadd.f32 %v1723_v51, %v1716_v28 }
 0x2cb   : > { %1748 = vrot.lane.b32.xlu1 %v1743_v54, %s4659_s13  ;;  %1768 = vrot.lane.b32.xlu0 %v1764_v52, %s4658_s11 }
 0x2cf   : > { %1770 = vrot.lane.b32.xlu1 %v1765_v59, %s4658_s11  ;;  %1782 = vrot.lane.b32.xlu0 %v1778_v34, %s4659_s13  ;;  %v4485_v34 = vld [vmem:[#allocation2 + $0x1] sm:$0xff] }
 0x2d0   : > { %v1758_v60 = vmul.f32 %v4485_v34, %v1757_v53  ;;  %v4493_v34 = vld [vmem:[#allocation2 + $0x1a] sm:$0xff] }
 0x2d3   : > { %1784 = vrot.lane.b32.xlu1 %v1779_v15, %s4659_s13  ;;  %1804 = vrot.lane.b32.xlu0 %v1800_v62, %s4658_s11 }
 0x2d7   : > { %1806 = vrot.lane.b32.xlu1 %v1801_v2, %s4658_s11  ;;  %1818 = vrot.lane.b32.xlu0 %v1814_v26, %s4659_s13 }
 0x2db   : > { %1820 = vrot.lane.b32.xlu1 %v1815_v45, %s4659_s13  ;;  %1840 = vrot.lane.b32.xlu0 %v1836_v6, %s4658_s11  ;;  %v1759_v45 = vmul.f32 %v4486_v3, %v1757_v53  ;;  %v1793_v6 = vstv %s4195_s30  ;;  %v1901_v53 = vstv %s4204_s16  ;;  %v4494_v3 = vld [vmem:[#allocation2 + $0x22] sm:$0xff]  ;;  %s4227_s30 = sld [smem:[#allocation5 + $0x28a]]  ;;  %s4231_s16 = sld [smem:[#allocation5 + $0x28e]] }
 0x2df   : > { %1842 = vrot.lane.b32.xlu1 %v1837_v40, %s4658_s11  ;;  %1854 = vrot.lane.b32.xlu0 %v1850_v4, %s4659_s13 }
 0x2e3   : > { %1856 = vrot.lane.b32.xlu1 %v1851_v1, %s4659_s13  ;;  %1876 = vrot.lane.b32.xlu0 %v1872_v30, %s4658_s11  ;;  %v4487_v30 = vld [vmem:[#allocation2 + $0x2] sm:$0xff] }
 0x2e4   : > { %v1794_v42 = vmul.f32 %v4487_v30, %v1793_v6  ;;  %v4495_v30 = vld [vmem:[#allocation2 + $0x30] sm:$0xff] }
 0x2e7   : > { %1878 = vrot.lane.b32.xlu1 %v1873_v11, %s4658_s11  ;;  %1890 = vrot.lane.b32.xlu0 %v1886_v10, %s4659_s13 }
 0x2eb   : > { %1892 = vrot.lane.b32.xlu1 %v1887_v25, %s4659_s13  ;;  %1912 = vrot.lane.b32.xlu0 %v1908_v19, %s4658_s11 }
 0x2ef   : > { %1914 = vrot.lane.b32.xlu1 %v1909_v18, %s4658_s11  ;;  %1926 = vrot.lane.b32.xlu0 %v1922_v43, %s4659_s13  ;;  %v1795_v18 = vmul.f32 %v4488_v21, %v1793_v6  ;;  %v1829_v43 = vstv %s4198_s14  ;;  %v1937_v6 = vstv %s4207_s17  ;;  %v4496_v21 = vld [vmem:[#allocation2 + $0x38] sm:$0xff]  ;;  %s4228_s14 = sld [smem:[#allocation5 + $0x28b]]  ;;  %s4233_s17 = sld [smem:[#allocation5 + $0x290]] }
 0x2f3   : > { %1928 = vrot.lane.b32.xlu1 %v1923_v57, %s4659_s13  ;;  %1948 = vrot.lane.b32.xlu0 %v1944_v39, %s4658_s11 }
 0x2f7   : > { %1950 = vrot.lane.b32.xlu1 %v1945_v44, %s4658_s11  ;;  %1962 = vrot.lane.b32.xlu0 %v1958_v5, %s4659_s13  ;;  %v4489_v5 = vld [vmem:[#allocation2 + $0x18] sm:$0xff] }
 0x2f8   : > { %v1830_v61 = vmul.f32 %v4489_v5, %v1829_v43 }
 0x2fb   : > { %1964 = vrot.lane.b32.xlu1 %v1959_v16, %s4659_s13  ;;  %1984 = vrot.lane.b32.xlu0 %v1980_v22, %s4658_s11 }
 0x2ff   : > { %1986 = vrot.lane.b32.xlu1 %v1981_v24, %s4658_s11  ;;  %1998 = vrot.lane.b32.xlu0 %v1994_v33, %s4659_s13 }
 0x303   : > { %2000 = vrot.lane.b32.xlu1 %v1995_v31, %s4659_s13  ;;  %2020 = vrot.lane.b32.xlu0 %v2016_v55, %s4658_s11  ;;  %v1831_v31 = vmul.f32 %v4490_v48, %v1829_v43  ;;  %v1865_v55 = vstv %s4201_s15  ;;  %v1973_v43 = vstv %s4210_s19  ;;  %s4230_s15 = sld [smem:[#allocation5 + $0x28d]]  ;;  %s4234_s19 = sld [smem:[#allocation5 + $0x291]] }
 0x304   : > { %v1867_v51 = vmul.f32 %v4492_v49, %v1865_v55  ;;  %v1974_v5 = vmul.f32 %v1973_v43, %v5550_v17  ;;  %v2009_v48 = vstv %s4213_s29  ;;  %s4236_s29 = sld [smem:[#allocation5 + $0x293]] }
 0x307   : > { %2022 = vrot.lane.b32.xlu1 %v2017_v58, %s4658_s11  ;;  %2034 = vrot.lane.b32.xlu0 %v2030_v35, %s4659_s13 }
 0x30b   : > { %2036 = vrot.lane.b32.xlu1 %v2031_v36, %s4659_s13 }
 0x331   : > { %v1707_v37 = vpop.permute.xlu0 %1706 }
 0x332   : > { %1713 = vst.msk [vmem:[#allocation3 + $0x49] sm:$0xff] %vm323_vm2, %v1707_v37  ;;  %v4491_v37 = vld [vmem:[#allocation2 + $0x19] sm:$0xff] }
 0x333   : > { %v1866_v38 = vmul.f32 %v4491_v37, %v1865_v55 }
 0x335   : > { %v1709_v9 = vpop.permute.xlu1 %1708  ;;  %v1733_v13 = vpop.permute.xlu0 %1732 }
 0x336   : > { %1714 = vst.msk [vmem:[#allocation3 + $0x51] sm:$0xff] %vm323_vm2, %v1709_v9  ;;  %v1738_v63 = vadd.f32 %v1733_v13, %v1724_v47 }
 0x339   : > { %v1735_v54 = vpop.permute.xlu1 %1734  ;;  %v1747_v52 = vpop.permute.xlu0 %1746 }
 0x33a   : > { %v1752_v59 = vadd.f32 %v1747_v52, %v1738_v63  ;;  %v1739_v15 = vadd.f32 %v1735_v54, %v1725_v32 }
 0x33c   : > { %v1760_v62 = vadd.f32 %v1758_v60, %v1752_v59  ;;  %v1902_v60 = vmul.f32 %v4493_v34, %v1901_v53  ;;  %v2081_v34 = vstv %s4219_s18  ;;  %s4239_s18 = sld [smem:[#allocation5 + $0x296]] }
 0x33d   : > { %v1749_v8 = vpop.permute.xlu1 %1748  ;;  %v1769_v2 = vpop.permute.xlu0 %1768 }
 0x33e   : > { %v1753_v26 = vadd.f32 %v1749_v8, %v1739_v15  ;;  %v1774_v7 = vadd.f32 %v1769_v2, %v1760_v62 }
 0x340   : > { %v1761_v40 = vadd.f32 %v1759_v45, %v1753_v26  ;;  %v1903_v45 = vmul.f32 %v4494_v3, %v1901_v53  ;;  %v5710_v3 = vld [vmem:[#allocation2 + $0x9] sm:$0xff] }
 0x341   : > { %v1771_v4 = vpop.permute.xlu1 %1770  ;;  %v1783_v27 = vpop.permute.xlu0 %1782 }
 0x342   : > { %v1788_v1 = vadd.f32 %v1783_v27, %v1774_v7  ;;  %v1775_v11 = vadd.f32 %v1771_v4, %v1761_v40 }
 0x344   : > { %v1796_v10 = vadd.f32 %v1794_v42, %v1788_v1  ;;  %v1938_v42 = vmul.f32 %v4495_v30, %v1937_v6  ;;  %v5722_v30 = vld [vmem:[#allocation2 + $0xa] sm:$0xff] }
 0x345   : > { %v1785_v20 = vpop.permute.xlu1 %1784  ;;  %v1805_v25 = vpop.permute.xlu0 %1804 }
 0x346   : > { %v1789_v19 = vadd.f32 %v1785_v20, %v1775_v11  ;;  %v1810_v23 = vadd.f32 %v1805_v25, %v1796_v10 }
 0x348   : > { %v1797_v57 = vadd.f32 %v1795_v18, %v1789_v19  ;;  %v1939_v18 = vmul.f32 %v4496_v21, %v1937_v6 }
 0x349   : > { %v1807_v39 = vpop.permute.xlu1 %1806  ;;  %v1819_v41 = vpop.permute.xlu0 %1818 }
 0x34a   : > { %v1824_v44 = vadd.f32 %v1819_v41, %v1810_v23  ;;  %v1811_v16 = vadd.f32 %v1807_v39, %v1797_v57 }
 0x34c   : > { %v1832_v22 = vadd.f32 %v1830_v61, %v1824_v44 }
 0x34d   : > { %v1821_v29 = vpop.permute.xlu1 %1820  ;;  %v1841_v24 = vpop.permute.xlu0 %1840 }
 0x34e   : > { %v1825_v33 = vadd.f32 %v1821_v29, %v1811_v16  ;;  %v1846_v50 = vadd.f32 %v1841_v24, %v1832_v22 }
 0x350   : > { %v1833_v58 = vadd.f32 %v1831_v31, %v1825_v33  ;;  %v1975_v33 = vmul.f32 %v1973_v43, %v5561_v0  ;;  %v2189_v43 = vstv %s4228_s14  ;;  %s4220_s14 = sld [smem:[#allocation5 + $0x283]] }
 0x351   : > { %v1843_v35 = vpop.permute.xlu1 %1842  ;;  %v1855_v36 = vpop.permute.xlu0 %1854 }
 0x352   : > { %v1860_v12 = vadd.f32 %v1855_v36, %v1846_v50  ;;  %v1847_v46 = vadd.f32 %v1843_v35, %v1833_v58  ;;  %v2010_v36 = vmul.f32 %v2009_v48, %v5571_v14  ;;  %v2067_v14 = vstv %s4218_s8  ;;  %s4237_s8 = sld [smem:[#allocation5 + $0x294]] }
 0x354   : > { %v1868_v28 = vadd.f32 %v1866_v38, %v1860_v12 }
 0x355   : > { %v1857_v9 = vpop.permute.xlu1 %1856  ;;  %v1877_v13 = vpop.permute.xlu0 %1876 }
 0x356   : > { %v1861_v47 = vadd.f32 %v1857_v9, %v1847_v46  ;;  %v1882_v63 = vadd.f32 %v1877_v13, %v1868_v28  ;;  %v2011_v28 = vmul.f32 %v2009_v48, %v5582_v56  ;;  %v5698_v56 = vld [vmem:[#allocation2 + $0x8] sm:$0xff] }
 0x358   : > { %v1869_v54 = vadd.f32 %v1867_v51, %v1861_v47 }
 0x359   : > { %v1879_v52 = vpop.permute.xlu1 %1878  ;;  %v1891_v32 = vpop.permute.xlu0 %1890 }
 0x35a   : > { %v1896_v59 = vadd.f32 %v1891_v32, %v1882_v63  ;;  %v1883_v15 = vadd.f32 %v1879_v52, %v1869_v54  ;;  %v5694_v54 = vld [vmem:[#allocation2] sm:$0xff] }
 0x35c   : > { %v1904_v62 = vadd.f32 %v1902_v60, %v1896_v59  ;;  %v2068_v59 = vmul.f32 %v2067_v14, %v5694_v54  ;;  %v2069_v60 = vmul.f32 %v2067_v14, %v5698_v56 }
 0x35d   : > { %v1893_v8 = vpop.permute.xlu1 %1892  ;;  %v1913_v2 = vpop.permute.xlu0 %1912 }
 0x35e   : > { %v1897_v26 = vadd.f32 %v1893_v8, %v1883_v15  ;;  %v1918_v7 = vadd.f32 %v1913_v2, %v1904_v62  ;;  %v2082_v15 = vmul.f32 %v2081_v34, %v5694_v54  ;;  %v5704_v62 = vld [vmem:[#allocation2 + $0x1] sm:$0xff]  ;;  %v2103_v8 = vstv %s4221_s24  ;;  %s4240_s24 = sld [smem:[#allocation5 + $0x297]] }
 0x35f   : > { %v2083_v2 = vmul.f32 %v2081_v34, %v5698_v56  ;;  %v2105_v6 = vmul.f32 %v2103_v8, %v5710_v3 }
 0x360   : > { %v1905_v40 = vadd.f32 %v1903_v45, %v1897_v26  ;;  %v2104_v26 = vmul.f32 %v2103_v8, %v5704_v62  ;;  %v2117_v45 = vstv %s4222_s25  ;;  %s4242_s25 = sld [smem:[#allocation5 + $0x299]] }
 0x361   : > { %v1915_v4 = vpop.permute.xlu1 %1914  ;;  %v1927_v27 = vpop.permute.xlu0 %1926 }
 0x362   : > { %v1932_v1 = vadd.f32 %v1927_v27, %v1918_v7  ;;  %v1919_v11 = vadd.f32 %v1915_v4, %v1905_v40  ;;  %v2118_v7 = vmul.f32 %v2117_v45, %v5704_v62  ;;  %v5716_v40 = vld [vmem:[#allocation2 + $0x2] sm:$0xff]  ;;  %v2139_v4 = vstv %s4224_s6  ;;  %s4243_s6 = sld [smem:[#allocation5 + $0x29a]] }
 0x363   : > { %v2119_v27 = vmul.f32 %v2117_v45, %v5710_v3 }
 0x364   : > { %v1940_v10 = vadd.f32 %v1938_v42, %v1932_v1  ;;  %v2140_v1 = vmul.f32 %v2139_v4, %v5716_v40  ;;  %v2153_v42 = vstv %s4225_s7  ;;  %s4217_s7 = sld [smem:[#allocation5 + $0x280]] }
 0x365   : > { %v1929_v20 = vpop.permute.xlu1 %1928  ;;  %v1949_v25 = vpop.permute.xlu0 %1948 }
 0x366   : > { %v1933_v19 = vadd.f32 %v1929_v20, %v1919_v11  ;;  %v1954_v23 = vadd.f32 %v1949_v25, %v1940_v10  ;;  %v2141_v11 = vmul.f32 %v2139_v4, %v5722_v30  ;;  %v2154_v10 = vmul.f32 %v2153_v42, %v5716_v40  ;;  %v5728_v20 = vld [vmem:[#allocation2 + $0x18] sm:$0xff] }
 0x367   : > { %v2175_v25 = vstv %s4227_s30  ;;  %s4216_s30 = sld [smem:[#allocation10 + $0x5]] }
 0x368   : > { %v1941_v57 = vadd.f32 %v1939_v18, %v1933_v19  ;;  %v2155_v19 = vmul.f32 %v2153_v42, %v5722_v30  ;;  %v2176_v21 = vmul.f32 %v2175_v25, %v5728_v20  ;;  %v5734_v18 = vld [vmem:[#allocation2 + $0x20] sm:$0xff] }
 0x369   : > { %v1951_v39 = vpop.permute.xlu1 %1950  ;;  %v1963_v41 = vpop.permute.xlu0 %1962 }
 0x36a   : > { %v1968_v44 = vadd.f32 %v1963_v41, %v1954_v23  ;;  %v1955_v61 = vadd.f32 %v1951_v39, %v1941_v57  ;;  %v2177_v23 = vmul.f32 %v2175_v25, %v5734_v18  ;;  %v2190_v57 = vmul.f32 %v2189_v43, %v5728_v20  ;;  %v5740_v39 = vld [vmem:[#allocation2 + $0x19] sm:$0xff] }
 0x36b   : > { %v2211_v41 = vstv %s4230_s15  ;;  %v2061_v45 = vstv %s4217_s7  ;;  %s4223_s15 = sld [smem:[#allocation5 + $0x286]]  ;;  %s4250_s7 = sld [smem:[#allocation5 + $0x305]] }
 0x36c   : > { %v1976_v16 = vadd.f32 %v1974_v5, %v1968_v44  ;;  %v2191_v44 = vmul.f32 %v2189_v43, %v5734_v18  ;;  %v2212_v5 = vmul.f32 %v2211_v41, %v5740_v39 }
 0x36d   : > { %v1965_v22 = vpop.permute.xlu1 %1964  ;;  %v1985_v29 = vpop.permute.xlu0 %1984  ;;  %v2056_v4 = vstv %s4216_s30  ;;  %s4252_s30 = sld [smem:[#allocation5 + $0x307]] }
 0x36e   : > { %v1969_v24 = vadd.f32 %v1965_v22, %v1955_v61  ;;  %v1990_v31 = vadd.f32 %v1985_v29, %v1976_v16  ;;  %v5746_v61 = vld [vmem:[#allocation2 + $0x21] sm:$0xff]  ;;  %v2225_v16 = vstv %s4231_s16  ;;  %s4226_s16 = sld [smem:[#allocation5 + $0x289]] }
 0x36f   : > { %v2213_v22 = vmul.f32 %v2211_v41, %v5746_v61  ;;  %v2226_v29 = vmul.f32 %v2225_v16, %v5740_v39  ;;  %v2227_v48 = vmul.f32 %v2225_v16, %v5746_v61 }
 0x370   : > { %v1977_v55 = vadd.f32 %v1975_v33, %v1969_v24  ;;  %v5752_v24 = vld [vmem:[#allocation2 + $0x1a] sm:$0xff]  ;;  %v2247_v33 = vstv %s4233_s17  ;;  %s4229_s17 = sld [smem:[#allocation5 + $0x28c]] }
 0x371   : > { %v1987_v50 = vpop.permute.xlu1 %1986  ;;  %v1999_v58 = vpop.permute.xlu0 %1998 }
 0x372   : > { %v2004_v35 = vadd.f32 %v1999_v58, %v1990_v31  ;;  %v1991_v12 = vadd.f32 %v1987_v50, %v1977_v55  ;;  %v2248_v31 = vmul.f32 %v2247_v33, %v5752_v24  ;;  %v5758_v55 = vld [vmem:[#allocation2 + $0x22] sm:$0xff]  ;;  %v2261_v50 = vstv %s4234_s19  ;;  %s4232_s19 = sld [smem:[#allocation5 + $0x28f]] }
 0x373   : > { %v2249_v58 = vmul.f32 %v2247_v33, %v5758_v55  ;;  %v2133_v33 = vstv %s4223_s15  ;;  %s4255_s15 = sld [smem:[#allocation5 + $0x30a]] }
 0x374   : > { %v2012_v37 = vadd.f32 %v2010_v36, %v2004_v35  ;;  %v2262_v35 = vmul.f32 %v2261_v50, %v5752_v24  ;;  %v5764_v36 = vld [vmem:[#allocation2 + $0x30] sm:$0xff] }
 0x375   : > { %v2001_v38 = vpop.permute.xlu1 %2000  ;;  %v2021_v46 = vpop.permute.xlu0 %2020 }
 0x376   : > { %v2005_v17 = vadd.f32 %v2001_v38, %v1991_v12  ;;  %v2026_v9 = vadd.f32 %v2021_v46, %v2012_v37  ;;  %v2283_v12 = vstv %s4236_s29  ;;  %v2263_v37 = vmul.f32 %v2261_v50, %v5758_v55  ;;  %v5770_v46 = vld [vmem:[#allocation2 + $0x38] sm:$0xff]  ;;  %s4235_s29 = sld [smem:[#allocation5 + $0x292]] }
 0x377   : > { %v2284_v38 = vmul.f32 %v2283_v12, %v5764_v36 }
 0x378   : > { %v2013_v13 = vadd.f32 %v2011_v28, %v2005_v17  ;;  %v2297_v17 = vstv %s4237_s8  ;;  %v2285_v28 = vmul.f32 %v2283_v12, %v5770_v46  ;;  %v2134_v12 = vmul.f32 %v2133_v33, %v5716_v40  ;;  %s4238_s8 = sld [smem:[#allocation5 + $0x295]] }
 0x379   : > { %v2023_v47 = vpop.permute.xlu1 %2022  ;;  %v2035_v0 = vpop.permute.xlu0 %2034 }
 0x37a   : > { %v2040_v49 = vadd.f32 %v2035_v0, %v2026_v9  ;;  %v2027_v51 = vadd.f32 %v2023_v47, %v2013_v13  ;;  %v2298_v9 = vmul.f32 %v2297_v17, %v5764_v36  ;;  %v5776_v13 = vld [vmem:[#allocation2 + $0x31] sm:$0xff]  ;;  %v2319_v47 = vstv %s4239_s18  ;;  %s4241_s18 = sld [smem:[#allocation5 + $0x298]] }
 0x37b   : > { %v2299_v0 = vmul.f32 %v2297_v17, %v5770_v46 }
 0x37c   : > { %v2042_v53 = vmax.f32 %v2040_v49, 0.0  ;;  %v2320_v49 = vmul.f32 %v2319_v47, %v5776_v13 }
 0x37d   : > { %v2037_v63 = vpop.permute.xlu1 %2036 }
 0x37e   : > { %v2041_v52 = vadd.f32 %v2037_v63, %v2027_v51  ;;  %2046 = vrot.lane.b32.xlu0 %v2042_v53, %s4656_s28  ;;  %v5782_v51 = vld [vmem:[#allocation2 + $0x39] sm:$0xff]  ;;  %v2333_v53 = vstv %s4240_s24  ;;  %s4246_s24 = sld [smem:[#allocation5 + $0x301]] }
 0x37f   : > { %v2321_v63 = vmul.f32 %v2319_v47, %v5782_v51  ;;  %v2334_v14 = vmul.f32 %v2333_v53, %v5776_v13  ;;  %v2135_v47 = vmul.f32 %v2133_v33, %v5722_v30 }
 0x380   : > { %v2043_v32 = vmax.f32 %v2041_v52, 0.0  ;;  %v5788_v52 = vld [vmem:[#allocation2 + $0x32] sm:$0xff] }
 0x382   : > { %2048 = vrot.lane.b32.xlu1 %v2043_v32, %s4656_s28  ;;  %2072 = vrot.lane.b32.xlu0 %v2068_v59, %s4658_s11  ;;  %v2355_v32 = vstv %s4242_s25  ;;  %v2335_v59 = vmul.f32 %v2333_v53, %v5782_v51  ;;  %s4247_s25 = sld [smem:[#allocation5 + $0x302]] }
 0x383   : > { %v2356_v34 = vmul.f32 %v2355_v32, %v5788_v52 }
 0x386   : > { %2074 = vrot.lane.b32.xlu1 %v2069_v60, %s4658_s11  ;;  %2086 = vrot.lane.b32.xlu0 %v2082_v15, %s4659_s13  ;;  %v5794_v60 = vld [vmem:[#allocation2 + $0x3a] sm:$0xff]  ;;  %v2369_v15 = vstv %s4243_s6  ;;  %s4249_s6 = sld [smem:[#allocation5 + $0x304]] }
 0x387   : > { %v2357_v8 = vmul.f32 %v2355_v32, %v5794_v60 }
 0x38a   : > { %2088 = vrot.lane.b32.xlu1 %v2083_v2, %s4659_s13  ;;  %2108 = vrot.lane.b32.xlu0 %v2104_v26, %s4658_s11  ;;  %v2370_v2 = vmul.f32 %v2369_v15, %v5788_v52  ;;  %v2371_v26 = vmul.f32 %v2369_v15, %v5794_v60 }
 0x38e   : > { %2110 = vrot.lane.b32.xlu1 %v2105_v6, %s4658_s11  ;;  %2122 = vrot.lane.b32.xlu0 %v2118_v7, %s4659_s13  ;;  %v2062_v7 = vmul.f32 %v2061_v45, %v5694_v54 }
 0x390   : > { %v2064_v42 = vadd.f32 %v2062_v7, %v2056_v4 }
 0x392   : > { %2124 = vrot.lane.b32.xlu1 %v2119_v27, %s4659_s13  ;;  %2144 = vrot.lane.b32.xlu0 %v2140_v1, %s4658_s11 }
 0x396   : > { %2146 = vrot.lane.b32.xlu1 %v2141_v11, %s4658_s11  ;;  %2158 = vrot.lane.b32.xlu0 %v2154_v10, %s4659_s13  ;;  %v2063_v11 = vmul.f32 %v2061_v45, %v5698_v56  ;;  %v2097_v10 = vstv %s4220_s14  ;;  %s4253_s14 = sld [smem:[#allocation5 + $0x308]] }
 0x398   : > { %v2065_v43 = vadd.f32 %v2063_v11, %v2056_v4 }
 0x39a   : > { %2160 = vrot.lane.b32.xlu1 %v2155_v19, %s4659_s13  ;;  %2180 = vrot.lane.b32.xlu0 %v2176_v21, %s4658_s11 }
 0x39e   : > { %2182 = vrot.lane.b32.xlu1 %v2177_v23, %s4658_s11  ;;  %2194 = vrot.lane.b32.xlu0 %v2190_v57, %s4659_s13  ;;  %v2098_v57 = vmul.f32 %v2097_v10, %v5704_v62 }
 0x3a2   : > { %2196 = vrot.lane.b32.xlu1 %v2191_v44, %s4659_s13  ;;  %2216 = vrot.lane.b32.xlu0 %v2212_v5, %s4658_s11 }
 0x3a6   : > { %2218 = vrot.lane.b32.xlu1 %v2213_v22, %s4658_s11  ;;  %2230 = vrot.lane.b32.xlu0 %v2226_v29, %s4659_s13  ;;  %v2099_v29 = vmul.f32 %v2097_v10, %v5710_v3 }
 0x3aa   : > { %2232 = vrot.lane.b32.xlu1 %v2227_v48, %s4659_s13  ;;  %2252 = vrot.lane.b32.xlu0 %v2248_v31, %s4658_s11 }
 0x3ae   : > { %2254 = vrot.lane.b32.xlu1 %v2249_v58, %s4658_s11  ;;  %2266 = vrot.lane.b32.xlu0 %v2262_v35, %s4659_s13 }
 0x3b2   : > { %2268 = vrot.lane.b32.xlu1 %v2263_v37, %s4659_s13  ;;  %2288 = vrot.lane.b32.xlu0 %v2284_v38, %s4658_s11 }
 0x3b6   : > { %2290 = vrot.lane.b32.xlu1 %v2285_v28, %s4658_s11  ;;  %2302 = vrot.lane.b32.xlu0 %v2298_v9, %s4659_s13 }
 0x3ba   : > { %2304 = vrot.lane.b32.xlu1 %v2299_v0, %s4659_s13  ;;  %2324 = vrot.lane.b32.xlu0 %v2320_v49, %s4658_s11  ;;  %v2169_v0 = vstv %s4226_s16  ;;  %s4256_s16 = sld [smem:[#allocation5 + $0x30b]] }
 0x3bb   : > { %v2171_v45 = vmul.f32 %v2169_v0, %v5734_v18 }
 0x3be   : > { %2326 = vrot.lane.b32.xlu1 %v2321_v63, %s4658_s11  ;;  %2338 = vrot.lane.b32.xlu0 %v2334_v14, %s4659_s13 }
 0x3c2   : > { %2340 = vrot.lane.b32.xlu1 %v2335_v59, %s4659_s13  ;;  %2360 = vrot.lane.b32.xlu0 %v2356_v34, %s4658_s11  ;;  %v2170_v59 = vmul.f32 %v2169_v0, %v5728_v20 }
 0x3c6   : > { %2362 = vrot.lane.b32.xlu1 %v2357_v8, %s4658_s11  ;;  %2374 = vrot.lane.b32.xlu0 %v2370_v2, %s4659_s13 }
 0x3ca   : > { %2376 = vrot.lane.b32.xlu1 %v2371_v26, %s4659_s13 }
 0x3f0   : > { %v2047_v6 = vpop.permute.xlu0 %2046 }
 0x3f1   : > { %2053 = vst.msk [vmem:[#allocation3 + $0x61] sm:$0xff] %vm323_vm2, %v2047_v6  ;;  %v2205_v6 = vstv %s4229_s17  ;;  %s4258_s17 = sld [smem:[#allocation5 + $0x30d]] }
 0x3f2   : > { %v2206_v11 = vmul.f32 %v2205_v6, %v5740_v39 }
 0x3f4   : > { %v2049_v27 = vpop.permute.xlu1 %2048  ;;  %v2073_v1 = vpop.permute.xlu0 %2072 }
 0x3f5   : > { %2054 = vst.msk [vmem:[#allocation3 + $0x69] sm:$0xff] %vm323_vm2, %v2049_v27  ;;  %v2078_v25 = vadd.f32 %v2073_v1, %v2064_v42 }
 0x3f8   : > { %v2075_v19 = vpop.permute.xlu1 %2074  ;;  %v2087_v21 = vpop.permute.xlu0 %2086 }
 0x3f9   : > { %v2092_v23 = vadd.f32 %v2087_v21, %v2078_v25  ;;  %v2079_v41 = vadd.f32 %v2075_v19, %v2065_v43 }
 0x3fb   : > { %v2100_v44 = vadd.f32 %v2098_v57, %v2092_v23  ;;  %v2207_v23 = vmul.f32 %v2205_v6, %v5746_v61  ;;  %v2241_v57 = vstv %s4232_s19  ;;  %s4259_s19 = sld [smem:[#allocation5 + $0x30e]] }
 0x3fc   : > { %v2089_v5 = vpop.permute.xlu1 %2088  ;;  %v2109_v16 = vpop.permute.xlu0 %2108 }
 0x3fd   : > { %v2093_v22 = vadd.f32 %v2089_v5, %v2079_v41  ;;  %v2114_v48 = vadd.f32 %v2109_v16, %v2100_v44 }
 0x3ff   : > { %v2101_v31 = vadd.f32 %v2099_v29, %v2093_v22  ;;  %v2242_v29 = vmul.f32 %v2241_v57, %v5752_v24 }
 0x400   : > { %v2111_v50 = vpop.permute.xlu1 %2110  ;;  %v2123_v58 = vpop.permute.xlu0 %2122 }
 0x401   : > { %v2128_v35 = vadd.f32 %v2123_v58, %v2114_v48  ;;  %v2115_v37 = vadd.f32 %v2111_v50, %v2101_v31 }
 0x403   : > { %v2136_v38 = vadd.f32 %v2134_v12, %v2128_v35  ;;  %v2243_v35 = vmul.f32 %v2241_v57, %v5758_v55  ;;  %v2277_v12 = vstv %s4235_s29  ;;  %s4261_s29 = sld [smem:[#allocation5 + $0x310]] }
 0x404   : > { %v2125_v17 = vpop.permute.xlu1 %2124  ;;  %v2145_v28 = vpop.permute.xlu0 %2144 }
 0x405   : > { %v2129_v9 = vadd.f32 %v2125_v17, %v2115_v37  ;;  %v2150_v49 = vadd.f32 %v2145_v28, %v2136_v38 }
 0x407   : > { %v2137_v53 = vadd.f32 %v2135_v47, %v2129_v9  ;;  %v2278_v47 = vmul.f32 %v2277_v12, %v5764_v36 }
 0x408   : > { %v2147_v63 = vpop.permute.xlu1 %2146  ;;  %v2159_v14 = vpop.permute.xlu0 %2158 }
 0x409   : > { %v2164_v32 = vadd.f32 %v2159_v14, %v2150_v49  ;;  %v2151_v34 = vadd.f32 %v2147_v63, %v2137_v53 }
 0x40b   : > { %v2172_v15 = vadd.f32 %v2170_v59, %v2164_v32  ;;  %v2279_v32 = vmul.f32 %v2277_v12, %v5770_v46  ;;  %v2313_v59 = vstv %s4238_s8  ;;  %s4262_s8 = sld [smem:[#allocation5 + $0x311]] }
 0x40c   : > { %v2161_v8 = vpop.permute.xlu1 %2160  ;;  %v2181_v2 = vpop.permute.xlu0 %2180 }
 0x40d   : > { %v2165_v26 = vadd.f32 %v2161_v8, %v2151_v34  ;;  %v2186_v7 = vadd.f32 %v2181_v2, %v2172_v15 }
 0x40f   : > { %v2173_v4 = vadd.f32 %v2171_v45, %v2165_v26  ;;  %v2314_v45 = vmul.f32 %v2313_v59, %v5776_v13 }
 0x410   : > { %v2183_v27 = vpop.permute.xlu1 %2182  ;;  %v2195_v1 = vpop.permute.xlu0 %2194 }
 0x411   : > { %v2200_v42 = vadd.f32 %v2195_v1, %v2186_v7  ;;  %v2187_v10 = vadd.f32 %v2183_v27, %v2173_v4 }
 0x413   : > { %v2208_v25 = vadd.f32 %v2206_v11, %v2200_v42  ;;  %v2315_v42 = vmul.f32 %v2313_v59, %v5782_v51  ;;  %v2349_v11 = vstv %s4241_s18  ;;  %s4264_s18 = sld [smem:[#allocation5 + $0x313]] }
 0x414   : > { %v2197_v19 = vpop.permute.xlu1 %2196  ;;  %v2217_v21 = vpop.permute.xlu0 %2216 }
 0x415   : > { %v2201_v43 = vadd.f32 %v2197_v19, %v2187_v10  ;;  %v2222_v41 = vadd.f32 %v2217_v21, %v2208_v25 }
 0x417   : > { %v2209_v44 = vadd.f32 %v2207_v23, %v2201_v43  ;;  %v2350_v23 = vmul.f32 %v2349_v11, %v5788_v52 }
 0x418   : > { %v2219_v5 = vpop.permute.xlu1 %2218  ;;  %v2231_v16 = vpop.permute.xlu0 %2230 }
 0x419   : > { %v2236_v22 = vadd.f32 %v2231_v16, %v2222_v41  ;;  %v2223_v33 = vadd.f32 %v2219_v5, %v2209_v44 }
 0x41b   : > { %v2244_v48 = vadd.f32 %v2242_v29, %v2236_v22  ;;  %v2351_v22 = vmul.f32 %v2349_v11, %v5794_v60  ;;  %v2551_v11 = vstv %s4258_s17  ;;  %s4251_s17 = sld [smem:[#allocation5 + $0x306]] }
 0x41c   : > { %v2233_v31 = vpop.permute.xlu1 %2232  ;;  %v2253_v50 = vpop.permute.xlu0 %2252 }
 0x41d   : > { %v2237_v58 = vadd.f32 %v2233_v31, %v2223_v33  ;;  %v2258_v37 = vadd.f32 %v2253_v50, %v2244_v48 }
 0x41f   : > { %v2245_v38 = vadd.f32 %v2243_v35, %v2237_v58 }
 0x420   : > { %v2255_v17 = vpop.permute.xlu1 %2254  ;;  %v2267_v28 = vpop.permute.xlu0 %2266 }
 0x421   : > { %v2272_v9 = vadd.f32 %v2267_v28, %v2258_v37  ;;  %v2259_v0 = vadd.f32 %v2255_v17, %v2245_v38  ;;  %v2407_v37 = vstv %s4246_s24  ;;  %s4265_s24 = sld [smem:[#allocation5 + $0x314]] }
 0x422   : > { %v2408_v28 = vmul.f32 %v2407_v37, %v5694_v54 }
 0x423   : > { %v2280_v49 = vadd.f32 %v2278_v47, %v2272_v9  ;;  %v2421_v9 = vstv %s4247_s25  ;;  %v2409_v47 = vmul.f32 %v2407_v37, %v5698_v56  ;;  %s4267_s25 = sld [smem:[#allocation5 + $0x316]] }
 0x424   : > { %v2269_v53 = vpop.permute.xlu1 %2268  ;;  %v2289_v63 = vpop.permute.xlu0 %2288 }
 0x425   : > { %v2273_v14 = vadd.f32 %v2269_v53, %v2259_v0  ;;  %v2294_v34 = vadd.f32 %v2289_v63, %v2280_v49  ;;  %v2422_v0 = vmul.f32 %v2421_v9, %v5694_v54  ;;  %v2443_v49 = vstv %s4249_s6  ;;  %s4268_s6 = sld [smem:[#allocation5 + $0x317]] }
 0x426   : > { %v2423_v53 = vmul.f32 %v2421_v9, %v5698_v56  ;;  %v2444_v63 = vmul.f32 %v2443_v49, %v5704_v62 }
 0x427   : > { %v2281_v15 = vadd.f32 %v2279_v32, %v2273_v14  ;;  %v2457_v14 = vstv %s4250_s7  ;;  %v2445_v32 = vmul.f32 %v2443_v49, %v5710_v3  ;;  %s4270_s7 = sld [smem:[#allocation5 + $0x319]] }
 0x428   : > { %v2291_v8 = vpop.permute.xlu1 %2290  ;;  %v2303_v2 = vpop.permute.xlu0 %2302  ;;  %v2458_v59 = vmul.f32 %v2457_v14, %v5704_v62 }
 0x429   : > { %v2308_v26 = vadd.f32 %v2303_v2, %v2294_v34  ;;  %v2295_v6 = vadd.f32 %v2291_v8, %v2281_v15  ;;  %v2479_v34 = vstv %s4252_s30  ;;  %v2459_v15 = vmul.f32 %v2457_v14, %v5710_v3  ;;  %s4271_s30 = sld [smem:[#allocation5 + $0x31a]] }
 0x42a   : > { %v2480_v8 = vmul.f32 %v2479_v34, %v5716_v40  ;;  %v2493_v2 = vstv %s4253_s14  ;;  %s4245_s14 = sld [smem:[#allocation5 + $0x300]] }
 0x42b   : > { %v2316_v7 = vadd.f32 %v2314_v45, %v2308_v26  ;;  %v2481_v26 = vmul.f32 %v2479_v34, %v5722_v30  ;;  %v2494_v45 = vmul.f32 %v2493_v2, %v5716_v40  ;;  %v2673_v37 = vstv %s4268_s6  ;;  %s4274_s6 = sld [smem:[#allocation5 + $0x381]] }
 0x42c   : > { %v2305_v4 = vpop.permute.xlu1 %2304  ;;  %v2325_v27 = vpop.permute.xlu0 %2324  ;;  %v2675_v9 = vmul.f32 %v2673_v37, %v5782_v51 }
 0x42d   : > { %v2309_v1 = vadd.f32 %v2305_v4, %v2295_v6  ;;  %v2330_v10 = vadd.f32 %v2325_v27, %v2316_v7  ;;  %v2515_v6 = vstv %s4255_s15  ;;  %v2495_v7 = vmul.f32 %v2493_v2, %v5722_v30  ;;  %s4244_s15 = sld [smem:[#allocation10 + $0x6]] }
 0x42e   : > { %v2516_v4 = vmul.f32 %v2515_v6, %v5728_v20  ;;  %v2529_v27 = vstv %s4256_s16  ;;  %s4248_s16 = sld [smem:[#allocation5 + $0x303]] }
 0x42f   : > { %v2317_v25 = vadd.f32 %v2315_v42, %v2309_v1  ;;  %v2517_v1 = vmul.f32 %v2515_v6, %v5734_v18  ;;  %v2530_v42 = vmul.f32 %v2529_v27, %v5728_v20 }
 0x430   : > { %v2327_v19 = vpop.permute.xlu1 %2326  ;;  %v2339_v21 = vpop.permute.xlu0 %2338  ;;  %v2401_v14 = vstv %s4245_s14  ;;  %s4278_s14 = sld [smem:[#allocation5 + $0x385]] }
 0x431   : > { %v2344_v43 = vadd.f32 %v2339_v21, %v2330_v10  ;;  %v2331_v57 = vadd.f32 %v2327_v19, %v2317_v25  ;;  %v2531_v10 = vmul.f32 %v2529_v27, %v5734_v18  ;;  %v2552_v25 = vmul.f32 %v2551_v11, %v5740_v39 }
 0x432   : > { %v2565_v19 = vstv %s4259_s19  ;;  %v2553_v21 = vmul.f32 %v2551_v11, %v5746_v61  ;;  %s4254_s19 = sld [smem:[#allocation5 + $0x309]] }
 0x433   : > { %v2352_v41 = vadd.f32 %v2350_v23, %v2344_v43  ;;  %v2566_v43 = vmul.f32 %v2565_v19, %v5740_v39  ;;  %v2587_v23 = vstv %s4261_s29  ;;  %v2396_v34 = vstv %s4244_s15  ;;  %s4257_s29 = sld [smem:[#allocation5 + $0x30c]]  ;;  %s4280_s15 = sld [smem:[#allocation5 + $0x387]] }
 0x434   : > { %v2341_v44 = vpop.permute.xlu1 %2340  ;;  %v2361_v5 = vpop.permute.xlu0 %2360 }
 0x435   : > { %v2345_v16 = vadd.f32 %v2341_v44, %v2331_v57  ;;  %v2366_v29 = vadd.f32 %v2361_v5, %v2352_v41  ;;  %v2567_v57 = vmul.f32 %v2565_v19, %v5746_v61  ;;  %v2588_v41 = vmul.f32 %v2587_v23, %v5752_v24 }
 0x436   : > { %v2601_v44 = vstv %s4262_s8  ;;  %v2589_v5 = vmul.f32 %v2587_v23, %v5758_v55  ;;  %s4260_s8 = sld [smem:[#allocation5 + $0x30f]] }
 0x437   : > { %v2353_v33 = vadd.f32 %v2351_v22, %v2345_v16  ;;  %v2602_v16 = vmul.f32 %v2601_v44, %v5752_v24  ;;  %v2623_v22 = vstv %s4264_s18  ;;  %s4263_s18 = sld [smem:[#allocation5 + $0x312]] }
 0x438   : > { %v2363_v48 = vpop.permute.xlu1 %2362  ;;  %v2375_v31 = vpop.permute.xlu0 %2374 }
 0x439   : > { %v2380_v50 = vadd.f32 %v2375_v31, %v2366_v29  ;;  %v2367_v58 = vadd.f32 %v2363_v48, %v2353_v33  ;;  %v2603_v29 = vmul.f32 %v2601_v44, %v5758_v55  ;;  %v2624_v33 = vmul.f32 %v2623_v22, %v5764_v36 }
 0x43a   : > { %v2637_v48 = vstv %s4265_s24  ;;  %v2625_v31 = vmul.f32 %v2623_v22, %v5770_v46  ;;  %s4266_s24 = sld [smem:[#allocation5 + $0x315]] }
 0x43b   : > { %v2382_v35 = vmax.f32 %v2380_v50, 0.0  ;;  %v2638_v50 = vmul.f32 %v2637_v48, %v5764_v36 }
 0x43c   : > { %v2377_v12 = vpop.permute.xlu1 %2376 }
 0x43d   : > { %v2381_v38 = vadd.f32 %v2377_v12, %v2367_v58  ;;  %2386 = vrot.lane.b32.xlu0 %v2382_v35, %s4656_s28  ;;  %v2659_v58 = vstv %s4267_s25  ;;  %v2639_v35 = vmul.f32 %v2637_v48, %v5770_v46  ;;  %s4269_s25 = sld [smem:[#allocation5 + $0x318]] }
 0x43e   : > { %v2660_v12 = vmul.f32 %v2659_v58, %v5776_v13 }
 0x43f   : > { %v2383_v17 = vmax.f32 %v2381_v38, 0.0  ;;  %v2661_v38 = vmul.f32 %v2659_v58, %v5782_v51 }
 0x441   : > { %2388 = vrot.lane.b32.xlu1 %v2383_v17, %s4656_s28  ;;  %2412 = vrot.lane.b32.xlu0 %v2408_v28, %s4658_s11  ;;  %v2674_v17 = vmul.f32 %v2673_v37, %v5776_v13  ;;  %v2695_v28 = vstv %s4270_s7  ;;  %s4275_s7 = sld [smem:[#allocation5 + $0x382]] }
 0x442   : > { %v2697_v49 = vmul.f32 %v2695_v28, %v5794_v60 }
 0x445   : > { %2414 = vrot.lane.b32.xlu1 %v2409_v47, %s4658_s11  ;;  %2426 = vrot.lane.b32.xlu0 %v2422_v0, %s4659_s13  ;;  %v2696_v47 = vmul.f32 %v2695_v28, %v5788_v52  ;;  %v2709_v0 = vstv %s4271_s30  ;;  %s4277_s30 = sld [smem:[#allocation5 + $0x384]] }
 0x449   : > { %2428 = vrot.lane.b32.xlu1 %v2423_v53, %s4659_s13  ;;  %2448 = vrot.lane.b32.xlu0 %v2444_v63, %s4658_s11  ;;  %v2710_v53 = vmul.f32 %v2709_v0, %v5788_v52  ;;  %v2711_v63 = vmul.f32 %v2709_v0, %v5794_v60  ;;  %v2545_v0 = vstv %s4257_s29  ;;  %s4286_s29 = sld [smem:[#allocation5 + $0x38d]] }
 0x44d   : > { %2450 = vrot.lane.b32.xlu1 %v2445_v32, %s4658_s11  ;;  %2462 = vrot.lane.b32.xlu0 %v2458_v59, %s4659_s13  ;;  %v2402_v59 = vmul.f32 %v2401_v14, %v5694_v54 }
 0x44f   : > { %v2404_v2 = vadd.f32 %v2402_v59, %v2396_v34 }
 0x451   : > { %2464 = vrot.lane.b32.xlu1 %v2459_v15, %s4659_s13  ;;  %2484 = vrot.lane.b32.xlu0 %v2480_v8, %s4658_s11 }
 0x455   : > { %2486 = vrot.lane.b32.xlu1 %v2481_v26, %s4658_s11  ;;  %2498 = vrot.lane.b32.xlu0 %v2494_v45, %s4659_s13  ;;  %v2403_v26 = vmul.f32 %v2401_v14, %v5698_v56  ;;  %v2437_v45 = vstv %s4248_s16  ;;  %s4281_s16 = sld [smem:[#allocation5 + $0x388]] }
 0x457   : > { %v2405_v27 = vadd.f32 %v2403_v26, %v2396_v34  ;;  %v2581_v26 = vstv %s4260_s8  ;;  %s4287_s8 = sld [smem:[#allocation5 + $0x38e]] }
 0x459   : > { %2500 = vrot.lane.b32.xlu1 %v2495_v7, %s4659_s13  ;;  %2520 = vrot.lane.b32.xlu0 %v2516_v4, %s4658_s11 }
 0x45d   : > { %2522 = vrot.lane.b32.xlu1 %v2517_v1, %s4658_s11  ;;  %2534 = vrot.lane.b32.xlu0 %v2530_v42, %s4659_s13  ;;  %v2438_v42 = vmul.f32 %v2437_v45, %v5704_v62 }
 0x461   : > { %2536 = vrot.lane.b32.xlu1 %v2531_v10, %s4659_s13  ;;  %2556 = vrot.lane.b32.xlu0 %v2552_v25, %s4658_s11 }
 0x465   : > { %2558 = vrot.lane.b32.xlu1 %v2553_v21, %s4658_s11  ;;  %2570 = vrot.lane.b32.xlu0 %v2566_v43, %s4659_s13  ;;  %v2439_v21 = vmul.f32 %v2437_v45, %v5710_v3  ;;  %v2473_v43 = vstv %s4251_s17  ;;  %s4283_s17 = sld [smem:[#allocation5 + $0x38a]] }
 0x466   : > { %v2475_v48 = vmul.f32 %v2473_v43, %v5722_v30 }
 0x469   : > { %2572 = vrot.lane.b32.xlu1 %v2567_v57, %s4659_s13  ;;  %2592 = vrot.lane.b32.xlu0 %v2588_v41, %s4658_s11 }
 0x46d   : > { %2594 = vrot.lane.b32.xlu1 %v2589_v5, %s4658_s11  ;;  %2606 = vrot.lane.b32.xlu0 %v2602_v16, %s4659_s13  ;;  %v2474_v5 = vmul.f32 %v2473_v43, %v5716_v40 }
 0x471   : > { %2608 = vrot.lane.b32.xlu1 %v2603_v29, %s4659_s13  ;;  %2628 = vrot.lane.b32.xlu0 %v2624_v33, %s4658_s11 }
 0x475   : > { %2630 = vrot.lane.b32.xlu1 %v2625_v31, %s4658_s11  ;;  %2642 = vrot.lane.b32.xlu0 %v2638_v50, %s4659_s13  ;;  %v2509_v31 = vstv %s4254_s19  ;;  %s4284_s19 = sld [smem:[#allocation5 + $0x38b]] }
 0x476   : > { %v2510_v37 = vmul.f32 %v2509_v31, %v5728_v20 }
 0x479   : > { %2644 = vrot.lane.b32.xlu1 %v2639_v35, %s4659_s13  ;;  %2664 = vrot.lane.b32.xlu0 %v2660_v12, %s4658_s11 }
 0x47d   : > { %2666 = vrot.lane.b32.xlu1 %v2661_v38, %s4658_s11  ;;  %2678 = vrot.lane.b32.xlu0 %v2674_v17, %s4659_s13 }
 0x481   : > { %2680 = vrot.lane.b32.xlu1 %v2675_v9, %s4659_s13  ;;  %2700 = vrot.lane.b32.xlu0 %v2696_v47, %s4658_s11  ;;  %v2511_v47 = vmul.f32 %v2509_v31, %v5734_v18 }
 0x485   : > { %2702 = vrot.lane.b32.xlu1 %v2697_v49, %s4658_s11  ;;  %2714 = vrot.lane.b32.xlu0 %v2710_v53, %s4659_s13 }
 0x489   : > { %2716 = vrot.lane.b32.xlu1 %v2711_v63, %s4659_s13 }
 0x4af   : > { %v2387_v32 = vpop.permute.xlu0 %2386 }
 0x4b0   : > { %2393 = vst.msk [vmem:[#allocation3 + $0x79] sm:$0xff] %vm323_vm2, %v2387_v32  ;;  %v2546_v32 = vmul.f32 %v2545_v0, %v5740_v39 }
 0x4b3   : > { %v2389_v15 = vpop.permute.xlu1 %2388  ;;  %v2413_v8 = vpop.permute.xlu0 %2412 }
 0x4b4   : > { %2394 = vst.msk [vmem:[#allocation3 + $0x81] sm:$0xff] %vm323_vm2, %v2389_v15  ;;  %v2418_v6 = vadd.f32 %v2413_v8, %v2404_v2  ;;  %v2547_v2 = vmul.f32 %v2545_v0, %v5746_v61 }
 0x4b7   : > { %v2415_v7 = vpop.permute.xlu1 %2414  ;;  %v2427_v4 = vpop.permute.xlu0 %2426 }
 0x4b8   : > { %v2432_v1 = vadd.f32 %v2427_v4, %v2418_v6  ;;  %v2419_v11 = vadd.f32 %v2415_v7, %v2405_v27  ;;  %v2582_v27 = vmul.f32 %v2581_v26, %v5752_v24 }
 0x4ba   : > { %v2440_v10 = vadd.f32 %v2438_v42, %v2432_v1 }
 0x4bb   : > { %v2429_v54 = vpop.permute.xlu1 %2428  ;;  %v2449_v25 = vpop.permute.xlu0 %2448 }
 0x4bc   : > { %v2433_v19 = vadd.f32 %v2429_v54, %v2419_v11  ;;  %v2454_v23 = vadd.f32 %v2449_v25, %v2440_v10  ;;  %v2583_v54 = vmul.f32 %v2581_v26, %v5758_v55  ;;  %v2617_v25 = vstv %s4263_s18  ;;  %s4289_s18 = sld [smem:[#allocation5 + $0x390]] }
 0x4be   : > { %v2441_v56 = vadd.f32 %v2439_v21, %v2433_v19 }
 0x4bf   : > { %v2451_v57 = vpop.permute.xlu1 %2450  ;;  %v2463_v41 = vpop.permute.xlu0 %2462 }
 0x4c0   : > { %v2468_v44 = vadd.f32 %v2463_v41, %v2454_v23  ;;  %v2455_v16 = vadd.f32 %v2451_v57, %v2441_v56  ;;  %v2618_v56 = vmul.f32 %v2617_v25, %v5764_v36 }
 0x4c2   : > { %v2476_v22 = vadd.f32 %v2474_v5, %v2468_v44 }
 0x4c3   : > { %v2465_v29 = vpop.permute.xlu1 %2464  ;;  %v2485_v62 = vpop.permute.xlu0 %2484 }
 0x4c4   : > { %v2469_v33 = vadd.f32 %v2465_v29, %v2455_v16  ;;  %v2490_v50 = vadd.f32 %v2485_v62, %v2476_v22  ;;  %v2619_v16 = vmul.f32 %v2617_v25, %v5770_v46  ;;  %v2653_v22 = vstv %s4266_s24  ;;  %v5940_v25 = vld [vmem:[#allocation2 + $0x2] sm:$0xff]  ;;  %s4290_s24 = sld [smem:[#allocation5 + $0x391]] }
 0x4c5   : > { %v2654_v31 = vmul.f32 %v2653_v22, %v5776_v13 }
 0x4c6   : > { %v2477_v3 = vadd.f32 %v2475_v48, %v2469_v33 }
 0x4c7   : > { %v2487_v58 = vpop.permute.xlu1 %2486  ;;  %v2499_v35 = vpop.permute.xlu0 %2498 }
 0x4c8   : > { %v2504_v12 = vadd.f32 %v2499_v35, %v2490_v50  ;;  %v2491_v38 = vadd.f32 %v2487_v58, %v2477_v3 }
 0x4ca   : > { %v2512_v17 = vadd.f32 %v2510_v37, %v2504_v12  ;;  %v2655_v12 = vmul.f32 %v2653_v22, %v5782_v51  ;;  %v2689_v37 = vstv %s4269_s25  ;;  %v2869_v22 = vstv %s4284_s19  ;;  %s4292_s25 = sld [smem:[#allocation5 + $0x393]]  ;;  %s4303_s19 = sld [smem:[#allocation11 + $0x4]] }
 0x4cb   : > { %v2501_v28 = vpop.permute.xlu1 %2500  ;;  %v2521_v40 = vpop.permute.xlu0 %2520 }
 0x4cc   : > { %v2505_v9 = vadd.f32 %v2501_v28, %v2491_v38  ;;  %v2526_v49 = vadd.f32 %v2521_v40, %v2512_v17 }
 0x4ce   : > { %v2513_v30 = vadd.f32 %v2511_v47, %v2505_v9  ;;  %v2690_v9 = vmul.f32 %v2689_v37, %v5788_v52  ;;  %v2747_v52 = vstv %s4274_s6  ;;  %s4293_s6 = sld [smem:[#allocation5 + $0x394]] }
 0x4cf   : > { %v2523_v53 = vpop.permute.xlu1 %2522  ;;  %v2535_v63 = vpop.permute.xlu0 %2534 }
 0x4d0   : > { %v2540_v14 = vadd.f32 %v2535_v63, %v2526_v49  ;;  %v2527_v59 = vadd.f32 %v2523_v53, %v2513_v30  ;;  %v2691_v53 = vmul.f32 %v2689_v37, %v5794_v60  ;;  %v5922_v60 = vld [vmem:[#allocation2 + $0x8] sm:$0xff] }
 0x4d2   : > { %v2548_v34 = vadd.f32 %v2546_v32, %v2540_v14 }
 0x4d3   : > { %v2537_v15 = vpop.permute.xlu1 %2536  ;;  %v2557_v20 = vpop.permute.xlu0 %2556 }
 0x4d4   : > { %v2541_v8 = vadd.f32 %v2537_v15, %v2527_v59  ;;  %v2562_v45 = vadd.f32 %v2557_v20, %v2548_v34 }
 0x4d6   : > { %v2549_v18 = vadd.f32 %v2547_v2, %v2541_v8  ;;  %v5918_v8 = vld [vmem:[#allocation2] sm:$0xff] }
 0x4d7   : > { %v2559_v6 = vpop.permute.xlu1 %2558  ;;  %v2571_v7 = vpop.permute.xlu0 %2570 }
 0x4d8   : > { %v2576_v4 = vadd.f32 %v2571_v7, %v2562_v45  ;;  %v2563_v1 = vadd.f32 %v2559_v6, %v2549_v18  ;;  %v2748_v45 = vmul.f32 %v2747_v52, %v5918_v8  ;;  %v2761_v18 = vstv %s4275_s7  ;;  %s4295_s7 = sld [smem:[#allocation5 + $0x396]] }
 0x4d9   : > { %v2749_v6 = vmul.f32 %v2747_v52, %v5922_v60  ;;  %v2762_v7 = vmul.f32 %v2761_v18, %v5918_v8 }
 0x4da   : > { %v2584_v42 = vadd.f32 %v2582_v27, %v2576_v4  ;;  %v5928_v4 = vld [vmem:[#allocation2 + $0x1] sm:$0xff]  ;;  %v2783_v27 = vstv %s4277_s30  ;;  %s4296_s30 = sld [smem:[#allocation5 + $0x397]] }
 0x4db   : > { %v2573_v11 = vpop.permute.xlu1 %2572  ;;  %v2593_v39 = vpop.permute.xlu0 %2592 }
 0x4dc   : > { %v2577_v10 = vadd.f32 %v2573_v11, %v2563_v1  ;;  %v2598_v19 = vadd.f32 %v2593_v39, %v2584_v42  ;;  %v2763_v1 = vmul.f32 %v2761_v18, %v5922_v60  ;;  %v2784_v42 = vmul.f32 %v2783_v27, %v5928_v4  ;;  %v5934_v11 = vld [vmem:[#allocation2 + $0x9] sm:$0xff] }
 0x4dd   : > { %v2797_v39 = vstv %s4278_s14  ;;  %s4298_s14 = sld [smem:[#allocation5 + $0x399]] }
 0x4de   : > { %v2585_v61 = vadd.f32 %v2583_v54, %v2577_v10  ;;  %v2785_v10 = vmul.f32 %v2783_v27, %v5934_v11  ;;  %v2798_v54 = vmul.f32 %v2797_v39, %v5928_v4 }
 0x4df   : > { %v2595_v21 = vpop.permute.xlu1 %2594  ;;  %v2607_v43 = vpop.permute.xlu0 %2606 }
 0x4e0   : > { %v2612_v23 = vadd.f32 %v2607_v43, %v2598_v19  ;;  %v2599_v57 = vadd.f32 %v2595_v21, %v2585_v61  ;;  %v2819_v19 = vstv %s4280_s15  ;;  %v2799_v61 = vmul.f32 %v2797_v39, %v5934_v11  ;;  %v5946_v43 = vld [vmem:[#allocation2 + $0xa] sm:$0xff]  ;;  %s4299_s15 = sld [smem:[#allocation5 + $0x39a]] }
 0x4e1   : > { %v2820_v21 = vmul.f32 %v2819_v19, %v5940_v25 }
 0x4e2   : > { %v2620_v41 = vadd.f32 %v2618_v56, %v2612_v23  ;;  %v2833_v23 = vstv %s4281_s16  ;;  %v2821_v56 = vmul.f32 %v2819_v19, %v5946_v43  ;;  %s4300_s16 = sld [smem:[#allocation11 + $0x1]]  ;;  %v6030_v19 = vld [vmem:[#allocation3 + $0x8] sm:$0xff] }
 0x4e3   : > { %v2609_v44 = vpop.permute.xlu1 %2608  ;;  %v2629_v24 = vpop.permute.xlu0 %2628 }
 0x4e4   : > { %v2613_v5 = vadd.f32 %v2609_v44, %v2599_v57  ;;  %v2634_v29 = vadd.f32 %v2629_v24, %v2620_v41  ;;  %v2834_v57 = vmul.f32 %v2833_v23, %v5940_v25  ;;  %v5952_v41 = vld [vmem:[#allocation2 + $0x18] sm:$0xff]  ;;  %v2855_v44 = vstv %s4283_s17  ;;  %s4301_s17 = sld [smem:[#allocation11 + $0x2]] }
 0x4e5   : > { %v2835_v24 = vmul.f32 %v2833_v23, %v5946_v43 }
 0x4e6   : > { %v2621_v55 = vadd.f32 %v2619_v16, %v2613_v5  ;;  %v2856_v5 = vmul.f32 %v2855_v44, %v5952_v41  ;;  %v5958_v16 = vld [vmem:[#allocation2 + $0x20] sm:$0xff] }
 0x4e7   : > { %v2631_v62 = vpop.permute.xlu1 %2630  ;;  %v2643_v33 = vpop.permute.xlu0 %2642 }
 0x4e8   : > { %v2648_v48 = vadd.f32 %v2643_v33, %v2634_v29  ;;  %v2635_v50 = vadd.f32 %v2631_v62, %v2621_v55  ;;  %v2857_v29 = vmul.f32 %v2855_v44, %v5958_v16  ;;  %v2870_v55 = vmul.f32 %v2869_v22, %v5952_v41  ;;  %v5964_v62 = vld [vmem:[#allocation2 + $0x19] sm:$0xff] }
 0x4e9   : > { %v2891_v33 = vstv %s4286_s29  ;;  %v3087_v39 = vstv %s4300_s16  ;;  %s4304_s29 = sld [smem:[#allocation11 + $0x5]]  ;;  %s6088_s16 = sld [smem:[#allocation10 + $0x7]] }
 0x4ea   : > { %v2656_v3 = vadd.f32 %v2654_v31, %v2648_v48  ;;  %v2871_v48 = vmul.f32 %v2869_v22, %v5958_v16  ;;  %v2892_v31 = vmul.f32 %v2891_v33, %v5964_v62 }
 0x4eb   : > { %v2645_v58 = vpop.permute.xlu1 %2644  ;;  %v2665_v36 = vpop.permute.xlu0 %2664 }
 0x4ec   : > { %v2649_v35 = vadd.f32 %v2645_v58, %v2635_v50  ;;  %v2670_v38 = vadd.f32 %v2665_v36, %v2656_v3  ;;  %v5970_v50 = vld [vmem:[#allocation2 + $0x21] sm:$0xff]  ;;  %v2905_v3 = vstv %s4287_s8  ;;  %s4306_s8 = sld [smem:[#allocation11 + $0x7]] }
 0x4ed   : > { %v2893_v58 = vmul.f32 %v2891_v33, %v5970_v50  ;;  %v2906_v36 = vmul.f32 %v2905_v3, %v5964_v62  ;;  %v2907_v37 = vmul.f32 %v2905_v3, %v5970_v50  ;;  %v6048_v33 = vld [vmem:[#allocation3 + $0x2] sm:$0xff] }
 0x4ee   : > { %v2657_v17 = vadd.f32 %v2655_v12, %v2649_v35  ;;  %v5976_v35 = vld [vmem:[#allocation2 + $0x1a] sm:$0xff]  ;;  %v2927_v12 = vstv %s4289_s18  ;;  %s4307_s18 = sld [smem:[#allocation11 + $0x8]] }
 0x4ef   : > { %v2667_v46 = vpop.permute.xlu1 %2666  ;;  %v2679_v28 = vpop.permute.xlu0 %2678  ;;  %v3137_v22 = vstv %s4304_s29  ;;  %s6109_s29 = sld [smem:[#allocation11 + $0x14]] }
 0x4f0   : > { %v2684_v40 = vadd.f32 %v2679_v28, %v2670_v38  ;;  %v2671_v47 = vadd.f32 %v2667_v46, %v2657_v17  ;;  %v2928_v38 = vmul.f32 %v2927_v12, %v5976_v35  ;;  %v5982_v17 = vld [vmem:[#allocation2 + $0x22] sm:$0xff]  ;;  %v2941_v46 = vstv %s4290_s24  ;;  %s4309_s24 = sld [smem:[#allocation11 + $0xa]] }
 0x4f1   : > { %v2929_v28 = vmul.f32 %v2927_v12, %v5982_v17 }
 0x4f2   : > { %v2692_v0 = vadd.f32 %v2690_v9, %v2684_v40  ;;  %v2942_v40 = vmul.f32 %v2941_v46, %v5976_v35  ;;  %v5988_v9 = vld [vmem:[#allocation2 + $0x30] sm:$0xff] }
 0x4f3   : > { %v2681_v49 = vpop.permute.xlu1 %2680  ;;  %v2701_v30 = vpop.permute.xlu0 %2700 }
 0x4f4   : > { %v2685_v13 = vadd.f32 %v2681_v49, %v2671_v47  ;;  %v2706_v63 = vadd.f32 %v2701_v30, %v2692_v0  ;;  %v2963_v47 = vstv %s4292_s25  ;;  %v2943_v0 = vmul.f32 %v2941_v46, %v5982_v17  ;;  %v5994_v30 = vld [vmem:[#allocation2 + $0x38] sm:$0xff]  ;;  %s4310_s25 = sld [smem:[#allocation11 + $0xb]] }
 0x4f5   : > { %v2964_v49 = vmul.f32 %v2963_v47, %v5988_v9 }
 0x4f6   : > { %v2693_v14 = vadd.f32 %v2691_v53, %v2685_v13  ;;  %v2977_v13 = vstv %s4293_s6  ;;  %v2965_v53 = vmul.f32 %v2963_v47, %v5994_v30  ;;  %v3195_v46 = vstv %s4309_s24  ;;  %s4312_s6 = sld [smem:[#allocation11 + $0xd]]  ;;  %v6066_v47 = vld [vmem:[#allocation3 + $0x20] sm:$0xff]  ;;  %s6134_s24 = sld [smem:[#allocation11 + $0x17]] }
 0x4f7   : > { %v2703_v32 = vpop.permute.xlu1 %2702  ;;  %v2715_v51 = vpop.permute.xlu0 %2714 }
 0x4f8   : > { %v2720_v59 = vadd.f32 %v2715_v51, %v2706_v63  ;;  %v2707_v34 = vadd.f32 %v2703_v32, %v2693_v14  ;;  %v2978_v63 = vmul.f32 %v2977_v13, %v5988_v9  ;;  %v6000_v14 = vld [vmem:[#allocation2 + $0x31] sm:$0xff]  ;;  %v2999_v32 = vstv %s4295_s7  ;;  %s4313_s7 = sld [smem:[#allocation11 + $0xe]] }
 0x4f9   : > { %v2979_v51 = vmul.f32 %v2977_v13, %v5994_v30 }
 0x4fa   : > { %v2722_v15 = vmax.f32 %v2720_v59, 0.0  ;;  %v3000_v59 = vmul.f32 %v2999_v32, %v6000_v14 }
 0x4fb   : > { %v2717_v20 = vpop.permute.xlu1 %2716 }
 0x4fc   : > { %v2721_v2 = vadd.f32 %v2717_v20, %v2707_v34  ;;  %2726 = vrot.lane.b32.xlu0 %v2722_v15, %s4656_s28  ;;  %v6006_v34 = vld [vmem:[#allocation2 + $0x39] sm:$0xff]  ;;  %v3013_v15 = vstv %s4296_s30  ;;  %s6074_s30 = sld [smem:[#allocation11 + $0x10]] }
 0x4fd   : > { %v3001_v20 = vmul.f32 %v2999_v32, %v6006_v34  ;;  %v3014_v52 = vmul.f32 %v3013_v15, %v6000_v14 }
 0x4fe   : > { %v2723_v26 = vmax.f32 %v2721_v2, 0.0  ;;  %v6012_v2 = vld [vmem:[#allocation2 + $0x32] sm:$0xff] }
 0x500   : > { %2728 = vrot.lane.b32.xlu1 %v2723_v26, %s4656_s28  ;;  %2752 = vrot.lane.b32.xlu0 %v2748_v45, %s4658_s11  ;;  %v3035_v26 = vstv %s4298_s14  ;;  %v3015_v45 = vmul.f32 %v3013_v15, %v6006_v34  ;;  %s6078_s14 = sld [smem:[#allocation5 + $0x380]]  ;;  %v3245_v15 = vstv %s4313_s7  ;;  %s6157_s7 = sld [smem:[#allocation11 + $0x1a]] }
 0x501   : > { %v3036_v18 = vmul.f32 %v3035_v26, %v6012_v2 }
 0x504   : > { %2754 = vrot.lane.b32.xlu1 %v2749_v6, %s4658_s11  ;;  %2766 = vrot.lane.b32.xlu0 %v2762_v7, %s4659_s13  ;;  %v6018_v6 = vld [vmem:[#allocation2 + $0x3a] sm:$0xff]  ;;  %v3049_v7 = vstv %s4299_s15  ;;  %s6084_s15 = sld [smem:[#allocation11 + $0x11]] }
 0x505   : > { %v3037_v27 = vmul.f32 %v3035_v26, %v6018_v6  ;;  %v6092_v26 = vld [vmem:[#allocation3 + $0x1a] sm:$0xff] }
 0x508   : > { %2768 = vrot.lane.b32.xlu1 %v2763_v1, %s4659_s13  ;;  %2788 = vrot.lane.b32.xlu0 %v2784_v42, %s4658_s11  ;;  %v3050_v1 = vmul.f32 %v3049_v7, %v6012_v2  ;;  %v6024_v42 = vld [vmem:[#allocation3] sm:$0xff] }
 0x50c   : > { %2790 = vrot.lane.b32.xlu1 %v2785_v10, %s4658_s11  ;;  %2802 = vrot.lane.b32.xlu0 %v2798_v54, %s4659_s13  ;;  %v3051_v10 = vmul.f32 %v3049_v7, %v6018_v6  ;;  %v3088_v54 = vmul.f32 %v3087_v39, %v6024_v42 }
 0x510   : > { %2804 = vrot.lane.b32.xlu1 %v2799_v61, %s4659_s13  ;;  %2824 = vrot.lane.b32.xlu0 %v2820_v21, %s4658_s11  ;;  %v3101_v61 = vstv %s4301_s17  ;;  %v3089_v21 = vmul.f32 %v3087_v39, %v6030_v19  ;;  %s6095_s17 = sld [smem:[#allocation11 + $0x13]] }
 0x511   : > { %v3102_v23 = vmul.f32 %v3101_v61, %v6024_v42  ;;  %v3103_v44 = vmul.f32 %v3101_v61, %v6030_v19  ;;  %v2736_v61 = vstv %s6088_s16  ;;  %s6193_s16 = sld [smem:[#allocation5 + $0x38f]] }
 0x514   : > { %2826 = vrot.lane.b32.xlu1 %v2821_v56, %s4658_s11  ;;  %2838 = vrot.lane.b32.xlu0 %v2834_v57, %s4659_s13  ;;  %v6036_v56 = vld [vmem:[#allocation3 + $0x1] sm:$0xff]  ;;  %v3123_v57 = vstv %s4303_s19  ;;  %s6100_s19 = sld [smem:[#allocation5 + $0x383]] }
 0x518   : > { %2840 = vrot.lane.b32.xlu1 %v2835_v24, %s4659_s13  ;;  %2860 = vrot.lane.b32.xlu0 %v2856_v5, %s4658_s11  ;;  %v3124_v24 = vmul.f32 %v3123_v57, %v6036_v56  ;;  %v6042_v5 = vld [vmem:[#allocation3 + $0x9] sm:$0xff] }
 0x51c   : > { %2862 = vrot.lane.b32.xlu1 %v2857_v29, %s4658_s11  ;;  %2874 = vrot.lane.b32.xlu0 %v2870_v55, %s4659_s13  ;;  %v3125_v29 = vmul.f32 %v3123_v57, %v6042_v5  ;;  %v3138_v55 = vmul.f32 %v3137_v22, %v6036_v56 }
 0x520   : > { %2876 = vrot.lane.b32.xlu1 %v2871_v48, %s4659_s13  ;;  %2896 = vrot.lane.b32.xlu0 %v2892_v31, %s4658_s11  ;;  %v3159_v48 = vstv %s4306_s8  ;;  %v3139_v31 = vmul.f32 %v3137_v22, %v6042_v5  ;;  %v6118_v22 = vld [vmem:[#allocation3 + $0x30] sm:$0xff]  ;;  %s6121_s8 = sld [smem:[#allocation11 + $0x16]] }
 0x521   : > { %v3160_v3 = vmul.f32 %v3159_v48, %v6048_v33 }
 0x524   : > { %2898 = vrot.lane.b32.xlu1 %v2893_v58, %s4658_s11  ;;  %2910 = vrot.lane.b32.xlu0 %v2906_v36, %s4659_s13  ;;  %v6054_v58 = vld [vmem:[#allocation3 + $0xa] sm:$0xff]  ;;  %v3173_v36 = vstv %s4307_s18  ;;  %s6126_s18 = sld [smem:[#allocation5 + $0x386]] }
 0x525   : > { %v3161_v12 = vmul.f32 %v3159_v48, %v6054_v58 }
 0x528   : > { %2912 = vrot.lane.b32.xlu1 %v2907_v37, %s4659_s13  ;;  %2932 = vrot.lane.b32.xlu0 %v2928_v38, %s4658_s11  ;;  %v3174_v37 = vmul.f32 %v3173_v36, %v6048_v33  ;;  %v6060_v38 = vld [vmem:[#allocation3 + $0x18] sm:$0xff] }
 0x52c   : > { %2934 = vrot.lane.b32.xlu1 %v2929_v28, %s4658_s11  ;;  %2946 = vrot.lane.b32.xlu0 %v2942_v40, %s4659_s13  ;;  %v3175_v28 = vmul.f32 %v3173_v36, %v6054_v58  ;;  %v3196_v40 = vmul.f32 %v3195_v46, %v6060_v38 }
 0x530   : > { %2948 = vrot.lane.b32.xlu1 %v2943_v0, %s4659_s13  ;;  %2968 = vrot.lane.b32.xlu0 %v2964_v49, %s4658_s11  ;;  %v3209_v0 = vstv %s4310_s25  ;;  %v3197_v49 = vmul.f32 %v3195_v46, %v6066_v47  ;;  %s6144_s25 = sld [smem:[#allocation11 + $0x19]] }
 0x531   : > { %v3210_v13 = vmul.f32 %v3209_v0, %v6060_v38  ;;  %v3211_v32 = vmul.f32 %v3209_v0, %v6066_v47 }
 0x534   : > { %2970 = vrot.lane.b32.xlu1 %v2965_v53, %s4658_s11  ;;  %2982 = vrot.lane.b32.xlu0 %v2978_v63, %s4659_s13  ;;  %v6072_v53 = vld [vmem:[#allocation3 + $0x19] sm:$0xff]  ;;  %v3231_v63 = vstv %s4312_s6  ;;  %s6149_s6 = sld [smem:[#allocation5 + $0x389]] }
 0x538   : > { %2984 = vrot.lane.b32.xlu1 %v2979_v51, %s4659_s13  ;;  %3004 = vrot.lane.b32.xlu0 %v3000_v59, %s4658_s11  ;;  %v3232_v51 = vmul.f32 %v3231_v63, %v6072_v53  ;;  %v6082_v59 = vld [vmem:[#allocation3 + $0x21] sm:$0xff] }
 0x53c   : > { %3006 = vrot.lane.b32.xlu1 %v3001_v20, %s4658_s11  ;;  %3018 = vrot.lane.b32.xlu0 %v3014_v52, %s4659_s13  ;;  %v3233_v20 = vmul.f32 %v3231_v63, %v6082_v59  ;;  %v3246_v52 = vmul.f32 %v3245_v15, %v6072_v53 }
 0x540   : > { %3020 = vrot.lane.b32.xlu1 %v3015_v45, %s4659_s13  ;;  %3040 = vrot.lane.b32.xlu0 %v3036_v18, %s4658_s11  ;;  %v3267_v45 = vstv %s6074_s30  ;;  %v2741_v18 = vstv %s6078_s14  ;;  %s6167_s30 = sld [smem:[#allocation11 + $0x1c]] }
 0x541   : > { %v2742_v39 = vmul.f32 %v2741_v18, %v5918_v8  ;;  %s6172_s14 = sld [smem:[#allocation5 + $0x38c]] }
 0x543   : > { %v2744_v8 = vadd.f32 %v2742_v39, %v2736_v61 }
 0x544   : > { %3042 = vrot.lane.b32.xlu1 %v3037_v27, %s4658_s11  ;;  %3054 = vrot.lane.b32.xlu0 %v3050_v1, %s4659_s13  ;;  %v3247_v27 = vmul.f32 %v3245_v15, %v6082_v59  ;;  %v3268_v1 = vmul.f32 %v3267_v45, %v6092_v26 }
 0x548   : > { %3056 = vrot.lane.b32.xlu1 %v3051_v10, %s4659_s13  ;;  %3092 = vrot.lane.b32.xlu0 %v3088_v54, %s4658_s11  ;;  %v6106_v10 = vld [vmem:[#allocation3 + $0x22] sm:$0xff]  ;;  %v3281_v54 = vstv %s6084_s15  ;;  %s6180_s15 = sld [smem:[#allocation11 + $0x1d]] }
 0x549   : > { %v3269_v57 = vmul.f32 %v3267_v45, %v6106_v10  ;;  %v3283_v36 = vmul.f32 %v3281_v54, %v6106_v10  ;;  %v2813_v45 = vstv %s6126_s18  ;;  %s6219_s18 = sld [smem:[#allocation4]] }
 0x54c   : > { %3094 = vrot.lane.b32.xlu1 %v3089_v21, %s4658_s11  ;;  %3106 = vrot.lane.b32.xlu0 %v3102_v23, %s4659_s13 }
 0x550   : > { %3108 = vrot.lane.b32.xlu1 %v3103_v44, %s4659_s13  ;;  %3128 = vrot.lane.b32.xlu0 %v3124_v24, %s4658_s11  ;;  %v3282_v44 = vmul.f32 %v3281_v54, %v6092_v26  ;;  %v2743_v24 = vmul.f32 %v2741_v18, %v5922_v60 }
 0x554   : > { %3130 = vrot.lane.b32.xlu1 %v3125_v29, %s4658_s11  ;;  %3142 = vrot.lane.b32.xlu0 %v3138_v55, %s4659_s13  ;;  %v3303_v29 = vstv %s6095_s17  ;;  %v2777_v55 = vstv %s6100_s19  ;;  %s4291_s17 = sld [smem:[#allocation5 + $0x392]]  ;;  %s4294_s19 = sld [smem:[#allocation5 + $0x395]] }
 0x555   : > { %v3304_v60 = vmul.f32 %v3303_v29, %v6118_v22  ;;  %v2778_v46 = vmul.f32 %v2777_v55, %v5928_v4  ;;  %v2779_v4 = vmul.f32 %v2777_v55, %v5934_v11 }
 0x558   : > { %3144 = vrot.lane.b32.xlu1 %v3139_v31, %s4659_s13  ;;  %3164 = vrot.lane.b32.xlu0 %v3160_v3, %s4658_s11 }
 0x55c   : > { %3166 = vrot.lane.b32.xlu1 %v3161_v12, %s4658_s11  ;;  %3178 = vrot.lane.b32.xlu0 %v3174_v37, %s4659_s13  ;;  %v2745_v12 = vadd.f32 %v2743_v24, %v2736_v61  ;;  %v2814_v61 = vmul.f32 %v2813_v45, %v5940_v25  ;;  %v2815_v25 = vmul.f32 %v2813_v45, %v5946_v43 }
 0x560   : > { %3180 = vrot.lane.b32.xlu1 %v3175_v28, %s4659_s13  ;;  %3200 = vrot.lane.b32.xlu0 %v3196_v40, %s4658_s11  ;;  %v6131_v28 = vld [vmem:[#allocation3 + $0x38] sm:$0xff]  ;;  %v3317_v40 = vstv %s6109_s29  ;;  %s4297_s29 = sld [smem:[#allocation5 + $0x398]] }
 0x561   : > { %v3319_v39 = vmul.f32 %v3317_v40, %v6131_v28 }
 0x564   : > { %3202 = vrot.lane.b32.xlu1 %v3197_v49, %s4658_s11  ;;  %3214 = vrot.lane.b32.xlu0 %v3210_v13, %s4659_s13 }
 0x568   : > { %3216 = vrot.lane.b32.xlu1 %v3211_v32, %s4659_s13  ;;  %3236 = vrot.lane.b32.xlu0 %v3232_v51, %s4658_s11  ;;  %v3305_v32 = vmul.f32 %v3303_v29, %v6131_v28  ;;  %v3318_v51 = vmul.f32 %v3317_v40, %v6118_v22 }
 0x56c   : > { %3238 = vrot.lane.b32.xlu1 %v3233_v20, %s4658_s11  ;;  %3250 = vrot.lane.b32.xlu0 %v3246_v52, %s4659_s13  ;;  %v6141_v20 = vld [vmem:[#allocation3 + $0x31] sm:$0xff]  ;;  %v3339_v52 = vstv %s6121_s8  ;;  %s6216_s8 = sld [smem:[#allocation11]] }
 0x56d   : > { %v3340_v11 = vmul.f32 %v3339_v52, %v6141_v20 }
 0x56e   : > { %v2727_v7 = vpop.permute.xlu0 %2726 }
 0x56f   : > { %2733 = vst.msk [vmem:[#allocation3 + $0x91] sm:$0xff] %vm323_vm2, %v2727_v7 }
 0x570   : > { %3252 = vrot.lane.b32.xlu1 %v3247_v27, %s4659_s13  ;;  %3272 = vrot.lane.b32.xlu0 %v3268_v1, %s4658_s11 }
 0x572   : > { %v2729_v21 = vpop.permute.xlu1 %2728  ;;  %v2753_v23 = vpop.permute.xlu0 %2752 }
 0x573   : > { %2734 = vst.msk [vmem:[#allocation3 + $0x99] sm:$0xff] %vm323_vm2, %v2729_v21  ;;  %v2758_v48 = vadd.f32 %v2753_v23, %v2744_v8  ;;  %v6154_v21 = vld [vmem:[#allocation3 + $0x39] sm:$0xff]  ;;  %v3353_v23 = vstv %s6134_s24  ;;  %s6223_s24 = sld [smem:[#allocation11 + $0x1f]] }
 0x574   : > { %3274 = vrot.lane.b32.xlu1 %v3269_v57, %s4658_s11  ;;  %3286 = vrot.lane.b32.xlu0 %v3282_v44, %s4659_s13  ;;  %v3341_v29 = vmul.f32 %v3339_v52, %v6154_v21  ;;  %v3354_v55 = vmul.f32 %v3353_v23, %v6141_v20  ;;  %v3355_v40 = vmul.f32 %v3353_v23, %v6154_v21 }
 0x576   : > { %v2755_v31 = vpop.permute.xlu1 %2754  ;;  %v2767_v3 = vpop.permute.xlu0 %2766 }
 0x577   : > { %v2772_v37 = vadd.f32 %v2767_v3, %v2758_v48  ;;  %v2759_v0 = vadd.f32 %v2755_v31, %v2745_v12  ;;  %v6164_v31 = vld [vmem:[#allocation3 + $0x32] sm:$0xff]  ;;  %v3375_v3 = vstv %s6144_s25  ;;  %s6226_s25 = sld [smem:[#allocation11 + $0x3]] }
 0x578   : > { %3288 = vrot.lane.b32.xlu1 %v3283_v36, %s4659_s13  ;;  %3308 = vrot.lane.b32.xlu0 %v3304_v60, %s4658_s11  ;;  %v2849_v36 = vstv %s6149_s6  ;;  %v3376_v43 = vmul.f32 %v3375_v3, %v6164_v31  ;;  %s6230_s6 = sld [smem:[#allocation11 + $0x20]] }
 0x579   : > { %v2780_v49 = vadd.f32 %v2778_v46, %v2772_v37 }
 0x57a   : > { %v2769_v13 = vpop.permute.xlu1 %2768  ;;  %v2789_v63 = vpop.permute.xlu0 %2788 }
 0x57b   : > { %v2773_v15 = vadd.f32 %v2769_v13, %v2759_v0  ;;  %v2794_v18 = vadd.f32 %v2789_v63, %v2780_v49  ;;  %v2850_v49 = vmul.f32 %v2849_v36, %v5952_v41  ;;  %v6177_v13 = vld [vmem:[#allocation3 + $0x3a] sm:$0xff]  ;;  %v3389_v63 = vstv %s6157_s7  ;;  %s6236_s7 = sld [smem:[#allocation11 + $0x22]] }
 0x57c   : > { %3310 = vrot.lane.b32.xlu1 %v3305_v32, %s4658_s11  ;;  %3322 = vrot.lane.b32.xlu0 %v3318_v51, %s4659_s13  ;;  %v3377_v52 = vmul.f32 %v3375_v3, %v6177_v13  ;;  %v3390_v45 = vmul.f32 %v3389_v63, %v6164_v31  ;;  %v2851_v41 = vmul.f32 %v2849_v36, %v5958_v16 }
 0x57d   : > { %v2781_v7 = vadd.f32 %v2779_v4, %v2773_v15  ;;  %v3391_v23 = vmul.f32 %v3389_v63, %v6177_v13 }
 0x57e   : > { %v2791_v27 = vpop.permute.xlu1 %2790  ;;  %v2803_v1 = vpop.permute.xlu0 %2802 }
 0x57f   : > { %v2808_v54 = vadd.f32 %v2803_v1, %v2794_v18  ;;  %v2795_v57 = vadd.f32 %v2791_v27, %v2781_v7  ;;  %v6187_v7 = vld [vmem:[#allocation3 + $0x48] sm:$0xff]  ;;  %v3411_v27 = vstv %s6167_s30  ;;  %v2885_v1 = vstv %s6172_s14  ;;  %s6240_s30 = sld [smem:[#allocation11 + $0x6]]  ;;  %s6246_s14 = sld [smem:[#allocation11 + $0x23]] }
 0x580   : > { %3324 = vrot.lane.b32.xlu1 %v3319_v39, %s4659_s13  ;;  %3344 = vrot.lane.b32.xlu0 %v3340_v11, %s4658_s11 }
 0x581   : > { %v2816_v44 = vadd.f32 %v2814_v61, %v2808_v54 }
 0x582   : > { %v2805_v8 = vpop.permute.xlu1 %2804  ;;  %v2825_v24 = vpop.permute.xlu0 %2824 }
 0x583   : > { %v2809_v48 = vadd.f32 %v2805_v8, %v2795_v57  ;;  %v2830_v60 = vadd.f32 %v2825_v24, %v2816_v44  ;;  %v3412_v57 = vmul.f32 %v3411_v27, %v6187_v7  ;;  %v2886_v44 = vmul.f32 %v2885_v1, %v5964_v62  ;;  %v6198_v8 = vld [vmem:[#allocation3 + $0x50] sm:$0xff] }
 0x584   : > { %3346 = vrot.lane.b32.xlu1 %v3341_v29, %s4658_s11  ;;  %3358 = vrot.lane.b32.xlu0 %v3354_v55, %s4659_s13  ;;  %v3425_v24 = vstv %s6180_s15  ;;  %v3413_v3 = vmul.f32 %v3411_v27, %v6198_v8  ;;  %v2921_v62 = vstv %s6193_s16  ;;  %s6256_s15 = sld [smem:[#allocation11 + $0x25]]  ;;  %s6269_s16 = sld [smem:[#allocation11 + $0x26]] }
 0x585   : > { %v2817_v12 = vadd.f32 %v2815_v25, %v2809_v48  ;;  %v3426_v36 = vmul.f32 %v3425_v24, %v6187_v7  ;;  %v2922_v63 = vmul.f32 %v2921_v62, %v5976_v35 }
 0x586   : > { %v2827_v37 = vpop.permute.xlu1 %2826  ;;  %v2839_v46 = vpop.permute.xlu0 %2838 }
 0x587   : > { %v2844_v0 = vadd.f32 %v2839_v46, %v2830_v60  ;;  %v2831_v32 = vadd.f32 %v2827_v37, %v2817_v12  ;;  %v2887_v12 = vmul.f32 %v2885_v1, %v5970_v50 }
 0x588   : > { %3360 = vrot.lane.b32.xlu1 %v3355_v40, %s4659_s13  ;;  %3380 = vrot.lane.b32.xlu0 %v3376_v43, %s4658_s11 }
 0x589   : > { %v2852_v51 = vadd.f32 %v2850_v49, %v2844_v0  ;;  %v3427_v0 = vmul.f32 %v3425_v24, %v6198_v8 }
 0x58a   : > { %v2841_v15 = vpop.permute.xlu1 %2840  ;;  %v2861_v4 = vpop.permute.xlu0 %2860 }
 0x58b   : > { %v2845_v18 = vadd.f32 %v2841_v15, %v2831_v32  ;;  %v2866_v39 = vadd.f32 %v2861_v4, %v2852_v51 }
 0x58c   : > { %3382 = vrot.lane.b32.xlu1 %v3377_v52, %s4658_s11  ;;  %3394 = vrot.lane.b32.xlu0 %v3390_v45, %s4659_s13  ;;  %v2923_v52 = vmul.f32 %v2921_v62, %v5982_v17  ;;  %v2957_v45 = vstv %s4291_s17  ;;  %s6279_s17 = sld [smem:[#allocation11 + $0x28]] }
 0x58d   : > { %v2853_v11 = vadd.f32 %v2851_v41, %v2845_v18 }
 0x58e   : > { %v2863_v54 = vpop.permute.xlu1 %2862  ;;  %v2875_v61 = vpop.permute.xlu0 %2874 }
 0x58f   : > { %v2880_v16 = vadd.f32 %v2875_v61, %v2866_v39  ;;  %v2867_v29 = vadd.f32 %v2863_v54, %v2853_v11  ;;  %v2958_v11 = vmul.f32 %v2957_v45, %v5988_v9 }
 0x590   : > { %3396 = vrot.lane.b32.xlu1 %v3391_v23, %s4659_s13  ;;  %3416 = vrot.lane.b32.xlu0 %v3412_v57, %s4658_s11 }
 0x591   : > { %v2888_v55 = vadd.f32 %v2886_v44, %v2880_v16  ;;  %v2959_v16 = vmul.f32 %v2957_v45, %v5994_v30  ;;  %v2993_v44 = vstv %s4294_s19  ;;  %v3029_v30 = vstv %s4297_s29  ;;  %s6285_s19 = sld [smem:[#allocation11 + $0xc]]  ;;  %s6292_s29 = sld [smem:[#allocation11 + $0x29]] }
 0x592   : > { %v2877_v48 = vpop.permute.xlu1 %2876  ;;  %v2897_v25 = vpop.permute.xlu0 %2896  ;;  %v2995_v62 = vmul.f32 %v2993_v44, %v6006_v34  ;;  %v3031_v34 = vmul.f32 %v3029_v30, %v6018_v6 }
 0x593   : > { %v2881_v60 = vadd.f32 %v2877_v48, %v2867_v29  ;;  %v2902_v37 = vadd.f32 %v2897_v25, %v2888_v55  ;;  %v2994_v25 = vmul.f32 %v2993_v44, %v6000_v14  ;;  %v3030_v14 = vmul.f32 %v3029_v30, %v6012_v2 }
 0x594   : > { %3418 = vrot.lane.b32.xlu1 %v3413_v3, %s4658_s11  ;;  %3430 = vrot.lane.b32.xlu0 %v3426_v36, %s4659_s13 }
 0x595   : > { %v2889_v46 = vadd.f32 %v2887_v12, %v2881_v60 }
 0x596   : > { %v2899_v40 = vpop.permute.xlu1 %2898  ;;  %v2911_v43 = vpop.permute.xlu0 %2910 }
 0x597   : > { %v2916_v49 = vadd.f32 %v2911_v43, %v2902_v37  ;;  %v2903_v32 = vadd.f32 %v2899_v40, %v2889_v46 }
 0x598   : > { %3432 = vrot.lane.b32.xlu1 %v3427_v0, %s4659_s13 }
 0x599   : > { %v2924_v51 = vadd.f32 %v2922_v63, %v2916_v49 }
 0x59a   : > { %v2913_v50 = vpop.permute.xlu1 %2912  ;;  %v2933_v15 = vpop.permute.xlu0 %2932 }
 0x59b   : > { %v2917_v4 = vadd.f32 %v2913_v50, %v2903_v32  ;;  %v2938_v18 = vadd.f32 %v2933_v15, %v2924_v51  ;;  %v3081_v32 = vstv %s6216_s8  ;;  %s6302_s8 = sld [smem:[#allocation11 + $0x2b]] }
 0x59d   : > { %v2925_v41 = vadd.f32 %v2923_v52, %v2917_v4  ;;  %v3082_v4 = vmul.f32 %v3081_v32, %v6024_v42  ;;  %v3447_v42 = vstv %s6223_s24  ;;  %s6315_s24 = sld [smem:[#allocation11 + $0x2c]] }
 0x59e   : > { %v2935_v27 = vpop.permute.xlu1 %2934  ;;  %v2947_v1 = vpop.permute.xlu0 %2946 }
 0x59f   : > { %v2952_v39 = vadd.f32 %v2947_v1, %v2938_v18  ;;  %v2939_v54 = vadd.f32 %v2935_v27, %v2925_v41  ;;  %v3076_v18 = vstv %s6219_s18  ;;  %s6308_s18 = sld [smem:[#allocation11 + $0xf]] }
 0x5a0   : > { %v3084_v1 = vadd.f32 %v3082_v4, %v3076_v18 }
 0x5a1   : > { %v2960_v35 = vadd.f32 %v2958_v11, %v2952_v39  ;;  %v3083_v39 = vmul.f32 %v3081_v32, %v6030_v19 }
 0x5a2   : > { %v2949_v61 = vpop.permute.xlu1 %2948  ;;  %v2969_v23 = vpop.permute.xlu0 %2968 }
 0x5a3   : > { %v2953_v57 = vadd.f32 %v2949_v61, %v2939_v54  ;;  %v2974_v24 = vadd.f32 %v2969_v23, %v2960_v35  ;;  %v6233_v61 = vld [vmem:[#allocation3 + $0x49] sm:$0xff]  ;;  %v3085_v44 = vadd.f32 %v3083_v39, %v3076_v18 }
 0x5a4   : > { %v3448_v19 = vmul.f32 %v3447_v42, %v6233_v61 }
 0x5a5   : > { %v2961_v17 = vadd.f32 %v2959_v16, %v2953_v57  ;;  %v3117_v16 = vstv %s6226_s25  ;;  %s6325_s25 = sld [smem:[#allocation11 + $0x2e]] }
 0x5a6   : > { %v2971_v29 = vpop.permute.xlu1 %2970  ;;  %v2983_v55 = vpop.permute.xlu0 %2982 }
 0x5a7   : > { %v2988_v48 = vadd.f32 %v2983_v55, %v2974_v24  ;;  %v2975_v3 = vadd.f32 %v2971_v29, %v2961_v17  ;;  %v6243_v55 = vld [vmem:[#allocation3 + $0x51] sm:$0xff] }
 0x5a9   : > { %v2996_v36 = vadd.f32 %v2994_v25, %v2988_v48  ;;  %v3461_v48 = vstv %s6230_s6  ;;  %v3118_v25 = vmul.f32 %v3117_v16, %v6036_v56  ;;  %v3119_v56 = vmul.f32 %v3117_v16, %v6042_v5  ;;  %v6289_v16 = vld [vmem:[#allocation3 + $0x68] sm:$0xff]  ;;  %s6331_s6 = sld [smem:[#allocation11 + $0x12]] }
 0x5aa   : > { %v2985_v9 = vpop.permute.xlu1 %2984  ;;  %v3005_v60 = vpop.permute.xlu0 %3004  ;;  %v3497_v5 = vstv %s6246_s14  ;;  %s6354_s14 = sld [smem:[#allocation11 + $0x15]] }
 0x5ab   : > { %v2989_v12 = vadd.f32 %v2985_v9, %v2975_v3  ;;  %v3010_v37 = vadd.f32 %v3005_v60, %v2996_v36  ;;  %v3449_v60 = vmul.f32 %v3447_v42, %v6243_v55 }
 0x5ad   : > { %v2997_v46 = vadd.f32 %v2995_v62, %v2989_v12  ;;  %v3462_v12 = vmul.f32 %v3461_v48, %v6233_v61 }
 0x5ae   : > { %v3007_v40 = vpop.permute.xlu1 %3006  ;;  %v3019_v43 = vpop.permute.xlu0 %3018 }
 0x5af   : > { %v3024_v0 = vadd.f32 %v3019_v43, %v3010_v37  ;;  %v3011_v49 = vadd.f32 %v3007_v40, %v2997_v46  ;;  %v6253_v37 = vld [vmem:[#allocation3 + $0x4a] sm:$0xff]  ;;  %v3483_v46 = vstv %s6236_s7  ;;  %s6338_s7 = sld [smem:[#allocation11 + $0x2f]] }
 0x5b0   : > { %v3498_v18 = vmul.f32 %v3497_v5, %v6253_v37 }
 0x5b1   : > { %v3032_v63 = vadd.f32 %v3030_v14, %v3024_v0  ;;  %v3153_v0 = vstv %s6240_s30  ;;  %s6348_s30 = sld [smem:[#allocation11 + $0x31]] }
 0x5b2   : > { %v3021_v51 = vpop.permute.xlu1 %3020  ;;  %v3041_v50 = vpop.permute.xlu0 %3040 }
 0x5b3   : > { %v3025_v15 = vadd.f32 %v3021_v51, %v3011_v49  ;;  %v3046_v52 = vadd.f32 %v3041_v50, %v3032_v63  ;;  %v3463_v49 = vmul.f32 %v3461_v48, %v6243_v55  ;;  %v3484_v63 = vmul.f32 %v3483_v46, %v6253_v37  ;;  %v6266_v50 = vld [vmem:[#allocation3 + $0x52] sm:$0xff] }
 0x5b5   : > { %v3033_v45 = vadd.f32 %v3031_v34, %v3025_v15  ;;  %v3154_v15 = vmul.f32 %v3153_v0, %v6048_v33  ;;  %v3155_v33 = vmul.f32 %v3153_v0, %v6054_v58  ;;  %v3533_v58 = vstv %s6269_s16  ;;  %v6312_v0 = vld [vmem:[#allocation3 + $0x69] sm:$0xff]  ;;  %s6377_s16 = sld [smem:[#allocation11 + $0x18]] }
 0x5b6   : > { %v3043_v41 = vpop.permute.xlu1 %3042  ;;  %v3055_v2 = vpop.permute.xlu0 %3054 }
 0x5b7   : > { %v3060_v27 = vadd.f32 %v3055_v2, %v3046_v52  ;;  %v3047_v11 = vadd.f32 %v3043_v41, %v3033_v45  ;;  %v3485_v45 = vmul.f32 %v3483_v46, %v6266_v50  ;;  %v3535_v46 = vmul.f32 %v3533_v58, %v6289_v16 }
 0x5b9   : > { %v3062_v54 = vmax.f32 %v3060_v27, 0.0  ;;  %v6276_v27 = vld [vmem:[#allocation3 + $0x60] sm:$0xff] }
 0x5ba   : > { %v3057_v6 = vpop.permute.xlu1 %3056  ;;  %v3093_v35 = vpop.permute.xlu0 %3092  ;;  %v3534_v48 = vmul.f32 %v3533_v58, %v6276_v27 }
 0x5bb   : > { %v3061_v23 = vadd.f32 %v3057_v6, %v3047_v11  ;;  %v3098_v57 = vadd.f32 %v3093_v35, %v3084_v1  ;;  %3066 = vrot.lane.b32.xlu0 %v3062_v54, %s4656_s28  ;;  %v3519_v1 = vstv %s6256_s15  ;;  %v3499_v35 = vmul.f32 %v3497_v5, %v6266_v50  ;;  %s6361_s15 = sld [smem:[#allocation11 + $0x32]] }
 0x5bc   : > { %v3520_v42 = vmul.f32 %v3519_v1, %v6276_v27 }
 0x5bd   : > { %v3063_v24 = vmax.f32 %v3061_v23, 0.0 }
 0x5be   : > { %v3095_v17 = vpop.permute.xlu1 %3094  ;;  %v3107_v29 = vpop.permute.xlu0 %3106 }
 0x5bf   : > { %v3099_v3 = vadd.f32 %v3095_v17, %v3085_v44  ;;  %v3112_v36 = vadd.f32 %v3107_v29, %v3098_v57  ;;  %3068 = vrot.lane.b32.xlu1 %v3063_v24, %s4656_s28  ;;  %3452 = vrot.lane.b32.xlu0 %v3448_v19, %s4658_s11  ;;  %s6262_s28 = sld [smem:[#allocation11 + $0x9]]  ;;  %v3521_v29 = vmul.f32 %v3519_v1, %v6289_v16 }
 0x5c1   : > { %v3120_v9 = vadd.f32 %v3118_v25, %v3112_v36  ;;  %v6299_v36 = vld [vmem:[#allocation3 + $0x61] sm:$0xff] }
 0x5c2   : > { %v3109_v62 = vpop.permute.xlu1 %3108  ;;  %v3129_v30 = vpop.permute.xlu0 %3128 }
 0x5c3   : > { %v3113_v40 = vadd.f32 %v3109_v62, %v3099_v3  ;;  %v3134_v43 = vadd.f32 %v3129_v30, %v3120_v9  ;;  %3454 = vrot.lane.b32.xlu1 %v3449_v60, %s4658_s11  ;;  %3466 = vrot.lane.b32.xlu0 %v3462_v12, %s4659_s13  ;;  %v3555_v9 = vstv %s6279_s17  ;;  %v3225_v62 = vstv %s6285_s19  ;;  %s6384_s17 = sld [smem:[#allocation11 + $0x35]]  ;;  %s6394_s19 = sld [smem:[#allocation11 + $0x37]] }
 0x5c5   : > { %v3121_v14 = vadd.f32 %v3119_v56, %v3113_v40  ;;  %v3189_v54 = vstv %s6262_s28  ;;  %v3556_v56 = vmul.f32 %v3555_v9, %v6299_v36  ;;  %s6371_s28 = sld [smem:[#allocation11 + $0x34]] }
 0x5c6   : > { %v3131_v32 = vpop.permute.xlu1 %3130  ;;  %v3143_v51 = vpop.permute.xlu0 %3142  ;;  %v3190_v44 = vmul.f32 %v3189_v54, %v6060_v38  ;;  %v3191_v38 = vmul.f32 %v3189_v54, %v6066_v47  ;;  %v3569_v47 = vstv %s6292_s29  ;;  %v6335_v54 = vld [vmem:[#allocation3 + $0x6a] sm:$0xff]  ;;  %s6400_s29 = sld [smem:[#allocation11 + $0x1b]] }
 0x5c7   : > { %v3135_v34 = vadd.f32 %v3131_v32, %v3121_v14  ;;  %v3148_v4 = vadd.f32 %v3143_v51, %v3134_v43  ;;  %3468 = vrot.lane.b32.xlu1 %v3463_v49, %s4659_s13  ;;  %3488 = vrot.lane.b32.xlu0 %v3484_v63, %s4658_s11  ;;  %v3226_v49 = vmul.f32 %v3225_v62, %v6072_v53 }
 0x5c8   : > { %v3557_v51 = vmul.f32 %v3555_v9, %v6312_v0  ;;  %v3570_v5 = vmul.f32 %v3569_v47, %v6299_v36  ;;  %v3227_v53 = vmul.f32 %v3225_v62, %v6082_v59  ;;  %v3571_v1 = vmul.f32 %v3569_v47, %v6312_v0  ;;  %v6358_v62 = vld [vmem:[#allocation3 + $0x80] sm:$0xff] }
 0x5c9   : > { %v3156_v52 = vadd.f32 %v3154_v15, %v3148_v4  ;;  %v6322_v4 = vld [vmem:[#allocation3 + $0x62] sm:$0xff]  ;;  %v3605_v59 = vstv %s6315_s24  ;;  %s6423_s24 = sld [smem:[#allocation11 + $0x1e]] }
 0x5ca   : > { %v3145_v41 = vpop.permute.xlu1 %3144  ;;  %v3165_v2 = vpop.permute.xlu0 %3164  ;;  %v3606_v58 = vmul.f32 %v3605_v59, %v6322_v4  ;;  %v3607_v9 = vmul.f32 %v3605_v59, %v6335_v54 }
 0x5cb   : > { %v3149_v39 = vadd.f32 %v3145_v41, %v3135_v34  ;;  %v3170_v11 = vadd.f32 %v3165_v2, %v3156_v52  ;;  %3490 = vrot.lane.b32.xlu1 %v3485_v45, %s4658_s11  ;;  %3502 = vrot.lane.b32.xlu0 %v3498_v18, %s4659_s13  ;;  %v3591_v52 = vstv %s6302_s8  ;;  %v3261_v41 = vstv %s6308_s18  ;;  %s6407_s8 = sld [smem:[#allocation11 + $0x38]]  ;;  %s6417_s18 = sld [smem:[#allocation11 + $0x3a]] }
 0x5cd   : > { %v3157_v6 = vadd.f32 %v3155_v33, %v3149_v39  ;;  %v3592_v33 = vmul.f32 %v3591_v52, %v6322_v4 }
 0x5ce   : > { %v3167_v23 = vpop.permute.xlu1 %3166  ;;  %v3179_v57 = vpop.permute.xlu0 %3178 }
 0x5cf   : > { %v3171_v24 = vadd.f32 %v3167_v23, %v3157_v6  ;;  %v3184_v19 = vadd.f32 %v3179_v57, %v3170_v11  ;;  %3504 = vrot.lane.b32.xlu1 %v3499_v35, %s4659_s13  ;;  %3524 = vrot.lane.b32.xlu0 %v3520_v42, %s4658_s11  ;;  %v3262_v35 = vmul.f32 %v3261_v41, %v6092_v26 }
 0x5d0   : > { %v3593_v57 = vmul.f32 %v3591_v52, %v6335_v54  ;;  %v3263_v26 = vmul.f32 %v3261_v41, %v6106_v10  ;;  %v3641_v10 = vstv %s6338_s7  ;;  %v6381_v41 = vld [vmem:[#allocation3 + $0x81] sm:$0xff]  ;;  %s4361_s7 = sld [smem:[#allocation11 + $0x3e]] }
 0x5d1   : > { %v3192_v17 = vadd.f32 %v3190_v44, %v3184_v19  ;;  %v6345_v19 = vld [vmem:[#allocation3 + $0x78] sm:$0xff]  ;;  %v3643_v52 = vmul.f32 %v3641_v10, %v6358_v62 }
 0x5d2   : > { %v3181_v25 = vpop.permute.xlu1 %3180  ;;  %v3201_v3 = vpop.permute.xlu0 %3200  ;;  %v3642_v47 = vmul.f32 %v3641_v10, %v6345_v19 }
 0x5d3   : > { %v3185_v60 = vadd.f32 %v3181_v25, %v3171_v24  ;;  %v3206_v12 = vadd.f32 %v3201_v3, %v3192_v17  ;;  %3526 = vrot.lane.b32.xlu1 %v3521_v29, %s4658_s11  ;;  %3538 = vrot.lane.b32.xlu0 %v3534_v48, %s4659_s13  ;;  %v3627_v17 = vstv %s6325_s25  ;;  %v3297_v25 = vstv %s6331_s6  ;;  %s6430_s25 = sld [smem:[#allocation11 + $0x3b]]  ;;  %s6440_s6 = sld [smem:[#allocation11 + $0x3d]] }
 0x5d5   : > { %v3193_v30 = vadd.f32 %v3191_v38, %v3185_v60  ;;  %v3628_v38 = vmul.f32 %v3627_v17, %v6345_v19 }
 0x5d6   : > { %v3203_v40 = vpop.permute.xlu1 %3202  ;;  %v3215_v43 = vpop.permute.xlu0 %3214 }
 0x5d7   : > { %v3207_v14 = vadd.f32 %v3203_v40, %v3193_v30  ;;  %v3220_v63 = vadd.f32 %v3215_v43, %v3206_v12  ;;  %3540 = vrot.lane.b32.xlu1 %v3535_v46, %s4659_s13  ;;  %3560 = vrot.lane.b32.xlu0 %v3556_v56, %s4658_s11  ;;  %v3298_v46 = vmul.f32 %v3297_v25, %v6118_v22 }
 0x5d8   : > { %v3629_v43 = vmul.f32 %v3627_v17, %v6358_v62 }
 0x5d9   : > { %v3228_v32 = vadd.f32 %v3226_v49, %v3220_v63  ;;  %v6368_v63 = vld [vmem:[#allocation3 + $0x79] sm:$0xff] }
 0x5da   : > { %v3217_v15 = vpop.permute.xlu1 %3216  ;;  %v3237_v34 = vpop.permute.xlu0 %3236 }
 0x5db   : > { %v3221_v45 = vadd.f32 %v3217_v15, %v3207_v14  ;;  %v3242_v18 = vadd.f32 %v3237_v34, %v3228_v32  ;;  %3562 = vrot.lane.b32.xlu1 %v3557_v51, %s4658_s11  ;;  %3574 = vrot.lane.b32.xlu0 %v3570_v5, %s4659_s13  ;;  %v3663_v32 = vstv %s6348_s30  ;;  %v3299_v51 = vmul.f32 %v3297_v25, %v6131_v28  ;;  %v6404_v25 = vld [vmem:[#allocation3 + $0x82] sm:$0xff]  ;;  %s4363_s30 = sld [smem:[#allocation11 + $0x40]] }
 0x5dc   : > { %v3333_v15 = vstv %s6354_s14  ;;  %s4332_s14 = sld [smem:[#allocation11 + $0x21]] }
 0x5dd   : > { %v3229_v2 = vadd.f32 %v3227_v53, %v3221_v45  ;;  %v3664_v53 = vmul.f32 %v3663_v32, %v6368_v63 }
 0x5de   : > { %v3239_v39 = vpop.permute.xlu1 %3238  ;;  %v3251_v11 = vpop.permute.xlu0 %3250 }
 0x5df   : > { %v3243_v6 = vadd.f32 %v3239_v39, %v3229_v2  ;;  %v3256_v42 = vadd.f32 %v3251_v11, %v3242_v18  ;;  %3576 = vrot.lane.b32.xlu1 %v3571_v1, %s4659_s13  ;;  %3596 = vrot.lane.b32.xlu0 %v3592_v33, %s4658_s11  ;;  %v3677_v2 = vstv %s6361_s15  ;;  %v3334_v1 = vmul.f32 %v3333_v15, %v6141_v20  ;;  %s6475_s15 = sld [smem:[#allocation11 + $0x41]] }
 0x5e0   : > { %v3665_v11 = vmul.f32 %v3663_v32, %v6381_v41  ;;  %v3678_v59 = vmul.f32 %v3677_v2, %v6368_v63  ;;  %v3335_v20 = vmul.f32 %v3333_v15, %v6154_v21  ;;  %v3679_v17 = vmul.f32 %v3677_v2, %v6381_v41  ;;  %v6427_v15 = vld [vmem:[#allocation3 + $0x98] sm:$0xff] }
 0x5e1   : > { %v3264_v23 = vadd.f32 %v3262_v35, %v3256_v42  ;;  %v6391_v42 = vld [vmem:[#allocation3 + $0x7a] sm:$0xff]  ;;  %v3713_v21 = vstv %s6384_s17  ;;  %s6487_s17 = sld [smem:[#allocation11 + $0x44]] }
 0x5e2   : > { %v3253_v44 = vpop.permute.xlu1 %3252  ;;  %v3273_v24 = vpop.permute.xlu0 %3272  ;;  %v3714_v10 = vmul.f32 %v3713_v21, %v6391_v42  ;;  %v3715_v32 = vmul.f32 %v3713_v21, %v6404_v25 }
 0x5e3   : > { %v3257_v29 = vadd.f32 %v3253_v44, %v3243_v6  ;;  %v3278_v48 = vadd.f32 %v3273_v24, %v3264_v23  ;;  %3598 = vrot.lane.b32.xlu1 %v3593_v57, %s4658_s11  ;;  %3610 = vrot.lane.b32.xlu0 %v3606_v58, %s4659_s13  ;;  %v3699_v23 = vstv %s6371_s28  ;;  %v3369_v44 = vstv %s6377_s16  ;;  %s6478_s28 = sld [smem:[#allocation11 + $0x43]]  ;;  %s6480_s16 = sld [smem:[#allocation11 + $0x24]] }
 0x5e5   : > { %v3265_v3 = vadd.f32 %v3263_v26, %v3257_v29  ;;  %v3700_v26 = vmul.f32 %v3699_v23, %v6391_v42 }
 0x5e6   : > { %v3275_v60 = vpop.permute.xlu1 %3274  ;;  %v3287_v12 = vpop.permute.xlu0 %3286 }
 0x5e7   : > { %v3279_v30 = vadd.f32 %v3275_v60, %v3265_v3  ;;  %v3292_v56 = vadd.f32 %v3287_v12, %v3278_v48  ;;  %3612 = vrot.lane.b32.xlu1 %v3607_v9, %s4659_s13  ;;  %3632 = vrot.lane.b32.xlu0 %v3628_v38, %s4658_s11  ;;  %v3370_v9 = vmul.f32 %v3369_v44, %v6164_v31 }
 0x5e8   : > { %v3701_v12 = vmul.f32 %v3699_v23, %v6404_v25  ;;  %v3371_v31 = vmul.f32 %v3369_v44, %v6177_v13  ;;  %v3749_v13 = vstv %s6407_s8  ;;  %v6448_v44 = vld [vmem:[#allocation3 + $0x99] sm:$0xff]  ;;  %s6511_s8 = sld [smem:[#allocation11 + $0x47]] }
 0x5e9   : > { %v3300_v40 = vadd.f32 %v3298_v46, %v3292_v56  ;;  %v6414_v56 = vld [vmem:[#allocation3 + $0x90] sm:$0xff]  ;;  %v3751_v23 = vmul.f32 %v3749_v13, %v6427_v15 }
 0x5ea   : > { %v3289_v14 = vpop.permute.xlu1 %3288  ;;  %v3309_v49 = vpop.permute.xlu0 %3308  ;;  %v3750_v2 = vmul.f32 %v3749_v13, %v6414_v56 }
 0x5eb   : > { %v3293_v22 = vadd.f32 %v3289_v14, %v3279_v30  ;;  %v3314_v5 = vadd.f32 %v3309_v49, %v3300_v40  ;;  %3634 = vrot.lane.b32.xlu1 %v3629_v43, %s4658_s11  ;;  %3646 = vrot.lane.b32.xlu0 %v3642_v47, %s4659_s13  ;;  %v3735_v40 = vstv %s6394_s19  ;;  %v3405_v14 = vstv %s6400_s29  ;;  %s6499_s19 = sld [smem:[#allocation11 + $0x46]]  ;;  %s6501_s29 = sld [smem:[#allocation11 + $0x27]] }
 0x5ed   : > { %v3301_v34 = vadd.f32 %v3299_v51, %v3293_v22  ;;  %v3736_v22 = vmul.f32 %v3735_v40, %v6414_v56 }
 0x5ee   : > { %v3311_v45 = vpop.permute.xlu1 %3310  ;;  %v3323_v18 = vpop.permute.xlu0 %3322 }
 0x5ef   : > { %v3315_v28 = vadd.f32 %v3311_v45, %v3301_v34  ;;  %v3328_v33 = vadd.f32 %v3323_v18, %v3314_v5  ;;  %3648 = vrot.lane.b32.xlu1 %v3643_v52, %s4659_s13  ;;  %3668 = vrot.lane.b32.xlu0 %v3664_v53, %s4658_s11  ;;  %v3406_v52 = vmul.f32 %v3405_v14, %v6187_v7 }
 0x5f0   : > { %v3737_v18 = vmul.f32 %v3735_v40, %v6427_v15  ;;  %v3821_v40 = vstv %s4361_s7  ;;  %s4359_s7 = sld [smem:[#allocation11 + $0x3c]] }
 0x5f1   : > { %v3336_v39 = vadd.f32 %v3334_v1, %v3328_v33  ;;  %v6437_v33 = vld [vmem:[#allocation3 + $0x91] sm:$0xff] }
 0x5f2   : > { %v3325_v6 = vpop.permute.xlu1 %3324  ;;  %v3345_v35 = vpop.permute.xlu0 %3344 }
 0x5f3   : > { %v3329_v57 = vadd.f32 %v3325_v6, %v3315_v28  ;;  %v3350_v58 = vadd.f32 %v3345_v35, %v3336_v39  ;;  %3670 = vrot.lane.b32.xlu1 %v3665_v11, %s4658_s11  ;;  %3682 = vrot.lane.b32.xlu0 %v3678_v59, %s4659_s13  ;;  %v3771_v39 = vstv %s6417_s18  ;;  %v3407_v11 = vmul.f32 %v3405_v14, %v6198_v8  ;;  %s6522_s18 = sld [smem:[#allocation11 + $0x2a]] }
 0x5f4   : > { %v3441_v6 = vstv %s6423_s24  ;;  %s4344_s24 = sld [smem:[#allocation11 + $0x2d]] }
 0x5f5   : > { %v3337_v24 = vadd.f32 %v3335_v20, %v3329_v57  ;;  %v3772_v20 = vmul.f32 %v3771_v39, %v6437_v33 }
 0x5f6   : > { %v3347_v29 = vpop.permute.xlu1 %3346  ;;  %v3359_v48 = vpop.permute.xlu0 %3358 }
 0x5f7   : > { %v3351_v3 = vadd.f32 %v3347_v29, %v3337_v24  ;;  %v3364_v38 = vadd.f32 %v3359_v48, %v3350_v58  ;;  %3684 = vrot.lane.b32.xlu1 %v3679_v17, %s4659_s13  ;;  %3704 = vrot.lane.b32.xlu0 %v3700_v26, %s4658_s11  ;;  %v3785_v24 = vstv %s6430_s25  ;;  %v3442_v26 = vmul.f32 %v3441_v6, %v6233_v61  ;;  %s4353_s25 = sld [smem:[#allocation11 + $0x36]] }
 0x5f8   : > { %v3773_v29 = vmul.f32 %v3771_v39, %v6448_v44  ;;  %v3786_v48 = vmul.f32 %v3785_v24, %v6437_v33 }
 0x5f9   : > { %v3372_v60 = vadd.f32 %v3370_v9, %v3364_v38  ;;  %v6456_v9 = vld [vmem:[#allocation3 + $0x92] sm:$0xff]  ;;  %v3807_v38 = vstv %s6440_s6  ;;  %s4356_s6 = sld [smem:[#allocation11 + $0x39]] }
 0x5fa   : > { %v3361_v30 = vpop.permute.xlu1 %3360  ;;  %v3381_v46 = vpop.permute.xlu0 %3380  ;;  %v3808_v61 = vmul.f32 %v3807_v38, %v6456_v9 }
 0x5fb   : > { %v3365_v43 = vadd.f32 %v3361_v30, %v3351_v3  ;;  %v3386_v47 = vadd.f32 %v3381_v46, %v3372_v60  ;;  %3706 = vrot.lane.b32.xlu1 %v3701_v12, %s4658_s11  ;;  %3718 = vrot.lane.b32.xlu0 %v3714_v10, %s4659_s13  ;;  %v3443_v12 = vmul.f32 %v3441_v6, %v6243_v55  ;;  %v6464_v46 = vld [vmem:[#allocation3 + $0x9a] sm:$0xff] }
 0x5fc   : > { %v3787_v10 = vmul.f32 %v3785_v24, %v6448_v44  ;;  %v3823_v55 = vmul.f32 %v3821_v40, %v6464_v46 }
 0x5fd   : > { %v3373_v49 = vadd.f32 %v3371_v31, %v3365_v43  ;;  %v3809_v31 = vmul.f32 %v3807_v38, %v6464_v46  ;;  %v3822_v43 = vmul.f32 %v3821_v40, %v6456_v9 }
 0x5fe   : > { %v3383_v51 = vpop.permute.xlu1 %3382  ;;  %v3395_v5 = vpop.permute.xlu0 %3394 }
 0x5ff   : > { %v3387_v34 = vadd.f32 %v3383_v51, %v3373_v49  ;;  %v3400_v53 = vadd.f32 %v3395_v5, %v3386_v47  ;;  %3720 = vrot.lane.b32.xlu1 %v3715_v32, %s4659_s13  ;;  %3740 = vrot.lane.b32.xlu0 %v3736_v22, %s4658_s11  ;;  %v3843_v32 = vstv %s4363_s30  ;;  %v3477_v22 = vstv %s4332_s14  ;;  %s4362_s30 = sld [smem:[#allocation11 + $0x3f]]  ;;  %s4365_s14 = sld [smem:[#allocation11 + $0x42]] }
 0x601   : > { %v3408_v45 = vadd.f32 %v3406_v52, %v3400_v53 }
 0x602   : > { %v3397_v28 = vpop.permute.xlu1 %3396  ;;  %v3417_v1 = vpop.permute.xlu0 %3416 }
 0x603   : > { %v3401_v7 = vadd.f32 %v3397_v28, %v3387_v34  ;;  %v3422_v59 = vadd.f32 %v3417_v1, %v3408_v45  ;;  %3742 = vrot.lane.b32.xlu1 %v3737_v18, %s4658_s11  ;;  %3754 = vrot.lane.b32.xlu0 %v3750_v2, %s4659_s13  ;;  %v3478_v45 = vmul.f32 %v3477_v22, %v6253_v37  ;;  %v3857_v18 = vstv %s6475_s15  ;;  %s4368_s15 = sld [smem:[#allocation11 + $0x45]] }
 0x604   : > { %v3879_v37 = vstv %s6478_s28  ;;  %s4077_s28 = sshll.u32 %s4866_s27, 4 }
 0x605   : > { %v3409_v35 = vadd.f32 %v3407_v11, %v3401_v7 }
 0x606   : > { %v3419_v57 = vpop.permute.xlu1 %3418  ;;  %v3431_v58 = vpop.permute.xlu0 %3430 }
 0x607   : > { %v3423_v17 = vadd.f32 %v3419_v57, %v3409_v35  ;;  %v3436_v8 = vadd.f32 %v3431_v58, %v3422_v59  ;;  %3756 = vrot.lane.b32.xlu1 %v3751_v23, %s4659_s13  ;;  %3776 = vrot.lane.b32.xlu0 %v3772_v20, %s4658_s11  ;;  %v3479_v35 = vmul.f32 %v3477_v22, %v6266_v50  ;;  %v3513_v20 = vstv %s6480_s16  ;;  %s281_s16 = scalar_lea.vmem [#allocation14], %s4077_s28 }
 0x609   : > { %v3444_v21 = vadd.f32 %v3442_v26, %v3436_v8 }
 0x60a   : > { %v3433_v3 = vpop.permute.xlu1 %3432 }
 0x60b   : > { %v3437_v60 = vadd.f32 %v3433_v3, %v3423_v17  ;;  %3778 = vrot.lane.b32.xlu1 %v3773_v29, %s4658_s11  ;;  %3790 = vrot.lane.b32.xlu0 %v3786_v48, %s4659_s13  ;;  %v3514_v29 = vmul.f32 %v3513_v20, %v6276_v27  ;;  %v3515_v27 = vmul.f32 %v3513_v20, %v6289_v16 }
 0x60d   : > { %v3445_v30 = vadd.f32 %v3443_v12, %v3437_v60 }
 0x60f   : > { %3792 = vrot.lane.b32.xlu1 %v3787_v10, %s4659_s13  ;;  %3812 = vrot.lane.b32.xlu0 %v3808_v61, %s4658_s11 }
 0x613   : > { %3814 = vrot.lane.b32.xlu1 %v3809_v31, %s4658_s11  ;;  %3826 = vrot.lane.b32.xlu0 %v3822_v43, %s4659_s13  ;;  %v3915_v31 = vstv %s6499_s19  ;;  %v3549_v43 = vstv %s6501_s29  ;;  %s4376_s19 = sshll.u32 %s4717_s3, 8  ;;  %s4660_s3 = smov [#allocation14]  }
 0x617   : > { %3828 = vrot.lane.b32.xlu1 %v3823_v55, %s4659_s13 }
 0x62d   : > { %v3067_v47 = vpop.permute.xlu0 %3066 }
 0x62e   : > { %3073 = vst.msk [vmem:[#allocation3 + $0xa9] sm:$0xff] %vm323_vm2, %v3067_v47 }
 0x631   : > { %v3069_v14 = vpop.permute.xlu1 %3068  ;;  %v3453_v49 = vpop.permute.xlu0 %3452 }
 0x632   : > { %3074 = vst.msk [vmem:[#allocation3 + $0xb1] sm:$0xff] %vm323_vm2, %v3069_v14  ;;  %v3458_v51 = vadd.f32 %v3453_v49, %v3444_v21  ;;  %v3893_v21 = vstv %s6487_s17  ;;  %s3959_s17 = sshll.u32 %s281_s16, 4  ;;  %s6564_s17 = int_to_ptr.vmem [resolvable:$true] %s3959_s17 }
 0x635   : > { %v3455_v5 = vpop.permute.xlu1 %3454  ;;  %v3467_v13 = vpop.permute.xlu0 %3466  ;;  %v6482_v34 = vld [vmem:[#allocation3 + $0xa8] sm:$0xff] }
 0x636   : > { %v3472_v52 = vadd.f32 %v3467_v13, %v3458_v51  ;;  %v3844_v53 = vmul.f32 %v3843_v32, %v6482_v34  ;;  %v3459_v2 = vadd.f32 %v3455_v5, %v3445_v30  ;;  %v3858_v6 = vmul.f32 %v3857_v18, %v6482_v34  ;;  %v6495_v23 = vld [vmem:[#allocation3 + $0xa9] sm:$0xff] }
 0x637   : > { %v3880_v26 = vmul.f32 %v3879_v37, %v6495_v23  ;;  %v3894_v30 = vmul.f32 %v3893_v21, %v6495_v23  ;;  %v3550_v51 = vmul.f32 %v3549_v43, %v6299_v36  ;;  %v3929_v13 = vstv %s6511_s8 }
 0x638   : > { %3848 = vrot.lane.b32.xlu0 %v3844_v53, %s4658_s11  ;;  %v3480_v28 = vadd.f32 %v3478_v45, %v3472_v52 }
 0x639   : > { %v3469_v1 = vpop.permute.xlu1 %3468  ;;  %v3489_v39 = vpop.permute.xlu0 %3488  ;;  %v6490_v7 = vld [vmem:[#allocation3 + $0xb0] sm:$0xff] }
 0x63a   : > { %v3473_v11 = vadd.f32 %v3469_v1, %v3459_v2  ;;  %v3845_v59 = vmul.f32 %v3843_v32, %v6490_v7  ;;  %v3494_v57 = vadd.f32 %v3489_v39, %v3480_v28  ;;  %v3859_v50 = vmul.f32 %v3857_v18, %v6490_v7  ;;  %v6508_v48 = vld [vmem:[#allocation3 + $0xb1] sm:$0xff] }
 0x63b   : > { %v3881_v61 = vmul.f32 %v3879_v37, %v6508_v48  ;;  %v6518_v40 = vld [vmem:[#allocation3 + $0xaa] sm:$0xff]  ;;  %v3895_v22 = vmul.f32 %v3893_v21, %v6508_v48  ;;  %v6529_v5 = vld [vmem:[#allocation3 + $0xb2] sm:$0xff]  ;;  %v3551_v39 = vmul.f32 %v3549_v43, %v6312_v0 }
 0x63c   : > { %3850 = vrot.lane.b32.xlu1 %v3845_v59, %s4658_s11  ;;  %3862 = vrot.lane.b32.xlu0 %v3858_v6, %s4659_s13  ;;  %v3481_v58 = vadd.f32 %v3479_v35, %v3473_v11  ;;  %v3916_v16 = vmul.f32 %v3915_v31, %v6518_v40  ;;  %v3917_v28 = vmul.f32 %v3915_v31, %v6529_v5  ;;  %v3585_v11 = vstv %s6522_s18  ;;  %s6569_s18 = scalar_lea.hbm %s6618_s5, %s4376_s19 }
 0x63d   : > { %v3491_v24 = vpop.permute.xlu1 %3490  ;;  %v3503_v17 = vpop.permute.xlu0 %3502  ;;  %v3930_v1 = vmul.f32 %v3929_v13, %v6518_v40  ;;  %v3931_v20 = vmul.f32 %v3929_v13, %v6529_v5 }
 0x63e   : > { %v3508_v8 = vadd.f32 %v3503_v17, %v3494_v57  ;;  %v3495_v3 = vadd.f32 %v3491_v24, %v3481_v58  ;;  %v3586_v57 = vmul.f32 %v3585_v11, %v6322_v4 }
 0x640   : > { %3864 = vrot.lane.b32.xlu1 %v3859_v50, %s4659_s13  ;;  %3884 = vrot.lane.b32.xlu0 %v3880_v26, %s4658_s11  ;;  %v3516_v38 = vadd.f32 %v3514_v29, %v3508_v8  ;;  %v3587_v50 = vmul.f32 %v3585_v11, %v6335_v54  ;;  %v3621_v26 = vstv %s4344_s24  ;;  %s3946_s24 = scalar_lea.sflag [#allocation7], %s4866_s27 }
 0x641   : > { %v3505_v60 = vpop.permute.xlu1 %3504  ;;  %v3525_v12 = vpop.permute.xlu0 %3524  ;;  %v3623_v31 = vmul.f32 %v3621_v26, %v6358_v62 }
 0x642   : > { %v3509_v10 = vadd.f32 %v3505_v60, %v3495_v3  ;;  %v3530_v55 = vadd.f32 %v3525_v12, %v3516_v38  ;;  %v3622_v12 = vmul.f32 %v3621_v26, %v6345_v19 }
 0x644   : > { %3886 = vrot.lane.b32.xlu1 %v3881_v61, %s4658_s11  ;;  %3898 = vrot.lane.b32.xlu0 %v3894_v30, %s4659_s13  ;;  %v3517_v47 = vadd.f32 %v3515_v27, %v3509_v10 }
 0x645   : > { %v3527_v14 = vpop.permute.xlu1 %3526  ;;  %v3539_v49 = vpop.permute.xlu0 %3538 }
 0x646   : > { %v3544_v32 = vadd.f32 %v3539_v49, %v3530_v55  ;;  %v3531_v52 = vadd.f32 %v3527_v14, %v3517_v47 }
 0x648   : > { %3900 = vrot.lane.b32.xlu1 %v3895_v22, %s4659_s13  ;;  %3920 = vrot.lane.b32.xlu0 %v3916_v16, %s4658_s11  ;;  %v3552_v53 = vadd.f32 %v3550_v51, %v3544_v32 }
 0x649   : > { %v3541_v45 = vpop.permute.xlu1 %3540  ;;  %v3561_v18 = vpop.permute.xlu0 %3560 }
 0x64a   : > { %v3545_v2 = vadd.f32 %v3541_v45, %v3531_v52  ;;  %v3566_v36 = vadd.f32 %v3561_v18, %v3552_v53 }
 0x64c   : > { %3922 = vrot.lane.b32.xlu1 %v3917_v28, %s4658_s11  ;;  %3934 = vrot.lane.b32.xlu0 %v3930_v1, %s4659_s13  ;;  %v3553_v59 = vadd.f32 %v3551_v39, %v3545_v2  ;;  %s4347_s11 = sld [smem:[#allocation11 + $0x30]] }
 0x64d   : > { %v3563_v6 = vpop.permute.xlu1 %3562  ;;  %v3575_v35 = vpop.permute.xlu0 %3574 }
 0x64e   : > { %v3580_v37 = vadd.f32 %v3575_v35, %v3566_v36  ;;  %v3567_v58 = vadd.f32 %v3563_v6, %v3553_v59  ;;  %v3729_v35 = vstv %s4353_s25 }
 0x64f   : > { %v3731_v26 = vmul.f32 %v3729_v35, %v6427_v15 }
 0x650   : > { %3936 = vrot.lane.b32.xlu1 %v3931_v20, %s4659_s13  ;;  %v3588_v24 = vadd.f32 %v3586_v57, %v3580_v37  ;;  %s4350_s13 = sld [smem:[#allocation11 + $0x33]] }
 0x651   : > { %v3577_v0 = vpop.permute.xlu1 %3576  ;;  %v3597_v17 = vpop.permute.xlu0 %3596 }
 0x652   : > { %v3581_v8 = vadd.f32 %v3577_v0, %v3567_v58  ;;  %v3602_v29 = vadd.f32 %v3597_v17, %v3588_v24  ;;  %v3657_v43 = vstv %s4347_s11  ;;  %v3730_v24 = vmul.f32 %v3729_v35, %v6414_v56  ;;  %s4570_s11 = scalar_lea.vmem %s6564_s17, 256 }
 0x653   : > { %v3658_v32 = vmul.f32 %v3657_v43, %v6368_v63  ;;  %v3659_v52 = vmul.f32 %v3657_v43, %v6381_v41  ;;  %p4571_p3 = scmp.ne.s32.totalorder %s6564_s17, %s4570_s11 }
 0x654   : > { %v3589_v21 = vadd.f32 %v3587_v50, %v3581_v8 }
 0x655   : > { %v3599_v3 = vpop.permute.xlu1 %3598  ;;  %v3611_v38 = vpop.permute.xlu0 %3610  ;;  %p4572_p10 = pnand %p4571_p3, %p6636_p5 }
 0x656   : > { %v3616_v60 = vadd.f32 %v3611_v38, %v3602_v29  ;;  %v3603_v10 = vadd.f32 %v3599_v3, %v3589_v21  ;;  %v3693_v53 = vstv %s4350_s13  ;;  %v3765_v29 = vstv %s4356_s6  ;;  %s4574_s13 = sshll.u32 %s4660_s3, 4  ;;  %s4575_s13 = int_to_ptr.vmem [resolvable:$false] %s4574_s13 }
 0x657   : > { %v3694_v1 = vmul.f32 %v3693_v53, %v6391_v42  ;;  %v3695_v6 = vmul.f32 %v3693_v53, %v6404_v25  ;;  %p4573_p1 = pneg %p4572_p10  ;;  %s4576_s25 = scalar_lea.vmem %s4575_s13, 512 }
 0x658   : > { %v3624_v4 = vadd.f32 %v3622_v12, %v3616_v60  ;;  %v3766_v12 = vmul.f32 %v3765_v29, %v6437_v33  ;;  %p4577_p6 = scmp.lt.s32.totalorder %s6564_s17, %s4575_s13  ;;  %p4578_p9 = scmp.lt.s32.totalorder %s4576_s25, %s4570_s11 }
 0x659   : > { %v3613_v61 = vpop.permute.xlu1 %3612  ;;  %v3633_v30 = vpop.permute.xlu0 %3632 }
 0x65a   : > { %v3617_v27 = vadd.f32 %v3613_v61, %v3603_v10  ;;  %v3638_v55 = vadd.f32 %v3633_v30, %v3624_v4  ;;  %p4579_p13 = por %p4578_p9, %p4577_p6 }
 0x65c   : > { %v3625_v54 = vadd.f32 %v3623_v31, %v3617_v27  ;;  %v3767_v27 = vmul.f32 %v3765_v29, %v6448_v44  ;;  %v3801_v31 = vstv %s4359_s7  ;;  %p4580_p12 = pnand %p4579_p13, %p4573_p1 }
 0x65d   : > { %v3635_v47 = vpop.permute.xlu1 %3634  ;;  %v3647_v14 = vpop.permute.xlu0 %3646 }
 0x65e   : > { %v3652_v49 = vadd.f32 %v3647_v14, %v3638_v55  ;;  %v3639_v22 = vadd.f32 %v3635_v47, %v3625_v54  ;;  %v3802_v14 = vmul.f32 %v3801_v31, %v6456_v9 }
 0x660   : > { %v3660_v16 = vadd.f32 %v3658_v32, %v3652_v49 }
 0x661   : > { %v3649_v51 = vpop.permute.xlu1 %3648  ;;  %v3669_v19 = vpop.permute.xlu0 %3668 }
 0x662   : > { %v3653_v13 = vadd.f32 %v3649_v51, %v3639_v22  ;;  %v3674_v45 = vadd.f32 %v3669_v19, %v3660_v16  ;;  %v3803_v51 = vmul.f32 %v3801_v31, %v6464_v46  ;;  %v3837_v19 = vstv %s4362_s30 }
 0x663   : > { %v3839_v9 = vmul.f32 %v3837_v19, %v6490_v7  ;;  %v3909_v7 = vstv %s4368_s15 }
 0x664   : > { %v3661_v62 = vadd.f32 %v3659_v52, %v3653_v13 }
 0x665   : > { %v3671_v18 = vpop.permute.xlu1 %3670  ;;  %v3683_v2 = vpop.permute.xlu0 %3682 }
 0x666   : > { %v3688_v28 = vadd.f32 %v3683_v2, %v3674_v45  ;;  %v3675_v39 = vadd.f32 %v3671_v18, %v3661_v62  ;;  %v3838_v62 = vmul.f32 %v3837_v19, %v6482_v34 }
 0x668   : > { %v3696_v11 = vadd.f32 %v3694_v1, %v3688_v28 }
 0x669   : > { %v3685_v36 = vpop.permute.xlu1 %3684  ;;  %v3705_v63 = vpop.permute.xlu0 %3704 }
 0x66a   : > { %v3689_v59 = vadd.f32 %v3685_v36, %v3675_v39  ;;  %v3710_v37 = vadd.f32 %v3705_v63, %v3696_v11  ;;  %v3873_v36 = vstv %s4365_s14 }
 0x66b   : > { %v3874_v35 = vmul.f32 %v3873_v36, %v6495_v23 }
 0x66c   : > { %v3697_v41 = vadd.f32 %v3695_v6, %v3689_v59 }
 0x66d   : > { %v3707_v20 = vpop.permute.xlu1 %3706  ;;  %v3719_v57 = vpop.permute.xlu0 %3718 }
 0x66e   : > { %v3724_v58 = vadd.f32 %v3719_v57, %v3710_v37  ;;  %v3711_v0 = vadd.f32 %v3707_v20, %v3697_v41 }
 0x670   : > { %v3732_v17 = vadd.f32 %v3730_v24, %v3724_v58  ;;  %v3875_v58 = vmul.f32 %v3873_v36, %v6508_v48 }
 0x671   : > { %v3721_v8 = vpop.permute.xlu1 %3720  ;;  %v3741_v42 = vpop.permute.xlu0 %3740 }
 0x672   : > { %v3725_v50 = vadd.f32 %v3721_v8, %v3711_v0  ;;  %v3746_v21 = vadd.f32 %v3741_v42, %v3732_v17 }
 0x674   : > { %v3733_v25 = vadd.f32 %v3731_v26, %v3725_v50  ;;  %v3910_v50 = vmul.f32 %v3909_v7, %v6518_v40 }
 0x675   : > { %v3743_v3 = vpop.permute.xlu1 %3742  ;;  %v3755_v38 = vpop.permute.xlu0 %3754 }
 0x676   : > { %v3760_v60 = vadd.f32 %v3755_v38, %v3746_v21  ;;  %v3747_v10 = vadd.f32 %v3743_v3, %v3733_v25  ;;  %v3911_v3 = vmul.f32 %v3909_v7, %v6529_v5 }
 0x678   : > { %v3768_v4 = vadd.f32 %v3766_v12, %v3760_v60 }
 0x679   : > { %v3757_v61 = vpop.permute.xlu1 %3756  ;;  %v3777_v56 = vpop.permute.xlu0 %3776 }
 0x67a   : > { %v3761_v30 = vadd.f32 %v3757_v61, %v3747_v10  ;;  %v3782_v43 = vadd.f32 %v3777_v56, %v3768_v4 }
 0x67c   : > { %v3769_v15 = vadd.f32 %v3767_v27, %v3761_v30 }
 0x67d   : > { %v3779_v55 = vpop.permute.xlu1 %3778  ;;  %v3791_v54 = vpop.permute.xlu0 %3790 }
 0x67e   : > { %v3796_v47 = vadd.f32 %v3791_v54, %v3782_v43  ;;  %v3783_v49 = vadd.f32 %v3779_v55, %v3769_v15 }
 0x680   : > { %v3804_v32 = vadd.f32 %v3802_v14, %v3796_v47 }
 0x681   : > { %v3793_v22 = vpop.permute.xlu1 %3792  ;;  %v3813_v33 = vpop.permute.xlu0 %3812 }
 0x682   : > { %v3797_v16 = vadd.f32 %v3793_v22, %v3783_v49  ;;  %v3818_v13 = vadd.f32 %v3813_v33, %v3804_v32 }
 0x684   : > { %v3805_v52 = vadd.f32 %v3803_v51, %v3797_v16 }
 0x685   : > { %v3815_v44 = vpop.permute.xlu1 %3814  ;;  %v3827_v53 = vpop.permute.xlu0 %3826 }
 0x686   : > { %v3832_v45 = vadd.f32 %v3827_v53, %v3818_v13  ;;  %v3819_v18 = vadd.f32 %v3815_v44, %v3805_v52 }
 0x688   : > { %v3840_v2 = vadd.f32 %v3838_v62, %v3832_v45 }
 0x689   : > { %v3829_v28 = vpop.permute.xlu1 %3828 }
 0x68a   : > { %v3833_v1 = vadd.f32 %v3829_v28, %v3819_v18 }
 0x68c   : > { %v3841_v39 = vadd.f32 %v3839_v9, %v3833_v1 }
 0x6aa   : > { %v3849_v11 = vpop.permute.xlu0 %3848 }
 0x6ab   : > { %v3854_v46 = vadd.f32 %v3849_v11, %v3840_v2 }
 0x6ae   : > { %v3851_v63 = vpop.permute.xlu1 %3850  ;;  %v3863_v59 = vpop.permute.xlu0 %3862 }
 0x6af   : > { %v3868_v6 = vadd.f32 %v3863_v59, %v3854_v46  ;;  %v3855_v37 = vadd.f32 %v3851_v63, %v3841_v39 }
 0x6b1   : > { %v3876_v41 = vadd.f32 %v3874_v35, %v3868_v6 }
 0x6b2   : > { %v3865_v34 = vpop.permute.xlu1 %3864  ;;  %v3885_v20 = vpop.permute.xlu0 %3884 }
 0x6b3   : > { %v3869_v57 = vadd.f32 %v3865_v34, %v3855_v37  ;;  %v3890_v24 = vadd.f32 %v3885_v20, %v3876_v41 }
 0x6b5   : > { %v3877_v0 = vadd.f32 %v3875_v58, %v3869_v57 }
 0x6b6   : > { %v3887_v17 = vpop.permute.xlu1 %3886  ;;  %v3899_v8 = vpop.permute.xlu0 %3898 }
 0x6b7   : > { %v3904_v42 = vadd.f32 %v3899_v8, %v3890_v24  ;;  %v3891_v26 = vadd.f32 %v3887_v17, %v3877_v0 }
 0x6b9   : > { %v3912_v29 = vadd.f32 %v3910_v50, %v3904_v42 }
 0x6ba   : > { %v3901_v23 = vpop.permute.xlu1 %3900  ;;  %v3921_v21 = vpop.permute.xlu0 %3920 }
 0x6bb   : > { %v3905_v25 = vadd.f32 %v3901_v23, %v3891_v26  ;;  %v3926_v38 = vadd.f32 %v3921_v21, %v3912_v29 }
 0x6bd   : > { %v3913_v48 = vadd.f32 %v3911_v3, %v3905_v25 }
 0x6be   : > { %v3923_v60 = vpop.permute.xlu1 %3922  ;;  %v3935_v12 = vpop.permute.xlu0 %3934 }
 0x6bf   : > { %v3940_v10 = vadd.f32 %v3935_v12, %v3926_v38  ;;  %v3927_v40 = vadd.f32 %v3923_v60, %v3913_v48 }
 0x6c1   : > { %3943 = vst.msk [vmem:[%s281_s16] sm:$0xff] %vm3942_vm3, %v3940_v10 }
 0x6c2   : > { %v3937_v4 = vpop.permute.xlu1 %3936 }
 0x6c3   : > { %v3941_v5 = vadd.f32 %v3937_v4, %v3927_v40 }
 0x6c5   : > { %3944 = vst.msk [vmem:[%s281_s16 + $0x8] sm:$0xff] %vm3942_vm3, %v3941_v5 }
 0x6c6   : > { %4583 = shalt.err (!%p4580_p12)
}
 0x6c7   : > { %s4584_s6 = scalar_lea.hbm %s6569_s18, 256  ;;  %s4588_s14 = scalar_lea.hbm %s6618_s5, 512 }
 0x6c8   : > { %p4585_p2 = scmp.ne.s32.totalorder %s6569_s18, %s4584_s6  ;;  %p4589_p0 = scmp.lt.u32.totalorder %s6569_s18, %s6618_s5 }
 0x6c9   : > { %p4590_p11 = scmp.lt.u32.totalorder %s4588_s14, %s4584_s6  ;;  %p4592_p3 = scmp.lt.u32.totalorder %s4584_s6, %s6569_s18 }
 0x6ca   : > { %p4586_p4 = pnand %p4585_p2, %p6636_p5 }
 0x6cb   : > { %p4591_p8 = por %p4590_p11, %p4589_p0 }
 0x6cc   : > { %p4587_p7 = pneg %p4586_p4 }
 0x6cd   : > { %p4593_p10 = por %p4592_p3, %p4591_p8 }
 0x6cf   : > { %p4594_p1 = pnand %p4593_p10, %p4587_p7 }
 0x6d1   : > { %4597 = shalt.err (!%p4594_p1)
}
 0x6d2   : > { %s4661_s16 = smov 128   ;;  %s4662_s19 = smov 8  }
 0x6d3   : > { %4394 = dma.vmem_to_hbm [thread:$0]  (%p6636_p5), %s6564_s17, 256, %s6569_s18, %s3946_s24, %s4661_s16, %s4661_s16, %s4662_s19  }
 0x6d4 PF: > { %s3974_s29 = sand.u32 1, %s4636_s20   ;;  %p6637_p6 = scmp.ne.s32.totalorder %s6623_s26, 0 }
 0x6d5   : > { %p6638_p9 = scmp.ge.s32.totalorder %s4648_s23, 2  ;;  %s3975_s8 = scalar_lea.sflag [#allocation7], %s3974_s29 }
 0x6d7   : > { %p4411_p13 = pnand %p6638_p9, %p6637_p6 }
 0x6d9   : > { %4631 = dma.done.wait (!%p4411_p13), %s3975_s8, 256  }
 0x6da   : > { %4633 = vsyncadd (!%p4411_p13), %s3975_s8, 4294967040  ;;  %p22_p12 = scmp.ge.s32.totalorder %s4758_s10, 4   ;;  %s6639_s20 = smov %s4640_s21 }
 0x6db   : > { %s6640_s21 = smov %s4644_s22  ;;  %s6641_s22 = smov %s4802_s9 }
 0x6dc   : > { %s6642_s23 = smov %s4758_s10  ;;  %24 = sbr.rel (!%p22_p12) target bundleno = 10 (0xa), region = 108 }
 0x6e3   :  { %3980 = vsyncpa [#allocation6], 1 }
 0x6e4   :  { %3982 = vsyncpa [#allocation6 + $0x1], 1 }
 0x6e5   :  { %3983 = vsyncpa [#allocation7], 1 }
 0x6e6   :  { %3985 = vsyncpa [#allocation7 + $0x1], 1 }
 0x6e7   :  { %3986 = vsyncpa [#allocation8], 1 }
 0x6e8   :  { %3988 = vsyncpa [#allocation8 + $0x1], 1 }
 0x6e9   :  { %3989 = vsyncpa [#allocation9], 1 }
 0x6ea   :  { %3991 = vsyncpa [#allocation9 + $0x1], 1 }
 0x6eb   :  { %3992 = vsyncpa [#allocation12], 1 }

</bundles_post_ra>
